<compile_context>
chip_gen: v7x
topology: tpu7x:2x2x1
jax: 0.10.0
libtpu: 0.0.40
codegen_flags: <defaults>
</compile_context>

<pallas_src>
import jax
import jax.numpy as jnp
from jax.experimental import pallas as pl
from jax.experimental.pallas import tpu as pltpu

KA = 7                                  # kernel_att
KC = 3                                  # kernel_conv
PAD_ATT = (1 * (KA - 1) + 1) // 2       # reflection pad = 3


# ----------------------------------------------------------------------------
# Kernel 1: fused q|k|v 1x1 convolutions as ONE row-tiled matmul.
# ----------------------------------------------------------------------------
def _qkv_kernel(x_ref, w_ref, b_ref, o_ref):
    o_ref[...] = (jnp.dot(x_ref[...], w_ref[...],
                          preferred_element_type=jnp.float32) + b_ref[...])


def _pick_row_tile(n):
    # prefer >= 2 row tiles so the pipeline double-buffers and v7x's two
    # TensorCores both get work; fall back to a single block for tiny n.
    for cand in (1024, 512, 256, 128, 64, 32, 16, 8):
        if n % cand == 0 and n // cand >= 2:
            return cand
    return n


def qkv_fused(x2d, wcat, bcat):
    n, cin = x2d.shape
    ncol = wcat.shape[1]
    tm = _pick_row_tile(n)
    return pl.pallas_call(
        _qkv_kernel,
        grid=(n // tm,),
        in_specs=[
            pl.BlockSpec((tm, cin), lambda i: (i, 0)),
            pl.BlockSpec((cin, ncol), lambda i: (0, 0)),
            pl.BlockSpec((1, ncol), lambda i: (0, 0)),
        ],
        out_specs=pl.BlockSpec((tm, ncol), lambda i: (i, 0)),
        out_shape=jax.ShapeDtypeStruct((n, ncol), jnp.float32),
        compiler_params=pltpu.CompilerParams(
            dimension_semantics=("parallel",)),
    )(x2d, wcat, bcat)


# ----------------------------------------------------------------------------
# Kernel 2: attention over the unfolded 7x7 neighborhood + shift-conv branch
#           + elementwise fuse (mul, BatchNorm, SiLU).  One grid step / batch.
#           Layout: (H rows on sublanes, W*C merged on lanes) -> lane dense.
# ----------------------------------------------------------------------------
def _acmix_attention_conv(q, kmp, vpad, pe, qz, kz, vz, msc, wfc, bnsc, bnsh,
                          *, H, W, C):
    B = q.shape[0]
    WC = W * C
    Hp, WpC = kmp.shape[1], kmp.shape[2]
    Hz, WzC = qz.shape[1], qz.shape[2]

    def kernel(q_ref, kmp_ref, vpad_ref, pe_ref, qz_ref, kz_ref, vz_ref,
               msc_ref, wfc_ref, bnsc_ref, bnsh_ref, out_ref, score_ref):
        qv = q_ref[0]                      # (H, W*C)
        msc_v = msc_ref[...]               # block-diag group-sum * scaling
        # offset-independent logit term, computed once (hoisted q . pe)
        qpe = jnp.dot(qv * pe_ref[...], msc_v,
                      preferred_element_type=jnp.float32)

        # ---- pass 1: compute every logit ONCE, cache in VMEM, track max ----
        m = jnp.full((H, WC), -jnp.inf, dtype=jnp.float32)
        for dy in range(KA):
            krow = kmp_ref[0, dy:dy + H, :]            # (H, Wp*C) row band
            for dx in range(KA):
                i = dy * KA + dx
                kwin = krow[:, dx * C:dx * C + WC]     # lane-shifted window
                # channel reduce (+ broadcast back over the C lanes of each
                # pixel group) on the MXU; attention scaling folded into msc.
                s = jnp.dot(qv * kwin, msc_v,
                            preferred_element_type=jnp.float32) + qpe
                score_ref[i] = s
                m = jnp.maximum(m, s)

        # ---- pass 2: exp-normalize cached logits, accumulate v windows ----
        denom = jnp.zeros((H, WC), jnp.float32)
        acc = jnp.zeros((H, WC), jnp.float32)
        for dy in range(KA):
            vrow = vpad_ref[0, dy:dy + H, :]
            for dx in range(KA):
                i = dy * KA + dx
                pexp = jnp.exp(score_ref[i] - m)
                denom = denom + pexp
                acc = acc + pexp * vrow[:, dx * C:dx * C + WC]
        out_att = acc * pl.reciprocal(denom, approx=True)   # EUP, not VALU div

        # ---- conv branch: fc(q,k,v) + fixed one-hot shift kernels ==
        #      weighted shift-and-add, weights read as SMEM scalars ----
        accc = jnp.zeros((H, WC), jnp.float32)
        for dy in range(KC):
            qrow = qz_ref[0, dy:dy + H, :]
            krow = kz_ref[0, dy:dy + H, :]
            vrow = vz_ref[0, dy:dy + H, :]
            for dx in range(KC):
                i = dy * KC + dx
                lo = dx * C
                accc = accc + (wfc_ref[3 * i + 0] * qrow[:, lo:lo + WC]
                               + wfc_ref[3 * i + 1] * krow[:, lo:lo + WC]
                               + wfc_ref[3 * i + 2] * vrow[:, lo:lo + WC])

        # ---- fuse: mul -> folded inference BN -> SiLU (EUP exp + recip) ----
        y = (out_att * accc) * bnsc_ref[...] + bnsh_ref[...]
        out_ref[0] = y * pl.reciprocal(1.0 + jnp.exp(-y), approx=True)

    per_batch = lambda r, c: pl.BlockSpec((1, r, c), lambda b: (b, 0, 0))
    shared = lambda a: pl.BlockSpec(a.shape, lambda b: (0,) * a.ndim)

    return pl.pallas_call(
        kernel,
        grid=(B,),
        in_specs=[
            per_batch(H, WC),      # q
            per_batch(Hp, WpC),    # reflect-padded (k - pe)
            per_batch(Hp, WpC),    # reflect-padded v
            shared(pe),            # positional encoding (H, W*C)
            per_batch(Hz, WzC),    # zero-padded q (conv branch)
            per_batch(Hz, WzC),    # zero-padded k
            per_batch(Hz, WzC),    # zero-padded v
            shared(msc),           # block-diag channel-group sum (* scaling)
            pl.BlockSpec(memory_space=pltpu.MemorySpace.SMEM),   # fc scalars
            shared(bnsc),          # folded BN scale, lane row (1, W*C)
            shared(bnsh),          # folded BN shift
        ],
        out_specs=per_batch(H, WC),                    # lane-dense output
        out_shape=jax.ShapeDtypeStruct((B, H, WC), jnp.float32),
        scratch_shapes=[pltpu.VMEM((KA * KA, H, WC), jnp.float32)],
        compiler_params=pltpu.CompilerParams(
            dimension_semantics=("parallel",),
            vmem_limit_bytes=32 * 1024 * 1024),
    )(q, kmp, vpad, pe, qz, kz, vz, msc, wfc, bnsc, bnsh)


# ----------------------------------------------------------------------------
# Full forward pass (glue: layout changes, padding, parameter folding).
# ----------------------------------------------------------------------------
def acmix_forward(x, params):
    B, Cin, H, W = x.shape
    Cout = params["wq"].shape[0]          # head = 1  =>  head_dim = out_planes
    C = Cout
    WC = W * C
    scaling = float(Cout) ** (-0.5)

    # --- fused q|k|v 1x1 conv as one matmul; output width padded to a lane
    #     multiple so the kernel's stores are unmasked (zero extra MXU cost).
    x2d = jnp.transpose(x, (0, 2, 3, 1)).reshape(B * H * W, Cin)
    ncol = 3 * Cout
    ncol_pad = -(-ncol // 128) * 128
    wcat = jnp.concatenate([params["wq"].T, params["wk"].T, params["wv"].T],
                           axis=1)
    wcat = jnp.pad(wcat, ((0, 0), (0, ncol_pad - ncol)))
    bcat = jnp.pad(jnp.concatenate([params["bq"], params["bk"], params["bv"]]),
                   (0, ncol_pad - ncol))[None, :]
    qkv = qkv_fused(x2d, wcat, bcat)
    q = qkv[:, 0 * Cout:1 * Cout].reshape(B, H, W, C)
    k = qkv[:, 1 * Cout:2 * Cout].reshape(B, H, W, C)
    v = qkv[:, 2 * Cout:3 * Cout].reshape(B, H, W, C)

    # positional encoding pe = conv_p(position(H, W)) (tiny, plain-JAX setup)
    loc = jnp.stack([jnp.tile(jnp.linspace(-1.0, 1.0, W)[None, :], (H, 1)),
                     jnp.tile(jnp.linspace(-1.0, 1.0, H)[:, None], (1, W))],
                    axis=-1)
    pe = jnp.einsum("hwm,cm->hwc", loc, params["wp"]) + params["bp"][None, None, :]

    p = PAD_ATT
    # fold the unfolded-pe subtraction into k once:
    #   q . (k_win + pe - pe_win) == q . (k - pe)_win + q . pe
    kmp = jnp.pad(k - pe[None], ((0, 0), (p, p), (p, p), (0, 0)), mode="reflect")
    vpad = jnp.pad(v, ((0, 0), (p, p), (p, p), (0, 0)), mode="reflect")
    qz = jnp.pad(q, ((0, 0), (1, 1), (1, 1), (0, 0)))
    kz = jnp.pad(k, ((0, 0), (1, 1), (1, 1), (0, 0)))
    vz = jnp.pad(v, ((0, 0), (1, 1), (1, 1), (0, 0)))

    # merge (W, C) into one lane-dense minor dimension.
    mrg = lambda t: t.reshape(t.shape[0], t.shape[1], t.shape[2] * C)
    q3, kmp3, vpad3 = mrg(q), mrg(kmp), mrg(vpad)
    qz3, kz3, vz3 = mrg(qz), mrg(kz), mrg(vz)
    pe2 = pe.reshape(H, WC)

    # block-diagonal channel-group sum matrix (softmax scaling folded in):
    lane = jnp.arange(WC)
    msc = jnp.where(lane[:, None] // C == lane[None, :] // C,
                    scaling, 0.0).astype(jnp.float32)

    # fc weights flat for SMEM scalar reads ([offset, q|k|v] row-major).
    wfc_flat = params["wfc"].reshape(-1).astype(jnp.float32)     # (27,)

    # fold inference-mode BatchNorm into lane-dense scale / shift rows.
    eps = 1e-5
    sc = params["bn_gamma"] / jnp.sqrt(params["bn_var"] + eps)
    sh = params["bn_beta"] - params["bn_mean"] * sc
    bnsc = jnp.tile(sc, W)[None, :]
    bnsh = jnp.tile(sh, W)[None, :]

    out3 = _acmix_attention_conv(q3, kmp3, vpad3, pe2, qz3, kz3, vz3,
                                 msc, wfc_flat, bnsc, bnsh, H=H, W=W, C=C)
    return jnp.transpose(out3.reshape(B, H, W, C), (0, 3, 1, 2))   # NCHW


# ----------------------------------------------------------------------------
# Pure-JAX reference (mirrors the PyTorch forward, NCHW) for verification.
# ----------------------------------------------------------------------------
def acmix_reference(x, params):
    B, Cin, H, W = x.shape
    Cout = params["wq"].shape[0]
    scaling = float(Cout) ** (-0.5)
    hp = jax.lax.Precision.HIGHEST

    conv1x1 = lambda t, w, b: (jnp.einsum("oc,bchw->bohw", w, t, precision=hp)
                               + b[None, :, None, None])
    q = conv1x1(x, params["wq"], params["bq"])
    k = conv1x1(x, params["wk"], params["bk"])
    v = conv1x1(x, params["wv"], params["bv"])

    loc_w = jnp.tile(jnp.linspace(-1.0, 1.0, W)[None, :], (H, 1))
    loc_h = jnp.tile(jnp.linspace(-1.0, 1.0, H)[:, None], (1, W))
    loc = jnp.stack([loc_w, loc_h], axis=0)[None]                        # (1,2,H,W)
    pe = (jnp.einsum("oc,bchw->bohw", params["wp"], loc, precision=hp)
          + params["bp"][None, :, None, None])                          # (1,Cout,H,W)

    pd = PAD_ATT
    rp = lambda t: jnp.pad(t, ((0, 0), (0, 0), (pd, pd), (pd, pd)), mode="reflect")
    kpad, vpad, pepad = rp(k), rp(v), rp(pe)

    def unfold(t):   # (N,C,H+2p,W+2p) -> (N,C,KA*KA,H,W)  (torch.nn.Unfold order)
        wins = [t[:, :, dy:dy + H, dx:dx + W] for dy in range(KA) for dx in range(KA)]
        return jnp.stack(wins, axis=2)

    att = jnp.sum((q * scaling)[:, :, None]
                  * (unfold(kpad) + pe[:, :, None] - unfold(pepad)), axis=1)
    att = jax.nn.softmax(att, axis=1)                                    # (B,49,H,W)
    out_att = jnp.sum(att[:, None] * unfold(vpad), axis=2)               # (B,Cout,H,W)

    f_all = jnp.einsum("jm,bmdp->bjdp", params["wfc"],
                       jnp.stack([q.reshape(B, Cout, H * W),
                                  k.reshape(B, Cout, H * W),
                                  v.reshape(B, Cout, H * W)], axis=1),
                       precision=hp)                                     # (B,9,Cout,H*W)
    f_conv = jnp.transpose(f_all, (0, 2, 1, 3)).reshape(B, Cout * KC * KC, H, W)
    dep_w = jnp.zeros((KC * KC, KC, KC), jnp.float32)
    for i in range(KC * KC):
        dep_w = dep_w.at[i, i // KC, i % KC].set(1.0)
    dep_w = jnp.tile(dep_w[None], (Cout, 1, 1, 1))                       # (Cout,9,3,3)
    out_conv = jax.lax.conv_general_dilated(
        f_conv, dep_w, window_strides=(1, 1), padding=((1, 1), (1, 1)),
        dimension_numbers=("NCHW", "OIHW", "NCHW"),
        feature_group_count=Cout, precision=hp)

    eps = 1e-5
    sc = params["bn_gamma"] / jnp.sqrt(params["bn_var"] + eps)
    sh = params["bn_beta"] - params["bn_mean"] * sc
    y = (out_att * out_conv) * sc[None, :, None, None] + sh[None, :, None, None]
    return y * jax.nn.sigmoid(y)


# ----------------------------------------------------------------------------
if __name__ == "__main__":
    B, Cin, Cout, H, W = 2, 4, 8, 16, 16      # in_planes=4, out_planes=8, head=1
    key = jax.random.PRNGKey(0)
    keys = jax.random.split(key, 14)
    nrm = lambda k, shape, s=0.3: (s * jax.random.normal(k, shape)).astype(jnp.float32)

    params = {
        "wq": nrm(keys[0], (Cout, Cin)), "bq": nrm(keys[1], (Cout,), 0.1),
        "wk": nrm(keys[2], (Cout, Cin)), "bk": nrm(keys[3], (Cout,), 0.1),
        "wv": nrm(keys[4], (Cout, Cin)), "bv": nrm(keys[5], (Cout,), 0.1),
        "wp": nrm(keys[6], (Cout, 2)),   "bp": nrm(keys[7], (Cout,), 0.1),
        "wfc": nrm(keys[8], (KC * KC, 3)),
        "bn_gamma": (1.0 + 0.1 * jax.random.normal(keys[9], (Cout,))).astype(jnp.float32),
        "bn_beta": nrm(keys[10], (Cout,), 0.1),
        "bn_mean": nrm(keys[11], (Cout,), 0.05),
        "bn_var": (1.0 + 0.1 * jnp.abs(jax.random.normal(keys[12], (Cout,)))).astype(jnp.float32),
    }
    x = jax.random.normal(keys[13], (B, Cin, H, W), jnp.float32)

    out = jax.jit(acmix_forward)(x, params)
    out = jax.block_until_ready(out)

    ref = acmix_reference(x, params)
    assert out.shape == ref.shape == (B, Cout, H, W)
    # tolerance accounts for MXU default-precision matmuls and the EUP
    # approx reciprocals vs. the HIGHEST-precision reference.
    if not bool(jnp.allclose(out, ref, atol=1e-2, rtol=1e-2)):
        max_err = float(jnp.max(jnp.abs(out - ref)))
        raise AssertionError(f"Pallas kernel mismatch vs reference, max abs err {max_err}")
    print("KERNEL_OK")
</pallas_src>

<mosaic_0001>
module attributes {stable_mosaic.version = 11 : i64} {
  func.func @_qkv_kernel(%arg0: i32, %arg1: memref<256x4xf32, #tpu.memory_space<vmem>>, %arg2: memref<4x128xf32, #tpu.memory_space<vmem>>, %arg3: memref<1x128xf32, #tpu.memory_space<vmem>>, %arg4: memref<256x128xf32, #tpu.memory_space<vmem>>) attributes {dimension_semantics = [#tpu.dimension_semantics<parallel>], iteration_bounds = array<i64: 2>, scalar_prefetch = 0 : i64, scratch_operands = 0 : i64, tpu.core_type = #tpu.core_type<tc>, window_params = [{transform_indices = @transform_0, window_bounds = array<i64: 256, 4>}, {pipeline_mode = #tpu.pipeline_mode<synchronous>, transform_indices = @transform_1, window_bounds = array<i64: 4, 128>}, {pipeline_mode = #tpu.pipeline_mode<synchronous>, transform_indices = @transform_2, window_bounds = array<i64: 1, 128>}, {transform_indices = @transform_3, window_bounds = array<i64: 256, 128>}]} {
    %c0 = arith.constant 0 : index
    %c0_0 = arith.constant 0 : index
    %0 = vector.load %arg1[%c0, %c0_0] : memref<256x4xf32, #tpu.memory_space<vmem>>, vector<256x4xf32>
    %c0_1 = arith.constant 0 : index
    %c0_2 = arith.constant 0 : index
    %1 = vector.load %arg2[%c0_1, %c0_2] : memref<4x128xf32, #tpu.memory_space<vmem>>, vector<4x128xf32>
    %cst = arith.constant dense<0.000000e+00> : vector<256x128xf32>
    %2 = tpu.matmul %0, %1, %cst {dimension_numbers = #tpu.dot_dimension_numbers<[1], [0], [0], [1], [0, 0, 1, 1], [], []>} : vector<256x4xf32>, vector<4x128xf32>, vector<256x128xf32> -> vector<256x128xf32>
    %c0_3 = arith.constant 0 : index
    %c0_4 = arith.constant 0 : index
    %3 = vector.load %arg3[%c0_3, %c0_4] : memref<1x128xf32, #tpu.memory_space<vmem>>, vector<1x128xf32>
    %4 = vector.broadcast %3 : vector<1x128xf32> to vector<256x128xf32>
    %5 = arith.addf %2, %4 : vector<256x128xf32>
    %c0_5 = arith.constant 0 : index
    %c0_6 = arith.constant 0 : index
    %6 = vector.load %arg4[%c0_5, %c0_6] : memref<256x128xf32, #tpu.memory_space<vmem>>, vector<256x128xf32>
    tpu.vector_store %arg4[%c0_5, %c0_6], %5 {strides = array<i32>} : memref<256x128xf32, #tpu.memory_space<vmem>>, vector<256x128xf32>,
    return
  }
  func.func @transform_0(%arg0: i32) -> (i32, i32) {
    %c0_i32 = arith.constant 0 : i32
    %c0_i32_0 = arith.constant 0 : i32
    return %arg0, %c0_i32 : i32, i32
  }
  func.func @transform_1(%arg0: i32) -> (i32, i32) {
    %c0_i32 = arith.constant 0 : i32
    %c0_i32_0 = arith.constant 0 : i32
    %c0_i32_1 = arith.constant 0 : i32
    return %c0_i32, %c0_i32_0 : i32, i32
  }
  func.func @transform_2(%arg0: i32) -> (i32, i32) {
    %c0_i32 = arith.constant 0 : i32
    %c0_i32_0 = arith.constant 0 : i32
    %c0_i32_1 = arith.constant 0 : i32
    return %c0_i32, %c0_i32_0 : i32, i32
  }
  func.func @transform_3(%arg0: i32) -> (i32, i32) {
    %c0_i32 = arith.constant 0 : i32
    %c0_i32_0 = arith.constant 0 : i32
    return %arg0, %c0_i32 : i32, i32
  }
}

module attributes {stable_mosaic.version = 11 : i64} {
  func.func @kernel(%arg0: i32, %arg1: memref<1x16x128xf32, #tpu.memory_space<vmem>>, %arg2: memref<1x22x176xf32, #tpu.memory_space<vmem>>, %arg3: memref<1x22x176xf32, #tpu.memory_space<vmem>>, %arg4: memref<16x128xf32, #tpu.memory_space<vmem>>, %arg5: memref<1x18x144xf32, #tpu.memory_space<vmem>>, %arg6: memref<1x18x144xf32, #tpu.memory_space<vmem>>, %arg7: memref<1x18x144xf32, #tpu.memory_space<vmem>>, %arg8: memref<128x128xf32, #tpu.memory_space<vmem>>, %arg9: memref<27xf32, #tpu.memory_space<smem>>, %arg10: memref<1x128xf32, #tpu.memory_space<vmem>>, %arg11: memref<1x128xf32, #tpu.memory_space<vmem>>, %arg12: memref<1x16x128xf32, #tpu.memory_space<vmem>>, %arg13: memref<49x16x128xf32, #tpu.memory_space<vmem>>) attributes {dimension_semantics = [#tpu.dimension_semantics<parallel>], iteration_bounds = array<i64: 2>, scalar_prefetch = 0 : i64, scratch_operands = 1 : i64, tpu.core_type = #tpu.core_type<tc>, window_params = [{transform_indices = @transform_0, window_bounds = array<i64: 1, 16, 128>}, {transform_indices = @transform_1, window_bounds = array<i64: 1, 22, 176>}, {transform_indices = @transform_2, window_bounds = array<i64: 1, 22, 176>}, {pipeline_mode = #tpu.pipeline_mode<synchronous>, transform_indices = @transform_3, window_bounds = array<i64: 16, 128>}, {transform_indices = @transform_4, window_bounds = array<i64: 1, 18, 144>}, {transform_indices = @transform_5, window_bounds = array<i64: 1, 18, 144>}, {transform_indices = @transform_6, window_bounds = array<i64: 1, 18, 144>}, {pipeline_mode = #tpu.pipeline_mode<synchronous>, transform_indices = @transform_7, window_bounds = array<i64: 128, 128>}, {transform_indices = @transform_8, window_bounds = array<i64: 27>}, {pipeline_mode = #tpu.pipeline_mode<synchronous>, transform_indices = @transform_9, window_bounds = array<i64: 1, 128>}, {pipeline_mode = #tpu.pipeline_mode<synchronous>, transform_indices = @transform_10, window_bounds = array<i64: 1, 128>}, {transform_indices = @transform_11, window_bounds = array<i64: 1, 16, 128>}]} {
    %c0 = arith.constant 0 : index
    %c0_0 = arith.constant 0 : index
    %c0_1 = arith.constant 0 : index
    %0 = vector.load %arg1[%c0, %c0_0, %c0_1] : memref<1x16x128xf32, #tpu.memory_space<vmem>>, vector<1x16x128xf32>
    %1 = vector.shape_cast %0 : vector<1x16x128xf32> to vector<16x128xf32>
    %c0_2 = arith.constant 0 : index
    %c0_3 = arith.constant 0 : index
    %2 = vector.load %arg8[%c0_2, %c0_3] : memref<128x128xf32, #tpu.memory_space<vmem>>, vector<128x128xf32>
    %c0_4 = arith.constant 0 : index
    %c0_5 = arith.constant 0 : index
    %3 = vector.load %arg4[%c0_4, %c0_5] : memref<16x128xf32, #tpu.memory_space<vmem>>, vector<16x128xf32>
    %4 = arith.mulf %1, %3 : vector<16x128xf32>
    %cst = arith.constant dense<0.000000e+00> : vector<16x128xf32>
    %5 = tpu.matmul %4, %2, %cst {dimension_numbers = #tpu.dot_dimension_numbers<[1], [0], [0], [1], [0, 0, 1, 1], [], []>} : vector<16x128xf32>, vector<128x128xf32>, vector<16x128xf32> -> vector<16x128xf32>
    %cst_6 = arith.constant 0xFF800000 : f32
    %6 = vector.broadcast %cst_6 : f32 to vector<16x128xf32>
    %c0_7 = arith.constant 0 : index
    %c0_8 = arith.constant 0 : index
    %c0_9 = arith.constant 0 : index
    %7 = vector.load %arg2[%c0_7, %c0_8, %c0_9] : memref<1x22x176xf32, #tpu.memory_space<vmem>>, vector<1x16x176xf32>
    %8 = vector.shape_cast %7 : vector<1x16x176xf32> to vector<16x176xf32>
    %9 = vector.extract_strided_slice %8 {offsets = [0, 0], sizes = [16, 128], strides = [1, 1]} : vector<16x176xf32> to vector<16x128xf32>
    %10 = arith.mulf %1, %9 : vector<16x128xf32>
    %cst_10 = arith.constant dense<0.000000e+00> : vector<16x128xf32>
    %11 = tpu.matmul %10, %2, %cst_10 {dimension_numbers = #tpu.dot_dimension_numbers<[1], [0], [0], [1], [0, 0, 1, 1], [], []>} : vector<16x128xf32>, vector<128x128xf32>, vector<16x128xf32> -> vector<16x128xf32>
    %12 = arith.addf %11, %5 : vector<16x128xf32>
    %c0_11 = arith.constant 0 : index
    %c0_12 = arith.constant 0 : index
    %c0_13 = arith.constant 0 : index
    %13 = vector.load %arg13[%c0_11, %c0_12, %c0_13] : memref<49x16x128xf32, #tpu.memory_space<vmem>>, vector<1x16x128xf32>
    %14 = vector.shape_cast %13 : vector<1x16x128xf32> to vector<16x128xf32>
    %15 = vector.shape_cast %12 : vector<16x128xf32> to vector<1x16x128xf32>
    tpu.vector_store %arg13[%c0_11, %c0_12, %c0_13], %15 {strides = array<i32>} : memref<49x16x128xf32, #tpu.memory_space<vmem>>, vector<1x16x128xf32>,
    %16 = arith.maximumf %6, %12 : vector<16x128xf32>
    %17 = vector.extract_strided_slice %8 {offsets = [0, 8], sizes = [16, 128], strides = [1, 1]} : vector<16x176xf32> to vector<16x128xf32>
    %18 = arith.mulf %1, %17 : vector<16x128xf32>
    %cst_14 = arith.constant dense<0.000000e+00> : vector<16x128xf32>
    %19 = tpu.matmul %18, %2, %cst_14 {dimension_numbers = #tpu.dot_dimension_numbers<[1], [0], [0], [1], [0, 0, 1, 1], [], []>} : vector<16x128xf32>, vector<128x128xf32>, vector<16x128xf32> -> vector<16x128xf32>
    %20 = arith.addf %19, %5 : vector<16x128xf32>
    %c1 = arith.constant 1 : index
    %c0_15 = arith.constant 0 : index
    %c0_16 = arith.constant 0 : index
    %21 = vector.load %arg13[%c1, %c0_15, %c0_16] : memref<49x16x128xf32, #tpu.memory_space<vmem>>, vector<1x16x128xf32>
    %22 = vector.shape_cast %21 : vector<1x16x128xf32> to vector<16x128xf32>
    %23 = vector.shape_cast %20 : vector<16x128xf32> to vector<1x16x128xf32>
    tpu.vector_store %arg13[%c1, %c0_15, %c0_16], %23 {strides = array<i32>} : memref<49x16x128xf32, #tpu.memory_space<vmem>>, vector<1x16x128xf32>,
    %24 = arith.maximumf %16, %20 : vector<16x128xf32>
    %25 = vector.extract_strided_slice %8 {offsets = [0, 16], sizes = [16, 128], strides = [1, 1]} : vector<16x176xf32> to vector<16x128xf32>
    %26 = arith.mulf %1, %25 : vector<16x128xf32>
    %cst_17 = arith.constant dense<0.000000e+00> : vector<16x128xf32>
    %27 = tpu.matmul %26, %2, %cst_17 {dimension_numbers = #tpu.dot_dimension_numbers<[1], [0], [0], [1], [0, 0, 1, 1], [], []>} : vector<16x128xf32>, vector<128x128xf32>, vector<16x128xf32> -> vector<16x128xf32>
    %28 = arith.addf %27, %5 : vector<16x128xf32>
    %c2 = arith.constant 2 : index
    %c0_18 = arith.constant 0 : index
    %c0_19 = arith.constant 0 : index
    %29 = vector.load %arg13[%c2, %c0_18, %c0_19] : memref<49x16x128xf32, #tpu.memory_space<vmem>>, vector<1x16x128xf32>
    %30 = vector.shape_cast %29 : vector<1x16x128xf32> to vector<16x128xf32>
    %31 = vector.shape_cast %28 : vector<16x128xf32> to vector<1x16x128xf32>
    tpu.vector_store %arg13[%c2, %c0_18, %c0_19], %31 {strides = array<i32>} : memref<49x16x128xf32, #tpu.memory_space<vmem>>, vector<1x16x128xf32>,
    %32 = arith.maximumf %24, %28 : vector<16x128xf32>
    %33 = vector.extract_strided_slice %8 {offsets = [0, 24], sizes = [16, 128], strides = [1, 1]} : vector<16x176xf32> to vector<16x128xf32>
    %34 = arith.mulf %1, %33 : vector<16x128xf32>
    %cst_20 = arith.constant dense<0.000000e+00> : vector<16x128xf32>
    %35 = tpu.matmul %34, %2, %cst_20 {dimension_numbers = #tpu.dot_dimension_numbers<[1], [0], [0], [1], [0, 0, 1, 1], [], []>} : vector<16x128xf32>, vector<128x128xf32>, vector<16x128xf32> -> vector<16x128xf32>
    %36 = arith.addf %35, %5 : vector<16x128xf32>
    %c3 = arith.constant 3 : index
    %c0_21 = arith.constant 0 : index
    %c0_22 = arith.constant 0 : index
    %37 = vector.load %arg13[%c3, %c0_21, %c0_22] : memref<49x16x128xf32, #tpu.memory_space<vmem>>, vector<1x16x128xf32>
    %38 = vector.shape_cast %37 : vector<1x16x128xf32> to vector<16x128xf32>
    %39 = vector.shape_cast %36 : vector<16x128xf32> to vector<1x16x128xf32>
    tpu.vector_store %arg13[%c3, %c0_21, %c0_22], %39 {strides = array<i32>} : memref<49x16x128xf32, #tpu.memory_space<vmem>>, vector<1x16x128xf32>,
    %40 = arith.maximumf %32, %36 : vector<16x128xf32>
    %41 = vector.extract_strided_slice %8 {offsets = [0, 32], sizes = [16, 128], strides = [1, 1]} : vector<16x176xf32> to vector<16x128xf32>
    %42 = arith.mulf %1, %41 : vector<16x128xf32>
    %cst_23 = arith.constant dense<0.000000e+00> : vector<16x128xf32>
    %43 = tpu.matmul %42, %2, %cst_23 {dimension_numbers = #tpu.dot_dimension_numbers<[1], [0], [0], [1], [0, 0, 1, 1], [], []>} : vector<16x128xf32>, vector<128x128xf32>, vector<16x128xf32> -> vector<16x128xf32>
    %44 = arith.addf %43, %5 : vector<16x128xf32>
    %c4 = arith.constant 4 : index
    %c0_24 = arith.constant 0 : index
    %c0_25 = arith.constant 0 : index
    %45 = vector.load %arg13[%c4, %c0_24, %c0_25] : memref<49x16x128xf32, #tpu.memory_space<vmem>>, vector<1x16x128xf32>
    %46 = vector.shape_cast %45 : vector<1x16x128xf32> to vector<16x128xf32>
    %47 = vector.shape_cast %44 : vector<16x128xf32> to vector<1x16x128xf32>
    tpu.vector_store %arg13[%c4, %c0_24, %c0_25], %47 {strides = array<i32>} : memref<49x16x128xf32, #tpu.memory_space<vmem>>, vector<1x16x128xf32>,
    %48 = arith.maximumf %40, %44 : vector<16x128xf32>
    %49 = vector.extract_strided_slice %8 {offsets = [0, 40], sizes = [16, 128], strides = [1, 1]} : vector<16x176xf32> to vector<16x128xf32>
    %50 = arith.mulf %1, %49 : vector<16x128xf32>
    %cst_26 = arith.constant dense<0.000000e+00> : vector<16x128xf32>
    %51 = tpu.matmul %50, %2, %cst_26 {dimension_numbers = #tpu.dot_dimension_numbers<[1], [0], [0], [1], [0, 0, 1, 1], [], []>} : vector<16x128xf32>, vector<128x128xf32>, vector<16x128xf32> -> vector<16x128xf32>
    %52 = arith.addf %51, %5 : vector<16x128xf32>
    %c5 = arith.constant 5 : index
    %c0_27 = arith.constant 0 : index
    %c0_28 = arith.constant 0 : index
    %53 = vector.load %arg13[%c5, %c0_27, %c0_28] : memref<49x16x128xf32, #tpu.memory_space<vmem>>, vector<1x16x128xf32>
    %54 = vector.shape_cast %53 : vector<1x16x128xf32> to vector<16x128xf32>
    %55 = vector.shape_cast %52 : vector<16x128xf32> to vector<1x16x128xf32>
    tpu.vector_store %arg13[%c5, %c0_27, %c0_28], %55 {strides = array<i32>} : memref<49x16x128xf32, #tpu.memory_space<vmem>>, vector<1x16x128xf32>,
    %56 = arith.maximumf %48, %52 : vector<16x128xf32>
    %57 = vector.extract_strided_slice %8 {offsets = [0, 48], sizes = [16, 128], strides = [1, 1]} : vector<16x176xf32> to vector<16x128xf32>
    %58 = arith.mulf %1, %57 : vector<16x128xf32>
    %cst_29 = arith.constant dense<0.000000e+00> : vector<16x128xf32>
    %59 = tpu.matmul %58, %2, %cst_29 {dimension_numbers = #tpu.dot_dimension_numbers<[1], [0], [0], [1], [0, 0, 1, 1], [], []>} : vector<16x128xf32>, vector<128x128xf32>, vector<16x128xf32> -> vector<16x128xf32>
    %60 = arith.addf %59, %5 : vector<16x128xf32>
    %c6 = arith.constant 6 : index
    %c0_30 = arith.constant 0 : index
    %c0_31 = arith.constant 0 : index
    %61 = vector.load %arg13[%c6, %c0_30, %c0_31] : memref<49x16x128xf32, #tpu.memory_space<vmem>>, vector<1x16x128xf32>
    %62 = vector.shape_cast %61 : vector<1x16x128xf32> to vector<16x128xf32>
    %63 = vector.shape_cast %60 : vector<16x128xf32> to vector<1x16x128xf32>
    tpu.vector_store %arg13[%c6, %c0_30, %c0_31], %63 {strides = array<i32>} : memref<49x16x128xf32, #tpu.memory_space<vmem>>, vector<1x16x128xf32>,
    %64 = arith.maximumf %56, %60 : vector<16x128xf32>
    %c0_32 = arith.constant 0 : index
    %c1_33 = arith.constant 1 : index
    %c0_34 = arith.constant 0 : index
    %65 = vector.load %arg2[%c0_32, %c1_33, %c0_34] : memref<1x22x176xf32, #tpu.memory_space<vmem>>, vector<1x16x176xf32>
    %66 = vector.shape_cast %65 : vector<1x16x176xf32> to vector<16x176xf32>
    %67 = vector.extract_strided_slice %66 {offsets = [0, 0], sizes = [16, 128], strides = [1, 1]} : vector<16x176xf32> to vector<16x128xf32>
    %68 = arith.mulf %1, %67 : vector<16x128xf32>
    %cst_35 = arith.constant dense<0.000000e+00> : vector<16x128xf32>
    %69 = tpu.matmul %68, %2, %cst_35 {dimension_numbers = #tpu.dot_dimension_numbers<[1], [0], [0], [1], [0, 0, 1, 1], [], []>} : vector<16x128xf32>, vector<128x128xf32>, vector<16x128xf32> -> vector<16x128xf32>
    %70 = arith.addf %69, %5 : vector<16x128xf32>
    %c7 = arith.constant 7 : index
    %c0_36 = arith.constant 0 : index
    %c0_37 = arith.constant 0 : index
    %71 = vector.load %arg13[%c7, %c0_36, %c0_37] : memref<49x16x128xf32, #tpu.memory_space<vmem>>, vector<1x16x128xf32>
    %72 = vector.shape_cast %71 : vector<1x16x128xf32> to vector<16x128xf32>
    %73 = vector.shape_cast %70 : vector<16x128xf32> to vector<1x16x128xf32>
    tpu.vector_store %arg13[%c7, %c0_36, %c0_37], %73 {strides = array<i32>} : memref<49x16x128xf32, #tpu.memory_space<vmem>>, vector<1x16x128xf32>,
    %74 = arith.maximumf %64, %70 : vector<16x128xf32>
    %75 = vector.extract_strided_slice %66 {offsets = [0, 8], sizes = [16, 128], strides = [1, 1]} : vector<16x176xf32> to vector<16x128xf32>
    %76 = arith.mulf %1, %75 : vector<16x128xf32>
    %cst_38 = arith.constant dense<0.000000e+00> : vector<16x128xf32>
    %77 = tpu.matmul %76, %2, %cst_38 {dimension_numbers = #tpu.dot_dimension_numbers<[1], [0], [0], [1], [0, 0, 1, 1], [], []>} : vector<16x128xf32>, vector<128x128xf32>, vector<16x128xf32> -> vector<16x128xf32>
    %78 = arith.addf %77, %5 : vector<16x128xf32>
    %c8 = arith.constant 8 : index
    %c0_39 = arith.constant 0 : index
    %c0_40 = arith.constant 0 : index
    %79 = vector.load %arg13[%c8, %c0_39, %c0_40] : memref<49x16x128xf32, #tpu.memory_space<vmem>>, vector<1x16x128xf32>
    %80 = vector.shape_cast %79 : vector<1x16x128xf32> to vector<16x128xf32>
    %81 = vector.shape_cast %78 : vector<16x128xf32> to vector<1x16x128xf32>
    tpu.vector_store %arg13[%c8, %c0_39, %c0_40], %81 {strides = array<i32>} : memref<49x16x128xf32, #tpu.memory_space<vmem>>, vector<1x16x128xf32>,
    %82 = arith.maximumf %74, %78 : vector<16x128xf32>
    %83 = vector.extract_strided_slice %66 {offsets = [0, 16], sizes = [16, 128], strides = [1, 1]} : vector<16x176xf32> to vector<16x128xf32>
    %84 = arith.mulf %1, %83 : vector<16x128xf32>
    %cst_41 = arith.constant dense<0.000000e+00> : vector<16x128xf32>
    %85 = tpu.matmul %84, %2, %cst_41 {dimension_numbers = #tpu.dot_dimension_numbers<[1], [0], [0], [1], [0, 0, 1, 1], [], []>} : vector<16x128xf32>, vector<128x128xf32>, vector<16x128xf32> -> vector<16x128xf32>
    %86 = arith.addf %85, %5 : vector<16x128xf32>
    %c9 = arith.constant 9 : index
    %c0_42 = arith.constant 0 : index
    %c0_43 = arith.constant 0 : index
    %87 = vector.load %arg13[%c9, %c0_42, %c0_43] : memref<49x16x128xf32, #tpu.memory_space<vmem>>, vector<1x16x128xf32>
    %88 = vector.shape_cast %87 : vector<1x16x128xf32> to vector<16x128xf32>
    %89 = vector.shape_cast %86 : vector<16x128xf32> to vector<1x16x128xf32>
    tpu.vector_store %arg13[%c9, %c0_42, %c0_43], %89 {strides = array<i32>} : memref<49x16x128xf32, #tpu.memory_space<vmem>>, vector<1x16x128xf32>,
    %90 = arith.maximumf %82, %86 : vector<16x128xf32>
    %91 = vector.extract_strided_slice %66 {offsets = [0, 24], sizes = [16, 128], strides = [1, 1]} : vector<16x176xf32> to vector<16x128xf32>
    %92 = arith.mulf %1, %91 : vector<16x128xf32>
    %cst_44 = arith.constant dense<0.000000e+00> : vector<16x128xf32>
    %93 = tpu.matmul %92, %2, %cst_44 {dimension_numbers = #tpu.dot_dimension_numbers<[1], [0], [0], [1], [0, 0, 1, 1], [], []>} : vector<16x128xf32>, vector<128x128xf32>, vector<16x128xf32> -> vector<16x128xf32>
    %94 = arith.addf %93, %5 : vector<16x128xf32>
    %c10 = arith.constant 10 : index
    %c0_45 = arith.constant 0 : index
    %c0_46 = arith.constant 0 : index
    %95 = vector.load %arg13[%c10, %c0_45, %c0_46] : memref<49x16x128xf32, #tpu.memory_space<vmem>>, vector<1x16x128xf32>
    %96 = vector.shape_cast %95 : vector<1x16x128xf32> to vector<16x128xf32>
    %97 = vector.shape_cast %94 : vector<16x128xf32> to vector<1x16x128xf32>
    tpu.vector_store %arg13[%c10, %c0_45, %c0_46], %97 {strides = array<i32>} : memref<49x16x128xf32, #tpu.memory_space<vmem>>, vector<1x16x128xf32>,
    %98 = arith.maximumf %90, %94 : vector<16x128xf32>
    %99 = vector.extract_strided_slice %66 {offsets = [0, 32], sizes = [16, 128], strides = [1, 1]} : vector<16x176xf32> to vector<16x128xf32>
    %100 = arith.mulf %1, %99 : vector<16x128xf32>
    %cst_47 = arith.constant dense<0.000000e+00> : vector<16x128xf32>
    %101 = tpu.matmul %100, %2, %cst_47 {dimension_numbers = #tpu.dot_dimension_numbers<[1], [0], [0], [1], [0, 0, 1, 1], [], []>} : vector<16x128xf32>, vector<128x128xf32>, vector<16x128xf32> -> vector<16x128xf32>
    %102 = arith.addf %101, %5 : vector<16x128xf32>
    %c11 = arith.constant 11 : index
    %c0_48 = arith.constant 0 : index
    %c0_49 = arith.constant 0 : index
    %103 = vector.load %arg13[%c11, %c0_48, %c0_49] : memref<49x16x128xf32, #tpu.memory_space<vmem>>, vector<1x16x128xf32>
    %104 = vector.shape_cast %103 : vector<1x16x128xf32> to vector<16x128xf32>
    %105 = vector.shape_cast %102 : vector<16x128xf32> to vector<1x16x128xf32>
    tpu.vector_store %arg13[%c11, %c0_48, %c0_49], %105 {strides = array<i32>} : memref<49x16x128xf32, #tpu.memory_space<vmem>>, vector<1x16x128xf32>,
    %106 = arith.maximumf %98, %102 : vector<16x128xf32>
    %107 = vector.extract_strided_slice %66 {offsets = [0, 40], sizes = [16, 128], strides = [1, 1]} : vector<16x176xf32> to vector<16x128xf32>
    %108 = arith.mulf %1, %107 : vector<16x128xf32>
    %cst_50 = arith.constant dense<0.000000e+00> : vector<16x128xf32>
    %109 = tpu.matmul %108, %2, %cst_50 {dimension_numbers = #tpu.dot_dimension_numbers<[1], [0], [0], [1], [0, 0, 1, 1], [], []>} : vector<16x128xf32>, vector<128x128xf32>, vector<16x128xf32> -> vector<16x128xf32>
    %110 = arith.addf %109, %5 : vector<16x128xf32>
    %c12 = arith.constant 12 : index
    %c0_51 = arith.constant 0 : index
    %c0_52 = arith.constant 0 : index
    %111 = vector.load %arg13[%c12, %c0_51, %c0_52] : memref<49x16x128xf32, #tpu.memory_space<vmem>>, vector<1x16x128xf32>
    %112 = vector.shape_cast %111 : vector<1x16x128xf32> to vector<16x128xf32>
    %113 = vector.shape_cast %110 : vector<16x128xf32> to vector<1x16x128xf32>
    tpu.vector_store %arg13[%c12, %c0_51, %c0_52], %113 {strides = array<i32>} : memref<49x16x128xf32, #tpu.memory_space<vmem>>, vector<1x16x128xf32>,
    %114 = arith.maximumf %106, %110 : vector<16x128xf32>
    %115 = vector.extract_strided_slice %66 {offsets = [0, 48], sizes = [16, 128], strides = [1, 1]} : vector<16x176xf32> to vector<16x128xf32>
    %116 = arith.mulf %1, %115 : vector<16x128xf32>
    %cst_53 = arith.constant dense<0.000000e+00> : vector<16x128xf32>
    %117 = tpu.matmul %116, %2, %cst_53 {dimension_numbers = #tpu.dot_dimension_numbers<[1], [0], [0], [1], [0, 0, 1, 1], [], []>} : vector<16x128xf32>, vector<128x128xf32>, vector<16x128xf32> -> vector<16x128xf32>
    %118 = arith.addf %117, %5 : vector<16x128xf32>
    %c13 = arith.constant 13 : index
    %c0_54 = arith.constant 0 : index
    %c0_55 = arith.constant 0 : index
    %119 = vector.load %arg13[%c13, %c0_54, %c0_55] : memref<49x16x128xf32, #tpu.memory_space<vmem>>, vector<1x16x128xf32>
    %120 = vector.shape_cast %119 : vector<1x16x128xf32> to vector<16x128xf32>
    %121 = vector.shape_cast %118 : vector<16x128xf32> to vector<1x16x128xf32>
    tpu.vector_store %arg13[%c13, %c0_54, %c0_55], %121 {strides = array<i32>} : memref<49x16x128xf32, #tpu.memory_space<vmem>>, vector<1x16x128xf32>,
    %122 = arith.maximumf %114, %118 : vector<16x128xf32>
    %c0_56 = arith.constant 0 : index
    %c2_57 = arith.constant 2 : index
    %c0_58 = arith.constant 0 : index
    %123 = vector.load %arg2[%c0_56, %c2_57, %c0_58] : memref<1x22x176xf32, #tpu.memory_space<vmem>>, vector<1x16x176xf32>
    %124 = vector.shape_cast %123 : vector<1x16x176xf32> to vector<16x176xf32>
    %125 = vector.extract_strided_slice %124 {offsets = [0, 0], sizes = [16, 128], strides = [1, 1]} : vector<16x176xf32> to vector<16x128xf32>
    %126 = arith.mulf %1, %125 : vector<16x128xf32>
    %cst_59 = arith.constant dense<0.000000e+00> : vector<16x128xf32>
    %127 = tpu.matmul %126, %2, %cst_59 {dimension_numbers = #tpu.dot_dimension_numbers<[1], [0], [0], [1], [0, 0, 1, 1], [], []>} : vector<16x128xf32>, vector<128x128xf32>, vector<16x128xf32> -> vector<16x128xf32>
    %128 = arith.addf %127, %5 : vector<16x128xf32>
    %c14 = arith.constant 14 : index
    %c0_60 = arith.constant 0 : index
    %c0_61 = arith.constant 0 : index
    %129 = vector.load %arg13[%c14, %c0_60, %c0_61] : memref<49x16x128xf32, #tpu.memory_space<vmem>>, vector<1x16x128xf32>
    %130 = vector.shape_cast %129 : vector<1x16x128xf32> to vector<16x128xf32>
    %131 = vector.shape_cast %128 : vector<16x128xf32> to vector<1x16x128xf32>
    tpu.vector_store %arg13[%c14, %c0_60, %c0_61], %131 {strides = array<i32>} : memref<49x16x128xf32, #tpu.memory_space<vmem>>, vector<1x16x128xf32>,
    %132 = arith.maximumf %122, %128 : vector<16x128xf32>
    %133 = vector.extract_strided_slice %124 {offsets = [0, 8], sizes = [16, 128], strides = [1, 1]} : vector<16x176xf32> to vector<16x128xf32>
    %134 = arith.mulf %1, %133 : vector<16x128xf32>
    %cst_62 = arith.constant dense<0.000000e+00> : vector<16x128xf32>
    %135 = tpu.matmul %134, %2, %cst_62 {dimension_numbers = #tpu.dot_dimension_numbers<[1], [0], [0], [1], [0, 0, 1, 1], [], []>} : vector<16x128xf32>, vector<128x128xf32>, vector<16x128xf32> -> vector<16x128xf32>
    %136 = arith.addf %135, %5 : vector<16x128xf32>
    %c15 = arith.constant 15 : index
    %c0_63 = arith.constant 0 : index
    %c0_64 = arith.constant 0 : index
    %137 = vector.load %arg13[%c15, %c0_63, %c0_64] : memref<49x16x128xf32, #tpu.memory_space<vmem>>, vector<1x16x128xf32>
    %138 = vector.shape_cast %137 : vector<1x16x128xf32> to vector<16x128xf32>
    %139 = vector.shape_cast %136 : vector<16x128xf32> to vector<1x16x128xf32>
    tpu.vector_store %arg13[%c15, %c0_63, %c0_64], %139 {strides = array<i32>} : memref<49x16x128xf32, #tpu.memory_space<vmem>>, vector<1x16x128xf32>,
    %140 = arith.maximumf %132, %136 : vector<16x128xf32>
    %141 = vector.extract_strided_slice %124 {offsets = [0, 16], sizes = [16, 128], strides = [1, 1]} : vector<16x176xf32> to vector<16x128xf32>
    %142 = arith.mulf %1, %141 : vector<16x128xf32>
    %cst_65 = arith.constant dense<0.000000e+00> : vector<16x128xf32>
    %143 = tpu.matmul %142, %2, %cst_65 {dimension_numbers = #tpu.dot_dimension_numbers<[1], [0], [0], [1], [0, 0, 1, 1], [], []>} : vector<16x128xf32>, vector<128x128xf32>, vector<16x128xf32> -> vector<16x128xf32>
    %144 = arith.addf %143, %5 : vector<16x128xf32>
    %c16 = arith.constant 16 : index
    %c0_66 = arith.constant 0 : index
    %c0_67 = arith.constant 0 : index
    %145 = vector.load %arg13[%c16, %c0_66, %c0_67] : memref<49x16x128xf32, #tpu.memory_space<vmem>>, vector<1x16x128xf32>
    %146 = vector.shape_cast %145 : vector<1x16x128xf32> to vector<16x128xf32>
    %147 = vector.shape_cast %144 : vector<16x128xf32> to vector<1x16x128xf32>
    tpu.vector_store %arg13[%c16, %c0_66, %c0_67], %147 {strides = array<i32>} : memref<49x16x128xf32, #tpu.memory_space<vmem>>, vector<1x16x128xf32>,
    %148 = arith.maximumf %140, %144 : vector<16x128xf32>
    %149 = vector.extract_strided_slice %124 {offsets = [0, 24], sizes = [16, 128], strides = [1, 1]} : vector<16x176xf32> to vector<16x128xf32>
    %150 = arith.mulf %1, %149 : vector<16x128xf32>
    %cst_68 = arith.constant dense<0.000000e+00> : vector<16x128xf32>
    %151 = tpu.matmul %150, %2, %cst_68 {dimension_numbers = #tpu.dot_dimension_numbers<[1], [0], [0], [1], [0, 0, 1, 1], [], []>} : vector<16x128xf32>, vector<128x128xf32>, vector<16x128xf32> -> vector<16x128xf32>
    %152 = arith.addf %151, %5 : vector<16x128xf32>
    %c17 = arith.constant 17 : index
    %c0_69 = arith.constant 0 : index
    %c0_70 = arith.constant 0 : index
    %153 = vector.load %arg13[%c17, %c0_69, %c0_70] : memref<49x16x128xf32, #tpu.memory_space<vmem>>, vector<1x16x128xf32>
    %154 = vector.shape_cast %153 : vector<1x16x128xf32> to vector<16x128xf32>
    %155 = vector.shape_cast %152 : vector<16x128xf32> to vector<1x16x128xf32>
    tpu.vector_store %arg13[%c17, %c0_69, %c0_70], %155 {strides = array<i32>} : memref<49x16x128xf32, #tpu.memory_space<vmem>>, vector<1x16x128xf32>,
    %156 = arith.maximumf %148, %152 : vector<16x128xf32>
    %157 = vector.extract_strided_slice %124 {offsets = [0, 32], sizes = [16, 128], strides = [1, 1]} : vector<16x176xf32> to vector<16x128xf32>
    %158 = arith.mulf %1, %157 : vector<16x128xf32>
    %cst_71 = arith.constant dense<0.000000e+00> : vector<16x128xf32>
    %159 = tpu.matmul %158, %2, %cst_71 {dimension_numbers = #tpu.dot_dimension_numbers<[1], [0], [0], [1], [0, 0, 1, 1], [], []>} : vector<16x128xf32>, vector<128x128xf32>, vector<16x128xf32> -> vector<16x128xf32>
    %160 = arith.addf %159, %5 : vector<16x128xf32>
    %c18 = arith.constant 18 : index
    %c0_72 = arith.constant 0 : index
    %c0_73 = arith.constant 0 : index
    %161 = vector.load %arg13[%c18, %c0_72, %c0_73] : memref<49x16x128xf32, #tpu.memory_space<vmem>>, vector<1x16x128xf32>
    %162 = vector.shape_cast %161 : vector<1x16x128xf32> to vector<16x128xf32>
    %163 = vector.shape_cast %160 : vector<16x128xf32> to vector<1x16x128xf32>
    tpu.vector_store %arg13[%c18, %c0_72, %c0_73], %163 {strides = array<i32>} : memref<49x16x128xf32, #tpu.memory_space<vmem>>, vector<1x16x128xf32>,
    %164 = arith.maximumf %156, %160 : vector<16x128xf32>
    %165 = vector.extract_strided_slice %124 {offsets = [0, 40], sizes = [16, 128], strides = [1, 1]} : vector<16x176xf32> to vector<16x128xf32>
    %166 = arith.mulf %1, %165 : vector<16x128xf32>
    %cst_74 = arith.constant dense<0.000000e+00> : vector<16x128xf32>
    %167 = tpu.matmul %166, %2, %cst_74 {dimension_numbers = #tpu.dot_dimension_numbers<[1], [0], [0], [1], [0, 0, 1, 1], [], []>} : vector<16x128xf32>, vector<128x128xf32>, vector<16x128xf32> -> vector<16x128xf32>
    %168 = arith.addf %167, %5 : vector<16x128xf32>
    %c19 = arith.constant 19 : index
    %c0_75 = arith.constant 0 : index
    %c0_76 = arith.constant 0 : index
    %169 = vector.load %arg13[%c19, %c0_75, %c0_76] : memref<49x16x128xf32, #tpu.memory_space<vmem>>, vector<1x16x128xf32>
    %170 = vector.shape_cast %169 : vector<1x16x128xf32> to vector<16x128xf32>
    %171 = vector.shape_cast %168 : vector<16x128xf32> to vector<1x16x128xf32>
    tpu.vector_store %arg13[%c19, %c0_75, %c0_76], %171 {strides = array<i32>} : memref<49x16x128xf32, #tpu.memory_space<vmem>>, vector<1x16x128xf32>,
    %172 = arith.maximumf %164, %168 : vector<16x128xf32>
    %173 = vector.extract_strided_slice %124 {offsets = [0, 48], sizes = [16, 128], strides = [1, 1]} : vector<16x176xf32> to vector<16x128xf32>
    %174 = arith.mulf %1, %173 : vector<16x128xf32>
    %cst_77 = arith.constant dense<0.000000e+00> : vector<16x128xf32>
    %175 = tpu.matmul %174, %2, %cst_77 {dimension_numbers = #tpu.dot_dimension_numbers<[1], [0], [0], [1], [0, 0, 1, 1], [], []>} : vector<16x128xf32>, vector<128x128xf32>, vector<16x128xf32> -> vector<16x128xf32>
    %176 = arith.addf %175, %5 : vector<16x128xf32>
    %c20 = arith.constant 20 : index
    %c0_78 = arith.constant 0 : index
    %c0_79 = arith.constant 0 : index
    %177 = vector.load %arg13[%c20, %c0_78, %c0_79] : memref<49x16x128xf32, #tpu.memory_space<vmem>>, vector<1x16x128xf32>
    %178 = vector.shape_cast %177 : vector<1x16x128xf32> to vector<16x128xf32>
    %179 = vector.shape_cast %176 : vector<16x128xf32> to vector<1x16x128xf32>
    tpu.vector_store %arg13[%c20, %c0_78, %c0_79], %179 {strides = array<i32>} : memref<49x16x128xf32, #tpu.memory_space<vmem>>, vector<1x16x128xf32>,
    %180 = arith.maximumf %172, %176 : vector<16x128xf32>
    %c0_80 = arith.constant 0 : index
    %c3_81 = arith.constant 3 : index
    %c0_82 = arith.constant 0 : index
    %181 = vector.load %arg2[%c0_80, %c3_81, %c0_82] : memref<1x22x176xf32, #tpu.memory_space<vmem>>, vector<1x16x176xf32>
    %182 = vector.shape_cast %181 : vector<1x16x176xf32> to vector<16x176xf32>
    %183 = vector.extract_strided_slice %182 {offsets = [0, 0], sizes = [16, 128], strides = [1, 1]} : vector<16x176xf32> to vector<16x128xf32>
    %184 = arith.mulf %1, %183 : vector<16x128xf32>
    %cst_83 = arith.constant dense<0.000000e+00> : vector<16x128xf32>
    %185 = tpu.matmul %184, %2, %cst_83 {dimension_numbers = #tpu.dot_dimension_numbers<[1], [0], [0], [1], [0, 0, 1, 1], [], []>} : vector<16x128xf32>, vector<128x128xf32>, vector<16x128xf32> -> vector<16x128xf32>
    %186 = arith.addf %185, %5 : vector<16x128xf32>
    %c21 = arith.constant 21 : index
    %c0_84 = arith.constant 0 : index
    %c0_85 = arith.constant 0 : index
    %187 = vector.load %arg13[%c21, %c0_84, %c0_85] : memref<49x16x128xf32, #tpu.memory_space<vmem>>, vector<1x16x128xf32>
    %188 = vector.shape_cast %187 : vector<1x16x128xf32> to vector<16x128xf32>
    %189 = vector.shape_cast %186 : vector<16x128xf32> to vector<1x16x128xf32>
    tpu.vector_store %arg13[%c21, %c0_84, %c0_85], %189 {strides = array<i32>} : memref<49x16x128xf32, #tpu.memory_space<vmem>>, vector<1x16x128xf32>,
    %190 = arith.maximumf %180, %186 : vector<16x128xf32>
    %191 = vector.extract_strided_slice %182 {offsets = [0, 8], sizes = [16, 128], strides = [1, 1]} : vector<16x176xf32> to vector<16x128xf32>
    %192 = arith.mulf %1, %191 : vector<16x128xf32>
    %cst_86 = arith.constant dense<0.000000e+00> : vector<16x128xf32>
    %193 = tpu.matmul %192, %2, %cst_86 {dimension_numbers = #tpu.dot_dimension_numbers<[1], [0], [0], [1], [0, 0, 1, 1], [], []>} : vector<16x128xf32>, vector<128x128xf32>, vector<16x128xf32> -> vector<16x128xf32>
    %194 = arith.addf %193, %5 : vector<16x128xf32>
    %c22 = arith.constant 22 : index
    %c0_87 = arith.constant 0 : index
    %c0_88 = arith.constant 0 : index
    %195 = vector.load %arg13[%c22, %c0_87, %c0_88] : memref<49x16x128xf32, #tpu.memory_space<vmem>>, vector<1x16x128xf32>
    %196 = vector.shape_cast %195 : vector<1x16x128xf32> to vector<16x128xf32>
    %197 = vector.shape_cast %194 : vector<16x128xf32> to vector<1x16x128xf32>
    tpu.vector_store %arg13[%c22, %c0_87, %c0_88], %197 {strides = array<i32>} : memref<49x16x128xf32, #tpu.memory_space<vmem>>, vector<1x16x128xf32>,
    %198 = arith.maximumf %190, %194 : vector<16x128xf32>
    %199 = vector.extract_strided_slice %182 {offsets = [0, 16], sizes = [16, 128], strides = [1, 1]} : vector<16x176xf32> to vector<16x128xf32>
    %200 = arith.mulf %1, %199 : vector<16x128xf32>
    %cst_89 = arith.constant dense<0.000000e+00> : vector<16x128xf32>
    %201 = tpu.matmul %200, %2, %cst_89 {dimension_numbers = #tpu.dot_dimension_numbers<[1], [0], [0], [1], [0, 0, 1, 1], [], []>} : vector<16x128xf32>, vector<128x128xf32>, vector<16x128xf32> -> vector<16x128xf32>
    %202 = arith.addf %201, %5 : vector<16x128xf32>
    %c23 = arith.constant 23 : index
    %c0_90 = arith.constant 0 : index
    %c0_91 = arith.constant 0 : index
    %203 = vector.load %arg13[%c23, %c0_90, %c0_91] : memref<49x16x128xf32, #tpu.memory_space<vmem>>, vector<1x16x128xf32>
    %204 = vector.shape_cast %203 : vector<1x16x128xf32> to vector<16x128xf32>
    %205 = vector.shape_cast %202 : vector<16x128xf32> to vector<1x16x128xf32>
    tpu.vector_store %arg13[%c23, %c0_90, %c0_91], %205 {strides = array<i32>} : memref<49x16x128xf32, #tpu.memory_space<vmem>>, vector<1x16x128xf32>,
    %206 = arith.maximumf %198, %202 : vector<16x128xf32>
    %207 = vector.extract_strided_slice %182 {offsets = [0, 24], sizes = [16, 128], strides = [1, 1]} : vector<16x176xf32> to vector<16x128xf32>
    %208 = arith.mulf %1, %207 : vector<16x128xf32>
    %cst_92 = arith.constant dense<0.000000e+00> : vector<16x128xf32>
    %209 = tpu.matmul %208, %2, %cst_92 {dimension_numbers = #tpu.dot_dimension_numbers<[1], [0], [0], [1], [0, 0, 1, 1], [], []>} : vector<16x128xf32>, vector<128x128xf32>, vector<16x128xf32> -> vector<16x128xf32>
    %210 = arith.addf %209, %5 : vector<16x128xf32>
    %c24 = arith.constant 24 : index
    %c0_93 = arith.constant 0 : index
    %c0_94 = arith.constant 0 : index
    %211 = vector.load %arg13[%c24, %c0_93, %c0_94] : memref<49x16x128xf32, #tpu.memory_space<vmem>>, vector<1x16x128xf32>
    %212 = vector.shape_cast %211 : vector<1x16x128xf32> to vector<16x128xf32>
    %213 = vector.shape_cast %210 : vector<16x128xf32> to vector<1x16x128xf32>
    tpu.vector_store %arg13[%c24, %c0_93, %c0_94], %213 {strides = array<i32>} : memref<49x16x128xf32, #tpu.memory_space<vmem>>, vector<1x16x128xf32>,
    %214 = arith.maximumf %206, %210 : vector<16x128xf32>
    %215 = vector.extract_strided_slice %182 {offsets = [0, 32], sizes = [16, 128], strides = [1, 1]} : vector<16x176xf32> to vector<16x128xf32>
    %216 = arith.mulf %1, %215 : vector<16x128xf32>
    %cst_95 = arith.constant dense<0.000000e+00> : vector<16x128xf32>
    %217 = tpu.matmul %216, %2, %cst_95 {dimension_numbers = #tpu.dot_dimension_numbers<[1], [0], [0], [1], [0, 0, 1, 1], [], []>} : vector<16x128xf32>, vector<128x128xf32>, vector<16x128xf32> -> vector<16x128xf32>
    %218 = arith.addf %217, %5 : vector<16x128xf32>
    %c25 = arith.constant 25 : index
    %c0_96 = arith.constant 0 : index
    %c0_97 = arith.constant 0 : index
    %219 = vector.load %arg13[%c25, %c0_96, %c0_97] : memref<49x16x128xf32, #tpu.memory_space<vmem>>, vector<1x16x128xf32>
    %220 = vector.shape_cast %219 : vector<1x16x128xf32> to vector<16x128xf32>
    %221 = vector.shape_cast %218 : vector<16x128xf32> to vector<1x16x128xf32>
    tpu.vector_store %arg13[%c25, %c0_96, %c0_97], %221 {strides = array<i32>} : memref<49x16x128xf32, #tpu.memory_space<vmem>>, vector<1x16x128xf32>,
    %222 = arith.maximumf %214, %218 : vector<16x128xf32>
    %223 = vector.extract_strided_slice %182 {offsets = [0, 40], sizes = [16, 128], strides = [1, 1]} : vector<16x176xf32> to vector<16x128xf32>
    %224 = arith.mulf %1, %223 : vector<16x128xf32>
    %cst_98 = arith.constant dense<0.000000e+00> : vector<16x128xf32>
    %225 = tpu.matmul %224, %2, %cst_98 {dimension_numbers = #tpu.dot_dimension_numbers<[1], [0], [0], [1], [0, 0, 1, 1], [], []>} : vector<16x128xf32>, vector<128x128xf32>, vector<16x128xf32> -> vector<16x128xf32>
    %226 = arith.addf %225, %5 : vector<16x128xf32>
    %c26 = arith.constant 26 : index
    %c0_99 = arith.constant 0 : index
    %c0_100 = arith.constant 0 : index
    %227 = vector.load %arg13[%c26, %c0_99, %c0_100] : memref<49x16x128xf32, #tpu.memory_space<vmem>>, vector<1x16x128xf32>
    %228 = vector.shape_cast %227 : vector<1x16x128xf32> to vector<16x128xf32>
    %229 = vector.shape_cast %226 : vector<16x128xf32> to vector<1x16x128xf32>
    tpu.vector_store %arg13[%c26, %c0_99, %c0_100], %229 {strides = array<i32>} : memref<49x16x128xf32, #tpu.memory_space<vmem>>, vector<1x16x128xf32>,
    %230 = arith.maximumf %222, %226 : vector<16x128xf32>
    %231 = vector.extract_strided_slice %182 {offsets = [0, 48], sizes = [16, 128], strides = [1, 1]} : vector<16x176xf32> to vector<16x128xf32>
    %232 = arith.mulf %1, %231 : vector<16x128xf32>
    %cst_101 = arith.constant dense<0.000000e+00> : vector<16x128xf32>
    %233 = tpu.matmul %232, %2, %cst_101 {dimension_numbers = #tpu.dot_dimension_numbers<[1], [0], [0], [1], [0, 0, 1, 1], [], []>} : vector<16x128xf32>, vector<128x128xf32>, vector<16x128xf32> -> vector<16x128xf32>
    %234 = arith.addf %233, %5 : vector<16x128xf32>
    %c27 = arith.constant 27 : index
    %c0_102 = arith.constant 0 : index
    %c0_103 = arith.constant 0 : index
    %235 = vector.load %arg13[%c27, %c0_102, %c0_103] : memref<49x16x128xf32, #tpu.memory_space<vmem>>, vector<1x16x128xf32>
    %236 = vector.shape_cast %235 : vector<1x16x128xf32> to vector<16x128xf32>
    %237 = vector.shape_cast %234 : vector<16x128xf32> to vector<1x16x128xf32>
    tpu.vector_store %arg13[%c27, %c0_102, %c0_103], %237 {strides = array<i32>} : memref<49x16x128xf32, #tpu.memory_space<vmem>>, vector<1x16x128xf32>,
    %238 = arith.maximumf %230, %234 : vector<16x128xf32>
    %c0_104 = arith.constant 0 : index
    %c4_105 = arith.constant 4 : index
    %c0_106 = arith.constant 0 : index
    %239 = vector.load %arg2[%c0_104, %c4_105, %c0_106] : memref<1x22x176xf32, #tpu.memory_space<vmem>>, vector<1x16x176xf32>
    %240 = vector.shape_cast %239 : vector<1x16x176xf32> to vector<16x176xf32>
    %241 = vector.extract_strided_slice %240 {offsets = [0, 0], sizes = [16, 128], strides = [1, 1]} : vector<16x176xf32> to vector<16x128xf32>
    %242 = arith.mulf %1, %241 : vector<16x128xf32>
    %cst_107 = arith.constant dense<0.000000e+00> : vector<16x128xf32>
    %243 = tpu.matmul %242, %2, %cst_107 {dimension_numbers = #tpu.dot_dimension_numbers<[1], [0], [0], [1], [0, 0, 1, 1], [], []>} : vector<16x128xf32>, vector<128x128xf32>, vector<16x128xf32> -> vector<16x128xf32>
    %244 = arith.addf %243, %5 : vector<16x128xf32>
    %c28 = arith.constant 28 : index
    %c0_108 = arith.constant 0 : index
    %c0_109 = arith.constant 0 : index
    %245 = vector.load %arg13[%c28, %c0_108, %c0_109] : memref<49x16x128xf32, #tpu.memory_space<vmem>>, vector<1x16x128xf32>
    %246 = vector.shape_cast %245 : vector<1x16x128xf32> to vector<16x128xf32>
    %247 = vector.shape_cast %244 : vector<16x128xf32> to vector<1x16x128xf32>
    tpu.vector_store %arg13[%c28, %c0_108, %c0_109], %247 {strides = array<i32>} : memref<49x16x128xf32, #tpu.memory_space<vmem>>, vector<1x16x128xf32>,
    %248 = arith.maximumf %238, %244 : vector<16x128xf32>
    %249 = vector.extract_strided_slice %240 {offsets = [0, 8], sizes = [16, 128], strides = [1, 1]} : vector<16x176xf32> to vector<16x128xf32>
    %250 = arith.mulf %1, %249 : vector<16x128xf32>
    %cst_110 = arith.constant dense<0.000000e+00> : vector<16x128xf32>
    %251 = tpu.matmul %250, %2, %cst_110 {dimension_numbers = #tpu.dot_dimension_numbers<[1], [0], [0], [1], [0, 0, 1, 1], [], []>} : vector<16x128xf32>, vector<128x128xf32>, vector<16x128xf32> -> vector<16x128xf32>
    %252 = arith.addf %251, %5 : vector<16x128xf32>
    %c29 = arith.constant 29 : index
    %c0_111 = arith.constant 0 : index
    %c0_112 = arith.constant 0 : index
    %253 = vector.load %arg13[%c29, %c0_111, %c0_112] : memref<49x16x128xf32, #tpu.memory_space<vmem>>, vector<1x16x128xf32>
    %254 = vector.shape_cast %253 : vector<1x16x128xf32> to vector<16x128xf32>
    %255 = vector.shape_cast %252 : vector<16x128xf32> to vector<1x16x128xf32>
    tpu.vector_store %arg13[%c29, %c0_111, %c0_112], %255 {strides = array<i32>} : memref<49x16x128xf32, #tpu.memory_space<vmem>>, vector<1x16x128xf32>,
    %256 = arith.maximumf %248, %252 : vector<16x128xf32>
    %257 = vector.extract_strided_slice %240 {offsets = [0, 16], sizes = [16, 128], strides = [1, 1]} : vector<16x176xf32> to vector<16x128xf32>
    %258 = arith.mulf %1, %257 : vector<16x128xf32>
    %cst_113 = arith.constant dense<0.000000e+00> : vector<16x128xf32>
    %259 = tpu.matmul %258, %2, %cst_113 {dimension_numbers = #tpu.dot_dimension_numbers<[1], [0], [0], [1], [0, 0, 1, 1], [], []>} : vector<16x128xf32>, vector<128x128xf32>, vector<16x128xf32> -> vector<16x128xf32>
    %260 = arith.addf %259, %5 : vector<16x128xf32>
    %c30 = arith.constant 30 : index
    %c0_114 = arith.constant 0 : index
    %c0_115 = arith.constant 0 : index
    %261 = vector.load %arg13[%c30, %c0_114, %c0_115] : memref<49x16x128xf32, #tpu.memory_space<vmem>>, vector<1x16x128xf32>
    %262 = vector.shape_cast %261 : vector<1x16x128xf32> to vector<16x128xf32>
    %263 = vector.shape_cast %260 : vector<16x128xf32> to vector<1x16x128xf32>
    tpu.vector_store %arg13[%c30, %c0_114, %c0_115], %263 {strides = array<i32>} : memref<49x16x128xf32, #tpu.memory_space<vmem>>, vector<1x16x128xf32>,
    %264 = arith.maximumf %256, %260 : vector<16x128xf32>
    %265 = vector.extract_strided_slice %240 {offsets = [0, 24], sizes = [16, 128], strides = [1, 1]} : vector<16x176xf32> to vector<16x128xf32>
    %266 = arith.mulf %1, %265 : vector<16x128xf32>
    %cst_116 = arith.constant dense<0.000000e+00> : vector<16x128xf32>
    %267 = tpu.matmul %266, %2, %cst_116 {dimension_numbers = #tpu.dot_dimension_numbers<[1], [0], [0], [1], [0, 0, 1, 1], [], []>} : vector<16x128xf32>, vector<128x128xf32>, vector<16x128xf32> -> vector<16x128xf32>
    %268 = arith.addf %267, %5 : vector<16x128xf32>
    %c31 = arith.constant 31 : index
    %c0_117 = arith.constant 0 : index
    %c0_118 = arith.constant 0 : index
    %269 = vector.load %arg13[%c31, %c0_117, %c0_118] : memref<49x16x128xf32, #tpu.memory_space<vmem>>, vector<1x16x128xf32>
    %270 = vector.shape_cast %269 : vector<1x16x128xf32> to vector<16x128xf32>
    %271 = vector.shape_cast %268 : vector<16x128xf32> to vector<1x16x128xf32>
    tpu.vector_store %arg13[%c31, %c0_117, %c0_118], %271 {strides = array<i32>} : memref<49x16x128xf32, #tpu.memory_space<vmem>>, vector<1x16x128xf32>,
    %272 = arith.maximumf %264, %268 : vector<16x128xf32>
    %273 = vector.extract_strided_slice %240 {offsets = [0, 32], sizes = [16, 128], strides = [1, 1]} : vector<16x176xf32> to vector<16x128xf32>
    %274 = arith.mulf %1, %273 : vector<16x128xf32>
    %cst_119 = arith.constant dense<0.000000e+00> : vector<16x128xf32>
    %275 = tpu.matmul %274, %2, %cst_119 {dimension_numbers = #tpu.dot_dimension_numbers<[1], [0], [0], [1], [0, 0, 1, 1], [], []>} : vector<16x128xf32>, vector<128x128xf32>, vector<16x128xf32> -> vector<16x128xf32>
    %276 = arith.addf %275, %5 : vector<16x128xf32>
    %c32 = arith.constant 32 : index
    %c0_120 = arith.constant 0 : index
    %c0_121 = arith.constant 0 : index
    %277 = vector.load %arg13[%c32, %c0_120, %c0_121] : memref<49x16x128xf32, #tpu.memory_space<vmem>>, vector<1x16x128xf32>
    %278 = vector.shape_cast %277 : vector<1x16x128xf32> to vector<16x128xf32>
    %279 = vector.shape_cast %276 : vector<16x128xf32> to vector<1x16x128xf32>
    tpu.vector_store %arg13[%c32, %c0_120, %c0_121], %279 {strides = array<i32>} : memref<49x16x128xf32, #tpu.memory_space<vmem>>, vector<1x16x128xf32>,
    %280 = arith.maximumf %272, %276 : vector<16x128xf32>
    %281 = vector.extract_strided_slice %240 {offsets = [0, 40], sizes = [16, 128], strides = [1, 1]} : vector<16x176xf32> to vector<16x128xf32>
    %282 = arith.mulf %1, %281 : vector<16x128xf32>
    %cst_122 = arith.constant dense<0.000000e+00> : vector<16x128xf32>
    %283 = tpu.matmul %282, %2, %cst_122 {dimension_numbers = #tpu.dot_dimension_numbers<[1], [0], [0], [1], [0, 0, 1, 1], [], []>} : vector<16x128xf32>, vector<128x128xf32>, vector<16x128xf32> -> vector<16x128xf32>
    %284 = arith.addf %283, %5 : vector<16x128xf32>
    %c33 = arith.constant 33 : index
    %c0_123 = arith.constant 0 : index
    %c0_124 = arith.constant 0 : index
    %285 = vector.load %arg13[%c33, %c0_123, %c0_124] : memref<49x16x128xf32, #tpu.memory_space<vmem>>, vector<1x16x128xf32>
    %286 = vector.shape_cast %285 : vector<1x16x128xf32> to vector<16x128xf32>
    %287 = vector.shape_cast %284 : vector<16x128xf32> to vector<1x16x128xf32>
    tpu.vector_store %arg13[%c33, %c0_123, %c0_124], %287 {strides = array<i32>} : memref<49x16x128xf32, #tpu.memory_space<vmem>>, vector<1x16x128xf32>,
    %288 = arith.maximumf %280, %284 : vector<16x128xf32>
    %289 = vector.extract_strided_slice %240 {offsets = [0, 48], sizes = [16, 128], strides = [1, 1]} : vector<16x176xf32> to vector<16x128xf32>
    %290 = arith.mulf %1, %289 : vector<16x128xf32>
    %cst_125 = arith.constant dense<0.000000e+00> : vector<16x128xf32>
    %291 = tpu.matmul %290, %2, %cst_125 {dimension_numbers = #tpu.dot_dimension_numbers<[1], [0], [0], [1], [0, 0, 1, 1], [], []>} : vector<16x128xf32>, vector<128x128xf32>, vector<16x128xf32> -> vector<16x128xf32>
    %292 = arith.addf %291, %5 : vector<16x128xf32>
    %c34 = arith.constant 34 : index
    %c0_126 = arith.constant 0 : index
    %c0_127 = arith.constant 0 : index
    %293 = vector.load %arg13[%c34, %c0_126, %c0_127] : memref<49x16x128xf32, #tpu.memory_space<vmem>>, vector<1x16x128xf32>
    %294 = vector.shape_cast %293 : vector<1x16x128xf32> to vector<16x128xf32>
    %295 = vector.shape_cast %292 : vector<16x128xf32> to vector<1x16x128xf32>
    tpu.vector_store %arg13[%c34, %c0_126, %c0_127], %295 {strides = array<i32>} : memref<49x16x128xf32, #tpu.memory_space<vmem>>, vector<1x16x128xf32>,
    %296 = arith.maximumf %288, %292 : vector<16x128xf32>
    %c0_128 = arith.constant 0 : index
    %c5_129 = arith.constant 5 : index
    %c0_130 = arith.constant 0 : index
    %297 = vector.load %arg2[%c0_128, %c5_129, %c0_130] : memref<1x22x176xf32, #tpu.memory_space<vmem>>, vector<1x16x176xf32>
    %298 = vector.shape_cast %297 : vector<1x16x176xf32> to vector<16x176xf32>
    %299 = vector.extract_strided_slice %298 {offsets = [0, 0], sizes = [16, 128], strides = [1, 1]} : vector<16x176xf32> to vector<16x128xf32>
    %300 = arith.mulf %1, %299 : vector<16x128xf32>
    %cst_131 = arith.constant dense<0.000000e+00> : vector<16x128xf32>
    %301 = tpu.matmul %300, %2, %cst_131 {dimension_numbers = #tpu.dot_dimension_numbers<[1], [0], [0], [1], [0, 0, 1, 1], [], []>} : vector<16x128xf32>, vector<128x128xf32>, vector<16x128xf32> -> vector<16x128xf32>
    %302 = arith.addf %301, %5 : vector<16x128xf32>
    %c35 = arith.constant 35 : index
    %c0_132 = arith.constant 0 : index
    %c0_133 = arith.constant 0 : index
    %303 = vector.load %arg13[%c35, %c0_132, %c0_133] : memref<49x16x128xf32, #tpu.memory_space<vmem>>, vector<1x16x128xf32>
    %304 = vector.shape_cast %303 : vector<1x16x128xf32> to vector<16x128xf32>
    %305 = vector.shape_cast %302 : vector<16x128xf32> to vector<1x16x128xf32>
    tpu.vector_store %arg13[%c35, %c0_132, %c0_133], %305 {strides = array<i32>} : memref<49x16x128xf32, #tpu.memory_space<vmem>>, vector<1x16x128xf32>,
    %306 = arith.maximumf %296, %302 : vector<16x128xf32>
    %307 = vector.extract_strided_slice %298 {offsets = [0, 8], sizes = [16, 128], strides = [1, 1]} : vector<16x176xf32> to vector<16x128xf32>
    %308 = arith.mulf %1, %307 : vector<16x128xf32>
    %cst_134 = arith.constant dense<0.000000e+00> : vector<16x128xf32>
    %309 = tpu.matmul %308, %2, %cst_134 {dimension_numbers = #tpu.dot_dimension_numbers<[1], [0], [0], [1], [0, 0, 1, 1], [], []>} : vector<16x128xf32>, vector<128x128xf32>, vector<16x128xf32> -> vector<16x128xf32>
    %310 = arith.addf %309, %5 : vector<16x128xf32>
    %c36 = arith.constant 36 : index
    %c0_135 = arith.constant 0 : index
    %c0_136 = arith.constant 0 : index
    %311 = vector.load %arg13[%c36, %c0_135, %c0_136] : memref<49x16x128xf32, #tpu.memory_space<vmem>>, vector<1x16x128xf32>
    %312 = vector.shape_cast %311 : vector<1x16x128xf32> to vector<16x128xf32>
    %313 = vector.shape_cast %310 : vector<16x128xf32> to vector<1x16x128xf32>
    tpu.vector_store %arg13[%c36, %c0_135, %c0_136], %313 {strides = array<i32>} : memref<49x16x128xf32, #tpu.memory_space<vmem>>, vector<1x16x128xf32>,
    %314 = arith.maximumf %306, %310 : vector<16x128xf32>
    %315 = vector.extract_strided_slice %298 {offsets = [0, 16], sizes = [16, 128], strides = [1, 1]} : vector<16x176xf32> to vector<16x128xf32>
    %316 = arith.mulf %1, %315 : vector<16x128xf32>
    %cst_137 = arith.constant dense<0.000000e+00> : vector<16x128xf32>
    %317 = tpu.matmul %316, %2, %cst_137 {dimension_numbers = #tpu.dot_dimension_numbers<[1], [0], [0], [1], [0, 0, 1, 1], [], []>} : vector<16x128xf32>, vector<128x128xf32>, vector<16x128xf32> -> vector<16x128xf32>
    %318 = arith.addf %317, %5 : vector<16x128xf32>
    %c37 = arith.constant 37 : index
    %c0_138 = arith.constant 0 : index
    %c0_139 = arith.constant 0 : index
    %319 = vector.load %arg13[%c37, %c0_138, %c0_139] : memref<49x16x128xf32, #tpu.memory_space<vmem>>, vector<1x16x128xf32>
    %320 = vector.shape_cast %319 : vector<1x16x128xf32> to vector<16x128xf32>
    %321 = vector.shape_cast %318 : vector<16x128xf32> to vector<1x16x128xf32>
    tpu.vector_store %arg13[%c37, %c0_138, %c0_139], %321 {strides = array<i32>} : memref<49x16x128xf32, #tpu.memory_space<vmem>>, vector<1x16x128xf32>,
    %322 = arith.maximumf %314, %318 : vector<16x128xf32>
    %323 = vector.extract_strided_slice %298 {offsets = [0, 24], sizes = [16, 128], strides = [1, 1]} : vector<16x176xf32> to vector<16x128xf32>
    %324 = arith.mulf %1, %323 : vector<16x128xf32>
    %cst_140 = arith.constant dense<0.000000e+00> : vector<16x128xf32>
    %325 = tpu.matmul %324, %2, %cst_140 {dimension_numbers = #tpu.dot_dimension_numbers<[1], [0], [0], [1], [0, 0, 1, 1], [], []>} : vector<16x128xf32>, vector<128x128xf32>, vector<16x128xf32> -> vector<16x128xf32>
    %326 = arith.addf %325, %5 : vector<16x128xf32>
    %c38 = arith.constant 38 : index
    %c0_141 = arith.constant 0 : index
    %c0_142 = arith.constant 0 : index
    %327 = vector.load %arg13[%c38, %c0_141, %c0_142] : memref<49x16x128xf32, #tpu.memory_space<vmem>>, vector<1x16x128xf32>
    %328 = vector.shape_cast %327 : vector<1x16x128xf32> to vector<16x128xf32>
    %329 = vector.shape_cast %326 : vector<16x128xf32> to vector<1x16x128xf32>
    tpu.vector_store %arg13[%c38, %c0_141, %c0_142], %329 {strides = array<i32>} : memref<49x16x128xf32, #tpu.memory_space<vmem>>, vector<1x16x128xf32>,
    %330 = arith.maximumf %322, %326 : vector<16x128xf32>
    %331 = vector.extract_strided_slice %298 {offsets = [0, 32], sizes = [16, 128], strides = [1, 1]} : vector<16x176xf32> to vector<16x128xf32>
    %332 = arith.mulf %1, %331 : vector<16x128xf32>
    %cst_143 = arith.constant dense<0.000000e+00> : vector<16x128xf32>
    %333 = tpu.matmul %332, %2, %cst_143 {dimension_numbers = #tpu.dot_dimension_numbers<[1], [0], [0], [1], [0, 0, 1, 1], [], []>} : vector<16x128xf32>, vector<128x128xf32>, vector<16x128xf32> -> vector<16x128xf32>
    %334 = arith.addf %333, %5 : vector<16x128xf32>
    %c39 = arith.constant 39 : index
    %c0_144 = arith.constant 0 : index
    %c0_145 = arith.constant 0 : index
    %335 = vector.load %arg13[%c39, %c0_144, %c0_145] : memref<49x16x128xf32, #tpu.memory_space<vmem>>, vector<1x16x128xf32>
    %336 = vector.shape_cast %335 : vector<1x16x128xf32> to vector<16x128xf32>
    %337 = vector.shape_cast %334 : vector<16x128xf32> to vector<1x16x128xf32>
    tpu.vector_store %arg13[%c39, %c0_144, %c0_145], %337 {strides = array<i32>} : memref<49x16x128xf32, #tpu.memory_space<vmem>>, vector<1x16x128xf32>,
    %338 = arith.maximumf %330, %334 : vector<16x128xf32>
    %339 = vector.extract_strided_slice %298 {offsets = [0, 40], sizes = [16, 128], strides = [1, 1]} : vector<16x176xf32> to vector<16x128xf32>
    %340 = arith.mulf %1, %339 : vector<16x128xf32>
    %cst_146 = arith.constant dense<0.000000e+00> : vector<16x128xf32>
    %341 = tpu.matmul %340, %2, %cst_146 {dimension_numbers = #tpu.dot_dimension_numbers<[1], [0], [0], [1], [0, 0, 1, 1], [], []>} : vector<16x128xf32>, vector<128x128xf32>, vector<16x128xf32> -> vector<16x128xf32>
    %342 = arith.addf %341, %5 : vector<16x128xf32>
    %c40 = arith.constant 40 : index
    %c0_147 = arith.constant 0 : index
    %c0_148 = arith.constant 0 : index
    %343 = vector.load %arg13[%c40, %c0_147, %c0_148] : memref<49x16x128xf32, #tpu.memory_space<vmem>>, vector<1x16x128xf32>
    %344 = vector.shape_cast %343 : vector<1x16x128xf32> to vector<16x128xf32>
    %345 = vector.shape_cast %342 : vector<16x128xf32> to vector<1x16x128xf32>
    tpu.vector_store %arg13[%c40, %c0_147, %c0_148], %345 {strides = array<i32>} : memref<49x16x128xf32, #tpu.memory_space<vmem>>, vector<1x16x128xf32>,
    %346 = arith.maximumf %338, %342 : vector<16x128xf32>
    %347 = vector.extract_strided_slice %298 {offsets = [0, 48], sizes = [16, 128], strides = [1, 1]} : vector<16x176xf32> to vector<16x128xf32>
    %348 = arith.mulf %1, %347 : vector<16x128xf32>
    %cst_149 = arith.constant dense<0.000000e+00> : vector<16x128xf32>
    %349 = tpu.matmul %348, %2, %cst_149 {dimension_numbers = #tpu.dot_dimension_numbers<[1], [0], [0], [1], [0, 0, 1, 1], [], []>} : vector<16x128xf32>, vector<128x128xf32>, vector<16x128xf32> -> vector<16x128xf32>
    %350 = arith.addf %349, %5 : vector<16x128xf32>
    %c41 = arith.constant 41 : index
    %c0_150 = arith.constant 0 : index
    %c0_151 = arith.constant 0 : index
    %351 = vector.load %arg13[%c41, %c0_150, %c0_151] : memref<49x16x128xf32, #tpu.memory_space<vmem>>, vector<1x16x128xf32>
    %352 = vector.shape_cast %351 : vector<1x16x128xf32> to vector<16x128xf32>
    %353 = vector.shape_cast %350 : vector<16x128xf32> to vector<1x16x128xf32>
    tpu.vector_store %arg13[%c41, %c0_150, %c0_151], %353 {strides = array<i32>} : memref<49x16x128xf32, #tpu.memory_space<vmem>>, vector<1x16x128xf32>,
    %354 = arith.maximumf %346, %350 : vector<16x128xf32>
    %c0_152 = arith.constant 0 : index
    %c6_153 = arith.constant 6 : index
    %c0_154 = arith.constant 0 : index
    %355 = vector.load %arg2[%c0_152, %c6_153, %c0_154] : memref<1x22x176xf32, #tpu.memory_space<vmem>>, vector<1x16x176xf32>
    %356 = vector.shape_cast %355 : vector<1x16x176xf32> to vector<16x176xf32>
    %357 = vector.extract_strided_slice %356 {offsets = [0, 0], sizes = [16, 128], strides = [1, 1]} : vector<16x176xf32> to vector<16x128xf32>
    %358 = arith.mulf %1, %357 : vector<16x128xf32>
    %cst_155 = arith.constant dense<0.000000e+00> : vector<16x128xf32>
    %359 = tpu.matmul %358, %2, %cst_155 {dimension_numbers = #tpu.dot_dimension_numbers<[1], [0], [0], [1], [0, 0, 1, 1], [], []>} : vector<16x128xf32>, vector<128x128xf32>, vector<16x128xf32> -> vector<16x128xf32>
    %360 = arith.addf %359, %5 : vector<16x128xf32>
    %c42 = arith.constant 42 : index
    %c0_156 = arith.constant 0 : index
    %c0_157 = arith.constant 0 : index
    %361 = vector.load %arg13[%c42, %c0_156, %c0_157] : memref<49x16x128xf32, #tpu.memory_space<vmem>>, vector<1x16x128xf32>
    %362 = vector.shape_cast %361 : vector<1x16x128xf32> to vector<16x128xf32>
    %363 = vector.shape_cast %360 : vector<16x128xf32> to vector<1x16x128xf32>
    tpu.vector_store %arg13[%c42, %c0_156, %c0_157], %363 {strides = array<i32>} : memref<49x16x128xf32, #tpu.memory_space<vmem>>, vector<1x16x128xf32>,
    %364 = arith.maximumf %354, %360 : vector<16x128xf32>
    %365 = vector.extract_strided_slice %356 {offsets = [0, 8], sizes = [16, 128], strides = [1, 1]} : vector<16x176xf32> to vector<16x128xf32>
    %366 = arith.mulf %1, %365 : vector<16x128xf32>
    %cst_158 = arith.constant dense<0.000000e+00> : vector<16x128xf32>
    %367 = tpu.matmul %366, %2, %cst_158 {dimension_numbers = #tpu.dot_dimension_numbers<[1], [0], [0], [1], [0, 0, 1, 1], [], []>} : vector<16x128xf32>, vector<128x128xf32>, vector<16x128xf32> -> vector<16x128xf32>
    %368 = arith.addf %367, %5 : vector<16x128xf32>
    %c43 = arith.constant 43 : index
    %c0_159 = arith.constant 0 : index
    %c0_160 = arith.constant 0 : index
    %369 = vector.load %arg13[%c43, %c0_159, %c0_160] : memref<49x16x128xf32, #tpu.memory_space<vmem>>, vector<1x16x128xf32>
    %370 = vector.shape_cast %369 : vector<1x16x128xf32> to vector<16x128xf32>
    %371 = vector.shape_cast %368 : vector<16x128xf32> to vector<1x16x128xf32>
    tpu.vector_store %arg13[%c43, %c0_159, %c0_160], %371 {strides = array<i32>} : memref<49x16x128xf32, #tpu.memory_space<vmem>>, vector<1x16x128xf32>,
    %372 = arith.maximumf %364, %368 : vector<16x128xf32>
    %373 = vector.extract_strided_slice %356 {offsets = [0, 16], sizes = [16, 128], strides = [1, 1]} : vector<16x176xf32> to vector<16x128xf32>
    %374 = arith.mulf %1, %373 : vector<16x128xf32>
    %cst_161 = arith.constant dense<0.000000e+00> : vector<16x128xf32>
    %375 = tpu.matmul %374, %2, %cst_161 {dimension_numbers = #tpu.dot_dimension_numbers<[1], [0], [0], [1], [0, 0, 1, 1], [], []>} : vector<16x128xf32>, vector<128x128xf32>, vector<16x128xf32> -> vector<16x128xf32>
    %376 = arith.addf %375, %5 : vector<16x128xf32>
    %c44 = arith.constant 44 : index
    %c0_162 = arith.constant 0 : index
    %c0_163 = arith.constant 0 : index
    %377 = vector.load %arg13[%c44, %c0_162, %c0_163] : memref<49x16x128xf32, #tpu.memory_space<vmem>>, vector<1x16x128xf32>
    %378 = vector.shape_cast %377 : vector<1x16x128xf32> to vector<16x128xf32>
    %379 = vector.shape_cast %376 : vector<16x128xf32> to vector<1x16x128xf32>
    tpu.vector_store %arg13[%c44, %c0_162, %c0_163], %379 {strides = array<i32>} : memref<49x16x128xf32, #tpu.memory_space<vmem>>, vector<1x16x128xf32>,
    %380 = arith.maximumf %372, %376 : vector<16x128xf32>
    %381 = vector.extract_strided_slice %356 {offsets = [0, 24], sizes = [16, 128], strides = [1, 1]} : vector<16x176xf32> to vector<16x128xf32>
    %382 = arith.mulf %1, %381 : vector<16x128xf32>
    %cst_164 = arith.constant dense<0.000000e+00> : vector<16x128xf32>
    %383 = tpu.matmul %382, %2, %cst_164 {dimension_numbers = #tpu.dot_dimension_numbers<[1], [0], [0], [1], [0, 0, 1, 1], [], []>} : vector<16x128xf32>, vector<128x128xf32>, vector<16x128xf32> -> vector<16x128xf32>
    %384 = arith.addf %383, %5 : vector<16x128xf32>
    %c45 = arith.constant 45 : index
    %c0_165 = arith.constant 0 : index
    %c0_166 = arith.constant 0 : index
    %385 = vector.load %arg13[%c45, %c0_165, %c0_166] : memref<49x16x128xf32, #tpu.memory_space<vmem>>, vector<1x16x128xf32>
    %386 = vector.shape_cast %385 : vector<1x16x128xf32> to vector<16x128xf32>
    %387 = vector.shape_cast %384 : vector<16x128xf32> to vector<1x16x128xf32>
    tpu.vector_store %arg13[%c45, %c0_165, %c0_166], %387 {strides = array<i32>} : memref<49x16x128xf32, #tpu.memory_space<vmem>>, vector<1x16x128xf32>,
    %388 = arith.maximumf %380, %384 : vector<16x128xf32>
    %389 = vector.extract_strided_slice %356 {offsets = [0, 32], sizes = [16, 128], strides = [1, 1]} : vector<16x176xf32> to vector<16x128xf32>
    %390 = arith.mulf %1, %389 : vector<16x128xf32>
    %cst_167 = arith.constant dense<0.000000e+00> : vector<16x128xf32>
    %391 = tpu.matmul %390, %2, %cst_167 {dimension_numbers = #tpu.dot_dimension_numbers<[1], [0], [0], [1], [0, 0, 1, 1], [], []>} : vector<16x128xf32>, vector<128x128xf32>, vector<16x128xf32> -> vector<16x128xf32>
    %392 = arith.addf %391, %5 : vector<16x128xf32>
    %c46 = arith.constant 46 : index
    %c0_168 = arith.constant 0 : index
    %c0_169 = arith.constant 0 : index
    %393 = vector.load %arg13[%c46, %c0_168, %c0_169] : memref<49x16x128xf32, #tpu.memory_space<vmem>>, vector<1x16x128xf32>
    %394 = vector.shape_cast %393 : vector<1x16x128xf32> to vector<16x128xf32>
    %395 = vector.shape_cast %392 : vector<16x128xf32> to vector<1x16x128xf32>
    tpu.vector_store %arg13[%c46, %c0_168, %c0_169], %395 {strides = array<i32>} : memref<49x16x128xf32, #tpu.memory_space<vmem>>, vector<1x16x128xf32>,
    %396 = arith.maximumf %388, %392 : vector<16x128xf32>
    %397 = vector.extract_strided_slice %356 {offsets = [0, 40], sizes = [16, 128], strides = [1, 1]} : vector<16x176xf32> to vector<16x128xf32>
    %398 = arith.mulf %1, %397 : vector<16x128xf32>
    %cst_170 = arith.constant dense<0.000000e+00> : vector<16x128xf32>
    %399 = tpu.matmul %398, %2, %cst_170 {dimension_numbers = #tpu.dot_dimension_numbers<[1], [0], [0], [1], [0, 0, 1, 1], [], []>} : vector<16x128xf32>, vector<128x128xf32>, vector<16x128xf32> -> vector<16x128xf32>
    %400 = arith.addf %399, %5 : vector<16x128xf32>
    %c47 = arith.constant 47 : index
    %c0_171 = arith.constant 0 : index
    %c0_172 = arith.constant 0 : index
    %401 = vector.load %arg13[%c47, %c0_171, %c0_172] : memref<49x16x128xf32, #tpu.memory_space<vmem>>, vector<1x16x128xf32>
    %402 = vector.shape_cast %401 : vector<1x16x128xf32> to vector<16x128xf32>
    %403 = vector.shape_cast %400 : vector<16x128xf32> to vector<1x16x128xf32>
    tpu.vector_store %arg13[%c47, %c0_171, %c0_172], %403 {strides = array<i32>} : memref<49x16x128xf32, #tpu.memory_space<vmem>>, vector<1x16x128xf32>,
    %404 = arith.maximumf %396, %400 : vector<16x128xf32>
    %405 = vector.extract_strided_slice %356 {offsets = [0, 48], sizes = [16, 128], strides = [1, 1]} : vector<16x176xf32> to vector<16x128xf32>
    %406 = arith.mulf %1, %405 : vector<16x128xf32>
    %cst_173 = arith.constant dense<0.000000e+00> : vector<16x128xf32>
    %407 = tpu.matmul %406, %2, %cst_173 {dimension_numbers = #tpu.dot_dimension_numbers<[1], [0], [0], [1], [0, 0, 1, 1], [], []>} : vector<16x128xf32>, vector<128x128xf32>, vector<16x128xf32> -> vector<16x128xf32>
    %408 = arith.addf %407, %5 : vector<16x128xf32>
    %c48 = arith.constant 48 : index
    %c0_174 = arith.constant 0 : index
    %c0_175 = arith.constant 0 : index
    %409 = vector.load %arg13[%c48, %c0_174, %c0_175] : memref<49x16x128xf32, #tpu.memory_space<vmem>>, vector<1x16x128xf32>
    %410 = vector.shape_cast %409 : vector<1x16x128xf32> to vector<16x128xf32>
    %411 = vector.shape_cast %408 : vector<16x128xf32> to vector<1x16x128xf32>
    tpu.vector_store %arg13[%c48, %c0_174, %c0_175], %411 {strides = array<i32>} : memref<49x16x128xf32, #tpu.memory_space<vmem>>, vector<1x16x128xf32>,
    %412 = arith.maximumf %404, %408 : vector<16x128xf32>
    %cst_176 = arith.constant 0.000000e+00 : f32
    %413 = vector.broadcast %cst_176 : f32 to vector<16x128xf32>
    %cst_177 = arith.constant 0.000000e+00 : f32
    %414 = vector.broadcast %cst_177 : f32 to vector<16x128xf32>
    %c0_178 = arith.constant 0 : index
    %c0_179 = arith.constant 0 : index
    %c0_180 = arith.constant 0 : index
    %415 = vector.load %arg3[%c0_178, %c0_179, %c0_180] : memref<1x22x176xf32, #tpu.memory_space<vmem>>, vector<1x16x176xf32>
    %416 = vector.shape_cast %415 : vector<1x16x176xf32> to vector<16x176xf32>
    %c0_181 = arith.constant 0 : index
    %c0_182 = arith.constant 0 : index
    %c0_183 = arith.constant 0 : index
    %417 = vector.load %arg13[%c0_181, %c0_182, %c0_183] : memref<49x16x128xf32, #tpu.memory_space<vmem>>, vector<1x16x128xf32>
    %418 = vector.shape_cast %417 : vector<1x16x128xf32> to vector<16x128xf32>
    %419 = arith.subf %418, %412 : vector<16x128xf32>
    %420 = math.exp %419 : vector<16x128xf32>
    %421 = arith.addf %413, %420 : vector<16x128xf32>
    %422 = vector.extract_strided_slice %416 {offsets = [0, 0], sizes = [16, 128], strides = [1, 1]} : vector<16x176xf32> to vector<16x128xf32>
    %423 = arith.mulf %420, %422 : vector<16x128xf32>
    %424 = arith.addf %414, %423 : vector<16x128xf32>
    %c1_184 = arith.constant 1 : index
    %c0_185 = arith.constant 0 : index
    %c0_186 = arith.constant 0 : index
    %425 = vector.load %arg13[%c1_184, %c0_185, %c0_186] : memref<49x16x128xf32, #tpu.memory_space<vmem>>, vector<1x16x128xf32>
    %426 = vector.shape_cast %425 : vector<1x16x128xf32> to vector<16x128xf32>
    %427 = arith.subf %426, %412 : vector<16x128xf32>
    %428 = math.exp %427 : vector<16x128xf32>
    %429 = arith.addf %421, %428 : vector<16x128xf32>
    %430 = vector.extract_strided_slice %416 {offsets = [0, 8], sizes = [16, 128], strides = [1, 1]} : vector<16x176xf32> to vector<16x128xf32>
    %431 = arith.mulf %428, %430 : vector<16x128xf32>
    %432 = arith.addf %424, %431 : vector<16x128xf32>
    %c2_187 = arith.constant 2 : index
    %c0_188 = arith.constant 0 : index
    %c0_189 = arith.constant 0 : index
    %433 = vector.load %arg13[%c2_187, %c0_188, %c0_189] : memref<49x16x128xf32, #tpu.memory_space<vmem>>, vector<1x16x128xf32>
    %434 = vector.shape_cast %433 : vector<1x16x128xf32> to vector<16x128xf32>
    %435 = arith.subf %434, %412 : vector<16x128xf32>
    %436 = math.exp %435 : vector<16x128xf32>
    %437 = arith.addf %429, %436 : vector<16x128xf32>
    %438 = vector.extract_strided_slice %416 {offsets = [0, 16], sizes = [16, 128], strides = [1, 1]} : vector<16x176xf32> to vector<16x128xf32>
    %439 = arith.mulf %436, %438 : vector<16x128xf32>
    %440 = arith.addf %432, %439 : vector<16x128xf32>
    %c3_190 = arith.constant 3 : index
    %c0_191 = arith.constant 0 : index
    %c0_192 = arith.constant 0 : index
    %441 = vector.load %arg13[%c3_190, %c0_191, %c0_192] : memref<49x16x128xf32, #tpu.memory_space<vmem>>, vector<1x16x128xf32>
    %442 = vector.shape_cast %441 : vector<1x16x128xf32> to vector<16x128xf32>
    %443 = arith.subf %442, %412 : vector<16x128xf32>
    %444 = math.exp %443 : vector<16x128xf32>
    %445 = arith.addf %437, %444 : vector<16x128xf32>
    %446 = vector.extract_strided_slice %416 {offsets = [0, 24], sizes = [16, 128], strides = [1, 1]} : vector<16x176xf32> to vector<16x128xf32>
    %447 = arith.mulf %444, %446 : vector<16x128xf32>
    %448 = arith.addf %440, %447 : vector<16x128xf32>
    %c4_193 = arith.constant 4 : index
    %c0_194 = arith.constant 0 : index
    %c0_195 = arith.constant 0 : index
    %449 = vector.load %arg13[%c4_193, %c0_194, %c0_195] : memref<49x16x128xf32, #tpu.memory_space<vmem>>, vector<1x16x128xf32>
    %450 = vector.shape_cast %449 : vector<1x16x128xf32> to vector<16x128xf32>
    %451 = arith.subf %450, %412 : vector<16x128xf32>
    %452 = math.exp %451 : vector<16x128xf32>
    %453 = arith.addf %445, %452 : vector<16x128xf32>
    %454 = vector.extract_strided_slice %416 {offsets = [0, 32], sizes = [16, 128], strides = [1, 1]} : vector<16x176xf32> to vector<16x128xf32>
    %455 = arith.mulf %452, %454 : vector<16x128xf32>
    %456 = arith.addf %448, %455 : vector<16x128xf32>
    %c5_196 = arith.constant 5 : index
    %c0_197 = arith.constant 0 : index
    %c0_198 = arith.constant 0 : index
    %457 = vector.load %arg13[%c5_196, %c0_197, %c0_198] : memref<49x16x128xf32, #tpu.memory_space<vmem>>, vector<1x16x128xf32>
    %458 = vector.shape_cast %457 : vector<1x16x128xf32> to vector<16x128xf32>
    %459 = arith.subf %458, %412 : vector<16x128xf32>
    %460 = math.exp %459 : vector<16x128xf32>
    %461 = arith.addf %453, %460 : vector<16x128xf32>
    %462 = vector.extract_strided_slice %416 {offsets = [0, 40], sizes = [16, 128], strides = [1, 1]} : vector<16x176xf32> to vector<16x128xf32>
    %463 = arith.mulf %460, %462 : vector<16x128xf32>
    %464 = arith.addf %456, %463 : vector<16x128xf32>
    %c6_199 = arith.constant 6 : index
    %c0_200 = arith.constant 0 : index
    %c0_201 = arith.constant 0 : index
    %465 = vector.load %arg13[%c6_199, %c0_200, %c0_201] : memref<49x16x128xf32, #tpu.memory_space<vmem>>, vector<1x16x128xf32>
    %466 = vector.shape_cast %465 : vector<1x16x128xf32> to vector<16x128xf32>
    %467 = arith.subf %466, %412 : vector<16x128xf32>
    %468 = math.exp %467 : vector<16x128xf32>
    %469 = arith.addf %461, %468 : vector<16x128xf32>
    %470 = vector.extract_strided_slice %416 {offsets = [0, 48], sizes = [16, 128], strides = [1, 1]} : vector<16x176xf32> to vector<16x128xf32>
    %471 = arith.mulf %468, %470 : vector<16x128xf32>
    %472 = arith.addf %464, %471 : vector<16x128xf32>
    %c0_202 = arith.constant 0 : index
    %c1_203 = arith.constant 1 : index
    %c0_204 = arith.constant 0 : index
    %473 = vector.load %arg3[%c0_202, %c1_203, %c0_204] : memref<1x22x176xf32, #tpu.memory_space<vmem>>, vector<1x16x176xf32>
    %474 = vector.shape_cast %473 : vector<1x16x176xf32> to vector<16x176xf32>
    %c7_205 = arith.constant 7 : index
    %c0_206 = arith.constant 0 : index
    %c0_207 = arith.constant 0 : index
    %475 = vector.load %arg13[%c7_205, %c0_206, %c0_207] : memref<49x16x128xf32, #tpu.memory_space<vmem>>, vector<1x16x128xf32>
    %476 = vector.shape_cast %475 : vector<1x16x128xf32> to vector<16x128xf32>
    %477 = arith.subf %476, %412 : vector<16x128xf32>
    %478 = math.exp %477 : vector<16x128xf32>
    %479 = arith.addf %469, %478 : vector<16x128xf32>
    %480 = vector.extract_strided_slice %474 {offsets = [0, 0], sizes = [16, 128], strides = [1, 1]} : vector<16x176xf32> to vector<16x128xf32>
    %481 = arith.mulf %478, %480 : vector<16x128xf32>
    %482 = arith.addf %472, %481 : vector<16x128xf32>
    %c8_208 = arith.constant 8 : index
    %c0_209 = arith.constant 0 : index
    %c0_210 = arith.constant 0 : index
    %483 = vector.load %arg13[%c8_208, %c0_209, %c0_210] : memref<49x16x128xf32, #tpu.memory_space<vmem>>, vector<1x16x128xf32>
    %484 = vector.shape_cast %483 : vector<1x16x128xf32> to vector<16x128xf32>
    %485 = arith.subf %484, %412 : vector<16x128xf32>
    %486 = math.exp %485 : vector<16x128xf32>
    %487 = arith.addf %479, %486 : vector<16x128xf32>
    %488 = vector.extract_strided_slice %474 {offsets = [0, 8], sizes = [16, 128], strides = [1, 1]} : vector<16x176xf32> to vector<16x128xf32>
    %489 = arith.mulf %486, %488 : vector<16x128xf32>
    %490 = arith.addf %482, %489 : vector<16x128xf32>
    %c9_211 = arith.constant 9 : index
    %c0_212 = arith.constant 0 : index
    %c0_213 = arith.constant 0 : index
    %491 = vector.load %arg13[%c9_211, %c0_212, %c0_213] : memref<49x16x128xf32, #tpu.memory_space<vmem>>, vector<1x16x128xf32>
    %492 = vector.shape_cast %491 : vector<1x16x128xf32> to vector<16x128xf32>
    %493 = arith.subf %492, %412 : vector<16x128xf32>
    %494 = math.exp %493 : vector<16x128xf32>
    %495 = arith.addf %487, %494 : vector<16x128xf32>
    %496 = vector.extract_strided_slice %474 {offsets = [0, 16], sizes = [16, 128], strides = [1, 1]} : vector<16x176xf32> to vector<16x128xf32>
    %497 = arith.mulf %494, %496 : vector<16x128xf32>
    %498 = arith.addf %490, %497 : vector<16x128xf32>
    %c10_214 = arith.constant 10 : index
    %c0_215 = arith.constant 0 : index
    %c0_216 = arith.constant 0 : index
    %499 = vector.load %arg13[%c10_214, %c0_215, %c0_216] : memref<49x16x128xf32, #tpu.memory_space<vmem>>, vector<1x16x128xf32>
    %500 = vector.shape_cast %499 : vector<1x16x128xf32> to vector<16x128xf32>
    %501 = arith.subf %500, %412 : vector<16x128xf32>
    %502 = math.exp %501 : vector<16x128xf32>
    %503 = arith.addf %495, %502 : vector<16x128xf32>
    %504 = vector.extract_strided_slice %474 {offsets = [0, 24], sizes = [16, 128], strides = [1, 1]} : vector<16x176xf32> to vector<16x128xf32>
    %505 = arith.mulf %502, %504 : vector<16x128xf32>
    %506 = arith.addf %498, %505 : vector<16x128xf32>
    %c11_217 = arith.constant 11 : index
    %c0_218 = arith.constant 0 : index
    %c0_219 = arith.constant 0 : index
    %507 = vector.load %arg13[%c11_217, %c0_218, %c0_219] : memref<49x16x128xf32, #tpu.memory_space<vmem>>, vector<1x16x128xf32>
    %508 = vector.shape_cast %507 : vector<1x16x128xf32> to vector<16x128xf32>
    %509 = arith.subf %508, %412 : vector<16x128xf32>
    %510 = math.exp %509 : vector<16x128xf32>
    %511 = arith.addf %503, %510 : vector<16x128xf32>
    %512 = vector.extract_strided_slice %474 {offsets = [0, 32], sizes = [16, 128], strides = [1, 1]} : vector<16x176xf32> to vector<16x128xf32>
    %513 = arith.mulf %510, %512 : vector<16x128xf32>
    %514 = arith.addf %506, %513 : vector<16x128xf32>
    %c12_220 = arith.constant 12 : index
    %c0_221 = arith.constant 0 : index
    %c0_222 = arith.constant 0 : index
    %515 = vector.load %arg13[%c12_220, %c0_221, %c0_222] : memref<49x16x128xf32, #tpu.memory_space<vmem>>, vector<1x16x128xf32>
    %516 = vector.shape_cast %515 : vector<1x16x128xf32> to vector<16x128xf32>
    %517 = arith.subf %516, %412 : vector<16x128xf32>
    %518 = math.exp %517 : vector<16x128xf32>
    %519 = arith.addf %511, %518 : vector<16x128xf32>
    %520 = vector.extract_strided_slice %474 {offsets = [0, 40], sizes = [16, 128], strides = [1, 1]} : vector<16x176xf32> to vector<16x128xf32>
    %521 = arith.mulf %518, %520 : vector<16x128xf32>
    %522 = arith.addf %514, %521 : vector<16x128xf32>
    %c13_223 = arith.constant 13 : index
    %c0_224 = arith.constant 0 : index
    %c0_225 = arith.constant 0 : index
    %523 = vector.load %arg13[%c13_223, %c0_224, %c0_225] : memref<49x16x128xf32, #tpu.memory_space<vmem>>, vector<1x16x128xf32>
    %524 = vector.shape_cast %523 : vector<1x16x128xf32> to vector<16x128xf32>
    %525 = arith.subf %524, %412 : vector<16x128xf32>
    %526 = math.exp %525 : vector<16x128xf32>
    %527 = arith.addf %519, %526 : vector<16x128xf32>
    %528 = vector.extract_strided_slice %474 {offsets = [0, 48], sizes = [16, 128], strides = [1, 1]} : vector<16x176xf32> to vector<16x128xf32>
    %529 = arith.mulf %526, %528 : vector<16x128xf32>
    %530 = arith.addf %522, %529 : vector<16x128xf32>
    %c0_226 = arith.constant 0 : index
    %c2_227 = arith.constant 2 : index
    %c0_228 = arith.constant 0 : index
    %531 = vector.load %arg3[%c0_226, %c2_227, %c0_228] : memref<1x22x176xf32, #tpu.memory_space<vmem>>, vector<1x16x176xf32>
    %532 = vector.shape_cast %531 : vector<1x16x176xf32> to vector<16x176xf32>
    %c14_229 = arith.constant 14 : index
    %c0_230 = arith.constant 0 : index
    %c0_231 = arith.constant 0 : index
    %533 = vector.load %arg13[%c14_229, %c0_230, %c0_231] : memref<49x16x128xf32, #tpu.memory_space<vmem>>, vector<1x16x128xf32>
    %534 = vector.shape_cast %533 : vector<1x16x128xf32> to vector<16x128xf32>
    %535 = arith.subf %534, %412 : vector<16x128xf32>
    %536 = math.exp %535 : vector<16x128xf32>
    %537 = arith.addf %527, %536 : vector<16x128xf32>
    %538 = vector.extract_strided_slice %532 {offsets = [0, 0], sizes = [16, 128], strides = [1, 1]} : vector<16x176xf32> to vector<16x128xf32>
    %539 = arith.mulf %536, %538 : vector<16x128xf32>
    %540 = arith.addf %530, %539 : vector<16x128xf32>
    %c15_232 = arith.constant 15 : index
    %c0_233 = arith.constant 0 : index
    %c0_234 = arith.constant 0 : index
    %541 = vector.load %arg13[%c15_232, %c0_233, %c0_234] : memref<49x16x128xf32, #tpu.memory_space<vmem>>, vector<1x16x128xf32>
    %542 = vector.shape_cast %541 : vector<1x16x128xf32> to vector<16x128xf32>
    %543 = arith.subf %542, %412 : vector<16x128xf32>
    %544 = math.exp %543 : vector<16x128xf32>
    %545 = arith.addf %537, %544 : vector<16x128xf32>
    %546 = vector.extract_strided_slice %532 {offsets = [0, 8], sizes = [16, 128], strides = [1, 1]} : vector<16x176xf32> to vector<16x128xf32>
    %547 = arith.mulf %544, %546 : vector<16x128xf32>
    %548 = arith.addf %540, %547 : vector<16x128xf32>
    %c16_235 = arith.constant 16 : index
    %c0_236 = arith.constant 0 : index
    %c0_237 = arith.constant 0 : index
    %549 = vector.load %arg13[%c16_235, %c0_236, %c0_237] : memref<49x16x128xf32, #tpu.memory_space<vmem>>, vector<1x16x128xf32>
    %550 = vector.shape_cast %549 : vector<1x16x128xf32> to vector<16x128xf32>
    %551 = arith.subf %550, %412 : vector<16x128xf32>
    %552 = math.exp %551 : vector<16x128xf32>
    %553 = arith.addf %545, %552 : vector<16x128xf32>
    %554 = vector.extract_strided_slice %532 {offsets = [0, 16], sizes = [16, 128], strides = [1, 1]} : vector<16x176xf32> to vector<16x128xf32>
    %555 = arith.mulf %552, %554 : vector<16x128xf32>
    %556 = arith.addf %548, %555 : vector<16x128xf32>
    %c17_238 = arith.constant 17 : index
    %c0_239 = arith.constant 0 : index
    %c0_240 = arith.constant 0 : index
    %557 = vector.load %arg13[%c17_238, %c0_239, %c0_240] : memref<49x16x128xf32, #tpu.memory_space<vmem>>, vector<1x16x128xf32>
    %558 = vector.shape_cast %557 : vector<1x16x128xf32> to vector<16x128xf32>
    %559 = arith.subf %558, %412 : vector<16x128xf32>
    %560 = math.exp %559 : vector<16x128xf32>
    %561 = arith.addf %553, %560 : vector<16x128xf32>
    %562 = vector.extract_strided_slice %532 {offsets = [0, 24], sizes = [16, 128], strides = [1, 1]} : vector<16x176xf32> to vector<16x128xf32>
    %563 = arith.mulf %560, %562 : vector<16x128xf32>
    %564 = arith.addf %556, %563 : vector<16x128xf32>
    %c18_241 = arith.constant 18 : index
    %c0_242 = arith.constant 0 : index
    %c0_243 = arith.constant 0 : index
    %565 = vector.load %arg13[%c18_241, %c0_242, %c0_243] : memref<49x16x128xf32, #tpu.memory_space<vmem>>, vector<1x16x128xf32>
    %566 = vector.shape_cast %565 : vector<1x16x128xf32> to vector<16x128xf32>
    %567 = arith.subf %566, %412 : vector<16x128xf32>
    %568 = math.exp %567 : vector<16x128xf32>
    %569 = arith.addf %561, %568 : vector<16x128xf32>
    %570 = vector.extract_strided_slice %532 {offsets = [0, 32], sizes = [16, 128], strides = [1, 1]} : vector<16x176xf32> to vector<16x128xf32>
    %571 = arith.mulf %568, %570 : vector<16x128xf32>
    %572 = arith.addf %564, %571 : vector<16x128xf32>
    %c19_244 = arith.constant 19 : index
    %c0_245 = arith.constant 0 : index
    %c0_246 = arith.constant 0 : index
    %573 = vector.load %arg13[%c19_244, %c0_245, %c0_246] : memref<49x16x128xf32, #tpu.memory_space<vmem>>, vector<1x16x128xf32>
    %574 = vector.shape_cast %573 : vector<1x16x128xf32> to vector<16x128xf32>
    %575 = arith.subf %574, %412 : vector<16x128xf32>
    %576 = math.exp %575 : vector<16x128xf32>
    %577 = arith.addf %569, %576 : vector<16x128xf32>
    %578 = vector.extract_strided_slice %532 {offsets = [0, 40], sizes = [16, 128], strides = [1, 1]} : vector<16x176xf32> to vector<16x128xf32>
    %579 = arith.mulf %576, %578 : vector<16x128xf32>
    %580 = arith.addf %572, %579 : vector<16x128xf32>
    %c20_247 = arith.constant 20 : index
    %c0_248 = arith.constant 0 : index
    %c0_249 = arith.constant 0 : index
    %581 = vector.load %arg13[%c20_247, %c0_248, %c0_249] : memref<49x16x128xf32, #tpu.memory_space<vmem>>, vector<1x16x128xf32>
    %582 = vector.shape_cast %581 : vector<1x16x128xf32> to vector<16x128xf32>
    %583 = arith.subf %582, %412 : vector<16x128xf32>
    %584 = math.exp %583 : vector<16x128xf32>
    %585 = arith.addf %577, %584 : vector<16x128xf32>
    %586 = vector.extract_strided_slice %532 {offsets = [0, 48], sizes = [16, 128], strides = [1, 1]} : vector<16x176xf32> to vector<16x128xf32>
    %587 = arith.mulf %584, %586 : vector<16x128xf32>
    %588 = arith.addf %580, %587 : vector<16x128xf32>
    %c0_250 = arith.constant 0 : index
    %c3_251 = arith.constant 3 : index
    %c0_252 = arith.constant 0 : index
    %589 = vector.load %arg3[%c0_250, %c3_251, %c0_252] : memref<1x22x176xf32, #tpu.memory_space<vmem>>, vector<1x16x176xf32>
    %590 = vector.shape_cast %589 : vector<1x16x176xf32> to vector<16x176xf32>
    %c21_253 = arith.constant 21 : index
    %c0_254 = arith.constant 0 : index
    %c0_255 = arith.constant 0 : index
    %591 = vector.load %arg13[%c21_253, %c0_254, %c0_255] : memref<49x16x128xf32, #tpu.memory_space<vmem>>, vector<1x16x128xf32>
    %592 = vector.shape_cast %591 : vector<1x16x128xf32> to vector<16x128xf32>
    %593 = arith.subf %592, %412 : vector<16x128xf32>
    %594 = math.exp %593 : vector<16x128xf32>
    %595 = arith.addf %585, %594 : vector<16x128xf32>
    %596 = vector.extract_strided_slice %590 {offsets = [0, 0], sizes = [16, 128], strides = [1, 1]} : vector<16x176xf32> to vector<16x128xf32>
    %597 = arith.mulf %594, %596 : vector<16x128xf32>
    %598 = arith.addf %588, %597 : vector<16x128xf32>
    %c22_256 = arith.constant 22 : index
    %c0_257 = arith.constant 0 : index
    %c0_258 = arith.constant 0 : index
    %599 = vector.load %arg13[%c22_256, %c0_257, %c0_258] : memref<49x16x128xf32, #tpu.memory_space<vmem>>, vector<1x16x128xf32>
    %600 = vector.shape_cast %599 : vector<1x16x128xf32> to vector<16x128xf32>
    %601 = arith.subf %600, %412 : vector<16x128xf32>
    %602 = math.exp %601 : vector<16x128xf32>
    %603 = arith.addf %595, %602 : vector<16x128xf32>
    %604 = vector.extract_strided_slice %590 {offsets = [0, 8], sizes = [16, 128], strides = [1, 1]} : vector<16x176xf32> to vector<16x128xf32>
    %605 = arith.mulf %602, %604 : vector<16x128xf32>
    %606 = arith.addf %598, %605 : vector<16x128xf32>
    %c23_259 = arith.constant 23 : index
    %c0_260 = arith.constant 0 : index
    %c0_261 = arith.constant 0 : index
    %607 = vector.load %arg13[%c23_259, %c0_260, %c0_261] : memref<49x16x128xf32, #tpu.memory_space<vmem>>, vector<1x16x128xf32>
    %608 = vector.shape_cast %607 : vector<1x16x128xf32> to vector<16x128xf32>
    %609 = arith.subf %608, %412 : vector<16x128xf32>
    %610 = math.exp %609 : vector<16x128xf32>
    %611 = arith.addf %603, %610 : vector<16x128xf32>
    %612 = vector.extract_strided_slice %590 {offsets = [0, 16], sizes = [16, 128], strides = [1, 1]} : vector<16x176xf32> to vector<16x128xf32>
    %613 = arith.mulf %610, %612 : vector<16x128xf32>
    %614 = arith.addf %606, %613 : vector<16x128xf32>
    %c24_262 = arith.constant 24 : index
    %c0_263 = arith.constant 0 : index
    %c0_264 = arith.constant 0 : index
    %615 = vector.load %arg13[%c24_262, %c0_263, %c0_264] : memref<49x16x128xf32, #tpu.memory_space<vmem>>, vector<1x16x128xf32>
    %616 = vector.shape_cast %615 : vector<1x16x128xf32> to vector<16x128xf32>
    %617 = arith.subf %616, %412 : vector<16x128xf32>
    %618 = math.exp %617 : vector<16x128xf32>
    %619 = arith.addf %611, %618 : vector<16x128xf32>
    %620 = vector.extract_strided_slice %590 {offsets = [0, 24], sizes = [16, 128], strides = [1, 1]} : vector<16x176xf32> to vector<16x128xf32>
    %621 = arith.mulf %618, %620 : vector<16x128xf32>
    %622 = arith.addf %614, %621 : vector<16x128xf32>
    %c25_265 = arith.constant 25 : index
    %c0_266 = arith.constant 0 : index
    %c0_267 = arith.constant 0 : index
    %623 = vector.load %arg13[%c25_265, %c0_266, %c0_267] : memref<49x16x128xf32, #tpu.memory_space<vmem>>, vector<1x16x128xf32>
    %624 = vector.shape_cast %623 : vector<1x16x128xf32> to vector<16x128xf32>
    %625 = arith.subf %624, %412 : vector<16x128xf32>
    %626 = math.exp %625 : vector<16x128xf32>
    %627 = arith.addf %619, %626 : vector<16x128xf32>
    %628 = vector.extract_strided_slice %590 {offsets = [0, 32], sizes = [16, 128], strides = [1, 1]} : vector<16x176xf32> to vector<16x128xf32>
    %629 = arith.mulf %626, %628 : vector<16x128xf32>
    %630 = arith.addf %622, %629 : vector<16x128xf32>
    %c26_268 = arith.constant 26 : index
    %c0_269 = arith.constant 0 : index
    %c0_270 = arith.constant 0 : index
    %631 = vector.load %arg13[%c26_268, %c0_269, %c0_270] : memref<49x16x128xf32, #tpu.memory_space<vmem>>, vector<1x16x128xf32>
    %632 = vector.shape_cast %631 : vector<1x16x128xf32> to vector<16x128xf32>
    %633 = arith.subf %632, %412 : vector<16x128xf32>
    %634 = math.exp %633 : vector<16x128xf32>
    %635 = arith.addf %627, %634 : vector<16x128xf32>
    %636 = vector.extract_strided_slice %590 {offsets = [0, 40], sizes = [16, 128], strides = [1, 1]} : vector<16x176xf32> to vector<16x128xf32>
    %637 = arith.mulf %634, %636 : vector<16x128xf32>
    %638 = arith.addf %630, %637 : vector<16x128xf32>
    %c27_271 = arith.constant 27 : index
    %c0_272 = arith.constant 0 : index
    %c0_273 = arith.constant 0 : index
    %639 = vector.load %arg13[%c27_271, %c0_272, %c0_273] : memref<49x16x128xf32, #tpu.memory_space<vmem>>, vector<1x16x128xf32>
    %640 = vector.shape_cast %639 : vector<1x16x128xf32> to vector<16x128xf32>
    %641 = arith.subf %640, %412 : vector<16x128xf32>
    %642 = math.exp %641 : vector<16x128xf32>
    %643 = arith.addf %635, %642 : vector<16x128xf32>
    %644 = vector.extract_strided_slice %590 {offsets = [0, 48], sizes = [16, 128], strides = [1, 1]} : vector<16x176xf32> to vector<16x128xf32>
    %645 = arith.mulf %642, %644 : vector<16x128xf32>
    %646 = arith.addf %638, %645 : vector<16x128xf32>
    %c0_274 = arith.constant 0 : index
    %c4_275 = arith.constant 4 : index
    %c0_276 = arith.constant 0 : index
    %647 = vector.load %arg3[%c0_274, %c4_275, %c0_276] : memref<1x22x176xf32, #tpu.memory_space<vmem>>, vector<1x16x176xf32>
    %648 = vector.shape_cast %647 : vector<1x16x176xf32> to vector<16x176xf32>
    %c28_277 = arith.constant 28 : index
    %c0_278 = arith.constant 0 : index
    %c0_279 = arith.constant 0 : index
    %649 = vector.load %arg13[%c28_277, %c0_278, %c0_279] : memref<49x16x128xf32, #tpu.memory_space<vmem>>, vector<1x16x128xf32>
    %650 = vector.shape_cast %649 : vector<1x16x128xf32> to vector<16x128xf32>
    %651 = arith.subf %650, %412 : vector<16x128xf32>
    %652 = math.exp %651 : vector<16x128xf32>
    %653 = arith.addf %643, %652 : vector<16x128xf32>
    %654 = vector.extract_strided_slice %648 {offsets = [0, 0], sizes = [16, 128], strides = [1, 1]} : vector<16x176xf32> to vector<16x128xf32>
    %655 = arith.mulf %652, %654 : vector<16x128xf32>
    %656 = arith.addf %646, %655 : vector<16x128xf32>
    %c29_280 = arith.constant 29 : index
    %c0_281 = arith.constant 0 : index
    %c0_282 = arith.constant 0 : index
    %657 = vector.load %arg13[%c29_280, %c0_281, %c0_282] : memref<49x16x128xf32, #tpu.memory_space<vmem>>, vector<1x16x128xf32>
    %658 = vector.shape_cast %657 : vector<1x16x128xf32> to vector<16x128xf32>
    %659 = arith.subf %658, %412 : vector<16x128xf32>
    %660 = math.exp %659 : vector<16x128xf32>
    %661 = arith.addf %653, %660 : vector<16x128xf32>
    %662 = vector.extract_strided_slice %648 {offsets = [0, 8], sizes = [16, 128], strides = [1, 1]} : vector<16x176xf32> to vector<16x128xf32>
    %663 = arith.mulf %660, %662 : vector<16x128xf32>
    %664 = arith.addf %656, %663 : vector<16x128xf32>
    %c30_283 = arith.constant 30 : index
    %c0_284 = arith.constant 0 : index
    %c0_285 = arith.constant 0 : index
    %665 = vector.load %arg13[%c30_283, %c0_284, %c0_285] : memref<49x16x128xf32, #tpu.memory_space<vmem>>, vector<1x16x128xf32>
    %666 = vector.shape_cast %665 : vector<1x16x128xf32> to vector<16x128xf32>
    %667 = arith.subf %666, %412 : vector<16x128xf32>
    %668 = math.exp %667 : vector<16x128xf32>
    %669 = arith.addf %661, %668 : vector<16x128xf32>
    %670 = vector.extract_strided_slice %648 {offsets = [0, 16], sizes = [16, 128], strides = [1, 1]} : vector<16x176xf32> to vector<16x128xf32>
    %671 = arith.mulf %668, %670 : vector<16x128xf32>
    %672 = arith.addf %664, %671 : vector<16x128xf32>
    %c31_286 = arith.constant 31 : index
    %c0_287 = arith.constant 0 : index
    %c0_288 = arith.constant 0 : index
    %673 = vector.load %arg13[%c31_286, %c0_287, %c0_288] : memref<49x16x128xf32, #tpu.memory_space<vmem>>, vector<1x16x128xf32>
    %674 = vector.shape_cast %673 : vector<1x16x128xf32> to vector<16x128xf32>
    %675 = arith.subf %674, %412 : vector<16x128xf32>
    %676 = math.exp %675 : vector<16x128xf32>
    %677 = arith.addf %669, %676 : vector<16x128xf32>
    %678 = vector.extract_strided_slice %648 {offsets = [0, 24], sizes = [16, 128], strides = [1, 1]} : vector<16x176xf32> to vector<16x128xf32>
    %679 = arith.mulf %676, %678 : vector<16x128xf32>
    %680 = arith.addf %672, %679 : vector<16x128xf32>
    %c32_289 = arith.constant 32 : index
    %c0_290 = arith.constant 0 : index
    %c0_291 = arith.constant 0 : index
    %681 = vector.load %arg13[%c32_289, %c0_290, %c0_291] : memref<49x16x128xf32, #tpu.memory_space<vmem>>, vector<1x16x128xf32>
    %682 = vector.shape_cast %681 : vector<1x16x128xf32> to vector<16x128xf32>
    %683 = arith.subf %682, %412 : vector<16x128xf32>
    %684 = math.exp %683 : vector<16x128xf32>
    %685 = arith.addf %677, %684 : vector<16x128xf32>
    %686 = vector.extract_strided_slice %648 {offsets = [0, 32], sizes = [16, 128], strides = [1, 1]} : vector<16x176xf32> to vector<16x128xf32>
    %687 = arith.mulf %684, %686 : vector<16x128xf32>
    %688 = arith.addf %680, %687 : vector<16x128xf32>
    %c33_292 = arith.constant 33 : index
    %c0_293 = arith.constant 0 : index
    %c0_294 = arith.constant 0 : index
    %689 = vector.load %arg13[%c33_292, %c0_293, %c0_294] : memref<49x16x128xf32, #tpu.memory_space<vmem>>, vector<1x16x128xf32>
    %690 = vector.shape_cast %689 : vector<1x16x128xf32> to vector<16x128xf32>
    %691 = arith.subf %690, %412 : vector<16x128xf32>
    %692 = math.exp %691 : vector<16x128xf32>
    %693 = arith.addf %685, %692 : vector<16x128xf32>
    %694 = vector.extract_strided_slice %648 {offsets = [0, 40], sizes = [16, 128], strides = [1, 1]} : vector<16x176xf32> to vector<16x128xf32>
    %695 = arith.mulf %692, %694 : vector<16x128xf32>
    %696 = arith.addf %688, %695 : vector<16x128xf32>
    %c34_295 = arith.constant 34 : index
    %c0_296 = arith.constant 0 : index
    %c0_297 = arith.constant 0 : index
    %697 = vector.load %arg13[%c34_295, %c0_296, %c0_297] : memref<49x16x128xf32, #tpu.memory_space<vmem>>, vector<1x16x128xf32>
    %698 = vector.shape_cast %697 : vector<1x16x128xf32> to vector<16x128xf32>
    %699 = arith.subf %698, %412 : vector<16x128xf32>
    %700 = math.exp %699 : vector<16x128xf32>
    %701 = arith.addf %693, %700 : vector<16x128xf32>
    %702 = vector.extract_strided_slice %648 {offsets = [0, 48], sizes = [16, 128], strides = [1, 1]} : vector<16x176xf32> to vector<16x128xf32>
    %703 = arith.mulf %700, %702 : vector<16x128xf32>
    %704 = arith.addf %696, %703 : vector<16x128xf32>
    %c0_298 = arith.constant 0 : index
    %c5_299 = arith.constant 5 : index
    %c0_300 = arith.constant 0 : index
    %705 = vector.load %arg3[%c0_298, %c5_299, %c0_300] : memref<1x22x176xf32, #tpu.memory_space<vmem>>, vector<1x16x176xf32>
    %706 = vector.shape_cast %705 : vector<1x16x176xf32> to vector<16x176xf32>
    %c35_301 = arith.constant 35 : index
    %c0_302 = arith.constant 0 : index
    %c0_303 = arith.constant 0 : index
    %707 = vector.load %arg13[%c35_301, %c0_302, %c0_303] : memref<49x16x128xf32, #tpu.memory_space<vmem>>, vector<1x16x128xf32>
    %708 = vector.shape_cast %707 : vector<1x16x128xf32> to vector<16x128xf32>
    %709 = arith.subf %708, %412 : vector<16x128xf32>
    %710 = math.exp %709 : vector<16x128xf32>
    %711 = arith.addf %701, %710 : vector<16x128xf32>
    %712 = vector.extract_strided_slice %706 {offsets = [0, 0], sizes = [16, 128], strides = [1, 1]} : vector<16x176xf32> to vector<16x128xf32>
    %713 = arith.mulf %710, %712 : vector<16x128xf32>
    %714 = arith.addf %704, %713 : vector<16x128xf32>
    %c36_304 = arith.constant 36 : index
    %c0_305 = arith.constant 0 : index
    %c0_306 = arith.constant 0 : index
    %715 = vector.load %arg13[%c36_304, %c0_305, %c0_306] : memref<49x16x128xf32, #tpu.memory_space<vmem>>, vector<1x16x128xf32>
    %716 = vector.shape_cast %715 : vector<1x16x128xf32> to vector<16x128xf32>
    %717 = arith.subf %716, %412 : vector<16x128xf32>
    %718 = math.exp %717 : vector<16x128xf32>
    %719 = arith.addf %711, %718 : vector<16x128xf32>
    %720 = vector.extract_strided_slice %706 {offsets = [0, 8], sizes = [16, 128], strides = [1, 1]} : vector<16x176xf32> to vector<16x128xf32>
    %721 = arith.mulf %718, %720 : vector<16x128xf32>
    %722 = arith.addf %714, %721 : vector<16x128xf32>
    %c37_307 = arith.constant 37 : index
    %c0_308 = arith.constant 0 : index
    %c0_309 = arith.constant 0 : index
    %723 = vector.load %arg13[%c37_307, %c0_308, %c0_309] : memref<49x16x128xf32, #tpu.memory_space<vmem>>, vector<1x16x128xf32>
    %724 = vector.shape_cast %723 : vector<1x16x128xf32> to vector<16x128xf32>
    %725 = arith.subf %724, %412 : vector<16x128xf32>
    %726 = math.exp %725 : vector<16x128xf32>
    %727 = arith.addf %719, %726 : vector<16x128xf32>
    %728 = vector.extract_strided_slice %706 {offsets = [0, 16], sizes = [16, 128], strides = [1, 1]} : vector<16x176xf32> to vector<16x128xf32>
    %729 = arith.mulf %726, %728 : vector<16x128xf32>
    %730 = arith.addf %722, %729 : vector<16x128xf32>
    %c38_310 = arith.constant 38 : index
    %c0_311 = arith.constant 0 : index
    %c0_312 = arith.constant 0 : index
    %731 = vector.load %arg13[%c38_310, %c0_311, %c0_312] : memref<49x16x128xf32, #tpu.memory_space<vmem>>, vector<1x16x128xf32>
    %732 = vector.shape_cast %731 : vector<1x16x128xf32> to vector<16x128xf32>
    %733 = arith.subf %732, %412 : vector<16x128xf32>
    %734 = math.exp %733 : vector<16x128xf32>
    %735 = arith.addf %727, %734 : vector<16x128xf32>
    %736 = vector.extract_strided_slice %706 {offsets = [0, 24], sizes = [16, 128], strides = [1, 1]} : vector<16x176xf32> to vector<16x128xf32>
    %737 = arith.mulf %734, %736 : vector<16x128xf32>
    %738 = arith.addf %730, %737 : vector<16x128xf32>
    %c39_313 = arith.constant 39 : index
    %c0_314 = arith.constant 0 : index
    %c0_315 = arith.constant 0 : index
    %739 = vector.load %arg13[%c39_313, %c0_314, %c0_315] : memref<49x16x128xf32, #tpu.memory_space<vmem>>, vector<1x16x128xf32>
    %740 = vector.shape_cast %739 : vector<1x16x128xf32> to vector<16x128xf32>
    %741 = arith.subf %740, %412 : vector<16x128xf32>
    %742 = math.exp %741 : vector<16x128xf32>
    %743 = arith.addf %735, %742 : vector<16x128xf32>
    %744 = vector.extract_strided_slice %706 {offsets = [0, 32], sizes = [16, 128], strides = [1, 1]} : vector<16x176xf32> to vector<16x128xf32>
    %745 = arith.mulf %742, %744 : vector<16x128xf32>
    %746 = arith.addf %738, %745 : vector<16x128xf32>
    %c40_316 = arith.constant 40 : index
    %c0_317 = arith.constant 0 : index
    %c0_318 = arith.constant 0 : index
    %747 = vector.load %arg13[%c40_316, %c0_317, %c0_318] : memref<49x16x128xf32, #tpu.memory_space<vmem>>, vector<1x16x128xf32>
    %748 = vector.shape_cast %747 : vector<1x16x128xf32> to vector<16x128xf32>
    %749 = arith.subf %748, %412 : vector<16x128xf32>
    %750 = math.exp %749 : vector<16x128xf32>
    %751 = arith.addf %743, %750 : vector<16x128xf32>
    %752 = vector.extract_strided_slice %706 {offsets = [0, 40], sizes = [16, 128], strides = [1, 1]} : vector<16x176xf32> to vector<16x128xf32>
    %753 = arith.mulf %750, %752 : vector<16x128xf32>
    %754 = arith.addf %746, %753 : vector<16x128xf32>
    %c41_319 = arith.constant 41 : index
    %c0_320 = arith.constant 0 : index
    %c0_321 = arith.constant 0 : index
    %755 = vector.load %arg13[%c41_319, %c0_320, %c0_321] : memref<49x16x128xf32, #tpu.memory_space<vmem>>, vector<1x16x128xf32>
    %756 = vector.shape_cast %755 : vector<1x16x128xf32> to vector<16x128xf32>
    %757 = arith.subf %756, %412 : vector<16x128xf32>
    %758 = math.exp %757 : vector<16x128xf32>
    %759 = arith.addf %751, %758 : vector<16x128xf32>
    %760 = vector.extract_strided_slice %706 {offsets = [0, 48], sizes = [16, 128], strides = [1, 1]} : vector<16x176xf32> to vector<16x128xf32>
    %761 = arith.mulf %758, %760 : vector<16x128xf32>
    %762 = arith.addf %754, %761 : vector<16x128xf32>
    %c0_322 = arith.constant 0 : index
    %c6_323 = arith.constant 6 : index
    %c0_324 = arith.constant 0 : index
    %763 = vector.load %arg3[%c0_322, %c6_323, %c0_324] : memref<1x22x176xf32, #tpu.memory_space<vmem>>, vector<1x16x176xf32>
    %764 = vector.shape_cast %763 : vector<1x16x176xf32> to vector<16x176xf32>
    %c42_325 = arith.constant 42 : index
    %c0_326 = arith.constant 0 : index
    %c0_327 = arith.constant 0 : index
    %765 = vector.load %arg13[%c42_325, %c0_326, %c0_327] : memref<49x16x128xf32, #tpu.memory_space<vmem>>, vector<1x16x128xf32>
    %766 = vector.shape_cast %765 : vector<1x16x128xf32> to vector<16x128xf32>
    %767 = arith.subf %766, %412 : vector<16x128xf32>
    %768 = math.exp %767 : vector<16x128xf32>
    %769 = arith.addf %759, %768 : vector<16x128xf32>
    %770 = vector.extract_strided_slice %764 {offsets = [0, 0], sizes = [16, 128], strides = [1, 1]} : vector<16x176xf32> to vector<16x128xf32>
    %771 = arith.mulf %768, %770 : vector<16x128xf32>
    %772 = arith.addf %762, %771 : vector<16x128xf32>
    %c43_328 = arith.constant 43 : index
    %c0_329 = arith.constant 0 : index
    %c0_330 = arith.constant 0 : index
    %773 = vector.load %arg13[%c43_328, %c0_329, %c0_330] : memref<49x16x128xf32, #tpu.memory_space<vmem>>, vector<1x16x128xf32>
    %774 = vector.shape_cast %773 : vector<1x16x128xf32> to vector<16x128xf32>
    %775 = arith.subf %774, %412 : vector<16x128xf32>
    %776 = math.exp %775 : vector<16x128xf32>
    %777 = arith.addf %769, %776 : vector<16x128xf32>
    %778 = vector.extract_strided_slice %764 {offsets = [0, 8], sizes = [16, 128], strides = [1, 1]} : vector<16x176xf32> to vector<16x128xf32>
    %779 = arith.mulf %776, %778 : vector<16x128xf32>
    %780 = arith.addf %772, %779 : vector<16x128xf32>
    %c44_331 = arith.constant 44 : index
    %c0_332 = arith.constant 0 : index
    %c0_333 = arith.constant 0 : index
    %781 = vector.load %arg13[%c44_331, %c0_332, %c0_333] : memref<49x16x128xf32, #tpu.memory_space<vmem>>, vector<1x16x128xf32>
    %782 = vector.shape_cast %781 : vector<1x16x128xf32> to vector<16x128xf32>
    %783 = arith.subf %782, %412 : vector<16x128xf32>
    %784 = math.exp %783 : vector<16x128xf32>
    %785 = arith.addf %777, %784 : vector<16x128xf32>
    %786 = vector.extract_strided_slice %764 {offsets = [0, 16], sizes = [16, 128], strides = [1, 1]} : vector<16x176xf32> to vector<16x128xf32>
    %787 = arith.mulf %784, %786 : vector<16x128xf32>
    %788 = arith.addf %780, %787 : vector<16x128xf32>
    %c45_334 = arith.constant 45 : index
    %c0_335 = arith.constant 0 : index
    %c0_336 = arith.constant 0 : index
    %789 = vector.load %arg13[%c45_334, %c0_335, %c0_336] : memref<49x16x128xf32, #tpu.memory_space<vmem>>, vector<1x16x128xf32>
    %790 = vector.shape_cast %789 : vector<1x16x128xf32> to vector<16x128xf32>
    %791 = arith.subf %790, %412 : vector<16x128xf32>
    %792 = math.exp %791 : vector<16x128xf32>
    %793 = arith.addf %785, %792 : vector<16x128xf32>
    %794 = vector.extract_strided_slice %764 {offsets = [0, 24], sizes = [16, 128], strides = [1, 1]} : vector<16x176xf32> to vector<16x128xf32>
    %795 = arith.mulf %792, %794 : vector<16x128xf32>
    %796 = arith.addf %788, %795 : vector<16x128xf32>
    %c46_337 = arith.constant 46 : index
    %c0_338 = arith.constant 0 : index
    %c0_339 = arith.constant 0 : index
    %797 = vector.load %arg13[%c46_337, %c0_338, %c0_339] : memref<49x16x128xf32, #tpu.memory_space<vmem>>, vector<1x16x128xf32>
    %798 = vector.shape_cast %797 : vector<1x16x128xf32> to vector<16x128xf32>
    %799 = arith.subf %798, %412 : vector<16x128xf32>
    %800 = math.exp %799 : vector<16x128xf32>
    %801 = arith.addf %793, %800 : vector<16x128xf32>
    %802 = vector.extract_strided_slice %764 {offsets = [0, 32], sizes = [16, 128], strides = [1, 1]} : vector<16x176xf32> to vector<16x128xf32>
    %803 = arith.mulf %800, %802 : vector<16x128xf32>
    %804 = arith.addf %796, %803 : vector<16x128xf32>
    %c47_340 = arith.constant 47 : index
    %c0_341 = arith.constant 0 : index
    %c0_342 = arith.constant 0 : index
    %805 = vector.load %arg13[%c47_340, %c0_341, %c0_342] : memref<49x16x128xf32, #tpu.memory_space<vmem>>, vector<1x16x128xf32>
    %806 = vector.shape_cast %805 : vector<1x16x128xf32> to vector<16x128xf32>
    %807 = arith.subf %806, %412 : vector<16x128xf32>
    %808 = math.exp %807 : vector<16x128xf32>
    %809 = arith.addf %801, %808 : vector<16x128xf32>
    %810 = vector.extract_strided_slice %764 {offsets = [0, 40], sizes = [16, 128], strides = [1, 1]} : vector<16x176xf32> to vector<16x128xf32>
    %811 = arith.mulf %808, %810 : vector<16x128xf32>
    %812 = arith.addf %804, %811 : vector<16x128xf32>
    %c48_343 = arith.constant 48 : index
    %c0_344 = arith.constant 0 : index
    %c0_345 = arith.constant 0 : index
    %813 = vector.load %arg13[%c48_343, %c0_344, %c0_345] : memref<49x16x128xf32, #tpu.memory_space<vmem>>, vector<1x16x128xf32>
    %814 = vector.shape_cast %813 : vector<1x16x128xf32> to vector<16x128xf32>
    %815 = arith.subf %814, %412 : vector<16x128xf32>
    %816 = math.exp %815 : vector<16x128xf32>
    %817 = arith.addf %809, %816 : vector<16x128xf32>
    %818 = vector.extract_strided_slice %764 {offsets = [0, 48], sizes = [16, 128], strides = [1, 1]} : vector<16x176xf32> to vector<16x128xf32>
    %819 = arith.mulf %816, %818 : vector<16x128xf32>
    %820 = arith.addf %812, %819 : vector<16x128xf32>
    %821 = tpu.reciprocal %817 {approx = true} : vector<16x128xf32> -> vector<16x128xf32>
    %822 = arith.mulf %820, %821 : vector<16x128xf32>
    %cst_346 = arith.constant 0.000000e+00 : f32
    %823 = vector.broadcast %cst_346 : f32 to vector<16x128xf32>
    %c0_347 = arith.constant 0 : index
    %c0_348 = arith.constant 0 : index
    %c0_349 = arith.constant 0 : index
    %824 = vector.load %arg5[%c0_347, %c0_348, %c0_349] : memref<1x18x144xf32, #tpu.memory_space<vmem>>, vector<1x16x144xf32>
    %825 = vector.shape_cast %824 : vector<1x16x144xf32> to vector<16x144xf32>
    %c0_350 = arith.constant 0 : index
    %c0_351 = arith.constant 0 : index
    %c0_352 = arith.constant 0 : index
    %826 = vector.load %arg6[%c0_350, %c0_351, %c0_352] : memref<1x18x144xf32, #tpu.memory_space<vmem>>, vector<1x16x144xf32>
    %827 = vector.shape_cast %826 : vector<1x16x144xf32> to vector<16x144xf32>
    %c0_353 = arith.constant 0 : index
    %c0_354 = arith.constant 0 : index
    %c0_355 = arith.constant 0 : index
    %828 = vector.load %arg7[%c0_353, %c0_354, %c0_355] : memref<1x18x144xf32, #tpu.memory_space<vmem>>, vector<1x16x144xf32>
    %829 = vector.shape_cast %828 : vector<1x16x144xf32> to vector<16x144xf32>
    %c0_356 = arith.constant 0 : index
    %830 = memref.load %arg9[%c0_356] : memref<27xf32, #tpu.memory_space<smem>>
    %831 = vector.extract_strided_slice %825 {offsets = [0, 0], sizes = [16, 128], strides = [1, 1]} : vector<16x144xf32> to vector<16x128xf32>
    %832 = vector.broadcast %830 : f32 to vector<16x128xf32>
    %833 = arith.mulf %832, %831 : vector<16x128xf32>
    %c1_357 = arith.constant 1 : index
    %834 = memref.load %arg9[%c1_357] : memref<27xf32, #tpu.memory_space<smem>>
    %835 = vector.extract_strided_slice %827 {offsets = [0, 0], sizes = [16, 128], strides = [1, 1]} : vector<16x144xf32> to vector<16x128xf32>
    %836 = vector.broadcast %834 : f32 to vector<16x128xf32>
    %837 = arith.mulf %836, %835 : vector<16x128xf32>
    %838 = arith.addf %833, %837 : vector<16x128xf32>
    %c2_358 = arith.constant 2 : index
    %839 = memref.load %arg9[%c2_358] : memref<27xf32, #tpu.memory_space<smem>>
    %840 = vector.extract_strided_slice %829 {offsets = [0, 0], sizes = [16, 128], strides = [1, 1]} : vector<16x144xf32> to vector<16x128xf32>
    %841 = vector.broadcast %839 : f32 to vector<16x128xf32>
    %842 = arith.mulf %841, %840 : vector<16x128xf32>
    %843 = arith.addf %838, %842 : vector<16x128xf32>
    %844 = arith.addf %823, %843 : vector<16x128xf32>
    %c3_359 = arith.constant 3 : index
    %845 = memref.load %arg9[%c3_359] : memref<27xf32, #tpu.memory_space<smem>>
    %846 = vector.extract_strided_slice %825 {offsets = [0, 8], sizes = [16, 128], strides = [1, 1]} : vector<16x144xf32> to vector<16x128xf32>
    %847 = vector.broadcast %845 : f32 to vector<16x128xf32>
    %848 = arith.mulf %847, %846 : vector<16x128xf32>
    %c4_360 = arith.constant 4 : index
    %849 = memref.load %arg9[%c4_360] : memref<27xf32, #tpu.memory_space<smem>>
    %850 = vector.extract_strided_slice %827 {offsets = [0, 8], sizes = [16, 128], strides = [1, 1]} : vector<16x144xf32> to vector<16x128xf32>
    %851 = vector.broadcast %849 : f32 to vector<16x128xf32>
    %852 = arith.mulf %851, %850 : vector<16x128xf32>
    %853 = arith.addf %848, %852 : vector<16x128xf32>
    %c5_361 = arith.constant 5 : index
    %854 = memref.load %arg9[%c5_361] : memref<27xf32, #tpu.memory_space<smem>>
    %855 = vector.extract_strided_slice %829 {offsets = [0, 8], sizes = [16, 128], strides = [1, 1]} : vector<16x144xf32> to vector<16x128xf32>
    %856 = vector.broadcast %854 : f32 to vector<16x128xf32>
    %857 = arith.mulf %856, %855 : vector<16x128xf32>
    %858 = arith.addf %853, %857 : vector<16x128xf32>
    %859 = arith.addf %844, %858 : vector<16x128xf32>
    %c6_362 = arith.constant 6 : index
    %860 = memref.load %arg9[%c6_362] : memref<27xf32, #tpu.memory_space<smem>>
    %861 = vector.extract_strided_slice %825 {offsets = [0, 16], sizes = [16, 128], strides = [1, 1]} : vector<16x144xf32> to vector<16x128xf32>
    %862 = vector.broadcast %860 : f32 to vector<16x128xf32>
    %863 = arith.mulf %862, %861 : vector<16x128xf32>
    %c7_363 = arith.constant 7 : index
    %864 = memref.load %arg9[%c7_363] : memref<27xf32, #tpu.memory_space<smem>>
    %865 = vector.extract_strided_slice %827 {offsets = [0, 16], sizes = [16, 128], strides = [1, 1]} : vector<16x144xf32> to vector<16x128xf32>
    %866 = vector.broadcast %864 : f32 to vector<16x128xf32>
    %867 = arith.mulf %866, %865 : vector<16x128xf32>
    %868 = arith.addf %863, %867 : vector<16x128xf32>
    %c8_364 = arith.constant 8 : index
    %869 = memref.load %arg9[%c8_364] : memref<27xf32, #tpu.memory_space<smem>>
    %870 = vector.extract_strided_slice %829 {offsets = [0, 16], sizes = [16, 128], strides = [1, 1]} : vector<16x144xf32> to vector<16x128xf32>
    %871 = vector.broadcast %869 : f32 to vector<16x128xf32>
    %872 = arith.mulf %871, %870 : vector<16x128xf32>
    %873 = arith.addf %868, %872 : vector<16x128xf32>
    %874 = arith.addf %859, %873 : vector<16x128xf32>
    %c0_365 = arith.constant 0 : index
    %c1_366 = arith.constant 1 : index
    %c0_367 = arith.constant 0 : index
    %875 = vector.load %arg5[%c0_365, %c1_366, %c0_367] : memref<1x18x144xf32, #tpu.memory_space<vmem>>, vector<1x16x144xf32>
    %876 = vector.shape_cast %875 : vector<1x16x144xf32> to vector<16x144xf32>
    %c0_368 = arith.constant 0 : index
    %c1_369 = arith.constant 1 : index
    %c0_370 = arith.constant 0 : index
    %877 = vector.load %arg6[%c0_368, %c1_369, %c0_370] : memref<1x18x144xf32, #tpu.memory_space<vmem>>, vector<1x16x144xf32>
    %878 = vector.shape_cast %877 : vector<1x16x144xf32> to vector<16x144xf32>
    %c0_371 = arith.constant 0 : index
    %c1_372 = arith.constant 1 : index
    %c0_373 = arith.constant 0 : index
    %879 = vector.load %arg7[%c0_371, %c1_372, %c0_373] : memref<1x18x144xf32, #tpu.memory_space<vmem>>, vector<1x16x144xf32>
    %880 = vector.shape_cast %879 : vector<1x16x144xf32> to vector<16x144xf32>
    %c9_374 = arith.constant 9 : index
    %881 = memref.load %arg9[%c9_374] : memref<27xf32, #tpu.memory_space<smem>>
    %882 = vector.extract_strided_slice %876 {offsets = [0, 0], sizes = [16, 128], strides = [1, 1]} : vector<16x144xf32> to vector<16x128xf32>
    %883 = vector.broadcast %881 : f32 to vector<16x128xf32>
    %884 = arith.mulf %883, %882 : vector<16x128xf32>
    %c10_375 = arith.constant 10 : index
    %885 = memref.load %arg9[%c10_375] : memref<27xf32, #tpu.memory_space<smem>>
    %886 = vector.extract_strided_slice %878 {offsets = [0, 0], sizes = [16, 128], strides = [1, 1]} : vector<16x144xf32> to vector<16x128xf32>
    %887 = vector.broadcast %885 : f32 to vector<16x128xf32>
    %888 = arith.mulf %887, %886 : vector<16x128xf32>
    %889 = arith.addf %884, %888 : vector<16x128xf32>
    %c11_376 = arith.constant 11 : index
    %890 = memref.load %arg9[%c11_376] : memref<27xf32, #tpu.memory_space<smem>>
    %891 = vector.extract_strided_slice %880 {offsets = [0, 0], sizes = [16, 128], strides = [1, 1]} : vector<16x144xf32> to vector<16x128xf32>
    %892 = vector.broadcast %890 : f32 to vector<16x128xf32>
    %893 = arith.mulf %892, %891 : vector<16x128xf32>
    %894 = arith.addf %889, %893 : vector<16x128xf32>
    %895 = arith.addf %874, %894 : vector<16x128xf32>
    %c12_377 = arith.constant 12 : index
    %896 = memref.load %arg9[%c12_377] : memref<27xf32, #tpu.memory_space<smem>>
    %897 = vector.extract_strided_slice %876 {offsets = [0, 8], sizes = [16, 128], strides = [1, 1]} : vector<16x144xf32> to vector<16x128xf32>
    %898 = vector.broadcast %896 : f32 to vector<16x128xf32>
    %899 = arith.mulf %898, %897 : vector<16x128xf32>
    %c13_378 = arith.constant 13 : index
    %900 = memref.load %arg9[%c13_378] : memref<27xf32, #tpu.memory_space<smem>>
    %901 = vector.extract_strided_slice %878 {offsets = [0, 8], sizes = [16, 128], strides = [1, 1]} : vector<16x144xf32> to vector<16x128xf32>
    %902 = vector.broadcast %900 : f32 to vector<16x128xf32>
    %903 = arith.mulf %902, %901 : vector<16x128xf32>
    %904 = arith.addf %899, %903 : vector<16x128xf32>
    %c14_379 = arith.constant 14 : index
    %905 = memref.load %arg9[%c14_379] : memref<27xf32, #tpu.memory_space<smem>>
    %906 = vector.extract_strided_slice %880 {offsets = [0, 8], sizes = [16, 128], strides = [1, 1]} : vector<16x144xf32> to vector<16x128xf32>
    %907 = vector.broadcast %905 : f32 to vector<16x128xf32>
    %908 = arith.mulf %907, %906 : vector<16x128xf32>
    %909 = arith.addf %904, %908 : vector<16x128xf32>
    %910 = arith.addf %895, %909 : vector<16x128xf32>
    %c15_380 = arith.constant 15 : index
    %911 = memref.load %arg9[%c15_380] : memref<27xf32, #tpu.memory_space<smem>>
    %912 = vector.extract_strided_slice %876 {offsets = [0, 16], sizes = [16, 128], strides = [1, 1]} : vector<16x144xf32> to vector<16x128xf32>
    %913 = vector.broadcast %911 : f32 to vector<16x128xf32>
    %914 = arith.mulf %913, %912 : vector<16x128xf32>
    %c16_381 = arith.constant 16 : index
    %915 = memref.load %arg9[%c16_381] : memref<27xf32, #tpu.memory_space<smem>>
    %916 = vector.extract_strided_slice %878 {offsets = [0, 16], sizes = [16, 128], strides = [1, 1]} : vector<16x144xf32> to vector<16x128xf32>
    %917 = vector.broadcast %915 : f32 to vector<16x128xf32>
    %918 = arith.mulf %917, %916 : vector<16x128xf32>
    %919 = arith.addf %914, %918 : vector<16x128xf32>
    %c17_382 = arith.constant 17 : index
    %920 = memref.load %arg9[%c17_382] : memref<27xf32, #tpu.memory_space<smem>>
    %921 = vector.extract_strided_slice %880 {offsets = [0, 16], sizes = [16, 128], strides = [1, 1]} : vector<16x144xf32> to vector<16x128xf32>
    %922 = vector.broadcast %920 : f32 to vector<16x128xf32>
    %923 = arith.mulf %922, %921 : vector<16x128xf32>
    %924 = arith.addf %919, %923 : vector<16x128xf32>
    %925 = arith.addf %910, %924 : vector<16x128xf32>
    %c0_383 = arith.constant 0 : index
    %c2_384 = arith.constant 2 : index
    %c0_385 = arith.constant 0 : index
    %926 = vector.load %arg5[%c0_383, %c2_384, %c0_385] : memref<1x18x144xf32, #tpu.memory_space<vmem>>, vector<1x16x144xf32>
    %927 = vector.shape_cast %926 : vector<1x16x144xf32> to vector<16x144xf32>
    %c0_386 = arith.constant 0 : index
    %c2_387 = arith.constant 2 : index
    %c0_388 = arith.constant 0 : index
    %928 = vector.load %arg6[%c0_386, %c2_387, %c0_388] : memref<1x18x144xf32, #tpu.memory_space<vmem>>, vector<1x16x144xf32>
    %929 = vector.shape_cast %928 : vector<1x16x144xf32> to vector<16x144xf32>
    %c0_389 = arith.constant 0 : index
    %c2_390 = arith.constant 2 : index
    %c0_391 = arith.constant 0 : index
    %930 = vector.load %arg7[%c0_389, %c2_390, %c0_391] : memref<1x18x144xf32, #tpu.memory_space<vmem>>, vector<1x16x144xf32>
    %931 = vector.shape_cast %930 : vector<1x16x144xf32> to vector<16x144xf32>
    %c18_392 = arith.constant 18 : index
    %932 = memref.load %arg9[%c18_392] : memref<27xf32, #tpu.memory_space<smem>>
    %933 = vector.extract_strided_slice %927 {offsets = [0, 0], sizes = [16, 128], strides = [1, 1]} : vector<16x144xf32> to vector<16x128xf32>
    %934 = vector.broadcast %932 : f32 to vector<16x128xf32>
    %935 = arith.mulf %934, %933 : vector<16x128xf32>
    %c19_393 = arith.constant 19 : index
    %936 = memref.load %arg9[%c19_393] : memref<27xf32, #tpu.memory_space<smem>>
    %937 = vector.extract_strided_slice %929 {offsets = [0, 0], sizes = [16, 128], strides = [1, 1]} : vector<16x144xf32> to vector<16x128xf32>
    %938 = vector.broadcast %936 : f32 to vector<16x128xf32>
    %939 = arith.mulf %938, %937 : vector<16x128xf32>
    %940 = arith.addf %935, %939 : vector<16x128xf32>
    %c20_394 = arith.constant 20 : index
    %941 = memref.load %arg9[%c20_394] : memref<27xf32, #tpu.memory_space<smem>>
    %942 = vector.extract_strided_slice %931 {offsets = [0, 0], sizes = [16, 128], strides = [1, 1]} : vector<16x144xf32> to vector<16x128xf32>
    %943 = vector.broadcast %941 : f32 to vector<16x128xf32>
    %944 = arith.mulf %943, %942 : vector<16x128xf32>
    %945 = arith.addf %940, %944 : vector<16x128xf32>
    %946 = arith.addf %925, %945 : vector<16x128xf32>
    %c21_395 = arith.constant 21 : index
    %947 = memref.load %arg9[%c21_395] : memref<27xf32, #tpu.memory_space<smem>>
    %948 = vector.extract_strided_slice %927 {offsets = [0, 8], sizes = [16, 128], strides = [1, 1]} : vector<16x144xf32> to vector<16x128xf32>
    %949 = vector.broadcast %947 : f32 to vector<16x128xf32>
    %950 = arith.mulf %949, %948 : vector<16x128xf32>
    %c22_396 = arith.constant 22 : index
    %951 = memref.load %arg9[%c22_396] : memref<27xf32, #tpu.memory_space<smem>>
    %952 = vector.extract_strided_slice %929 {offsets = [0, 8], sizes = [16, 128], strides = [1, 1]} : vector<16x144xf32> to vector<16x128xf32>
    %953 = vector.broadcast %951 : f32 to vector<16x128xf32>
    %954 = arith.mulf %953, %952 : vector<16x128xf32>
    %955 = arith.addf %950, %954 : vector<16x128xf32>
    %c23_397 = arith.constant 23 : index
    %956 = memref.load %arg9[%c23_397] : memref<27xf32, #tpu.memory_space<smem>>
    %957 = vector.extract_strided_slice %931 {offsets = [0, 8], sizes = [16, 128], strides = [1, 1]} : vector<16x144xf32> to vector<16x128xf32>
    %958 = vector.broadcast %956 : f32 to vector<16x128xf32>
    %959 = arith.mulf %958, %957 : vector<16x128xf32>
    %960 = arith.addf %955, %959 : vector<16x128xf32>
    %961 = arith.addf %946, %960 : vector<16x128xf32>
    %c24_398 = arith.constant 24 : index
    %962 = memref.load %arg9[%c24_398] : memref<27xf32, #tpu.memory_space<smem>>
    %963 = vector.extract_strided_slice %927 {offsets = [0, 16], sizes = [16, 128], strides = [1, 1]} : vector<16x144xf32> to vector<16x128xf32>
    %964 = vector.broadcast %962 : f32 to vector<16x128xf32>
    %965 = arith.mulf %964, %963 : vector<16x128xf32>
    %c25_399 = arith.constant 25 : index
    %966 = memref.load %arg9[%c25_399] : memref<27xf32, #tpu.memory_space<smem>>
    %967 = vector.extract_strided_slice %929 {offsets = [0, 16], sizes = [16, 128], strides = [1, 1]} : vector<16x144xf32> to vector<16x128xf32>
    %968 = vector.broadcast %966 : f32 to vector<16x128xf32>
    %969 = arith.mulf %968, %967 : vector<16x128xf32>
    %970 = arith.addf %965, %969 : vector<16x128xf32>
    %c26_400 = arith.constant 26 : index
    %971 = memref.load %arg9[%c26_400] : memref<27xf32, #tpu.memory_space<smem>>
    %972 = vector.extract_strided_slice %931 {offsets = [0, 16], sizes = [16, 128], strides = [1, 1]} : vector<16x144xf32> to vector<16x128xf32>
    %973 = vector.broadcast %971 : f32 to vector<16x128xf32>
    %974 = arith.mulf %973, %972 : vector<16x128xf32>
    %975 = arith.addf %970, %974 : vector<16x128xf32>
    %976 = arith.addf %961, %975 : vector<16x128xf32>
    %977 = arith.mulf %822, %976 : vector<16x128xf32>
    %c0_401 = arith.constant 0 : index
    %c0_402 = arith.constant 0 : index
    %978 = vector.load %arg10[%c0_401, %c0_402] : memref<1x128xf32, #tpu.memory_space<vmem>>, vector<1x128xf32>
    %979 = vector.broadcast %978 : vector<1x128xf32> to vector<16x128xf32>
    %980 = arith.mulf %977, %979 : vector<16x128xf32>
    %c0_403 = arith.constant 0 : index
    %c0_404 = arith.constant 0 : index
    %981 = vector.load %arg11[%c0_403, %c0_404] : memref<1x128xf32, #tpu.memory_space<vmem>>, vector<1x128xf32>
    %982 = vector.broadcast %981 : vector<1x128xf32> to vector<16x128xf32>
    %983 = arith.addf %980, %982 : vector<16x128xf32>
    %cst_405 = arith.constant 0.000000e+00 : f32
    %984 = vector.broadcast %cst_405 : f32 to vector<16x128xf32>
    %985 = arith.subf %984, %983 : vector<16x128xf32>
    %986 = math.exp %985 : vector<16x128xf32>
    %cst_406 = arith.constant 1.000000e+00 : f32
    %987 = vector.broadcast %cst_406 : f32 to vector<16x128xf32>
    %988 = arith.addf %987, %986 : vector<16x128xf32>
    %989 = tpu.reciprocal %988 {approx = true} : vector<16x128xf32> -> vector<16x128xf32>
    %990 = arith.mulf %983, %989 : vector<16x128xf32>
    %c0_407 = arith.constant 0 : index
    %c0_408 = arith.constant 0 : index
    %c0_409 = arith.constant 0 : index
    %991 = vector.load %arg12[%c0_407, %c0_408, %c0_409] : memref<1x16x128xf32, #tpu.memory_space<vmem>>, vector<1x16x128xf32>
    %992 = vector.shape_cast %991 : vector<1x16x128xf32> to vector<16x128xf32>
    %993 = vector.shape_cast %990 : vector<16x128xf32> to vector<1x16x128xf32>
    tpu.vector_store %arg12[%c0_407, %c0_408, %c0_409], %993 {strides = array<i32>} : memref<1x16x128xf32, #tpu.memory_space<vmem>>, vector<1x16x128xf32>,
    return
  }
  func.func @transform_0(%arg0: i32) -> (i32, i32, i32) {
    %c0_i32 = arith.constant 0 : i32
    %c0_i32_0 = arith.constant 0 : i32
    %c0_i32_1 = arith.constant 0 : i32
    return %arg0, %c0_i32, %c0_i32_0 : i32, i32, i32
  }
  func.func @transform_1(%arg0: i32) -> (i32, i32, i32) {
    %c0_i32 = arith.constant 0 : i32
    %c0_i32_0 = arith.constant 0 : i32
    %c0_i32_1 = arith.constant 0 : i32
    return %arg0, %c0_i32, %c0_i32_0 : i32, i32, i32
  }
  func.func @transform_2(%arg0: i32) -> (i32, i32, i32) {
    %c0_i32 = arith.constant 0 : i32
    %c0_i32_0 = arith.constant 0 : i32
    %c0_i32_1 = arith.constant 0 : i32
    return %arg0, %c0_i32, %c0_i32_0 : i32, i32, i32
  }
  func.func @transform_3(%arg0: i32) -> (i32, i32) {
    %c0_i32 = arith.constant 0 : i32
    %c0_i32_0 = arith.constant 0 : i32
    %c0_i32_1 = arith.constant 0 : i32
    return %c0_i32, %c0_i32_0 : i32, i32
  }
  func.func @transform_4(%arg0: i32) -> (i32, i32, i32) {
    %c0_i32 = arith.constant 0 : i32
    %c0_i32_0 = arith.constant 0 : i32
    %c0_i32_1 = arith.constant 0 : i32
    return %arg0, %c0_i32, %c0_i32_0 : i32, i32, i32
  }
  func.func @transform_5(%arg0: i32) -> (i32, i32, i32) {
    %c0_i32 = arith.constant 0 : i32
    %c0_i32_0 = arith.constant 0 : i32
    %c0_i32_1 = arith.constant 0 : i32
    return %arg0, %c0_i32, %c0_i32_0 : i32, i32, i32
  }
  func.func @transform_6(%arg0: i32) -> (i32, i32, i32) {
    %c0_i32 = arith.constant 0 : i32
    %c0_i32_0 = arith.constant 0 : i32
    %c0_i32_1 = arith.constant 0 : i32
    return %arg0, %c0_i32, %c0_i32_0 : i32, i32, i32
  }
  func.func @transform_7(%arg0: i32) -> (i32, i32) {
    %c0_i32 = arith.constant 0 : i32
    %c0_i32_0 = arith.constant 0 : i32
    %c0_i32_1 = arith.constant 0 : i32
    return %c0_i32, %c0_i32_0 : i32, i32
  }
  func.func @transform_8(%arg0: i32) -> i32 {
    %c0_i32 = arith.constant 0 : i32
    %c0_i32_0 = arith.constant 0 : i32
    return %c0_i32 : i32
  }
  func.func @transform_9(%arg0: i32) -> (i32, i32) {
    %c0_i32 = arith.constant 0 : i32
    %c0_i32_0 = arith.constant 0 : i32
    %c0_i32_1 = arith.constant 0 : i32
    return %c0_i32, %c0_i32_0 : i32, i32
  }
  func.func @transform_10(%arg0: i32) -> (i32, i32) {
    %c0_i32 = arith.constant 0 : i32
    %c0_i32_0 = arith.constant 0 : i32
    %c0_i32_1 = arith.constant 0 : i32
    return %c0_i32, %c0_i32_0 : i32, i32
  }
  func.func @transform_11(%arg0: i32) -> (i32, i32, i32) {
    %c0_i32 = arith.constant 0 : i32
    %c0_i32_0 = arith.constant 0 : i32
    %c0_i32_1 = arith.constant 0 : i32
    return %arg0, %c0_i32, %c0_i32_0 : i32, i32, i32
  }
}

</mosaic_0001>

<bundles_post_ra>
// kernel: tile.34
= control target key start
LH: loop header
LB: loop body
LE: loop exit
PB: predicated region body
PF: predicated region fallthrough
CT: control target
= control target key end

     0   :  { %s28_s0 = inlined_call_operand.vmem [shape: f32[8], index: 0, kind: input, shape index: {}]   ;;  %s29_s1 = inlined_call_operand.vmem [shape: f32[16,8], index: 1, kind: output, shape index: {}]  }
   0x1   :  { %v4_v0 = vld [vmem:[%s28_s0] ss:$0 sm:$0xff] }
   0x2   :  { %5 = vst [vmem:[%s29_s1] sm:$0xff] %v4_v0  ;;  %8 = vst [vmem:[%s29_s1 + $0x8] sm:$0xff] %v4_v0 }

// kernel: tile.35
= control target key start
LH: loop header
LB: loop body
LE: loop exit
PB: predicated region body
PF: predicated region fallthrough
CT: control target
= control target key end

     0   :  { %s131_s10 = smov 120   ;;  %s132_s11 = smov 104   ;;  %vm3_vm0 = vcmask 64512   ;;  %vm9_vm1 = vcmask 1048512   ;;  %vm15_vm2 = vcmask 982912   ;;  %vm21_vm3 = vcmask 917312   ;;  %s207_s0 = inlined_call_operand.vmem [shape: f32[16,8], index: 0, kind: input, shape index: {}]   ;;  %s208_s1 = inlined_call_operand.vmem [shape: f32[1,128], index: 1, kind: output, shape index: {}]  }
   0x1   :  { %v101_v0 = vld [vmem:[%s207_s0 + $0xf] sm:$0x1]   ;;  %v103_v1 = vld [vmem:[%s207_s0 + $0xd] sm:$0x1]   ;;  %v102_v2 = vld [vmem:[%s207_s0 + $0xe] sm:$0x1]  }
   0x2   :  { %7 = vrot.lane.b32.xlu0 %v101_v0, %s131_s10  ;;  %19 = vrot.lane.b32.xlu1 %v103_v1, %s132_s11  ;;  %v104_v3 = vld [vmem:[%s207_s0 + $0xc] sm:$0x1]   ;;  %s133_s16 = smov 112   ;;  %s134_s17 = smov 96   ;;  %v105_v4 = vld [vmem:[%s207_s0 + $0xb] sm:$0x1]  }
   0x3   :  { %v106_v5 = vld [vmem:[%s207_s0 + $0xa] sm:$0x1]   ;;  %v2_v6 = vld [vmem:[%s207_s0] sm:$0x1]   ;;  %s135_s24 = smov 88   ;;  %s136_s25 = smov 80  }
   0x4   :  { %4 = vst.msk [vmem:[#allocation0] sm:$0x1] %vm3_vm0, %v2_v6   ;;  %v107_v7 = vld [vmem:[%s207_s0 + $0x9] sm:$0x1]   ;;  %v108_v8 = vld [vmem:[%s207_s0 + $0x8] sm:$0x1]  }
   0x5   :  { %s137_s30 = smov 72   ;;  %s138_s2 = smov 64   ;;  %v109_v9 = vld [vmem:[%s207_s0 + $0x7] sm:$0x1]   ;;  %v110_v10 = vld [vmem:[%s207_s0 + $0x6] sm:$0x1]  }
   0x6   :  { %13 = vrot.lane.b32.xlu0 %v102_v2, %s133_s16  ;;  %25 = vrot.lane.b32.xlu1 %v104_v3, %s134_s17  ;;  %s139_s7 = smov 56   ;;  %s140_s8 = smov 48   ;;  %v111_v11 = vld [vmem:[%s207_s0 + $0x5] sm:$0x1]   ;;  %v112_v12 = vld [vmem:[%s207_s0 + $0x4] sm:$0x1]  }
   0x7   :  { %s141_s13 = smov 40   ;;  %s142_s14 = smov 32   ;;  %v113_v13 = vld [vmem:[%s207_s0 + $0x3] sm:$0x1]   ;;  %v114_v14 = vld [vmem:[%s207_s0 + $0x2] sm:$0x1]  }
   0x8   :  { %s143_s19 = smov 24   ;;  %s144_s20 = smov 16   ;;  %v115_v15 = vld [vmem:[%s207_s0 + $0x1] sm:$0x1]   ;;  %vm27_vm4 = vcmask 851712   ;;  %vm33_vm5 = vcmask 786112  }
   0x9   :  { %s145_s0 = smov 8   ;;  %vm39_vm6 = vcmask 720512   ;;  %vm45_vm7 = vcmask 654912   ;;  %vm51_vm8 = vcmask 589312   ;;  %vm57_vm9 = vcmask 523712  }
   0xa   :  { %31 = vrot.lane.b32.xlu0 %v105_v4, %s135_s24  ;;  %37 = vrot.lane.b32.xlu1 %v106_v5, %s136_s25  ;;  %vm63_vm10 = vcmask 458112   ;;  %vm69_vm11 = vcmask 392512   ;;  %vm75_vm12 = vcmask 326912   ;;  %vm81_vm13 = vcmask 261312  }
   0xb   :  { %vm87_vm14 = vcmask 195712   ;;  %vm93_vm15 = vcmask 130112  }
   0xe   :  { %43 = vrot.lane.b32.xlu0 %v107_v7, %s137_s30  ;;  %49 = vrot.lane.b32.xlu1 %v108_v8, %s138_s2 }
  0x12   :  { %55 = vrot.lane.b32.xlu0 %v109_v9, %s139_s7  ;;  %61 = vrot.lane.b32.xlu1 %v110_v10, %s140_s8 }
  0x16   :  { %67 = vrot.lane.b32.xlu0 %v111_v11, %s141_s13  ;;  %73 = vrot.lane.b32.xlu1 %v112_v12, %s142_s14 }
  0x1a   :  { %79 = vrot.lane.b32.xlu0 %v113_v13, %s143_s19  ;;  %85 = vrot.lane.b32.xlu1 %v114_v14, %s144_s20 }
  0x1e   :  { %91 = vrot.lane.b32.xlu0 %v115_v15, %s145_s0 }
  0x74   :  { %v8_v16 = vpop.permute.xlu0 %7   ;;  %v20_v17 = vpop.permute.xlu1 %19  }
  0x75   :  { %10 = vst.msk [vmem:[#allocation0] sm:$0x1] %vm9_vm1, %v8_v16  }
  0x78   :  { %v14_v18 = vpop.permute.xlu0 %13   ;;  %v26_v19 = vpop.permute.xlu1 %25  }
  0x79   :  { %16 = vst.msk [vmem:[#allocation0] sm:$0x1] %vm15_vm2, %v14_v18  }
  0x7a   :  { %22 = vst.msk [vmem:[#allocation0] sm:$0x1] %vm21_vm3, %v20_v17  }
  0x7b   :  { %28 = vst.msk [vmem:[#allocation0] sm:$0x1] %vm27_vm4, %v26_v19  }
  0x7c   :  { %v32_v20 = vpop.permute.xlu0 %31   ;;  %v38_v21 = vpop.permute.xlu1 %37  }
  0x7d   :  { %34 = vst.msk [vmem:[#allocation0] sm:$0x1] %vm33_vm5, %v32_v20  }
  0x7e   :  { %40 = vst.msk [vmem:[#allocation0] sm:$0x1] %vm39_vm6, %v38_v21  }
  0x80   :  { %v44_v22 = vpop.permute.xlu0 %43   ;;  %v50_v23 = vpop.permute.xlu1 %49  }
  0x81   :  { %46 = vst.msk [vmem:[#allocation0] sm:$0x1] %vm45_vm7, %v44_v22  }
  0x82   :  { %52 = vst.msk [vmem:[#allocation0] sm:$0x1] %vm51_vm8, %v50_v23  }
  0x84   :  { %v56_v24 = vpop.permute.xlu0 %55   ;;  %v62_v25 = vpop.permute.xlu1 %61  }
  0x85   :  { %58 = vst.msk [vmem:[#allocation0] sm:$0x1] %vm57_vm9, %v56_v24  }
  0x86   :  { %64 = vst.msk [vmem:[#allocation0] sm:$0x1] %vm63_vm10, %v62_v25  }
  0x88   :  { %v68_v26 = vpop.permute.xlu0 %67   ;;  %v74_v27 = vpop.permute.xlu1 %73  }
  0x89   :  { %70 = vst.msk [vmem:[#allocation0] sm:$0x1] %vm69_vm11, %v68_v26  }
  0x8a   :  { %76 = vst.msk [vmem:[#allocation0] sm:$0x1] %vm75_vm12, %v74_v27  }
  0x8c   :  { %v80_v28 = vpop.permute.xlu0 %79   ;;  %v86_v29 = vpop.permute.xlu1 %85  }
  0x8d   :  { %82 = vst.msk [vmem:[#allocation0] sm:$0x1] %vm81_vm13, %v80_v28  }
  0x8e   :  { %88 = vst.msk [vmem:[#allocation0] sm:$0x1] %vm87_vm14, %v86_v29  }
  0x90   :  { %v92_v30 = vpop.permute.xlu0 %91  }
  0x91   :  { %94 = vst.msk [vmem:[#allocation0] sm:$0x1] %vm93_vm15, %v92_v30  }
  0x98   :  { %v98_v31 = vld [vmem:[#allocation0] sm:$0x1] }
  0x99   :  { %100 = vst [vmem:[%s208_s1] sm:$0x1] %v98_v31 }

// kernel: acmix_forward.2
= control target key start
LH: loop header
LB: loop body
LE: loop exit
PB: predicated region body
PF: predicated region fallthrough
CT: control target
= control target key end

     0   :  { %s794_s12 = smov 0   ;;  %s958_s0 = inlined_call_operand.vmem [shape: f32[512,4], index: 0, kind: input, shape index: {}]   ;;  %s959_s1 = inlined_call_operand.vmem [shape: f32[4,128], index: 1, kind: input, shape index: {}]   ;;  %s960_s2 = inlined_call_operand.vmem [shape: f32[1,128], index: 2, kind: input, shape index: {}]   ;;  %s961_s3 = inlined_call_operand.vmem [shape: f32[512,128], index: 3, kind: output, shape index: {}]  }
   0x1 LB: > { %s628_s13 = sadd.s32 4294967295, %s772_s12   ;;  %p632_p0 = scmp.ge.s32.totalorder %s772_s12, 1  ;;  %s772_s12 = sphi %s794_s12, %s13_s12  }
   0x2   : > { %p138_p1 = scmp.lt.s32.totalorder %s772_s12, 3 }
   0x4   : > { %p139_p2 = pnand %p632_p0, %p138_p1 }
   0x5   : > { %v206_v0 = vld [vmem:[%s959_s1] sm:$0xf] (!%p139_p2)  ;;  %vm311_vm0 = vcmask (!%p139_p2), 1043456   ;;  %s633_s16 = sshll.u32 (!%p139_p2), %s628_s13, 5  ;;  %vm214_vm1 = vcmask (!%p139_p2), 31744  }
   0x6   : > { %142 = sbr.rel (%p139_p2) target bundleno = 263 (0x107), region = 32  ;;  %706 = vmatprep.subr.msk.mxu0 (!%p139_p2), %vm311_vm0, %v206_v0  ;;  %756 = vmatprep.subr.msk.mxu1 (!%p139_p2), %vm311_vm0, %v206_v0  ;;  %p163_p3 = scmp.lt.s32.totalorder (!%p139_p2), %s633_s16, 63  ;;  %v882_v33 = vld [vmem:[%s960_s2] ss:$0 sm:$0xff] (!%p139_p2) }
   0x7   : > { %707 = vmatpush3.msk.msra.mxu0 (!%p139_p2), %vm311_vm0, %v206_v0  ;;  %757 = vmatpush3.msk.msra.mxu1 (!%p139_p2), %vm311_vm0, %v206_v0 }
   0xd   : > { %s963_s16 = smov (!%p163_p3, %s633_s16), 63 }
   0xe   : > { %s634_s17 = sshll.u32 %s963_s16, 3 }
   0xf   : > { %s813_s20 = scalar_lea.vmem %s958_s0, %s634_s17  ;;  %s889_s25 = scalar_lea.vmem %s961_s3, %s634_s17 }
  0x10   : > { %v174_v1 = vld [vmem:[%s813_s20] sm:$0xff]  ;;  %v175_v3 = vld [vmem:[%s813_s20 + $0x8] sm:$0xff]  ;;  %v176_v5 = vld [vmem:[%s813_s20 + $0x10] sm:$0xff] }
  0x11   : > { %v190_v2 = vld [vmem:[%s813_s20 + $0x80] sm:$0xff]  ;;  %708 = vmatprep.mubr.msk.f32.mxu0 %vm214_vm1, %v174_v1  ;;  %v191_v4 = vld [vmem:[%s813_s20 + $0x88] sm:$0xff]  ;;  %v192_v6 = vld [vmem:[%s813_s20 + $0x90] sm:$0xff] }
  0x12   : > { %732 = vmatprep.mubr.msk.f32.mxu1 %vm214_vm1, %v190_v2  ;;  %709 = vmatmul.mubr.msk.f32.vlgmr.msra.gmra.mrb[0].mxu0 %vm214_vm1, %v175_v3  ;;  %v177_v7 = vld [vmem:[%s813_s20 + $0x18] sm:$0xff]  ;;  %v178_v9 = vld [vmem:[%s813_s20 + $0x20] sm:$0xff]  ;;  %v179_v11 = vld [vmem:[%s813_s20 + $0x28] sm:$0xff] }
  0x13   : > { %733 = vmatmul.mubr.msk.f32.vlgmr.msra.gmra.mrb[0].mxu1 %vm214_vm1, %v191_v4  ;;  %711 = vmatprep.mubr.msk.f32.mxu0 %vm214_vm1, %v176_v5  ;;  %v193_v8 = vld [vmem:[%s813_s20 + $0x98] sm:$0xff]  ;;  %v194_v10 = vld [vmem:[%s813_s20 + $0xa0] sm:$0xff]  ;;  %v195_v12 = vld [vmem:[%s813_s20 + $0xa8] sm:$0xff] }
  0x14   : > { %735 = vmatprep.mubr.msk.f32.mxu1 %vm214_vm1, %v192_v6  ;;  %v180_v13 = vld [vmem:[%s813_s20 + $0x30] sm:$0xff]  ;;  %v181_v15 = vld [vmem:[%s813_s20 + $0x38] sm:$0xff]  ;;  %v182_v17 = vld [vmem:[%s813_s20 + $0x40] sm:$0xff] }
  0x15   : > { %v196_v14 = vld [vmem:[%s813_s20 + $0xb0] sm:$0xff]  ;;  %v197_v16 = vld [vmem:[%s813_s20 + $0xb8] sm:$0xff]  ;;  %v198_v18 = vld [vmem:[%s813_s20 + $0xc0] sm:$0xff] }
  0x16   : > { %712 = vmatmul.mubr.msk.f32.gmra.mrb[2].mxu0 %vm214_vm1, %v177_v7  ;;  %v183_v19 = vld [vmem:[%s813_s20 + $0x48] sm:$0xff]  ;;  %v184_v21 = vld [vmem:[%s813_s20 + $0x50] sm:$0xff]  ;;  %v185_v23 = vld [vmem:[%s813_s20 + $0x58] sm:$0xff] }
  0x17   : > { %736 = vmatmul.mubr.msk.f32.gmra.mrb[2].mxu1 %vm214_vm1, %v193_v8  ;;  %714 = vmatprep.mubr.msk.f32.mxu0 %vm214_vm1, %v178_v9  ;;  %v199_v20 = vld [vmem:[%s813_s20 + $0xc8] sm:$0xff]  ;;  %v200_v22 = vld [vmem:[%s813_s20 + $0xd0] sm:$0xff]  ;;  %v201_v24 = vld [vmem:[%s813_s20 + $0xd8] sm:$0xff] }
  0x18   : > { %738 = vmatprep.mubr.msk.f32.mxu1 %vm214_vm1, %v194_v10  ;;  %v186_v25 = vld [vmem:[%s813_s20 + $0x60] sm:$0xff]  ;;  %v187_v27 = vld [vmem:[%s813_s20 + $0x68] sm:$0xff]  ;;  %v188_v29 = vld [vmem:[%s813_s20 + $0x70] sm:$0xff] }
  0x19   : > { %v202_v26 = vld [vmem:[%s813_s20 + $0xe0] sm:$0xff]  ;;  %v203_v28 = vld [vmem:[%s813_s20 + $0xe8] sm:$0xff]  ;;  %v204_v30 = vld [vmem:[%s813_s20 + $0xf0] sm:$0xff] }
  0x1a   : > { %715 = vmatmul.mubr.msk.f32.gmra.mrb[4].mxu0 %vm214_vm1, %v179_v11  ;;  %v189_v31 = vld [vmem:[%s813_s20 + $0x78] sm:$0xff] }
  0x1b   : > { %739 = vmatmul.mubr.msk.f32.gmra.mrb[4].mxu1 %vm214_vm1, %v195_v12  ;;  %717 = vmatprep.mubr.msk.f32.mxu0 %vm214_vm1, %v180_v13  ;;  %v205_v32 = vld [vmem:[%s813_s20 + $0xf8] sm:$0xff] }
  0x1c   : > { %741 = vmatprep.mubr.msk.f32.mxu1 %vm214_vm1, %v196_v14 }
  0x1e   : > { %718 = vmatmul.mubr.msk.f32.gmra.mrb[6].mxu0 %vm214_vm1, %v181_v15 }
  0x1f   : > { %742 = vmatmul.mubr.msk.f32.gmra.mrb[6].mxu1 %vm214_vm1, %v197_v16  ;;  %720 = vmatprep.mubr.msk.f32.mxu0 %vm214_vm1, %v182_v17 }
  0x20   : > { %744 = vmatprep.mubr.msk.f32.mxu1 %vm214_vm1, %v198_v18 }
  0x22   : > { %721 = vmatmul.mubr.msk.f32.gmra.mrb[8].mxu0 %vm214_vm1, %v183_v19 }
  0x23   : > { %745 = vmatmul.mubr.msk.f32.gmra.mrb[8].mxu1 %vm214_vm1, %v199_v20  ;;  %723 = vmatprep.mubr.msk.f32.mxu0 %vm214_vm1, %v184_v21 }
  0x24   : > { %747 = vmatprep.mubr.msk.f32.mxu1 %vm214_vm1, %v200_v22 }
  0x26   : > { %724 = vmatmul.mubr.msk.f32.gmra.mrb[10].mxu0 %vm214_vm1, %v185_v23 }
  0x27   : > { %748 = vmatmul.mubr.msk.f32.gmra.mrb[10].mxu1 %vm214_vm1, %v201_v24  ;;  %726 = vmatprep.mubr.msk.f32.mxu0 %vm214_vm1, %v186_v25 }
  0x28   : > { %750 = vmatprep.mubr.msk.f32.mxu1 %vm214_vm1, %v202_v26 }
  0x2a   : > { %727 = vmatmul.mubr.msk.f32.gmra.mrb[12].mxu0 %vm214_vm1, %v187_v27 }
  0x2b   : > { %751 = vmatmul.mubr.msk.f32.gmra.mrb[12].mxu1 %vm214_vm1, %v203_v28  ;;  %729 = vmatprep.mubr.msk.f32.mxu0 %vm214_vm1, %v188_v29 }
  0x2c   : > { %753 = vmatprep.mubr.msk.f32.mxu1 %vm214_vm1, %v204_v30 }
  0x2e   : > { %730 = vmatmul.mubr.msk.f32.gmra.mrb[14].mxu0 %vm214_vm1, %v189_v31 }
  0x2f   : > { %754 = vmatmul.mubr.msk.f32.gmra.mrb[14].mxu1 %vm214_vm1, %v205_v32 }
  0xe5   : > { %v710_v34 = vpop.f32.mrb[0].mxu0 }
  0xe6   : > { %v734_v35 = vpop.f32.mrb[0].mxu1  ;;  %v387_v36 = vadd.f32 %v710_v34, %v882_v33  ;;  %v381_v38 = vpop.f32.mrb[1].mxu0 }
  0xe7   : > { %v467_v37 = vadd.f32 %v734_v35, %v882_v33  ;;  %v461_v39 = vpop.f32.mrb[1].mxu1  ;;  %v382_v40 = vadd.f32 %v882_v33, %v381_v38 }
  0xe8   : > { %v462_v41 = vadd.f32 %v882_v33, %v461_v39  ;;  %541 = vst [vmem:[%s889_s25 + $0x8] sm:$0xff] %v387_v36 }
  0xe9   : > { %557 = vst [vmem:[%s889_s25 + $0x88] sm:$0xff] %v467_v37  ;;  %540 = vst [vmem:[%s889_s25] sm:$0xff] %v382_v40  ;;  %v713_v42 = vpop.f32.mrb[2].mxu0 }
  0xea   : > { %556 = vst [vmem:[%s889_s25 + $0x80] sm:$0xff] %v462_v41  ;;  %v737_v43 = vpop.f32.mrb[2].mxu1  ;;  %v397_v44 = vadd.f32 %v713_v42, %v882_v33  ;;  %v391_v46 = vpop.f32.mrb[3].mxu0 }
  0xeb   : > { %v477_v45 = vadd.f32 %v737_v43, %v882_v33  ;;  %v471_v47 = vpop.f32.mrb[3].mxu1  ;;  %v392_v48 = vadd.f32 %v882_v33, %v391_v46 }
  0xec   : > { %v472_v49 = vadd.f32 %v882_v33, %v471_v47  ;;  %543 = vst [vmem:[%s889_s25 + $0x18] sm:$0xff] %v397_v44 }
  0xed   : > { %559 = vst [vmem:[%s889_s25 + $0x98] sm:$0xff] %v477_v45  ;;  %542 = vst [vmem:[%s889_s25 + $0x10] sm:$0xff] %v392_v48  ;;  %v716_v50 = vpop.f32.mrb[4].mxu0 }
  0xee   : > { %558 = vst [vmem:[%s889_s25 + $0x90] sm:$0xff] %v472_v49  ;;  %v740_v51 = vpop.f32.mrb[4].mxu1  ;;  %v407_v52 = vadd.f32 %v716_v50, %v882_v33  ;;  %v401_v54 = vpop.f32.mrb[5].mxu0 }
  0xef   : > { %v487_v53 = vadd.f32 %v740_v51, %v882_v33  ;;  %v481_v55 = vpop.f32.mrb[5].mxu1  ;;  %v402_v56 = vadd.f32 %v882_v33, %v401_v54 }
  0xf0   : > { %v482_v57 = vadd.f32 %v882_v33, %v481_v55  ;;  %545 = vst [vmem:[%s889_s25 + $0x28] sm:$0xff] %v407_v52 }
  0xf1   : > { %561 = vst [vmem:[%s889_s25 + $0xa8] sm:$0xff] %v487_v53  ;;  %544 = vst [vmem:[%s889_s25 + $0x20] sm:$0xff] %v402_v56  ;;  %v719_v58 = vpop.f32.mrb[6].mxu0 }
  0xf2   : > { %560 = vst [vmem:[%s889_s25 + $0xa0] sm:$0xff] %v482_v57  ;;  %v743_v59 = vpop.f32.mrb[6].mxu1  ;;  %v417_v60 = vadd.f32 %v719_v58, %v882_v33  ;;  %v411_v62 = vpop.f32.mrb[7].mxu0 }
  0xf3   : > { %v497_v61 = vadd.f32 %v743_v59, %v882_v33  ;;  %v491_v63 = vpop.f32.mrb[7].mxu1  ;;  %v412_v0 = vadd.f32 %v882_v33, %v411_v62 }
  0xf4   : > { %v492_v1 = vadd.f32 %v882_v33, %v491_v63  ;;  %547 = vst [vmem:[%s889_s25 + $0x38] sm:$0xff] %v417_v60 }
  0xf5   : > { %563 = vst [vmem:[%s889_s25 + $0xb8] sm:$0xff] %v497_v61  ;;  %546 = vst [vmem:[%s889_s25 + $0x30] sm:$0xff] %v412_v0  ;;  %v722_v2 = vpop.f32.mrb[8].mxu0 }
  0xf6   : > { %562 = vst [vmem:[%s889_s25 + $0xb0] sm:$0xff] %v492_v1  ;;  %v746_v3 = vpop.f32.mrb[8].mxu1  ;;  %v427_v4 = vadd.f32 %v722_v2, %v882_v33  ;;  %v421_v6 = vpop.f32.mrb[9].mxu0 }
  0xf7   : > { %v507_v5 = vadd.f32 %v746_v3, %v882_v33  ;;  %v501_v7 = vpop.f32.mrb[9].mxu1  ;;  %v422_v8 = vadd.f32 %v882_v33, %v421_v6 }
  0xf8   : > { %v502_v9 = vadd.f32 %v882_v33, %v501_v7  ;;  %549 = vst [vmem:[%s889_s25 + $0x48] sm:$0xff] %v427_v4 }
  0xf9   : > { %565 = vst [vmem:[%s889_s25 + $0xc8] sm:$0xff] %v507_v5  ;;  %548 = vst [vmem:[%s889_s25 + $0x40] sm:$0xff] %v422_v8  ;;  %v725_v10 = vpop.f32.mrb[10].mxu0 }
  0xfa   : > { %564 = vst [vmem:[%s889_s25 + $0xc0] sm:$0xff] %v502_v9  ;;  %v749_v11 = vpop.f32.mrb[10].mxu1  ;;  %v437_v12 = vadd.f32 %v725_v10, %v882_v33  ;;  %v431_v14 = vpop.f32.mrb[11].mxu0 }
  0xfb   : > { %v517_v13 = vadd.f32 %v749_v11, %v882_v33  ;;  %v511_v15 = vpop.f32.mrb[11].mxu1  ;;  %v432_v16 = vadd.f32 %v882_v33, %v431_v14 }
  0xfc   : > { %v512_v17 = vadd.f32 %v882_v33, %v511_v15  ;;  %551 = vst [vmem:[%s889_s25 + $0x58] sm:$0xff] %v437_v12 }
  0xfd   : > { %567 = vst [vmem:[%s889_s25 + $0xd8] sm:$0xff] %v517_v13  ;;  %550 = vst [vmem:[%s889_s25 + $0x50] sm:$0xff] %v432_v16  ;;  %v728_v18 = vpop.f32.mrb[12].mxu0 }
  0xfe   : > { %566 = vst [vmem:[%s889_s25 + $0xd0] sm:$0xff] %v512_v17  ;;  %v752_v19 = vpop.f32.mrb[12].mxu1  ;;  %v447_v20 = vadd.f32 %v728_v18, %v882_v33  ;;  %v441_v22 = vpop.f32.mrb[13].mxu0 }
  0xff   : > { %v527_v21 = vadd.f32 %v752_v19, %v882_v33  ;;  %v521_v23 = vpop.f32.mrb[13].mxu1  ;;  %v442_v24 = vadd.f32 %v882_v33, %v441_v22 }
 0x100   : > { %v522_v25 = vadd.f32 %v882_v33, %v521_v23  ;;  %553 = vst [vmem:[%s889_s25 + $0x68] sm:$0xff] %v447_v20 }
 0x101   : > { %569 = vst [vmem:[%s889_s25 + $0xe8] sm:$0xff] %v527_v21  ;;  %552 = vst [vmem:[%s889_s25 + $0x60] sm:$0xff] %v442_v24  ;;  %v731_v26 = vpop.f32.mrb[14].mxu0 }
 0x102   : > { %568 = vst [vmem:[%s889_s25 + $0xe0] sm:$0xff] %v522_v25  ;;  %v755_v27 = vpop.f32.mrb[14].mxu1  ;;  %v457_v28 = vadd.f32 %v731_v26, %v882_v33  ;;  %v451_v30 = vpop.f32.mrb[15].mxu0 }
 0x103   : > { %v537_v29 = vadd.f32 %v755_v27, %v882_v33  ;;  %v531_v31 = vpop.f32.mrb[15].mxu1  ;;  %v452_v32 = vadd.f32 %v882_v33, %v451_v30 }
 0x104   : > { %v532_v34 = vadd.f32 %v882_v33, %v531_v31  ;;  %555 = vst [vmem:[%s889_s25 + $0x78] sm:$0xff] %v457_v28 }
 0x105   : > { %571 = vst [vmem:[%s889_s25 + $0xf8] sm:$0xff] %v537_v29  ;;  %554 = vst [vmem:[%s889_s25 + $0x70] sm:$0xff] %v452_v32 }
 0x106   : > { %570 = vst [vmem:[%s889_s25 + $0xf0] sm:$0xff] %v532_v34 }
 0x107 PF: > { %s13_s12 = sadd.s32 1, %s772_s12  }
 0x108   : > { %p10_p4 = scmp.ge.s32.totalorder %s13_s12, 4  }
 0x10a   :  { %12 = sbr.rel (!%p10_p4) target bundleno = 1 (0x1), region = 62 }

// kernel: acmix_forward.3
= control target key start
LH: loop header
LB: loop body
LE: loop exit
PB: predicated region body
PF: predicated region fallthrough
CT: control target
= control target key end

     0   :  { %16 = vsyncpa [#allocation4], 0  ;;  %s11897_s17 = smov 0   ;;  %s16421_s0 = inlined_call_operand.vmem [shape: f32[2,16,128], index: 0, kind: input, shape index: {}]   ;;  %s16422_s1 = inlined_call_operand.vmem [shape: f32[2,22,176], index: 1, kind: input, shape index: {}]   ;;  %s16423_s2 = inlined_call_operand.vmem [shape: f32[2,22,176], index: 2, kind: input, shape index: {}]   ;;  %s16424_s3 = inlined_call_operand.vmem [shape: f32[16,128], index: 3, kind: input, shape index: {}]   ;;  %s16425_s4 = inlined_call_operand.vmem [shape: f32[2,18,144], index: 4, kind: input, shape index: {}]   ;;  %s16426_s5 = inlined_call_operand.vmem [shape: f32[2,18,144], index: 5, kind: input, shape index: {}]   ;;  %s16427_s6 = inlined_call_operand.vmem [shape: f32[2,18,144], index: 6, kind: input, shape index: {}]   ;;  %s16428_s7 = inlined_call_operand.vmem [shape: f32[128,128], index: 7, kind: input, shape index: {}]   ;;  %s16429_s8 = inlined_call_operand.vmem [shape: f32[27], index: 8, kind: input, shape index: {}]   ;;  %s16430_s9 = inlined_call_operand.vmem [shape: f32[1,128], index: 9, kind: input, shape index: {}]   ;;  %s16431_s10 = inlined_call_operand.vmem [shape: f32[1,128], index: 10, kind: input, shape index: {}]   ;;  %s16432_s11 = inlined_call_operand.vmem [shape: f32[2,16,128], index: 11, kind: output, shape index: {}]  }
   0x1 LB: > { %s11903_s18 = sadd.s32 4294967295, %s11828_s17   ;;  %p7244_p0 = scmp.ge.s32.totalorder %s11828_s17, 1  ;;  %s11828_s17 = sphi %s11897_s17, %s22_s17  }
   0x2   : > { %p314_p1 = scmp.lt.s32.totalorder %s11828_s17, 3  ;;  %s333_s21 = sshll.u32 %s16429_s8, 4  ;;  %s334_s21 = int_to_ptr.vmem [resolvable:$true] %s333_s21 }
   0x3   : > { %p11549_p3 = scmp.eq.s32.totalorder %s11903_s18, 0  ;;  %s11803_s23 = scalar_lea.vmem %s334_s21, 16 }
   0x4   : > { %p11910_p2 = pnand %p7244_p0, %p314_p1  ;;  %p11804_p6 = scmp.ne.s32.totalorder %s334_s21, %s11803_s23 }
   0x5   : > { %p11811_p10 = scmp.lt.s32.totalorder %s334_s21, %s334_s21  ;;  %p11812_p11 = scmp.lt.s32.totalorder %s11803_s23, %s11803_s23 }
   0x6   : > { %p11545_p4 = pneg %p11910_p2 }
   0x7   : > { %p11813_p12 = por %p11812_p11, %p11811_p10 }
   0x8   : > { %p11546_p5 = pnand %p11549_p3, %p11545_p4 }
   0xa   : > { %p11805_p7 = pneg %p11546_p5 }
   0xc   : > { %p11806_p8 = pnand %p11805_p7, %p11804_p6 }
   0xe   : > { %p11807_p9 = pneg %p11806_p8 }
  0x10   : > { %p11814_p13 = pnand %p11813_p12, %p11807_p9 }
  0x12   : > { %11817 = shalt.err (!%p11814_p13)
}
  0x13   : > { %s11830_s24 = smov [#allocation3]   ;;  %400 = sbr.rel (%p11910_p2) target bundleno = 1393 (0x571), region = 64 }
  0x14   : > { %11548 = dma.vmem_to_smem (!%p11546_p5), %s334_s21, 16, %s11830_s24, [#allocation4]  }
  0x1a   : > { %11823 = dma.done.wait (%p11549_p3), [#allocation4], 16  }
  0x1b   : > { %11825 = vsyncadd (%p11549_p3), [#allocation4], 4294967280 }
  0x1c   : > { %406 = sfence }
  0x1d   : > { %p466_p0 = scmp.lt.s32.totalorder %s11903_s18, 1  ;;  %v503_v0 = vld [vmem:[%s16428_s7] sm:$0xff]  ;;  %v504_v1 = vld [vmem:[%s16428_s7 + $0x8] sm:$0xff]  ;;  %v505_v2 = vld [vmem:[%s16428_s7 + $0x10] sm:$0xff]  ;;  %s11831_s15 = smov 120   ;;  %vm1264_vm0 = vcmask 1046528  }
  0x1e   : > { %v11935_v3 = vpack.c.bf16 %v504_v1, %v503_v0  ;;  %v506_v4 = vld [vmem:[%s16428_s7 + $0x18] sm:$0xff]  ;;  %v507_v6 = vld [vmem:[%s16428_s7 + $0x20] sm:$0xff]  ;;  %v508_v7 = vld [vmem:[%s16428_s7 + $0x28] sm:$0xff]  ;;  %s11832_s30 = smov 112   ;;  %s11833_s26 = smov 104   ;;  %vm1935_vm1 = vcmask 1045504  }
  0x1f   : > { %s17305_s18 = smov (!%p466_p0, %s11903_s18), 1  ;;  %v11943_v5 = vpack.c.bf16 %v506_v4, %v505_v2  ;;  %v519_v8 = vld [vmem:[%s16424_s3] sm:$0xff]  ;;  %v11980_v10 = vpack.c.bf16 %v508_v7, %v507_v6  ;;  %v509_v11 = vld [vmem:[%s16428_s7 + $0x30] sm:$0xff]  ;;  %v510_v14 = vld [vmem:[%s16428_s7 + $0x38] sm:$0xff]  ;;  %s11834_s12 = smov 96   ;;  %vm693_vm2 = vcmask 982016  }
  0x20   : > { %9941 = vmatprep.subr.bf16.mxu0 %v11935_v3  ;;  %9973 = vmatprep.subr.bf16.mxu1 %v11935_v3  ;;  %s11954_s20 = smul.u32 48, %s17305_s18  ;;  %s16480_s21 = sshll.u32 %s17305_s18, 4  ;;  %v12010_v19 = vpack.c.bf16 %v510_v14, %v509_v11  ;;  %v511_v20 = vld [vmem:[%s16428_s7 + $0x40] sm:$0xff]  ;;  %v512_v21 = vld [vmem:[%s16428_s7 + $0x48] sm:$0xff]  ;;  %v513_v23 = vld [vmem:[%s16428_s7 + $0x50] sm:$0xff]  ;;  %vm788_vm3 = vcmask 916480  }
  0x21   : > { %9943 = vmatpush3.bf16.msra.mxu0 %v11935_v3  ;;  %9975 = vmatpush3.bf16.msra.mxu1 %v11935_v3  ;;  %s11964_s24 = scalar_lea.vmem %s16421_s0, %s16480_s21  ;;  %v12026_v22 = vpack.c.bf16 %v512_v21, %v511_v20  ;;  %v514_v24 = vld [vmem:[%s16428_s7 + $0x58] sm:$0xff]  ;;  %v515_v26 = vld [vmem:[%s16428_s7 + $0x60] sm:$0xff]  ;;  %v516_v27 = vld [vmem:[%s16428_s7 + $0x68] sm:$0xff]  ;;  %s16481_s13 = smov 88   ;;  %vm883_vm4 = vcmask 850944   ;;  %vm978_vm5 = vcmask 785408  }
  0x22   : > { %9945 = vmatprep.subr.bf16.mxu0 %v11943_v5  ;;  %9977 = vmatprep.subr.bf16.mxu1 %v11943_v5  ;;  %s11975_s29 = scalar_lea.vmem %s16422_s1, %s11954_s20  ;;  %v11978_v9 = vld [vmem:[%s11964_s24] sm:$0xff]  ;;  %v12042_v25 = vpack.c.bf16 %v514_v24, %v513_v23  ;;  %v12058_v28 = vpack.c.bf16 %v516_v27, %v515_v26  ;;  %v517_v29 = vld [vmem:[%s16428_s7 + $0x70] sm:$0xff]  ;;  %v518_v30 = vld [vmem:[%s16428_s7 + $0x78] sm:$0xff]  ;;  %s11836_s14 = smov 80   ;;  %vm1073_vm6 = vcmask 719872   ;;  %vm1168_vm7 = vcmask 654336  }
  0x23   : > { %v11986_v12 = vld [vmem:[%s11975_s29 + $0x10] sm:$0xff]  ;;  %v11989_v13 = vld [vmem:[%s11975_s29] sm:$0xff]  ;;  %v521_v15 = vmul.f32 %v519_v8, %v11978_v9  ;;  %v12002_v17 = vld [vmem:[%s11975_s29 + $0x18] sm:$0xff]  ;;  %v12074_v31 = vpack.c.bf16 %v518_v30, %v517_v29  ;;  %vm2606_vm8 = vcmask 1044480   ;;  %vm3277_vm9 = vcmask 1043456   ;;  %s13203_s19 = scalar_lea.vmem %s16423_s2, %s11954_s20  ;;  %s14431_s22 = sld [smem:[#allocation3 + $0x3]] }
  0x24   : > { %689 = vrot.lane.b32.xlu1 %v11986_v12, %s11831_s15  ;;  %685 = vrot.lane.b32.xlu0 %v11989_v13, %s11831_s15  ;;  %v602_v16 = vmul.f32 %v11989_v13, %v11978_v9  ;;  %v12005_v18 = vld [vmem:[%s11975_s29 + $0x8] sm:$0xff]  ;;  %v1255_v37 = vld [vmem:[%s11975_s29] sm:$0xfe]  ;;  %v1358_v39 = vrot.slane %v12002_v17, 1  ;;  %v1266_v41 = vrot.slane %v11986_v12, 1  ;;  %v2029_v53 = vrot.slane %v12002_v17, 2  ;;  %s14494_s28 = scalar_lea.vmem %s16427_s6, %s11954_s20 }
  0x25   : > { %9947 = vmatpush3.bf16.msra.mxu0 %v11943_v5  ;;  %9979 = vmatpush3.bf16.msra.mxu1 %v11943_v5  ;;  %v12084_v32 = vld [vmem:[%s11964_s24 + $0x8] sm:$0xff]  ;;  %v1265_v40 = vrot.slane %v1255_v37, 1  ;;  %v1259_v43 = vld [vmem:[%s11975_s29 + $0x20] sm:$0x1]  ;;  %v1926_v51 = vld [vmem:[%s11975_s29] sm:$0xfc] }
  0x26   : > { %9949 = vmatprep.subr.bf16.mxu0 %v11980_v10  ;;  %9981 = vmatprep.subr.bf16.mxu1 %v11980_v10  ;;  %v520_v33 = vld [vmem:[%s16424_s3 + $0x8] sm:$0xff]  ;;  %v603_v35 = vmul.f32 %v11986_v12, %v12084_v32  ;;  %v1268_v47 = vrot.slane %v1259_v43, 1  ;;  %v1936_v54 = vrot.slane %v1926_v51, 2  ;;  %v1937_v55 = vrot.slane %v11986_v12, 2  ;;  %v1930_v59 = vld [vmem:[%s11975_s29 + $0x20] sm:$0x3] }
  0x27   : > { %8222 = vmatprep.mubr.f32.mxu0 %v521_v15  ;;  %8257 = vmatprep.mubr.f32.mxu1 %v602_v16  ;;  %v522_v34 = vmul.f32 %v520_v33, %v12084_v32  ;;  %v1256_v36 = vld [vmem:[%s11975_s29 + $0x8] sm:$0xfe]  ;;  %v1260_v42 = vld [vmem:[%s11975_s29 + $0x28] sm:$0x1]  ;;  %v12146_v45 = vsel %vm1264_vm0, %v1265_v40, %v1266_v41  ;;  %v1939_v61 = vrot.slane %v1930_v59, 2  ;;  %vm3948_vm10 = vcmask 1042432  }
  0x28   : > { %691 = vrot.lane.b32.xlu1 %v12002_v17, %s11831_s15  ;;  %687 = vrot.lane.b32.xlu0 %v12005_v18, %s11831_s15  ;;  %v1357_v38 = vrot.slane %v1256_v36, 1  ;;  %v1360_v46 = vrot.slane %v1260_v42, 1  ;;  %v12157_v49 = vsel %vm1264_vm0, %v1266_v41, %v1268_v47  ;;  %v1927_v50 = vld [vmem:[%s11975_s29 + $0x8] sm:$0xfc]  ;;  %v12212_v57 = vsel %vm1935_vm1, %v1936_v54, %v1937_v55  ;;  %v1931_v58 = vld [vmem:[%s11975_s29 + $0x28] sm:$0x3] }
  0x29   : > { %9951 = vmatpush3.bf16.msra.mxu0 %v11980_v10  ;;  %9983 = vmatpush3.bf16.msra.mxu1 %v11980_v10  ;;  %v2028_v52 = vrot.slane %v1927_v50, 2  ;;  %v2031_v60 = vrot.slane %v1931_v58, 2  ;;  %v12224_v63 = vsel %vm1935_vm1, %v1937_v55, %v1939_v61  ;;  %v1272_v61 = vmul.f32 %v12146_v45, %v11978_v9  ;;  %s14433_s23 = sld [smem:[#allocation3 + $0x4]]  ;;  %s14453_s25 = sld [smem:[#allocation3 + $0x5]] }
  0x2a   : > { %9953 = vmatprep.subr.bf16.mxu0 %v12010_v19  ;;  %9985 = vmatprep.subr.bf16.mxu1 %v12010_v19  ;;  %v1359_v44 = vsel %vm1264_vm0, %v1357_v38, %v1358_v39  ;;  %v1361_v48 = vsel %vm1264_vm0, %v1358_v39, %v1360_v46  ;;  %vm4619_vm11 = vcmask 1041408   ;;  %s14660_s16 = sld [smem:[#allocation3 + $0xd]]  ;;  %s14682_s21 = sld [smem:[#allocation3 + $0xe]] }
  0x2b   : > { %v12209_v56 = vsel %vm1935_vm1, %v2028_v52, %v2029_v53  ;;  %v12221_v62 = vsel %vm1935_vm1, %v2029_v53, %v2031_v60  ;;  %s14768_s27 = sld [smem:[#allocation3 + $0xf]] }
  0x2c   : > { %782 = vrot.lane.b32.xlu1 %v12005_v18, %s11832_s30  ;;  %780 = vrot.lane.b32.xlu0 %v11989_v13, %s11832_s30 }
  0x2d   : > { %9955 = vmatpush3.bf16.msra.mxu0 %v12010_v19  ;;  %9987 = vmatpush3.bf16.msra.mxu1 %v12010_v19 }
  0x2e   : > { %9957 = vmatprep.subr.bf16.mxu0 %v12026_v22  ;;  %9989 = vmatprep.subr.bf16.mxu1 %v12026_v22 }
  0x30   : > { %786 = vrot.lane.b32.xlu1 %v12002_v17, %s11832_s30  ;;  %784 = vrot.lane.b32.xlu0 %v11986_v12, %s11832_s30 }
  0x31   : > { %9959 = vmatpush3.bf16.msra.mxu0 %v12026_v22  ;;  %9991 = vmatpush3.bf16.msra.mxu1 %v12026_v22 }
  0x32   : > { %9961 = vmatprep.subr.bf16.mxu0 %v12042_v25  ;;  %9993 = vmatprep.subr.bf16.mxu1 %v12042_v25 }
  0x34   : > { %877 = vrot.lane.b32.xlu1 %v12005_v18, %s11833_s26  ;;  %875 = vrot.lane.b32.xlu0 %v11989_v13, %s11833_s26 }
  0x35   : > { %9963 = vmatpush3.bf16.msra.mxu0 %v12042_v25  ;;  %9995 = vmatpush3.bf16.msra.mxu1 %v12042_v25 }
  0x36   : > { %9965 = vmatprep.subr.bf16.mxu0 %v12058_v28  ;;  %9997 = vmatprep.subr.bf16.mxu1 %v12058_v28 }
  0x38   : > { %881 = vrot.lane.b32.xlu1 %v12002_v17, %s11833_s26  ;;  %879 = vrot.lane.b32.xlu0 %v11986_v12, %s11833_s26 }
  0x39   : > { %9967 = vmatpush3.bf16.msra.mxu0 %v12058_v28  ;;  %9999 = vmatpush3.bf16.msra.mxu1 %v12058_v28 }
  0x3a   : > { %9969 = vmatprep.subr.bf16.mxu0 %v12074_v31  ;;  %10001 = vmatprep.subr.bf16.mxu1 %v12074_v31 }
  0x3c   : > { %972 = vrot.lane.b32.xlu1 %v12005_v18, %s11834_s12  ;;  %970 = vrot.lane.b32.xlu0 %v11989_v13, %s11834_s12 }
  0x3d   : > { %9971 = vmatpush3.bf16.msra.mxu0 %v12074_v31  ;;  %10003 = vmatpush3.bf16.msra.mxu1 %v12074_v31 }
  0x3e   : > { %10005 = vmatprep.subr.bf16.mxu0 %v11935_v3  ;;  %10037 = vmatprep.subr.bf16.mxu1 %v11935_v3 }
  0x40   : > { %976 = vrot.lane.b32.xlu1 %v12002_v17, %s11834_s12  ;;  %974 = vrot.lane.b32.xlu0 %v11986_v12, %s11834_s12 }
  0x41   : > { %8223 = vmatmul.mubr.f32.vlgmr.msra.gmra.mrb[0].mxu0 %v522_v34  ;;  %8258 = vmatmul.mubr.f32.vlgmr.msra.gmra.mrb[0].mxu1 %v603_v35 }
  0x42   : > { %10007 = vmatpush3.bf16.msra.mxu0 %v11935_v3  ;;  %10039 = vmatpush3.bf16.msra.mxu1 %v11935_v3 }
  0x43   : > { %10009 = vmatprep.subr.bf16.mxu0 %v11943_v5  ;;  %10041 = vmatprep.subr.bf16.mxu1 %v11943_v5 }
  0x44   : > { %1067 = vrot.lane.b32.xlu1 %v12005_v18, %s16481_s13  ;;  %1065 = vrot.lane.b32.xlu0 %v11989_v13, %s16481_s13 }
  0x46   : > { %10011 = vmatpush3.bf16.msra.mxu0 %v11943_v5  ;;  %10043 = vmatpush3.bf16.msra.mxu1 %v11943_v5 }
  0x47   : > { %10013 = vmatprep.subr.bf16.mxu0 %v11980_v10  ;;  %10045 = vmatprep.subr.bf16.mxu1 %v11980_v10 }
  0x48   : > { %1071 = vrot.lane.b32.xlu1 %v12002_v17, %s16481_s13  ;;  %1069 = vrot.lane.b32.xlu0 %v11986_v12, %s16481_s13 }
  0x4a   : > { %10015 = vmatpush3.bf16.msra.mxu0 %v11980_v10  ;;  %10047 = vmatpush3.bf16.msra.mxu1 %v11980_v10 }
  0x4b   : > { %10017 = vmatprep.subr.bf16.mxu0 %v12010_v19  ;;  %10049 = vmatprep.subr.bf16.mxu1 %v12010_v19 }
  0x4c   : > { %1162 = vrot.lane.b32.xlu1 %v12005_v18, %s11836_s14  ;;  %1160 = vrot.lane.b32.xlu0 %v11989_v13, %s11836_s14 }
  0x4e   : > { %10019 = vmatpush3.bf16.msra.mxu0 %v12010_v19  ;;  %10051 = vmatpush3.bf16.msra.mxu1 %v12010_v19 }
  0x4f   : > { %10021 = vmatprep.subr.bf16.mxu0 %v12026_v22  ;;  %10053 = vmatprep.subr.bf16.mxu1 %v12026_v22 }
  0x50   : > { %1166 = vrot.lane.b32.xlu1 %v12002_v17, %s11836_s14  ;;  %1164 = vrot.lane.b32.xlu0 %v11986_v12, %s11836_s14 }
  0x52   : > { %10023 = vmatpush3.bf16.msra.mxu0 %v12026_v22  ;;  %10055 = vmatpush3.bf16.msra.mxu1 %v12026_v22 }
  0x53   : > { %10025 = vmatprep.subr.bf16.mxu0 %v12042_v25  ;;  %10057 = vmatprep.subr.bf16.mxu1 %v12042_v25 }
  0x54   : > { %1364 = vrot.lane.b32.xlu1 %v1359_v44, %s11831_s15  ;;  %1362 = vrot.lane.b32.xlu0 %v12146_v45, %s11831_s15 }
  0x56   : > { %10027 = vmatpush3.bf16.msra.mxu0 %v12042_v25  ;;  %10059 = vmatpush3.bf16.msra.mxu1 %v12042_v25 }
  0x57   : > { %10029 = vmatprep.subr.bf16.mxu0 %v12058_v28  ;;  %10061 = vmatprep.subr.bf16.mxu1 %v12058_v28 }
  0x58   : > { %1368 = vrot.lane.b32.xlu1 %v1361_v48, %s11831_s15  ;;  %1366 = vrot.lane.b32.xlu0 %v12157_v49, %s11831_s15 }
  0x5a   : > { %10031 = vmatpush3.bf16.msra.mxu0 %v12058_v28  ;;  %10063 = vmatpush3.bf16.msra.mxu1 %v12058_v28 }
  0x5b   : > { %10033 = vmatprep.subr.bf16.mxu0 %v12074_v31  ;;  %10065 = vmatprep.subr.bf16.mxu1 %v12074_v31 }
  0x5c   : > { %1458 = vrot.lane.b32.xlu1 %v1359_v44, %s11832_s30  ;;  %1456 = vrot.lane.b32.xlu0 %v12146_v45, %s11832_s30 }
  0x5e   : > { %10035 = vmatpush3.bf16.msra.mxu0 %v12074_v31  ;;  %10067 = vmatpush3.bf16.msra.mxu1 %v12074_v31 }
  0x5f   : > { %10069 = vmatprep.subr.bf16.mxu0 %v11935_v3  ;;  %10101 = vmatprep.subr.bf16.mxu1 %v11935_v3 }
  0x60   : > { %1462 = vrot.lane.b32.xlu1 %v1361_v48, %s11832_s30  ;;  %1460 = vrot.lane.b32.xlu0 %v12157_v49, %s11832_s30 }
  0x64   : > { %1552 = vrot.lane.b32.xlu1 %v1359_v44, %s11833_s26  ;;  %1550 = vrot.lane.b32.xlu0 %v12146_v45, %s11833_s26 }
  0x68   : > { %1556 = vrot.lane.b32.xlu1 %v1361_v48, %s11833_s26  ;;  %1554 = vrot.lane.b32.xlu0 %v12157_v49, %s11833_s26 }
  0x6c   : > { %1646 = vrot.lane.b32.xlu1 %v1359_v44, %s11834_s12  ;;  %1644 = vrot.lane.b32.xlu0 %v12146_v45, %s11834_s12 }
  0x70   : > { %1650 = vrot.lane.b32.xlu1 %v1361_v48, %s11834_s12  ;;  %1648 = vrot.lane.b32.xlu0 %v12157_v49, %s11834_s12 }
  0x74   : > { %1740 = vrot.lane.b32.xlu1 %v1359_v44, %s16481_s13  ;;  %1738 = vrot.lane.b32.xlu0 %v12146_v45, %s16481_s13 }
  0x78   : > { %1744 = vrot.lane.b32.xlu1 %v1361_v48, %s16481_s13  ;;  %1742 = vrot.lane.b32.xlu0 %v12157_v49, %s16481_s13 }
  0x7c   : > { %1834 = vrot.lane.b32.xlu1 %v1359_v44, %s11836_s14  ;;  %1832 = vrot.lane.b32.xlu0 %v12146_v45, %s11836_s14 }
  0x80   : > { %1838 = vrot.lane.b32.xlu1 %v1361_v48, %s11836_s14  ;;  %1836 = vrot.lane.b32.xlu0 %v12157_v49, %s11836_s14 }
  0x84   : > { %2035 = vrot.lane.b32.xlu1 %v12209_v56, %s11831_s15  ;;  %2033 = vrot.lane.b32.xlu0 %v12212_v57, %s11831_s15 }
  0x88   : > { %2039 = vrot.lane.b32.xlu1 %v12221_v62, %s11831_s15  ;;  %2037 = vrot.lane.b32.xlu0 %v12224_v63, %s11831_s15 }
  0x8c   : > { %2129 = vrot.lane.b32.xlu1 %v12209_v56, %s11832_s30  ;;  %2127 = vrot.lane.b32.xlu0 %v12212_v57, %s11832_s30 }
  0x90   : > { %2133 = vrot.lane.b32.xlu1 %v12221_v62, %s11832_s30  ;;  %2131 = vrot.lane.b32.xlu0 %v12224_v63, %s11832_s30 }
  0x94   : > { %2223 = vrot.lane.b32.xlu1 %v12209_v56, %s11833_s26  ;;  %2221 = vrot.lane.b32.xlu0 %v12212_v57, %s11833_s26 }
  0x96   : > { %v690_v0 = vpop.permute.xlu1 %689  ;;  %v686_v1 = vpop.permute.xlu0 %685 }
  0x98   : > { %2227 = vrot.lane.b32.xlu1 %v12221_v62, %s11833_s26  ;;  %2225 = vrot.lane.b32.xlu0 %v12224_v63, %s11833_s26 }
  0x9a   : > { %v692_v2 = vpop.permute.xlu1 %691  ;;  %v688_v4 = vpop.permute.xlu0 %687 }
  0x9b   : > { %v695_v6 = vsel %vm693_vm2, %v690_v0, %v692_v2  ;;  %v694_v7 = vsel %vm693_vm2, %v686_v1, %v688_v4  ;;  %v2598_v2 = vld [vmem:[%s11975_s29 + $0x8] sm:$0xf8]  ;;  %v12371_v4 = vld [vmem:[%s11975_s29 + $0x18] sm:$0xff] }
  0x9c   : > { %v699_v8 = vmul.f32 %v695_v6, %v12084_v32  ;;  %v698_v11 = vmul.f32 %v694_v7, %v11978_v9  ;;  %2317 = vrot.lane.b32.xlu1 %v12209_v56, %s11834_s12  ;;  %2315 = vrot.lane.b32.xlu0 %v12212_v57, %s11834_s12  ;;  %v2597_v6 = vld [vmem:[%s11975_s29] sm:$0xf8]  ;;  %v2699_v7 = vrot.slane %v2598_v2, 3 }
  0x9e   : > { %v783_v12 = vpop.permute.xlu1 %782  ;;  %v781_v13 = vpop.permute.xlu0 %780  ;;  %8292 = vmatprep.mubr.f32.mxu0 %v698_v11  ;;  %v12377_v11 = vld [vmem:[%s11975_s29 + $0x10] sm:$0xff] }
  0x9f   : > { %v789_v14 = vsel %vm788_vm3, %v781_v13, %v783_v12  ;;  %8293 = vmatmul.mubr.f32.vlgmr.msra.gmra.mrb[2].mxu0 %v699_v8  ;;  %v2700_v8 = vrot.slane %v12371_v4, 3  ;;  %v2607_v12 = vrot.slane %v2597_v6, 3  ;;  %v2608_v13 = vrot.slane %v12377_v11, 3 }
  0xa0   : > { %v793_v15 = vmul.f32 %v789_v14, %v11978_v9  ;;  %10071 = vmatpush3.bf16.msra.mxu0 %v11935_v3  ;;  %2321 = vrot.lane.b32.xlu1 %v12221_v62, %s11834_s12 }
  0xa1   : > { %10073 = vmatprep.subr.bf16.mxu0 %v11943_v5  ;;  %2319 = vrot.lane.b32.xlu0 %v12224_v63, %s11834_s12  ;;  %v12382_v14 = vsel %vm2606_vm8, %v2699_v7, %v2700_v8 }
  0xa2   : > { %v787_v16 = vpop.permute.xlu1 %786  ;;  %v785_v17 = vpop.permute.xlu0 %784  ;;  %8327 = vmatprep.mubr.f32.mxu1 %v793_v15  ;;  %v12387_v15 = vsel %vm2606_vm8, %v2607_v12, %v2608_v13 }
  0xa3   : > { %v790_v18 = vsel %vm788_vm3, %v785_v17, %v787_v16  ;;  %v2602_v16 = vld [vmem:[%s11975_s29 + $0x28] sm:$0x7]  ;;  %v2601_v17 = vld [vmem:[%s11975_s29 + $0x20] sm:$0x7] }
  0xa4   : > { %v794_v20 = vmul.f32 %v790_v18, %v12084_v32  ;;  %10075 = vmatpush3.bf16.msra.mxu0 %v11943_v5  ;;  %2411 = vrot.lane.b32.xlu1 %v12209_v56, %s16481_s13 }
  0xa5   : > { %10077 = vmatprep.subr.bf16.mxu0 %v11980_v10  ;;  %2409 = vrot.lane.b32.xlu0 %v12212_v57, %s16481_s13 }
  0xa6   : > { %8328 = vmatmul.mubr.f32.vlgmr.msra.gmra.mrb[2].mxu1 %v794_v20  ;;  %v878_v21 = vpop.permute.xlu1 %877  ;;  %v876_v23 = vpop.permute.xlu0 %875 }
  0xa7   : > { %10103 = vmatpush3.bf16.msra.mxu1 %v11935_v3  ;;  %v884_v24 = vsel %vm883_vm4, %v876_v23, %v878_v21  ;;  %v2702_v21 = vrot.slane %v2602_v16, 3  ;;  %v2610_v23 = vrot.slane %v2601_v17, 3  ;;  %v12562_v16 = vld [vmem:[%s11964_s24] sm:$0xff] }
  0xa8   : > { %10079 = vmatpush3.bf16.msra.mxu0 %v11980_v10  ;;  %10105 = vmatprep.subr.bf16.mxu1 %v11943_v5  ;;  %v888_v26 = vmul.f32 %v884_v24, %v11978_v9 }
  0xa9   : > { %10081 = vmatprep.subr.bf16.mxu0 %v12010_v19  ;;  %2415 = vrot.lane.b32.xlu1 %v12221_v62, %s16481_s13  ;;  %v12398_v24 = vsel %vm2606_vm8, %v2700_v8, %v2702_v21  ;;  %v1943_v21 = vmul.f32 %v12562_v16, %v12212_v57 }
  0xaa   : > { %v882_v27 = vpop.permute.xlu1 %881  ;;  %v880_v29 = vpop.permute.xlu0 %879  ;;  %8362 = vmatprep.mubr.f32.mxu0 %v888_v26  ;;  %2413 = vrot.lane.b32.xlu0 %v12224_v63, %s16481_s13  ;;  %v12401_v26 = vsel %vm2606_vm8, %v2608_v13, %v2610_v23 }
  0xab   : > { %10107 = vmatpush3.bf16.msra.mxu1 %v11943_v5  ;;  %v885_v40 = vsel %vm883_vm4, %v880_v29, %v882_v27 }
  0xac   : > { %10083 = vmatpush3.bf16.msra.mxu0 %v12010_v19  ;;  %10109 = vmatprep.subr.bf16.mxu1 %v11980_v10  ;;  %v889_v44 = vmul.f32 %v885_v40, %v12084_v32 }
  0xad   : > { %10085 = vmatprep.subr.bf16.mxu0 %v12026_v22  ;;  %2505 = vrot.lane.b32.xlu1 %v12209_v56, %s11836_s14 }
  0xae   : > { %v973_v30 = vpop.permute.xlu1 %972  ;;  %v971_v33 = vpop.permute.xlu0 %970  ;;  %2503 = vrot.lane.b32.xlu0 %v12212_v57, %s11836_s14 }
  0xaf   : > { %10111 = vmatpush3.bf16.msra.mxu1 %v11980_v10  ;;  %v979_v34 = vsel %vm978_vm5, %v971_v33, %v973_v30 }
  0xb0   : > { %10087 = vmatpush3.bf16.msra.mxu0 %v12026_v22  ;;  %10113 = vmatprep.subr.bf16.mxu1 %v12010_v19  ;;  %v983_v35 = vmul.f32 %v979_v34, %v11978_v9 }
  0xb1   : > { %10089 = vmatprep.subr.bf16.mxu0 %v12042_v25  ;;  %2509 = vrot.lane.b32.xlu1 %v12221_v62, %s11836_s14 }
  0xb2   : > { %v977_v36 = vpop.permute.xlu1 %976  ;;  %v975_v37 = vpop.permute.xlu0 %974  ;;  %8397 = vmatprep.mubr.f32.mxu1 %v983_v35  ;;  %2507 = vrot.lane.b32.xlu0 %v12224_v63, %s11836_s14  ;;  %v1273_v35 = vmul.f32 %v12157_v49, %v12084_v32 }
  0xb3   : > { %10115 = vmatpush3.bf16.msra.mxu1 %v12010_v19  ;;  %v980_v50 = vsel %vm978_vm5, %v975_v37, %v977_v36 }
  0xb4   : > { %10091 = vmatpush3.bf16.msra.mxu0 %v12042_v25  ;;  %10117 = vmatprep.subr.bf16.mxu1 %v12026_v22  ;;  %v984_v52 = vmul.f32 %v980_v50, %v12084_v32 }
  0xb5   : > { %10093 = vmatprep.subr.bf16.mxu0 %v12058_v28  ;;  %2706 = vrot.lane.b32.xlu1 %v12382_v14, %s11831_s15 }
  0xb6   : > { %v1068_v38 = vpop.permute.xlu1 %1067  ;;  %v1066_v39 = vpop.permute.xlu0 %1065  ;;  %2704 = vrot.lane.b32.xlu0 %v12387_v15, %s11831_s15 }
  0xb7   : > { %10119 = vmatpush3.bf16.msra.mxu1 %v12026_v22  ;;  %v1074_v41 = vsel %vm1073_vm6, %v1066_v39, %v1068_v38 }
  0xb8   : > { %10095 = vmatpush3.bf16.msra.mxu0 %v12058_v28  ;;  %10121 = vmatprep.subr.bf16.mxu1 %v12042_v25  ;;  %v1078_v46 = vmul.f32 %v1074_v41, %v11978_v9 }
  0xb9   : > { %10097 = vmatprep.subr.bf16.mxu0 %v12074_v31  ;;  %2710 = vrot.lane.b32.xlu1 %v12398_v24, %s11831_s15 }
  0xba   : > { %v1072_v42 = vpop.permute.xlu1 %1071  ;;  %v1070_v43 = vpop.permute.xlu0 %1069  ;;  %2708 = vrot.lane.b32.xlu0 %v12401_v26, %s11831_s15 }
  0xbb   : > { %10123 = vmatpush3.bf16.msra.mxu1 %v12042_v25  ;;  %v1075_v54 = vsel %vm1073_vm6, %v1070_v43, %v1072_v42 }
  0xbc   : > { %10099 = vmatpush3.bf16.msra.mxu0 %v12074_v31  ;;  %10125 = vmatprep.subr.bf16.mxu1 %v12058_v28  ;;  %v1079_v58 = vmul.f32 %v1075_v54, %v12084_v32 }
  0xbd   : > { %10133 = vmatprep.subr.bf16.mxu0 %v11935_v3  ;;  %2800 = vrot.lane.b32.xlu1 %v12382_v14, %s11832_s30 }
  0xbe   : > { %v1163_v47 = vpop.permute.xlu1 %1162  ;;  %v1161_v48 = vpop.permute.xlu0 %1160  ;;  %2798 = vrot.lane.b32.xlu0 %v12387_v15, %s11832_s30 }
  0xbf   : > { %8363 = vmatmul.mubr.f32.vlgmr.msra.gmra.mrb[4].mxu0 %v889_v44  ;;  %10127 = vmatpush3.bf16.msra.mxu1 %v12058_v28  ;;  %v1169_v51 = vsel %vm1168_vm7, %v1161_v48, %v1163_v47 }
  0xc0   : > { %10135 = vmatpush3.bf16.msra.mxu0 %v11935_v3  ;;  %10129 = vmatprep.subr.bf16.mxu1 %v12074_v31  ;;  %v1173_v53 = vmul.f32 %v1169_v51, %v11978_v9 }
  0xc1   : > { %10137 = vmatprep.subr.bf16.mxu0 %v11943_v5  ;;  %8432 = vmatprep.mubr.f32.mxu0 %v1078_v46 }
  0xc2   : > { %v1167_v55 = vpop.permute.xlu1 %1166  ;;  %v1165_v56 = vpop.permute.xlu0 %1164  ;;  %2804 = vrot.lane.b32.xlu1 %v12398_v24, %s11832_s30  ;;  %2802 = vrot.lane.b32.xlu0 %v12401_v26, %s11832_s30 }
  0xc3   : > { %10131 = vmatpush3.bf16.msra.mxu1 %v12074_v31  ;;  %v1170_v62 = vsel %vm1168_vm7, %v1165_v56, %v1167_v55 }
  0xc4   : > { %10139 = vmatpush3.bf16.msra.mxu0 %v11943_v5  ;;  %10165 = vmatprep.subr.bf16.mxu1 %v11935_v3  ;;  %v1174_v1 = vmul.f32 %v1170_v62, %v12084_v32 }
  0xc5   : > { %10141 = vmatprep.subr.bf16.mxu0 %v11980_v10 }
  0xc6   : > { %8398 = vmatmul.mubr.f32.vlgmr.msra.gmra.mrb[4].mxu1 %v984_v52  ;;  %v1365_v59 = vpop.permute.xlu1 %1364  ;;  %v1363_v60 = vpop.permute.xlu0 %1362  ;;  %2894 = vrot.lane.b32.xlu1 %v12382_v14, %s11833_s26 }
  0xc7   : > { %10167 = vmatpush3.bf16.msra.mxu1 %v11935_v3  ;;  %8467 = vmatprep.mubr.f32.mxu1 %v1173_v53  ;;  %v1370_v0 = vsel %vm693_vm2, %v1363_v60, %v1365_v59 }
  0xc8   : > { %10143 = vmatpush3.bf16.msra.mxu0 %v11980_v10  ;;  %10169 = vmatprep.subr.bf16.mxu1 %v11943_v5  ;;  %v1374_v45 = vmul.f32 %v1370_v0, %v11978_v9 }
  0xc9   : > { %10145 = vmatprep.subr.bf16.mxu0 %v12010_v19  ;;  %2892 = vrot.lane.b32.xlu0 %v12387_v15, %s11833_s26 }
  0xca   : > { %v1369_v18 = vpop.permute.xlu1 %1368  ;;  %v1367_v20 = vpop.permute.xlu0 %1366  ;;  %2898 = vrot.lane.b32.xlu1 %v12398_v24, %s11833_s26 }
  0xcb   : > { %10171 = vmatpush3.bf16.msra.mxu1 %v11943_v5  ;;  %v1371_v49 = vsel %vm693_vm2, %v1367_v20, %v1369_v18 }
  0xcc   : > { %10147 = vmatpush3.bf16.msra.mxu0 %v12010_v19  ;;  %10173 = vmatprep.subr.bf16.mxu1 %v11980_v10  ;;  %v1375_v40 = vmul.f32 %v1371_v49, %v12084_v32  ;;  %v3269_v49 = vld [vmem:[%s11975_s29 + $0x8] sm:$0xf0] }
  0xcd   : > { %10149 = vmatprep.subr.bf16.mxu0 %v12026_v22  ;;  %2896 = vrot.lane.b32.xlu0 %v12401_v26, %s11833_s26 }
  0xce   : > { %v1459_v27 = vpop.permute.xlu1 %1458  ;;  %v1457_v29 = vpop.permute.xlu0 %1456  ;;  %2988 = vrot.lane.b32.xlu1 %v12382_v14, %s11834_s12 }
  0xcf   : > { %10175 = vmatpush3.bf16.msra.mxu1 %v11980_v10  ;;  %v1464_v34 = vsel %vm788_vm3, %v1457_v29, %v1459_v27 }
  0xd0   : > { %10151 = vmatpush3.bf16.msra.mxu0 %v12026_v22  ;;  %10177 = vmatprep.subr.bf16.mxu1 %v12010_v19  ;;  %v1468_v36 = vmul.f32 %v1464_v34, %v11978_v9 }
  0xd1   : > { %10153 = vmatprep.subr.bf16.mxu0 %v12042_v25  ;;  %2986 = vrot.lane.b32.xlu0 %v12387_v15, %s11834_s12 }
  0xd2   : > { %v12419_v30 = vpop.permute.xlu1 %1462  ;;  %v12421_v33 = vpop.permute.xlu0 %1460  ;;  %2992 = vrot.lane.b32.xlu1 %v12398_v24, %s11834_s12 }
  0xd3   : > { %10179 = vmatpush3.bf16.msra.mxu1 %v12010_v19  ;;  %v1465_v56 = vsel %vm788_vm3, %v12421_v33, %v12419_v30 }
  0xd4   : > { %10155 = vmatpush3.bf16.msra.mxu0 %v12042_v25  ;;  %10181 = vmatprep.subr.bf16.mxu1 %v12026_v22  ;;  %v1469_v59 = vmul.f32 %v1465_v56, %v12084_v32  ;;  %v3272_v56 = vld [vmem:[%s11975_s29 + $0x20] sm:$0xf] }
  0xd5   : > { %10157 = vmatprep.subr.bf16.mxu0 %v12058_v28  ;;  %2990 = vrot.lane.b32.xlu0 %v12401_v26, %s11834_s12 }
  0xd6   : > { %v1553_v37 = vpop.permute.xlu1 %1552  ;;  %v1551_v38 = vpop.permute.xlu0 %1550  ;;  %3082 = vrot.lane.b32.xlu1 %v12382_v14, %s16481_s13 }
  0xd7   : > { %10183 = vmatpush3.bf16.msra.mxu1 %v12026_v22  ;;  %v1558_v39 = vsel %vm883_vm4, %v1551_v38, %v1553_v37 }
  0xd8   : > { %10159 = vmatpush3.bf16.msra.mxu0 %v12058_v28  ;;  %10185 = vmatprep.subr.bf16.mxu1 %v12042_v25  ;;  %v1562_v41 = vmul.f32 %v1558_v39, %v11978_v9  ;;  %v3268_v39 = vld [vmem:[%s11975_s29] sm:$0xf0] }
  0xd9   : > { %10161 = vmatprep.subr.bf16.mxu0 %v12074_v31  ;;  %3080 = vrot.lane.b32.xlu0 %v12387_v15, %s16481_s13 }
  0xda   : > { %v1557_v42 = vpop.permute.xlu1 %1556  ;;  %v1555_v43 = vpop.permute.xlu0 %1554  ;;  %3086 = vrot.lane.b32.xlu1 %v12398_v24, %s16481_s13 }
  0xdb   : > { %10187 = vmatpush3.bf16.msra.mxu1 %v12042_v25  ;;  %v1559_v0 = vsel %vm883_vm4, %v1555_v43, %v1557_v42  ;;  %v3278_v42 = vrot.slane %v3268_v39, 4  ;;  %v12618_v43 = vld [vmem:[%s11964_s24 + $0x8] sm:$0xff] }
  0xdc   : > { %10163 = vmatpush3.bf16.msra.mxu0 %v12074_v31  ;;  %10189 = vmatprep.subr.bf16.mxu1 %v12058_v28 }
  0xdd   : > { %10197 = vmatprep.subr.bf16.mxu0 %v11935_v3  ;;  %3084 = vrot.lane.b32.xlu0 %v12401_v26, %s16481_s13 }
  0xde   : > { %v1647_v44 = vpop.permute.xlu1 %1646  ;;  %v1645_v46 = vpop.permute.xlu0 %1644  ;;  %3176 = vrot.lane.b32.xlu1 %v12382_v14, %s11836_s14 }
  0xdf   : > { %8433 = vmatmul.mubr.f32.vlgmr.msra.gmra.mrb[6].mxu0 %v1079_v58  ;;  %10191 = vmatpush3.bf16.msra.mxu1 %v12058_v28  ;;  %v1652_v58 = vsel %vm978_vm5, %v1645_v46, %v1647_v44  ;;  %v1944_v44 = vmul.f32 %v12618_v43, %v12224_v63  ;;  %v3279_v46 = vrot.slane %v12377_v11, 4 }
  0xe0   : > { %10199 = vmatpush3.bf16.msra.mxu0 %v11935_v3  ;;  %10193 = vmatprep.subr.bf16.mxu1 %v12074_v31  ;;  %v1656_v60 = vmul.f32 %v1652_v58, %v11978_v9  ;;  %v3281_v58 = vrot.slane %v3272_v56, 4 }
  0xe1   : > { %10201 = vmatprep.subr.bf16.mxu0 %v11943_v5  ;;  %8502 = vmatprep.mubr.f32.mxu0 %v1272_v61 }
  0xe2   : > { %v1651_v54 = vpop.permute.xlu1 %1650  ;;  %v1649_v55 = vpop.permute.xlu0 %1648  ;;  %3174 = vrot.lane.b32.xlu0 %v12387_v15, %s11836_s14  ;;  %3180 = vrot.lane.b32.xlu1 %v12398_v24, %s11836_s14 }
  0xe3   : > { %10195 = vmatpush3.bf16.msra.mxu1 %v12074_v31  ;;  %v1653_v7 = vsel %vm978_vm5, %v1649_v55, %v1651_v54  ;;  %v12631_v54 = vsel %vm3277_vm9, %v3278_v42, %v3279_v46  ;;  %v3273_v55 = vld [vmem:[%s11975_s29 + $0x28] sm:$0xf] }
  0xe4   : > { %10203 = vmatpush3.bf16.msra.mxu0 %v11943_v5  ;;  %10229 = vmatprep.subr.bf16.mxu1 %v11935_v3  ;;  %v1657_v14 = vmul.f32 %v1653_v7, %v12084_v32  ;;  %v3373_v63 = vrot.slane %v3273_v55, 4 }
  0xe5   : > { %10205 = vmatprep.subr.bf16.mxu0 %v11980_v10 }
  0xe6   : > { %8468 = vmatmul.mubr.f32.vlgmr.msra.gmra.mrb[6].mxu1 %v1174_v1  ;;  %v1741_v61 = vpop.permute.xlu1 %1740  ;;  %v1739_v62 = vpop.permute.xlu0 %1738  ;;  %3178 = vrot.lane.b32.xlu0 %v12401_v26, %s11836_s14 }
  0xe7   : > { %10231 = vmatpush3.bf16.msra.mxu1 %v11935_v3  ;;  %8537 = vmatprep.mubr.f32.mxu1 %v1374_v45  ;;  %v1746_v1 = vsel %vm1073_vm6, %v1739_v62, %v1741_v61  ;;  %v1563_v45 = vmul.f32 %v1559_v0, %v12084_v32 }
  0xe8   : > { %10207 = vmatpush3.bf16.msra.mxu0 %v11980_v10  ;;  %10233 = vmatprep.subr.bf16.mxu1 %v11943_v5  ;;  %v1750_v2 = vmul.f32 %v1746_v1, %v11978_v9 }
  0xe9   : > { %10209 = vmatprep.subr.bf16.mxu0 %v12010_v19 }
  0xea   : > { %v1745_v9 = vpop.permute.xlu1 %1744  ;;  %v1743_v6 = vpop.permute.xlu0 %1742  ;;  %3375 = vrot.lane.b32.xlu0 %v12631_v54, %s11831_s15 }
  0xeb   : > { %10235 = vmatpush3.bf16.msra.mxu1 %v11943_v5  ;;  %v1747_v18 = vsel %vm1073_vm6, %v1743_v6, %v1745_v9 }
  0xec   : > { %10211 = vmatpush3.bf16.msra.mxu0 %v12010_v19  ;;  %10237 = vmatprep.subr.bf16.mxu1 %v11980_v10  ;;  %v1751_v20 = vmul.f32 %v1747_v18, %v12084_v32 }
  0xed   : > { %10213 = vmatprep.subr.bf16.mxu0 %v12026_v22 }
  0xee   : > { %v1835_v8 = vpop.permute.xlu1 %1834  ;;  %v1833_v12 = vpop.permute.xlu0 %1832 }
  0xef   : > { %10239 = vmatpush3.bf16.msra.mxu1 %v11980_v10  ;;  %v1840_v13 = vsel %vm1168_vm7, %v1833_v12, %v1835_v8 }
  0xf0   : > { %10215 = vmatpush3.bf16.msra.mxu0 %v12026_v22  ;;  %10241 = vmatprep.subr.bf16.mxu1 %v12010_v19  ;;  %v1844_v17 = vmul.f32 %v12562_v16, %v1840_v13 }
  0xf1   : > { %10217 = vmatprep.subr.bf16.mxu0 %v12042_v25 }
  0xf2   : > { %v1839_v57 = vpop.permute.xlu1 %1838  ;;  %v1837_v23 = vpop.permute.xlu0 %1836 }
  0xf3   : > { %10243 = vmatpush3.bf16.msra.mxu1 %v12010_v19  ;;  %v1841_v33 = vsel %vm1168_vm7, %v1837_v23, %v1839_v57 }
  0xf4   : > { %10219 = vmatpush3.bf16.msra.mxu0 %v12042_v25  ;;  %10245 = vmatprep.subr.bf16.mxu1 %v12026_v22 }
  0xf5   : > { %10221 = vmatprep.subr.bf16.mxu0 %v12058_v28 }
  0xf6   : > { %v2036_v24 = vpop.permute.xlu1 %2035  ;;  %v2034_v27 = vpop.permute.xlu0 %2033 }
  0xf7   : > { %10247 = vmatpush3.bf16.msra.mxu1 %v12026_v22  ;;  %v2041_v34 = vsel %vm693_vm2, %v2034_v27, %v2036_v24 }
  0xf8   : > { %10223 = vmatpush3.bf16.msra.mxu0 %v12058_v28  ;;  %10249 = vmatprep.subr.bf16.mxu1 %v12042_v25 }
  0xf9   : > { %10225 = vmatprep.subr.bf16.mxu0 %v12074_v31 }
  0xfa   : > { %v12594_v29 = vpop.permute.xlu1 %2039  ;;  %v12596_v30 = vpop.permute.xlu0 %2037 }
  0xfb   : > { %10251 = vmatpush3.bf16.msra.mxu1 %v12042_v25  ;;  %v2042_v12 = vsel %vm693_vm2, %v12596_v30, %v12594_v29 }
  0xfc   : > { %10227 = vmatpush3.bf16.msra.mxu0 %v12074_v31  ;;  %10253 = vmatprep.subr.bf16.mxu1 %v12058_v28 }
  0xfd   : > { %10261 = vmatprep.subr.bf16.mxu0 %v11935_v3 }
  0xfe   : > { %v2130_v37 = vpop.permute.xlu1 %2129  ;;  %v2128_v38 = vpop.permute.xlu0 %2127 }
  0xff   : > { %8503 = vmatmul.mubr.f32.vlgmr.msra.gmra.mrb[8].mxu0 %v1273_v35  ;;  %10255 = vmatpush3.bf16.msra.mxu1 %v12058_v28  ;;  %v1845_v35 = vmul.f32 %v1841_v33, %v12084_v32  ;;  %v2135_v32 = vsel %vm788_vm3, %v2128_v38, %v2130_v37 }
 0x100   : > { %10263 = vmatpush3.bf16.msra.mxu0 %v11935_v3  ;;  %10257 = vmatprep.subr.bf16.mxu1 %v12074_v31 }
 0x101   : > { %10265 = vmatprep.subr.bf16.mxu0 %v11943_v5  ;;  %8572 = vmatprep.mubr.f32.mxu0 %v1468_v36  ;;  %v2045_v36 = vmul.f32 %v12562_v16, %v2041_v34 }
 0x102   : > { %v2134_v61 = vpop.permute.xlu1 %2133  ;;  %v2132_v62 = vpop.permute.xlu0 %2131 }
 0x103   : > { %10259 = vmatpush3.bf16.msra.mxu1 %v12074_v31  ;;  %v2136_v27 = vsel %vm788_vm3, %v2132_v62, %v2134_v61 }
 0x104   : > { %10267 = vmatpush3.bf16.msra.mxu0 %v11943_v5  ;;  %10293 = vmatprep.subr.bf16.mxu1 %v11935_v3  ;;  %v2140_v30 = vmul.f32 %v12618_v43, %v2136_v27 }
 0x105   : > { %10269 = vmatprep.subr.bf16.mxu0 %v11980_v10 }
 0x106   : > { %8538 = vmatmul.mubr.f32.vlgmr.msra.gmra.mrb[8].mxu1 %v1375_v40  ;;  %v3370_v40 = vrot.slane %v3269_v49, 4  ;;  %v2224_v0 = vpop.permute.xlu1 %2223  ;;  %v2222_v1 = vpop.permute.xlu0 %2221 }
 0x107   : > { %10295 = vmatpush3.bf16.msra.mxu1 %v11935_v3  ;;  %8607 = vmatprep.mubr.f32.mxu1 %v1562_v41  ;;  %v3371_v41 = vrot.slane %v12371_v4, 4  ;;  %v2229_v18 = vsel %vm883_vm4, %v2222_v1, %v2224_v0 }
 0x108   : > { %10271 = vmatpush3.bf16.msra.mxu0 %v11980_v10  ;;  %10297 = vmatprep.subr.bf16.mxu1 %v11943_v5  ;;  %v2233_v57 = vmul.f32 %v12562_v16, %v2229_v18  ;;  %v3939_v18 = vld [vmem:[%s11975_s29] sm:$0xe0] }
 0x109   : > { %10273 = vmatprep.subr.bf16.mxu0 %v12010_v19 }
 0x10a   : > { %v12685_v7 = vpop.permute.xlu1 %2227  ;;  %v12687_v8 = vpop.permute.xlu0 %2225 }
 0x10b   : > { %10299 = vmatpush3.bf16.msra.mxu1 %v11943_v5 }
 0x10c   : > { %10275 = vmatpush3.bf16.msra.mxu0 %v12010_v19  ;;  %10301 = vmatprep.subr.bf16.mxu1 %v11980_v10 }
 0x10d   : > { %10277 = vmatprep.subr.bf16.mxu0 %v12026_v22 }
 0x10e   : > { %v2318_v23 = vpop.permute.xlu1 %2317  ;;  %v2316_v24 = vpop.permute.xlu0 %2315 }
 0x10f   : > { %10303 = vmatpush3.bf16.msra.mxu1 %v11980_v10  ;;  %v2323_v29 = vsel %vm978_vm5, %v2316_v24, %v2318_v23  ;;  %v3949_v23 = vrot.slane %v3939_v18, 5  ;;  %v3950_v24 = vrot.slane %v12377_v11, 5  ;;  %v3943_v11 = vld [vmem:[%s11975_s29 + $0x20] sm:$0x1f] }
 0x110   : > { %10279 = vmatpush3.bf16.msra.mxu0 %v12026_v22  ;;  %10305 = vmatprep.subr.bf16.mxu1 %v12010_v19  ;;  %v2327_v33 = vmul.f32 %v12562_v16, %v2323_v29 }
 0x111   : > { %10281 = vmatprep.subr.bf16.mxu0 %v12042_v25 }
 0x112   : > { %v2322_v34 = vpop.permute.xlu1 %2321 }
 0x113   : > { %10307 = vmatpush3.bf16.msra.mxu1 %v12010_v19 }
 0x114   : > { %10283 = vmatpush3.bf16.msra.mxu0 %v12042_v25  ;;  %10309 = vmatprep.subr.bf16.mxu1 %v12026_v22  ;;  %v12487_v47 = vpop.f32.mrb[0].mxu0  ;;  %v8259_v48 = vpop.f32.mrb[0].mxu1 }
 0x115   : > { %10285 = vmatprep.subr.bf16.mxu0 %v12058_v28  ;;  %v12491_v50 = vadd.f32 %v8259_v48, %v12487_v47  ;;  %v12493_v51 = vpop.f32.mrb[1].mxu0  ;;  %v670_v52 = vpop.f32.mrb[1].mxu1  ;;  %v2139_v48 = vmul.f32 %v12562_v16, %v2135_v32 }
 0x116   : > { %v12498_v53 = vadd.f32 %v670_v52, %v12493_v51  ;;  %v12626_v52 = vsel %vm3277_vm9, %v3370_v40, %v3371_v41 }
 0x117   : > { %16586 = vst [vmem:[#allocation6_spill] sm:$0xff] %v12491_v50  ;;  %10311 = vmatpush3.bf16.msra.mxu1 %v12026_v22  ;;  %3377 = vrot.lane.b32.xlu1 %v12626_v52, %s11831_s15 }
 0x118   : > { %16587 = vst [vmem:[#allocation7_spill] sm:$0xff] %v12498_v53  ;;  %10287 = vmatpush3.bf16.msra.mxu0 %v12058_v28  ;;  %10313 = vmatprep.subr.bf16.mxu1 %v12042_v25 }
 0x119   : > { %10289 = vmatprep.subr.bf16.mxu0 %v12074_v31 }
 0x11b   : > { %10315 = vmatpush3.bf16.msra.mxu1 %v12042_v25 }
 0x11c   : > { %10291 = vmatpush3.bf16.msra.mxu0 %v12074_v31  ;;  %10317 = vmatprep.subr.bf16.mxu1 %v12058_v28 }
 0x11d   : > { %10325 = vmatprep.subr.bf16.mxu0 %v11935_v3 }
 0x11f   : > { %8573 = vmatmul.mubr.f32.vlgmr.msra.gmra.mrb[10].mxu0 %v1469_v59  ;;  %10319 = vmatpush3.bf16.msra.mxu1 %v12058_v28  ;;  %v12642_v59 = vsel %vm3277_vm9, %v3371_v41, %v3373_v63 }
 0x120   : > { %10327 = vmatpush3.bf16.msra.mxu0 %v11935_v3  ;;  %10321 = vmatprep.subr.bf16.mxu1 %v12074_v31 }
 0x121   : > { %10329 = vmatprep.subr.bf16.mxu0 %v11943_v5  ;;  %8642 = vmatprep.mubr.f32.mxu0 %v1656_v60  ;;  %v12645_v60 = vsel %vm3277_vm9, %v3279_v46, %v3281_v58 }
 0x122   : > { %3381 = vrot.lane.b32.xlu1 %v12642_v59, %s11831_s15  ;;  %3379 = vrot.lane.b32.xlu0 %v12645_v60, %s11831_s15 }
 0x123   : > { %10323 = vmatpush3.bf16.msra.mxu1 %v12074_v31 }
 0x124   : > { %10331 = vmatpush3.bf16.msra.mxu0 %v11943_v5  ;;  %10357 = vmatprep.subr.bf16.mxu1 %v11935_v3 }
 0x125   : > { %10333 = vmatprep.subr.bf16.mxu0 %v11980_v10 }
 0x126   : > { %8608 = vmatmul.mubr.f32.vlgmr.msra.gmra.mrb[10].mxu1 %v1563_v45  ;;  %3471 = vrot.lane.b32.xlu1 %v12626_v52, %s11832_s30 }
 0x127   : > { %10359 = vmatpush3.bf16.msra.mxu1 %v11935_v3  ;;  %8677 = vmatprep.mubr.f32.mxu1 %v1750_v2 }
 0x128   : > { %10335 = vmatpush3.bf16.msra.mxu0 %v11980_v10  ;;  %10361 = vmatprep.subr.bf16.mxu1 %v11943_v5 }
 0x129   : > { %10337 = vmatprep.subr.bf16.mxu0 %v12010_v19  ;;  %3469 = vrot.lane.b32.xlu0 %v12631_v54, %s11832_s30 }
 0x12a   : > { %3475 = vrot.lane.b32.xlu1 %v12642_v59, %s11832_s30 }
 0x12b   : > { %10363 = vmatpush3.bf16.msra.mxu1 %v11943_v5 }
 0x12c   : > { %10339 = vmatpush3.bf16.msra.mxu0 %v12010_v19  ;;  %10365 = vmatprep.subr.bf16.mxu1 %v11980_v10 }
 0x12d   : > { %10341 = vmatprep.subr.bf16.mxu0 %v12026_v22  ;;  %3473 = vrot.lane.b32.xlu0 %v12645_v60, %s11832_s30 }
 0x12e   : > { %3565 = vrot.lane.b32.xlu1 %v12626_v52, %s11833_s26 }
 0x12f   : > { %10367 = vmatpush3.bf16.msra.mxu1 %v11980_v10 }
 0x130   : > { %10343 = vmatpush3.bf16.msra.mxu0 %v12026_v22  ;;  %10369 = vmatprep.subr.bf16.mxu1 %v12010_v19 }
 0x131   : > { %10345 = vmatprep.subr.bf16.mxu0 %v12042_v25  ;;  %3563 = vrot.lane.b32.xlu0 %v12631_v54, %s11833_s26 }
 0x132   : > { %3569 = vrot.lane.b32.xlu1 %v12642_v59, %s11833_s26 }
 0x133   : > { %10371 = vmatpush3.bf16.msra.mxu1 %v12010_v19 }
 0x134   : > { %10347 = vmatpush3.bf16.msra.mxu0 %v12042_v25  ;;  %10373 = vmatprep.subr.bf16.mxu1 %v12026_v22 }
 0x135   : > { %10349 = vmatprep.subr.bf16.mxu0 %v12058_v28  ;;  %3567 = vrot.lane.b32.xlu0 %v12645_v60, %s11833_s26 }
 0x136   : > { %3659 = vrot.lane.b32.xlu1 %v12626_v52, %s11834_s12 }
 0x137   : > { %10375 = vmatpush3.bf16.msra.mxu1 %v12026_v22 }
 0x138   : > { %10351 = vmatpush3.bf16.msra.mxu0 %v12058_v28  ;;  %10377 = vmatprep.subr.bf16.mxu1 %v12042_v25 }
 0x139   : > { %10353 = vmatprep.subr.bf16.mxu0 %v12074_v31  ;;  %3657 = vrot.lane.b32.xlu0 %v12631_v54, %s11834_s12 }
 0x13a   : > { %3663 = vrot.lane.b32.xlu1 %v12642_v59, %s11834_s12 }
 0x13b   : > { %10379 = vmatpush3.bf16.msra.mxu1 %v12042_v25 }
 0x13c   : > { %10355 = vmatpush3.bf16.msra.mxu0 %v12074_v31  ;;  %10381 = vmatprep.subr.bf16.mxu1 %v12058_v28 }
 0x13d   : > { %10389 = vmatprep.subr.bf16.mxu0 %v11935_v3  ;;  %3661 = vrot.lane.b32.xlu0 %v12645_v60, %s11834_s12 }
 0x13e   : > { %3753 = vrot.lane.b32.xlu1 %v12626_v52, %s16481_s13 }
 0x13f   : > { %8643 = vmatmul.mubr.f32.vlgmr.msra.gmra.mrb[12].mxu0 %v1657_v14  ;;  %10383 = vmatpush3.bf16.msra.mxu1 %v12058_v28 }
 0x140   : > { %10391 = vmatpush3.bf16.msra.mxu0 %v11935_v3  ;;  %10385 = vmatprep.subr.bf16.mxu1 %v12074_v31 }
 0x141   : > { %10393 = vmatprep.subr.bf16.mxu0 %v11943_v5  ;;  %8712 = vmatprep.mubr.f32.mxu0 %v1844_v17 }
 0x142   : > { %3751 = vrot.lane.b32.xlu0 %v12631_v54, %s16481_s13  ;;  %3757 = vrot.lane.b32.xlu1 %v12642_v59, %s16481_s13 }
 0x143   : > { %10387 = vmatpush3.bf16.msra.mxu1 %v12074_v31 }
 0x144   : > { %10395 = vmatpush3.bf16.msra.mxu0 %v11943_v5  ;;  %10421 = vmatprep.subr.bf16.mxu1 %v11935_v3 }
 0x145   : > { %10397 = vmatprep.subr.bf16.mxu0 %v11980_v10 }
 0x146   : > { %8678 = vmatmul.mubr.f32.vlgmr.msra.gmra.mrb[12].mxu1 %v1751_v20  ;;  %v2046_v20 = vmul.f32 %v12618_v43, %v2042_v12  ;;  %3755 = vrot.lane.b32.xlu0 %v12645_v60, %s16481_s13 }
 0x147   : > { %10423 = vmatpush3.bf16.msra.mxu1 %v11935_v3  ;;  %8747 = vmatprep.mubr.f32.mxu1 %v1943_v21 }
 0x148   : > { %10399 = vmatpush3.bf16.msra.mxu0 %v11980_v10  ;;  %10425 = vmatprep.subr.bf16.mxu1 %v11943_v5 }
 0x149   : > { %10401 = vmatprep.subr.bf16.mxu0 %v12010_v19  ;;  %3847 = vrot.lane.b32.xlu1 %v12626_v52, %s11836_s14 }
 0x14a   : > { %3845 = vrot.lane.b32.xlu0 %v12631_v54, %s11836_s14 }
 0x14b   : > { %10427 = vmatpush3.bf16.msra.mxu1 %v11943_v5 }
 0x14c   : > { %10403 = vmatpush3.bf16.msra.mxu0 %v12010_v19  ;;  %10429 = vmatprep.subr.bf16.mxu1 %v11980_v10 }
 0x14d   : > { %10405 = vmatprep.subr.bf16.mxu0 %v12026_v22  ;;  %3851 = vrot.lane.b32.xlu1 %v12642_v59, %s11836_s14 }
 0x14e   : > { %3849 = vrot.lane.b32.xlu0 %v12645_v60, %s11836_s14 }
 0x14f   : > { %10431 = vmatpush3.bf16.msra.mxu1 %v11980_v10 }
 0x150   : > { %10407 = vmatpush3.bf16.msra.mxu0 %v12026_v22  ;;  %10433 = vmatprep.subr.bf16.mxu1 %v12010_v19 }
 0x151   : > { %10409 = vmatprep.subr.bf16.mxu0 %v12042_v25 }
 0x153   : > { %10435 = vmatpush3.bf16.msra.mxu1 %v12010_v19 }
 0x154   : > { %10411 = vmatpush3.bf16.msra.mxu0 %v12042_v25  ;;  %10437 = vmatprep.subr.bf16.mxu1 %v12026_v22 }
 0x155   : > { %10413 = vmatprep.subr.bf16.mxu0 %v12058_v28 }
 0x157   : > { %10439 = vmatpush3.bf16.msra.mxu1 %v12026_v22 }
 0x158   : > { %10415 = vmatpush3.bf16.msra.mxu0 %v12058_v28  ;;  %10441 = vmatprep.subr.bf16.mxu1 %v12042_v25 }
 0x159   : > { %10417 = vmatprep.subr.bf16.mxu0 %v12074_v31 }
 0x15b   : > { %10443 = vmatpush3.bf16.msra.mxu1 %v12042_v25 }
 0x15c   : > { %10419 = vmatpush3.bf16.msra.mxu0 %v12074_v31  ;;  %10445 = vmatprep.subr.bf16.mxu1 %v12058_v28 }
 0x15d   : > { %10453 = vmatprep.subr.bf16.mxu0 %v11935_v3 }
 0x15f   : > { %8713 = vmatmul.mubr.f32.vlgmr.msra.gmra.mrb[14].mxu0 %v1845_v35  ;;  %10447 = vmatpush3.bf16.msra.mxu1 %v12058_v28  ;;  %v2320_v35 = vpop.permute.xlu0 %2319 }
 0x160   : > { %10455 = vmatpush3.bf16.msra.mxu0 %v11935_v3  ;;  %10449 = vmatprep.subr.bf16.mxu1 %v12074_v31  ;;  %v2324_v0 = vsel %vm978_vm5, %v2320_v35, %v2322_v34  ;;  %v3952_v35 = vrot.slane %v3943_v11, 5 }
 0x161   : > { %10457 = vmatprep.subr.bf16.mxu0 %v11943_v5  ;;  %8782 = vmatprep.mubr.f32.mxu0 %v2045_v36  ;;  %v2412_v36 = vpop.permute.xlu1 %2411 }
 0x163   : > { %10451 = vmatpush3.bf16.msra.mxu1 %v12074_v31  ;;  %v2410_v37 = vpop.permute.xlu0 %2409 }
 0x164   : > { %10459 = vmatpush3.bf16.msra.mxu0 %v11943_v5  ;;  %10485 = vmatprep.subr.bf16.mxu1 %v11935_v3  ;;  %v2417_v56 = vsel %vm1073_vm6, %v2410_v37, %v2412_v36  ;;  %v12853_v37 = vsel %vm3948_vm10, %v3950_v24, %v3952_v35 }
 0x165   : > { %10461 = vmatprep.subr.bf16.mxu0 %v11980_v10  ;;  %v12754_v38 = vpop.permute.xlu1 %2415  ;;  %v2421_v59 = vmul.f32 %v12562_v16, %v2417_v56 }
 0x166   : > { %8748 = vmatmul.mubr.f32.vlgmr.msra.gmra.mrb[14].mxu1 %v1944_v44  ;;  %v2230_v44 = vsel %vm883_vm4, %v12687_v8, %v12685_v7 }
 0x167   : > { %10487 = vmatpush3.bf16.msra.mxu1 %v11935_v3  ;;  %8817 = vmatprep.mubr.f32.mxu1 %v2139_v48  ;;  %v12758_v49 = vpop.permute.xlu0 %2413  ;;  %v2234_v63 = vmul.f32 %v12618_v43, %v2230_v44 }
 0x168   : > { %10463 = vmatpush3.bf16.msra.mxu0 %v11980_v10  ;;  %10489 = vmatprep.subr.bf16.mxu1 %v11943_v5  ;;  %v2418_v56 = vsel %vm1073_vm6, %v12758_v49, %v12754_v38  ;;  %v2614_v49 = vmul.f32 %v12562_v16, %v12387_v15 }
 0x169   : > { %10465 = vmatprep.subr.bf16.mxu0 %v12010_v19  ;;  %v2506_v42 = vpop.permute.xlu1 %2505 }
 0x16b   : > { %10491 = vmatpush3.bf16.msra.mxu1 %v11943_v5  ;;  %v2504_v46 = vpop.permute.xlu0 %2503 }
 0x16c   : > { %10467 = vmatpush3.bf16.msra.mxu0 %v12010_v19  ;;  %10493 = vmatprep.subr.bf16.mxu1 %v11980_v10  ;;  %v2511_v1 = vsel %vm1168_vm7, %v2504_v46, %v2506_v42 }
 0x16d   : > { %10469 = vmatprep.subr.bf16.mxu0 %v12026_v22  ;;  %v12794_v61 = vpop.permute.xlu1 %2509  ;;  %v2515_v8 = vmul.f32 %v12562_v16, %v2511_v1 }
 0x16f   : > { %10495 = vmatpush3.bf16.msra.mxu1 %v11980_v10  ;;  %v12796_v62 = vpop.permute.xlu0 %2507 }
 0x170   : > { %10471 = vmatpush3.bf16.msra.mxu0 %v12026_v22  ;;  %10497 = vmatprep.subr.bf16.mxu1 %v12010_v19  ;;  %v2512_v18 = vsel %vm1168_vm7, %v12796_v62, %v12794_v61 }
 0x171   : > { %10473 = vmatprep.subr.bf16.mxu0 %v12042_v25 }
 0x172   : > { %v8294_v45 = vpop.f32.mrb[2].mxu0 }
 0x173   : > { %v12671_v2 = vadd.f32 %v8294_v45, %v12487_v47  ;;  %10499 = vmatpush3.bf16.msra.mxu1 %v12010_v19  ;;  %v766_v9 = vpop.f32.mrb[3].mxu0  ;;  %v12804_v45 = vpop.permute.xlu1 %2706 }
 0x174   : > { %v12675_v6 = vadd.f32 %v766_v9, %v12493_v51  ;;  %10475 = vmatpush3.bf16.msra.mxu0 %v12042_v25  ;;  %10501 = vmatprep.subr.bf16.mxu1 %v12026_v22  ;;  %v2328_v9 = vmul.f32 %v12618_v43, %v2324_v0  ;;  %v12807_v7 = vpop.permute.xlu0 %2704 }
 0x175   : > { %16588 = vst [vmem:[#allocation8_spill] sm:$0xff] %v12671_v2  ;;  %10477 = vmatprep.subr.bf16.mxu0 %v12058_v28  ;;  %v2712_v15 = vsel %vm693_vm2, %v12807_v7, %v12804_v45 }
 0x176   : > { %16589 = vst [vmem:[#allocation9_spill] sm:$0xff] %v12675_v6  ;;  %v2716_v61 = vmul.f32 %v12562_v16, %v2712_v15 }
 0x177   : > { %10503 = vmatpush3.bf16.msra.mxu1 %v12026_v22  ;;  %v12815_v12 = vpop.permute.xlu1 %2710 }
 0x178   : > { %10479 = vmatpush3.bf16.msra.mxu0 %v12058_v28  ;;  %10505 = vmatprep.subr.bf16.mxu1 %v12042_v25 }
 0x179   : > { %v8329_v13 = vpop.f32.mrb[2].mxu1  ;;  %10481 = vmatprep.subr.bf16.mxu0 %v12074_v31 }
 0x17a   : > { %v12698_v14 = vadd.f32 %v8329_v13, %v12487_v47  ;;  %v861_v17 = vpop.f32.mrb[3].mxu1  ;;  %v12819_v13 = vpop.permute.xlu0 %2708 }
 0x17b   : > { %v12705_v21 = vadd.f32 %v861_v17, %v12493_v51  ;;  %10507 = vmatpush3.bf16.msra.mxu1 %v12042_v25  ;;  %v3940_v17 = vld [vmem:[%s11975_s29 + $0x8] sm:$0xe0]  ;;  %v12827_v27 = vpop.permute.xlu1 %2800 }
 0x17c   : > { %16590 = vst [vmem:[#allocation10_spill] sm:$0xff] %v12698_v14  ;;  %10483 = vmatpush3.bf16.msra.mxu0 %v12074_v31  ;;  %10509 = vmatprep.subr.bf16.mxu1 %v12058_v28 }
 0x17d   : > { %16591 = vst [vmem:[#allocation11_spill] sm:$0xff] %v12705_v21  ;;  %10517 = vmatprep.subr.bf16.mxu0 %v11935_v3 }
 0x17e   : > { %v12831_v29 = vpop.permute.xlu0 %2798 }
 0x17f   : > { %8783 = vmatmul.mubr.f32.vlgmr.msra.gmra.mrb[16].mxu0 %v2046_v20  ;;  %10511 = vmatpush3.bf16.msra.mxu1 %v12058_v28  ;;  %v4041_v20 = vrot.slane %v3940_v17, 5 }
 0x180   : > { %10519 = vmatpush3.bf16.msra.mxu0 %v11935_v3  ;;  %10513 = vmatprep.subr.bf16.mxu1 %v12074_v31 }
 0x181   : > { %10521 = vmatprep.subr.bf16.mxu0 %v11943_v5  ;;  %8852 = vmatprep.mubr.f32.mxu0 %v2233_v57  ;;  %v4042_v57 = vrot.slane %v12371_v4, 5  ;;  %v3944_v4 = vld [vmem:[%s11975_s29 + $0x28] sm:$0x1f] }
 0x182   : > { %v4044_v34 = vrot.slane %v3944_v4, 5  ;;  %v12860_v42 = vpop.permute.xlu0 %2802 }
 0x183   : > { %10515 = vmatpush3.bf16.msra.mxu1 %v12074_v31 }
 0x184   : > { %10523 = vmatpush3.bf16.msra.mxu0 %v11943_v5  ;;  %10549 = vmatprep.subr.bf16.mxu1 %v11935_v3  ;;  %v12850_v36 = vsel %vm3948_vm10, %v4042_v57, %v4044_v34 }
 0x185   : > { %10525 = vmatprep.subr.bf16.mxu0 %v11980_v10 }
 0x186   : > { %8818 = vmatmul.mubr.f32.vlgmr.msra.gmra.mrb[16].mxu1 %v2140_v30  ;;  %v12834_v30 = vsel %vm3948_vm10, %v4041_v20, %v4042_v57  ;;  %v2516_v57 = vmul.f32 %v12618_v43, %v2512_v18  ;;  %v4610_v18 = vld [vmem:[%s11975_s29] sm:$0xc0] }
 0x187   : > { %10551 = vmatpush3.bf16.msra.mxu1 %v11935_v3  ;;  %8887 = vmatprep.mubr.f32.mxu1 %v2327_v33  ;;  %v12837_v33 = vsel %vm3948_vm10, %v3949_v23, %v3950_v24 }
 0x188   : > { %10527 = vmatpush3.bf16.msra.mxu0 %v11980_v10  ;;  %10553 = vmatprep.subr.bf16.mxu1 %v11943_v5 }
 0x189   : > { %10529 = vmatprep.subr.bf16.mxu0 %v12010_v19  ;;  %4048 = vrot.lane.b32.xlu1 %v12834_v30, %s11831_s15 }
 0x18a   : > { %4046 = vrot.lane.b32.xlu0 %v12837_v33, %s11831_s15 }
 0x18b   : > { %10555 = vmatpush3.bf16.msra.mxu1 %v11943_v5 }
 0x18c   : > { %10531 = vmatpush3.bf16.msra.mxu0 %v12010_v19  ;;  %10557 = vmatprep.subr.bf16.mxu1 %v11980_v10 }
 0x18d   : > { %10533 = vmatprep.subr.bf16.mxu0 %v12026_v22  ;;  %4052 = vrot.lane.b32.xlu1 %v12850_v36, %s11831_s15 }
 0x18e   : > { %4050 = vrot.lane.b32.xlu0 %v12853_v37, %s11831_s15 }
 0x18f   : > { %10559 = vmatpush3.bf16.msra.mxu1 %v11980_v10 }
 0x190   : > { %10535 = vmatpush3.bf16.msra.mxu0 %v12026_v22  ;;  %10561 = vmatprep.subr.bf16.mxu1 %v12010_v19 }
 0x191   : > { %10537 = vmatprep.subr.bf16.mxu0 %v12042_v25  ;;  %4142 = vrot.lane.b32.xlu1 %v12834_v30, %s11832_s30 }
 0x192   : > { %v8364_v32 = vpop.f32.mrb[4].mxu0  ;;  %4140 = vrot.lane.b32.xlu0 %v12837_v33, %s11832_s30 }
 0x193   : > { %v12763_v39 = vadd.f32 %v8364_v32, %v12487_v47  ;;  %v956_v40 = vpop.f32.mrb[5].mxu0  ;;  %10563 = vmatpush3.bf16.msra.mxu1 %v12010_v19  ;;  %v12856_v32 = vpop.permute.xlu1 %2804 }
 0x194   : > { %v12767_v41 = vadd.f32 %v956_v40, %v12493_v51  ;;  %10539 = vmatpush3.bf16.msra.mxu0 %v12042_v25  ;;  %10565 = vmatprep.subr.bf16.mxu1 %v12026_v22 }
 0x195   : > { %16592 = vst [vmem:[#allocation12_spill] sm:$0xff] %v12763_v39  ;;  %10541 = vmatprep.subr.bf16.mxu0 %v12058_v28  ;;  %4146 = vrot.lane.b32.xlu1 %v12850_v36, %s11832_s30 }
 0x196   : > { %16593 = vst [vmem:[#allocation13_spill] sm:$0xff] %v12767_v41  ;;  %4144 = vrot.lane.b32.xlu0 %v12853_v37, %s11832_s30 }
 0x197   : > { %10567 = vmatpush3.bf16.msra.mxu1 %v12026_v22 }
 0x198   : > { %10543 = vmatpush3.bf16.msra.mxu0 %v12058_v28  ;;  %10569 = vmatprep.subr.bf16.mxu1 %v12042_v25 }
 0x199   : > { %v8399_v48 = vpop.f32.mrb[4].mxu1  ;;  %10545 = vmatprep.subr.bf16.mxu0 %v12074_v31  ;;  %4236 = vrot.lane.b32.xlu1 %v12834_v30, %s11833_s26 }
 0x19a   : > { %v12782_v52 = vadd.f32 %v8399_v48, %v12487_v47  ;;  %v1051_v55 = vpop.f32.mrb[5].mxu1  ;;  %4234 = vrot.lane.b32.xlu0 %v12837_v33, %s11833_s26 }
 0x19b   : > { %v12787_v58 = vadd.f32 %v1051_v55, %v12493_v51  ;;  %10571 = vmatpush3.bf16.msra.mxu1 %v12042_v25  ;;  %v12879_v55 = vpop.permute.xlu1 %2894 }
 0x19c   : > { %16594 = vst [vmem:[#allocation14_spill] sm:$0xff] %v12782_v52  ;;  %10547 = vmatpush3.bf16.msra.mxu0 %v12074_v31  ;;  %10573 = vmatprep.subr.bf16.mxu1 %v12058_v28 }
 0x19d   : > { %16595 = vst [vmem:[#allocation15_spill] sm:$0xff] %v12787_v58  ;;  %10581 = vmatprep.subr.bf16.mxu0 %v11935_v3  ;;  %4240 = vrot.lane.b32.xlu1 %v12850_v36, %s11833_s26 }
 0x19e   : > { %4238 = vrot.lane.b32.xlu0 %v12853_v37, %s11833_s26 }
 0x19f   : > { %8853 = vmatmul.mubr.f32.vlgmr.msra.gmra.mrb[18].mxu0 %v2234_v63  ;;  %10575 = vmatpush3.bf16.msra.mxu1 %v12058_v28  ;;  %v12886_v63 = vpop.permute.xlu0 %2892 }
 0x1a0   : > { %10583 = vmatpush3.bf16.msra.mxu0 %v11935_v3  ;;  %10577 = vmatprep.subr.bf16.mxu1 %v12074_v31 }
 0x1a1   : > { %10585 = vmatprep.subr.bf16.mxu0 %v11943_v5  ;;  %8922 = vmatprep.mubr.f32.mxu0 %v2421_v59 }
 0x1a2   : > { %4330 = vrot.lane.b32.xlu1 %v12834_v30, %s11834_s12  ;;  %4328 = vrot.lane.b32.xlu0 %v12837_v33, %s11834_s12 }
 0x1a3   : > { %10579 = vmatpush3.bf16.msra.mxu1 %v12074_v31  ;;  %v12910_v17 = vpop.permute.xlu0 %2896 }
 0x1a4   : > { %10587 = vmatpush3.bf16.msra.mxu0 %v11943_v5  ;;  %10613 = vmatprep.subr.bf16.mxu1 %v11935_v3 }
 0x1a5   : > { %10589 = vmatprep.subr.bf16.mxu0 %v11980_v10 }
 0x1a6   : > { %8888 = vmatmul.mubr.f32.vlgmr.msra.gmra.mrb[18].mxu1 %v2328_v9  ;;  %v2422_v9 = vmul.f32 %v12618_v43, %v2418_v56  ;;  %4334 = vrot.lane.b32.xlu1 %v12850_v36, %s11834_s12 }
 0x1a7   : > { %10615 = vmatpush3.bf16.msra.mxu1 %v11935_v3  ;;  %8957 = vmatprep.mubr.f32.mxu1 %v2515_v8  ;;  %v12906_v8 = vpop.permute.xlu1 %2898  ;;  %v12927_v23 = vpop.permute.xlu0 %2986 }
 0x1a8   : > { %10591 = vmatpush3.bf16.msra.mxu0 %v11980_v10  ;;  %10617 = vmatprep.subr.bf16.mxu1 %v11943_v5 }
 0x1a9   : > { %10593 = vmatprep.subr.bf16.mxu0 %v12010_v19  ;;  %4332 = vrot.lane.b32.xlu0 %v12853_v37, %s11834_s12 }
 0x1aa   : > { %4424 = vrot.lane.b32.xlu1 %v12834_v30, %s16481_s13 }
 0x1ab   : > { %10619 = vmatpush3.bf16.msra.mxu1 %v11943_v5  ;;  %v12924_v20 = vpop.permute.xlu1 %2988  ;;  %v12945_v45 = vpop.permute.xlu0 %2990 }
 0x1ac   : > { %10595 = vmatpush3.bf16.msra.mxu0 %v12010_v19  ;;  %10621 = vmatprep.subr.bf16.mxu1 %v11980_v10  ;;  %v2994_v39 = vsel %vm978_vm5, %v12927_v23, %v12924_v20  ;;  %v2901_v23 = vsel %vm883_vm4, %v12910_v17, %v12906_v8 }
 0x1ad   : > { %10597 = vmatprep.subr.bf16.mxu0 %v12026_v22  ;;  %4422 = vrot.lane.b32.xlu0 %v12837_v33, %s16481_s13 }
 0x1ae   : > { %4428 = vrot.lane.b32.xlu1 %v12850_v36, %s16481_s13 }
 0x1af   : > { %10623 = vmatpush3.bf16.msra.mxu1 %v11980_v10  ;;  %v12941_v62 = vpop.permute.xlu1 %2992  ;;  %v12960_v24 = vpop.permute.xlu0 %3080 }
 0x1b0   : > { %10599 = vmatpush3.bf16.msra.mxu0 %v12026_v22  ;;  %10625 = vmatprep.subr.bf16.mxu1 %v12010_v19 }
 0x1b1   : > { %10601 = vmatprep.subr.bf16.mxu0 %v12042_v25  ;;  %4426 = vrot.lane.b32.xlu0 %v12853_v37, %s16481_s13 }
 0x1b2   : > { %v8434_v40 = vpop.f32.mrb[6].mxu0  ;;  %4518 = vrot.lane.b32.xlu1 %v12834_v30, %s11836_s14  ;;  %v4611_v30 = vld [vmem:[%s11975_s29 + $0x8] sm:$0xc0] }
 0x1b3   : > { %v12865_v44 = vadd.f32 %v8434_v40, %v12487_v47  ;;  %v1146_v46 = vpop.f32.mrb[7].mxu0  ;;  %10627 = vmatpush3.bf16.msra.mxu1 %v12010_v19  ;;  %v12956_v7 = vpop.permute.xlu1 %3082 }
 0x1b4   : > { %v12869_v48 = vadd.f32 %v1146_v46, %v12493_v51  ;;  %10603 = vmatpush3.bf16.msra.mxu0 %v12042_v25  ;;  %10629 = vmatprep.subr.bf16.mxu1 %v12026_v22  ;;  %v12983_v46 = vpop.permute.xlu0 %3084 }
 0x1b5   : > { %16596 = vst [vmem:[#allocation16_spill] sm:$0xff] %v12865_v44  ;;  %10605 = vmatprep.subr.bf16.mxu0 %v12058_v28  ;;  %4516 = vrot.lane.b32.xlu0 %v12837_v33, %s11836_s14 }
 0x1b6   : > { %16597 = vst [vmem:[#allocation17_spill] sm:$0xff] %v12869_v48  ;;  %4522 = vrot.lane.b32.xlu1 %v12850_v36, %s11836_s14 }
 0x1b7   : > { %10631 = vmatpush3.bf16.msra.mxu1 %v12026_v22  ;;  %v12976_v35 = vpop.permute.xlu1 %3086 }
 0x1b8   : > { %10607 = vmatpush3.bf16.msra.mxu0 %v12058_v28  ;;  %10633 = vmatprep.subr.bf16.mxu1 %v12042_v25 }
 0x1b9   : > { %v8469_v59 = vpop.f32.mrb[6].mxu1  ;;  %10609 = vmatprep.subr.bf16.mxu0 %v12074_v31  ;;  %4520 = vrot.lane.b32.xlu0 %v12853_v37, %s11836_s14 }
 0x1ba   : > { %v12892_v0 = vadd.f32 %v8469_v59, %v12487_v47  ;;  %v1241_v1 = vpop.f32.mrb[7].mxu1  ;;  %v12995_v59 = vpop.permute.xlu0 %3174 }
 0x1bb   : > { %v12898_v38 = vadd.f32 %v1241_v1, %v12493_v51  ;;  %10635 = vmatpush3.bf16.msra.mxu1 %v12042_v25  ;;  %v12991_v56 = vpop.permute.xlu1 %3176 }
 0x1bc   : > { %16598 = vst [vmem:[#allocation18_spill] sm:$0xff] %v12892_v0  ;;  %10611 = vmatpush3.bf16.msra.mxu0 %v12074_v31  ;;  %10637 = vmatprep.subr.bf16.mxu1 %v12058_v28  ;;  %v2900_v0 = vsel %vm883_vm4, %v12886_v63, %v12879_v55 }
 0x1bd   : > { %16599 = vst [vmem:[#allocation19_spill] sm:$0xff] %v12898_v38  ;;  %10645 = vmatprep.subr.bf16.mxu0 %v11935_v3  ;;  %v2904_v55 = vmul.f32 %v12562_v16, %v2900_v0 }
 0x1bf   : > { %8923 = vmatmul.mubr.f32.vlgmr.msra.gmra.mrb[20].mxu0 %v2422_v9  ;;  %10639 = vmatpush3.bf16.msra.mxu1 %v12058_v28  ;;  %v2615_v9 = vmul.f32 %v12618_v43, %v12401_v26  ;;  %v13025_v36 = vpop.permute.xlu1 %3180 }
 0x1c0   : > { %10647 = vmatpush3.bf16.msra.mxu0 %v11935_v3  ;;  %10641 = vmatprep.subr.bf16.mxu1 %v12074_v31 }
 0x1c1   : > { %10649 = vmatprep.subr.bf16.mxu0 %v11943_v5  ;;  %8992 = vmatprep.mubr.f32.mxu0 %v2614_v49  ;;  %v4613_v49 = vld [vmem:[%s11975_s29 + $0x18] sm:$0xff] }
 0x1c2   : > { %v4713_v26 = vrot.slane %v4613_v49, 6  ;;  %v4614_v49 = vld [vmem:[%s11975_s29 + $0x20] sm:$0x3f] }
 0x1c3   : > { %10643 = vmatpush3.bf16.msra.mxu1 %v12074_v31 }
 0x1c4   : > { %10651 = vmatpush3.bf16.msra.mxu0 %v11943_v5  ;;  %10677 = vmatprep.subr.bf16.mxu1 %v11935_v3 }
 0x1c5   : > { %10653 = vmatprep.subr.bf16.mxu0 %v11980_v10 }
 0x1c6   : > { %8958 = vmatmul.mubr.f32.vlgmr.msra.gmra.mrb[20].mxu1 %v2516_v57 }
 0x1c7   : > { %10679 = vmatpush3.bf16.msra.mxu1 %v11935_v3  ;;  %9027 = vmatprep.mubr.f32.mxu1 %v2716_v61  ;;  %v2806_v61 = vsel %vm788_vm3, %v12831_v29, %v12827_v27 }
 0x1c8   : > { %10655 = vmatpush3.bf16.msra.mxu0 %v11980_v10  ;;  %10681 = vmatprep.subr.bf16.mxu1 %v11943_v5  ;;  %v2810_v29 = vmul.f32 %v12562_v16, %v2806_v61  ;;  %v2713_v61 = vsel %vm693_vm2, %v12819_v13, %v12815_v12 }
 0x1c9   : > { %10657 = vmatprep.subr.bf16.mxu0 %v12010_v19  ;;  %v2717_v12 = vmul.f32 %v12618_v43, %v2713_v61 }
 0x1cb   : > { %10683 = vmatpush3.bf16.msra.mxu1 %v11943_v5 }
 0x1cc   : > { %10659 = vmatpush3.bf16.msra.mxu0 %v12010_v19  ;;  %10685 = vmatprep.subr.bf16.mxu1 %v11980_v10 }
 0x1cd   : > { %10661 = vmatprep.subr.bf16.mxu0 %v12026_v22 }
 0x1cf   : > { %10687 = vmatpush3.bf16.msra.mxu1 %v11980_v10 }
 0x1d0   : > { %10663 = vmatpush3.bf16.msra.mxu0 %v12026_v22  ;;  %10689 = vmatprep.subr.bf16.mxu1 %v12010_v19 }
 0x1d1   : > { %10665 = vmatprep.subr.bf16.mxu0 %v12042_v25 }
 0x1d2   : > { %v8504_v4 = vpop.f32.mrb[8].mxu0 }
 0x1d3   : > { %v12973_v11 = vadd.f32 %v8504_v4, %v12487_v47  ;;  %v1340_v34 = vpop.f32.mrb[9].mxu0  ;;  %10691 = vmatpush3.bf16.msra.mxu1 %v12010_v19  ;;  %v4712_v4 = vrot.slane %v4611_v30, 6  ;;  %v4615_v30 = vld [vmem:[%s11975_s29 + $0x28] sm:$0x3f] }
 0x1d4   : > { %v12979_v40 = vadd.f32 %v1340_v34, %v12493_v51  ;;  %10667 = vmatpush3.bf16.msra.mxu0 %v12042_v25  ;;  %10693 = vmatprep.subr.bf16.mxu1 %v12026_v22  ;;  %v4612_v34 = vld [vmem:[%s11975_s29 + $0x10] sm:$0xff]  ;;  %s14471_s29 = scalar_lea.vmem %s16425_s4, %s11954_s20 }
 0x1d5   : > { %16600 = vst [vmem:[#allocation20_spill] sm:$0xff] %v12973_v11  ;;  %10669 = vmatprep.subr.bf16.mxu0 %v12058_v28  ;;  %v13021_v27 = vsel %vm4619_vm11, %v4712_v4, %v4713_v26 }
 0x1d6   : > { %16601 = vst [vmem:[#allocation21_spill] sm:$0xff] %v12979_v40  ;;  %4719 = vrot.lane.b32.xlu1 %v13021_v27, %s11831_s15 }
 0x1d7   : > { %10695 = vmatpush3.bf16.msra.mxu1 %v12026_v22 }
 0x1d8   : > { %10671 = vmatpush3.bf16.msra.mxu0 %v12058_v28  ;;  %10697 = vmatprep.subr.bf16.mxu1 %v12042_v25 }
 0x1d9   : > { %v8539_v1 = vpop.f32.mrb[8].mxu1  ;;  %10673 = vmatprep.subr.bf16.mxu0 %v12074_v31 }
 0x1da   : > { %v13006_v15 = vadd.f32 %v8539_v1, %v12487_v47  ;;  %v1442_v57 = vpop.f32.mrb[9].mxu1  ;;  %v4620_v1 = vrot.slane %v4610_v18, 6  ;;  %v13031_v18 = vpop.permute.xlu0 %3178 }
 0x1db   : > { %v13015_v11 = vadd.f32 %v1442_v57, %v12493_v51  ;;  %10699 = vmatpush3.bf16.msra.mxu1 %v12042_v25  ;;  %v4715_v57 = vrot.slane %v4615_v30, 6  ;;  %v13051_v30 = vpop.permute.xlu1 %3377 }
 0x1dc   : > { %16602 = vst [vmem:[#allocation22_spill] sm:$0xff] %v13006_v15  ;;  %v4621_v15 = vrot.slane %v4612_v34, 6  ;;  %10675 = vmatpush3.bf16.msra.mxu0 %v12074_v31  ;;  %10701 = vmatprep.subr.bf16.mxu1 %v12058_v28  ;;  %v4623_v34 = vrot.slane %v4614_v49, 6 }
 0x1dd   : > { %16603 = vst [vmem:[#allocation23_spill] sm:$0xff] %v13015_v11  ;;  %10709 = vmatprep.subr.bf16.mxu0 %v11935_v3  ;;  %v3182_v11 = vsel %vm1168_vm7, %v12995_v59, %v12991_v56  ;;  %v13286_v56 = vld [vmem:[%s11964_s24] sm:$0xff] }
 0x1de   : > { %v13040_v4 = vsel %vm4619_vm11, %v4620_v1, %v4621_v15  ;;  %v13054_v13 = vpop.permute.xlu0 %3375  ;;  %v13063_v63 = vsel %vm4619_vm11, %v4621_v15, %v4623_v34  ;;  %v3186_v59 = vmul.f32 %v13286_v56, %v3182_v11 }
 0x1df   : > { %8993 = vmatmul.mubr.f32.vlgmr.msra.gmra.mrb[22].mxu0 %v2615_v9  ;;  %10703 = vmatpush3.bf16.msra.mxu1 %v12058_v28  ;;  %16604 = vst [vmem:[#allocation24_spill] sm:$0xff] %v13040_v4  ;;  %v13048_v9 = vsel %vm4619_vm11, %v4713_v26, %v4715_v57  ;;  %16605 = vst [vmem:[#allocation25_spill] sm:$0xff] %v13063_v63  ;;  %v13071_v26 = vpop.permute.xlu1 %3381  ;;  %v3383_v6 = vsel %vm693_vm2, %v13054_v13, %v13051_v30  ;;  %v5460_v13 = vld [vmem:[%s13203_s19 + $0x8] sm:$0xfe] }
 0x1e0   : > { %10711 = vmatpush3.bf16.msra.mxu0 %v11935_v3  ;;  %10705 = vmatprep.subr.bf16.mxu1 %v12074_v31 }
 0x1e1   : > { %10713 = vmatprep.subr.bf16.mxu0 %v11943_v5  ;;  %9062 = vmatprep.mubr.f32.mxu0 %v2810_v29 }
 0x1e2   : > { %4717 = vrot.lane.b32.xlu0 %v13040_v4, %s11831_s15  ;;  %4723 = vrot.lane.b32.xlu1 %v13048_v9, %s11831_s15  ;;  %v13075_v0 = vpop.permute.xlu0 %3379 }
 0x1e3   : > { %10707 = vmatpush3.bf16.msra.mxu1 %v12074_v31  ;;  %v13086_v15 = vpop.permute.xlu1 %3471 }
 0x1e4   : > { %10715 = vmatpush3.bf16.msra.mxu0 %v11943_v5  ;;  %10741 = vmatprep.subr.bf16.mxu1 %v11935_v3 }
 0x1e5   : > { %10717 = vmatprep.subr.bf16.mxu0 %v11980_v10 }
 0x1e6   : > { %9028 = vmatmul.mubr.f32.vlgmr.msra.gmra.mrb[22].mxu1 %v2717_v12  ;;  %4721 = vrot.lane.b32.xlu0 %v13063_v63, %s11831_s15  ;;  %v13090_v1 = vpop.permute.xlu0 %3469 }
 0x1e7   : > { %10743 = vmatpush3.bf16.msra.mxu1 %v11935_v3  ;;  %9097 = vmatprep.mubr.f32.mxu1 %v2904_v55  ;;  %v13106_v61 = vpop.permute.xlu1 %3475 }
 0x1e8   : > { %10719 = vmatpush3.bf16.msra.mxu0 %v11980_v10  ;;  %10745 = vmatprep.subr.bf16.mxu1 %v11943_v5 }
 0x1e9   : > { %10721 = vmatprep.subr.bf16.mxu0 %v12010_v19  ;;  %4813 = vrot.lane.b32.xlu1 %v13021_v27, %s11832_s30 }
 0x1ea   : > { %4811 = vrot.lane.b32.xlu0 %v13040_v4, %s11832_s30  ;;  %v13113_v12 = vpop.permute.xlu0 %3473 }
 0x1eb   : > { %10747 = vmatpush3.bf16.msra.mxu1 %v11943_v5  ;;  %v13121_v55 = vpop.permute.xlu1 %3565 }
 0x1ec   : > { %10723 = vmatpush3.bf16.msra.mxu0 %v12010_v19  ;;  %10749 = vmatprep.subr.bf16.mxu1 %v11980_v10 }
 0x1ed   : > { %10725 = vmatprep.subr.bf16.mxu0 %v12026_v22  ;;  %4817 = vrot.lane.b32.xlu1 %v13048_v9, %s11832_s30 }
 0x1ee   : > { %4815 = vrot.lane.b32.xlu0 %v13063_v63, %s11832_s30 }
 0x1ef   : > { %10751 = vmatpush3.bf16.msra.mxu1 %v11980_v10  ;;  %v13152_v20 = vpop.permute.xlu1 %3569 }
 0x1f0   : > { %10727 = vmatpush3.bf16.msra.mxu0 %v12026_v22  ;;  %10753 = vmatprep.subr.bf16.mxu1 %v12010_v19 }
 0x1f1   : > { %10729 = vmatprep.subr.bf16.mxu0 %v12042_v25  ;;  %4907 = vrot.lane.b32.xlu1 %v13021_v27, %s11833_s26 }
 0x1f2   : > { %v8574_v29 = vpop.f32.mrb[10].mxu0  ;;  %4905 = vrot.lane.b32.xlu0 %v13040_v4, %s11833_s26 }
 0x1f3   : > { %v13103_v49 = vadd.f32 %v8574_v29, %v12487_v47  ;;  %v1536_v57 = vpop.f32.mrb[11].mxu0  ;;  %10755 = vmatpush3.bf16.msra.mxu1 %v12010_v19  ;;  %v2807_v29 = vsel %vm788_vm3, %v12860_v42, %v12856_v32  ;;  %v13175_v17 = vpop.permute.xlu1 %3659 }
 0x1f4   : > { %v13109_v34 = vadd.f32 %v1536_v57, %v12493_v51  ;;  %10731 = vmatpush3.bf16.msra.mxu0 %v12042_v25  ;;  %10757 = vmatprep.subr.bf16.mxu1 %v12026_v22  ;;  %v13128_v57 = vpop.permute.xlu0 %3563  ;;  %v2811_v32 = vmul.f32 %v12618_v43, %v2807_v29  ;;  %v2905_v29 = vmul.f32 %v12618_v43, %v2901_v23 }
 0x1f5   : > { %16606 = vst [vmem:[#allocation26_spill] sm:$0xff] %v13103_v49  ;;  %10733 = vmatprep.subr.bf16.mxu0 %v12058_v28  ;;  %4911 = vrot.lane.b32.xlu1 %v13048_v9, %s11833_s26 }
 0x1f6   : > { %16607 = vst [vmem:[#allocation27_spill] sm:$0xff] %v13109_v34  ;;  %4909 = vrot.lane.b32.xlu0 %v13063_v63, %s11833_s26 }
 0x1f7   : > { %10759 = vmatpush3.bf16.msra.mxu1 %v12026_v22 }
 0x1f8   : > { %10735 = vmatpush3.bf16.msra.mxu0 %v12058_v28  ;;  %10761 = vmatprep.subr.bf16.mxu1 %v12042_v25 }
 0x1f9   : > { %v8609_v49 = vpop.f32.mrb[10].mxu1  ;;  %10737 = vmatprep.subr.bf16.mxu0 %v12074_v31  ;;  %5001 = vrot.lane.b32.xlu1 %v13021_v27, %s11834_s12 }
 0x1fa   : > { %v13134_v44 = vadd.f32 %v8609_v49, %v12487_v47  ;;  %v1630_v52 = vpop.f32.mrb[11].mxu1  ;;  %4999 = vrot.lane.b32.xlu0 %v13040_v4, %s11834_s12  ;;  %v2998_v49 = vmul.f32 %v12562_v16, %v2994_v39  ;;  %v3088_v39 = vsel %vm1073_vm6, %v12960_v24, %v12956_v7 }
 0x1fb   : > { %v13143_v42 = vadd.f32 %v1630_v52, %v12493_v51  ;;  %10763 = vmatpush3.bf16.msra.mxu1 %v12042_v25  ;;  %v13156_v52 = vpop.permute.xlu0 %3567  ;;  %v3092_v8 = vmul.f32 %v12562_v16, %v3088_v39  ;;  %v13190_v16 = vpop.permute.xlu1 %3663 }
 0x1fc   : > { %16608 = vst [vmem:[#allocation28_spill] sm:$0xff] %v13134_v44  ;;  %10739 = vmatpush3.bf16.msra.mxu0 %v12074_v31  ;;  %10765 = vmatprep.subr.bf16.mxu1 %v12058_v28 }
 0x1fd   : > { %16609 = vst [vmem:[#allocation29_spill] sm:$0xff] %v13143_v42  ;;  %10773 = vmatprep.subr.bf16.mxu0 %v11935_v3  ;;  %5005 = vrot.lane.b32.xlu1 %v13048_v9, %s11834_s12 }
 0x1fe   : > { %5003 = vrot.lane.b32.xlu0 %v13063_v63, %s11834_s12 }
 0x1ff   : > { %9063 = vmatmul.mubr.f32.vlgmr.msra.gmra.mrb[24].mxu0 %v2811_v32  ;;  %10767 = vmatpush3.bf16.msra.mxu1 %v12058_v28  ;;  %v13179_v7 = vpop.permute.xlu0 %3657 }
 0x200   : > { %10775 = vmatpush3.bf16.msra.mxu0 %v11935_v3  ;;  %10769 = vmatprep.subr.bf16.mxu1 %v12074_v31 }
 0x201   : > { %10777 = vmatprep.subr.bf16.mxu0 %v11943_v5  ;;  %9132 = vmatprep.mubr.f32.mxu0 %v2998_v49  ;;  %v13216_v49 = vld [vmem:[%s13203_s19 + $0x8] sm:$0xff] }
 0x202   : > { %5095 = vrot.lane.b32.xlu1 %v13021_v27, %s16481_s13  ;;  %5093 = vrot.lane.b32.xlu0 %v13040_v4, %s16481_s13 }
 0x203   : > { %10771 = vmatpush3.bf16.msra.mxu1 %v12074_v31  ;;  %v13192_v24 = vpop.permute.xlu0 %3661 }
 0x204   : > { %10779 = vmatpush3.bf16.msra.mxu0 %v11943_v5  ;;  %10805 = vmatprep.subr.bf16.mxu1 %v11935_v3 }
 0x205   : > { %10781 = vmatprep.subr.bf16.mxu0 %v11980_v10 }
 0x206   : > { %9098 = vmatmul.mubr.f32.vlgmr.msra.gmra.mrb[24].mxu1 %v2905_v29  ;;  %5099 = vrot.lane.b32.xlu1 %v13048_v9, %s16481_s13 }
 0x207   : > { %10807 = vmatpush3.bf16.msra.mxu1 %v11935_v3  ;;  %9167 = vmatprep.mubr.f32.mxu1 %v3092_v8  ;;  %v13212_v32 = vpop.permute.xlu0 %3751  ;;  %v13233_v8 = vld [vmem:[%s13203_s19 + $0x18] sm:$0xff] }
 0x208   : > { %10783 = vmatpush3.bf16.msra.mxu0 %v11980_v10  ;;  %10809 = vmatprep.subr.bf16.mxu1 %v11943_v5 }
 0x209   : > { %10785 = vmatprep.subr.bf16.mxu0 %v12010_v19  ;;  %5097 = vrot.lane.b32.xlu0 %v13063_v63, %s16481_s13 }
 0x20a   : > { %5189 = vrot.lane.b32.xlu1 %v13021_v27, %s11836_s14  ;;  %v13208_v27 = vpop.permute.xlu1 %3753 }
 0x20b   : > { %10811 = vmatpush3.bf16.msra.mxu1 %v11943_v5  ;;  %v13242_v50 = vpop.permute.xlu0 %3755 }
 0x20c   : > { %10787 = vmatpush3.bf16.msra.mxu0 %v12010_v19  ;;  %10813 = vmatprep.subr.bf16.mxu1 %v11980_v10 }
 0x20d   : > { %10789 = vmatprep.subr.bf16.mxu0 %v12026_v22  ;;  %5187 = vrot.lane.b32.xlu0 %v13040_v4, %s11836_s14  ;;  %v5459_v4 = vld [vmem:[%s13203_s19] sm:$0xfe] }
 0x20e   : > { %5193 = vrot.lane.b32.xlu1 %v13048_v9, %s11836_s14  ;;  %v13226_v9 = vld [vmem:[%s13203_s19] sm:$0xff]  ;;  %v13235_v44 = vpop.permute.xlu1 %3757 }
 0x20f   : > { %10815 = vmatpush3.bf16.msra.mxu1 %v11980_v10  ;;  %v13260_v2 = vpop.permute.xlu0 %3845 }
 0x210   : > { %10791 = vmatpush3.bf16.msra.mxu0 %v12026_v22  ;;  %10817 = vmatprep.subr.bf16.mxu1 %v12010_v19 }
 0x211   : > { %10793 = vmatprep.subr.bf16.mxu0 %v12042_v25  ;;  %5191 = vrot.lane.b32.xlu0 %v13063_v63, %s11836_s14 }
 0x212   : > { %v8644_v23 = vpop.f32.mrb[12].mxu0  ;;  %5315 = vrot.lane.b32.xlu1 %v13216_v49, %s11831_s15 }
 0x213   : > { %v13229_v39 = vadd.f32 %v8644_v23, %v12487_v47  ;;  %v1724_v29 = vpop.f32.mrb[13].mxu0  ;;  %10819 = vmatpush3.bf16.msra.mxu1 %v12010_v19  ;;  %v13250_v23 = vld [vmem:[%s13203_s19 + $0x10] sm:$0xff] }
 0x214   : > { %v13238_v14 = vadd.f32 %v1724_v29, %v12493_v51  ;;  %10795 = vmatpush3.bf16.msra.mxu0 %v12042_v25  ;;  %10821 = vmatprep.subr.bf16.mxu1 %v12026_v22  ;;  %v13253_v29 = vpop.permute.xlu1 %3847 }
 0x215   : > { %16610 = vst [vmem:[#allocation30_spill] sm:$0xff] %v13229_v39  ;;  %10797 = vmatprep.subr.bf16.mxu0 %v12058_v28  ;;  %5313 = vrot.lane.b32.xlu0 %v13226_v9, %s11831_s15  ;;  %v2995_v39 = vsel %vm978_vm5, %v12945_v45, %v12941_v62 }
 0x216   : > { %16611 = vst [vmem:[#allocation31_spill] sm:$0xff] %v13238_v14  ;;  %5319 = vrot.lane.b32.xlu1 %v13233_v8, %s11831_s15  ;;  %v2999_v62 = vmul.f32 %v12618_v43, %v2995_v39 }
 0x217   : > { %10823 = vmatpush3.bf16.msra.mxu1 %v12026_v22 }
 0x218   : > { %10799 = vmatpush3.bf16.msra.mxu0 %v12058_v28  ;;  %10825 = vmatprep.subr.bf16.mxu1 %v12042_v25  ;;  %v13278_v40 = vpop.permute.xlu1 %3851 }
 0x219   : > { %v8679_v14 = vpop.f32.mrb[12].mxu1  ;;  %10801 = vmatprep.subr.bf16.mxu0 %v12074_v31  ;;  %5317 = vrot.lane.b32.xlu0 %v13250_v23, %s11831_s15 }
 0x21a   : > { %v13266_v42 = vadd.f32 %v8679_v14, %v12487_v47  ;;  %v1818_v34 = vpop.f32.mrb[13].mxu1  ;;  %5341 = vrot.lane.b32.xlu1 %v13216_v49, %s11832_s30  ;;  %v13282_v14 = vpop.permute.xlu0 %3849 }
 0x21b   : > { %v13275_v45 = vadd.f32 %v1818_v34, %v12493_v51  ;;  %10827 = vmatpush3.bf16.msra.mxu1 %v12042_v25  ;;  %v3089_v34 = vsel %vm1073_vm6, %v12983_v46, %v12976_v35  ;;  %v3285_v35 = vmul.f32 %v13286_v56, %v12631_v54 }
 0x21c   : > { %16612 = vst [vmem:[#allocation32_spill] sm:$0xff] %v13266_v42  ;;  %10803 = vmatpush3.bf16.msra.mxu0 %v12074_v31  ;;  %10829 = vmatprep.subr.bf16.mxu1 %v12058_v28  ;;  %v13297_v39 = vpop.permute.xlu1 %4048  ;;  %v3093_v42 = vmul.f32 %v12618_v43, %v3089_v34 }
 0x21d   : > { %16613 = vst [vmem:[#allocation33_spill] sm:$0xff] %v13275_v45  ;;  %10837 = vmatprep.subr.bf16.mxu0 %v11935_v3  ;;  %5339 = vrot.lane.b32.xlu0 %v13226_v9, %s11832_s30 }
 0x21e   : > { %5345 = vrot.lane.b32.xlu1 %v13233_v8, %s11832_s30  ;;  %v13301_v11 = vpop.permute.xlu0 %4046 }
 0x21f   : > { %9133 = vmatmul.mubr.f32.vlgmr.msra.gmra.mrb[26].mxu0 %v2999_v62  ;;  %10831 = vmatpush3.bf16.msra.mxu1 %v12058_v28 }
 0x220   : > { %10839 = vmatpush3.bf16.msra.mxu0 %v11935_v3  ;;  %10833 = vmatprep.subr.bf16.mxu1 %v12074_v31  ;;  %v13312_v46 = vpop.permute.xlu1 %4052 }
 0x221   : > { %10841 = vmatprep.subr.bf16.mxu0 %v11943_v5  ;;  %9202 = vmatprep.mubr.f32.mxu0 %v3186_v59 }
 0x222   : > { %5343 = vrot.lane.b32.xlu0 %v13250_v23, %s11832_s30  ;;  %5367 = vrot.lane.b32.xlu1 %v13216_v49, %s11833_s26  ;;  %v13316_v62 = vpop.permute.xlu0 %4050 }
 0x223   : > { %10835 = vmatpush3.bf16.msra.mxu1 %v12074_v31 }
 0x224   : > { %10843 = vmatpush3.bf16.msra.mxu0 %v11943_v5  ;;  %10869 = vmatprep.subr.bf16.mxu1 %v11935_v3  ;;  %v13322_v43 = vpop.permute.xlu1 %4142 }
 0x225   : > { %10845 = vmatprep.subr.bf16.mxu0 %v11980_v10 }
 0x226   : > { %9168 = vmatmul.mubr.f32.vlgmr.msra.gmra.mrb[26].mxu1 %v3093_v42  ;;  %5365 = vrot.lane.b32.xlu0 %v13226_v9, %s11833_s26  ;;  %v13326_v54 = vpop.permute.xlu0 %4140 }
 0x227   : > { %10871 = vmatpush3.bf16.msra.mxu1 %v11935_v3  ;;  %9237 = vmatprep.mubr.f32.mxu1 %v3285_v35 }
 0x228   : > { %10847 = vmatpush3.bf16.msra.mxu0 %v11980_v10  ;;  %10873 = vmatprep.subr.bf16.mxu1 %v11943_v5  ;;  %v13334_v42 = vpop.permute.xlu1 %4146 }
 0x229   : > { %10849 = vmatprep.subr.bf16.mxu0 %v12010_v19  ;;  %5371 = vrot.lane.b32.xlu1 %v13233_v8, %s11833_s26 }
 0x22a   : > { %5369 = vrot.lane.b32.xlu0 %v13250_v23, %s11833_s26  ;;  %v13338_v59 = vpop.permute.xlu0 %4144 }
 0x22b   : > { %10875 = vmatpush3.bf16.msra.mxu1 %v11943_v5 }
 0x22c   : > { %10851 = vmatpush3.bf16.msra.mxu0 %v12010_v19  ;;  %10877 = vmatprep.subr.bf16.mxu1 %v11980_v10  ;;  %v13346_v34 = vpop.permute.xlu1 %4236 }
 0x22d   : > { %10853 = vmatprep.subr.bf16.mxu0 %v12026_v22  ;;  %5393 = vrot.lane.b32.xlu1 %v13216_v49, %s11834_s12 }
 0x22e   : > { %5391 = vrot.lane.b32.xlu0 %v13226_v9, %s11834_s12  ;;  %v13350_v35 = vpop.permute.xlu0 %4234 }
 0x22f   : > { %10879 = vmatpush3.bf16.msra.mxu1 %v11980_v10 }
 0x230   : > { %10855 = vmatpush3.bf16.msra.mxu0 %v12026_v22  ;;  %10881 = vmatprep.subr.bf16.mxu1 %v12010_v19  ;;  %v13366_v41 = vpop.permute.xlu1 %4240 }
 0x231   : > { %10857 = vmatprep.subr.bf16.mxu0 %v12042_v25  ;;  %5397 = vrot.lane.b32.xlu1 %v13233_v8, %s11834_s12 }
 0x232   : > { %v8714_v45 = vpop.f32.mrb[14].mxu0  ;;  %5395 = vrot.lane.b32.xlu0 %v13250_v23, %s11834_s12 }
 0x233   : > { %v13358_v38 = vadd.f32 %v8714_v45, %v12487_v47  ;;  %v1912_v48 = vpop.f32.mrb[15].mxu0  ;;  %10883 = vmatpush3.bf16.msra.mxu1 %v12010_v19  ;;  %v13371_v45 = vpop.permute.xlu0 %4238 }
 0x234   : > { %v13362_v58 = vadd.f32 %v1912_v48, %v12493_v51  ;;  %10859 = vmatpush3.bf16.msra.mxu0 %v12042_v25  ;;  %10885 = vmatprep.subr.bf16.mxu1 %v12026_v22  ;;  %v3183_v48 = vsel %vm1168_vm7, %v13031_v18, %v13025_v36  ;;  %v13398_v18 = vld [vmem:[%s11964_s24 + $0x8] sm:$0xff] }
 0x235   : > { %16614 = vst [vmem:[#allocation34_spill] sm:$0xff] %v13358_v38  ;;  %10861 = vmatprep.subr.bf16.mxu0 %v12058_v28  ;;  %5419 = vrot.lane.b32.xlu1 %v13216_v49, %s16481_s13  ;;  %v13381_v38 = vpop.permute.xlu1 %4330  ;;  %v3187_v63 = vmul.f32 %v13398_v18, %v3183_v48 }
 0x236   : > { %16615 = vst [vmem:[#allocation35_spill] sm:$0xff] %v13362_v58  ;;  %5417 = vrot.lane.b32.xlu0 %v13226_v9, %s16481_s13 }
 0x237   : > { %10887 = vmatpush3.bf16.msra.mxu1 %v12026_v22 }
 0x238   : > { %10863 = vmatpush3.bf16.msra.mxu0 %v12058_v28  ;;  %10889 = vmatprep.subr.bf16.mxu1 %v12042_v25 }
 0x239   : > { %v8749_v58 = vpop.f32.mrb[14].mxu1  ;;  %10865 = vmatprep.subr.bf16.mxu0 %v12074_v31  ;;  %5423 = vrot.lane.b32.xlu1 %v13233_v8, %s16481_s13  ;;  %v13406_v30 = vpop.permute.xlu1 %4334 }
 0x23a   : > { %v13387_v21 = vadd.f32 %v8749_v58, %v12487_v47  ;;  %v2011_v53 = vpop.f32.mrb[15].mxu1  ;;  %5421 = vrot.lane.b32.xlu0 %v13250_v23, %s16481_s13  ;;  %v13402_v58 = vpop.permute.xlu0 %4328  ;;  %16618 = vst [vmem:[#allocation38_spill] sm:$0xff] %v13406_v30 }
 0x23b   : > { %v13395_v36 = vadd.f32 %v2011_v53, %v12493_v51  ;;  %10891 = vmatpush3.bf16.msra.mxu1 %v12042_v25  ;;  %v3387_v53 = vmul.f32 %v13286_v56, %v3383_v6  ;;  %v3477_v6 = vsel %vm788_vm3, %v13090_v1, %v13086_v15 }
 0x23c   : > { %16616 = vst [vmem:[#allocation36_spill] sm:$0xff] %v13387_v21  ;;  %10867 = vmatpush3.bf16.msra.mxu0 %v12074_v31  ;;  %10893 = vmatprep.subr.bf16.mxu1 %v12058_v28  ;;  %v5498_v21 = vrot.slane %v5460_v13, 1  ;;  %v5475_v13 = vrot.slane %v5459_v4, 1  ;;  %v3481_v15 = vmul.f32 %v13286_v56, %v3477_v6 }
 0x23d   : > { %16617 = vst [vmem:[#allocation37_spill] sm:$0xff] %v13395_v36  ;;  %10901 = vmatprep.subr.bf16.mxu0 %v11935_v3  ;;  %5445 = vrot.lane.b32.xlu1 %v13216_v49, %s11836_s14  ;;  %v5499_v36 = vrot.slane %v13233_v8, 1  ;;  %v13425_v49 = vpop.permute.xlu1 %4424 }
 0x23e   : > { %5443 = vrot.lane.b32.xlu0 %v13226_v9, %s11836_s14  ;;  %v13416_v48 = vpop.permute.xlu0 %4332  ;;  %16620 = vst [vmem:[#allocation40_spill] sm:$0xff] %v13425_v49  ;;  %v3286_v9 = vmul.f32 %v13398_v18, %v12645_v60  ;;  %v5461_v60 = vld [vmem:[%s13203_s19 + $0x20] sm:$0x1] }
 0x23f   : > { %9203 = vmatmul.mubr.f32.vlgmr.msra.gmra.mrb[28].mxu0 %v3187_v63  ;;  %10895 = vmatpush3.bf16.msra.mxu1 %v12058_v28  ;;  %16619 = vst [vmem:[#allocation39_spill] sm:$0xff] %v13416_v48  ;;  %v5462_v63 = vld [vmem:[%s13203_s19 + $0x28] sm:$0x1]  ;;  %v5476_v48 = vrot.slane %v13250_v23, 1  ;;  %v13439_v1 = vsel %vm1264_vm0, %v5498_v21, %v5499_v36  ;;  %v5478_v21 = vrot.slane %v5461_v60, 1 }
 0x240   : > { %10903 = vmatpush3.bf16.msra.mxu0 %v11935_v3  ;;  %10897 = vmatprep.subr.bf16.mxu1 %v12074_v31  ;;  %v5501_v30 = vrot.slane %v5462_v63, 1 }
 0x241   : > { %10905 = vmatprep.subr.bf16.mxu0 %v11943_v5  ;;  %9272 = vmatprep.mubr.f32.mxu0 %v3387_v53  ;;  %v13446_v49 = vpop.permute.xlu1 %4428  ;;  %v13452_v4 = vsel %vm1264_vm0, %v5475_v13, %v5476_v48  ;;  %v13470_v13 = vsel %vm1264_vm0, %v5476_v48, %v5478_v21 }
 0x242   : > { %5449 = vrot.lane.b32.xlu1 %v13233_v8, %s11836_s14  ;;  %5447 = vrot.lane.b32.xlu0 %v13250_v23, %s11836_s14  ;;  %v13441_v53 = vpop.permute.xlu0 %4422  ;;  %16621 = vst [vmem:[#allocation41_spill] sm:$0xff] %v13452_v4  ;;  %v13456_v6 = vsel %vm1264_vm0, %v5499_v36, %v5501_v30  ;;  %16623 = vst [vmem:[#allocation43_spill] sm:$0xff] %v13470_v13 }
 0x243   : > { %10899 = vmatpush3.bf16.msra.mxu1 %v12074_v31 }
 0x244   : > { %10907 = vmatpush3.bf16.msra.mxu0 %v11943_v5  ;;  %10933 = vmatprep.subr.bf16.mxu1 %v11935_v3 }
 0x245   : > { %10909 = vmatprep.subr.bf16.mxu0 %v11980_v10 }
 0x246   : > { %9238 = vmatmul.mubr.f32.vlgmr.msra.gmra.mrb[28].mxu1 %v3286_v9  ;;  %5505 = vrot.lane.b32.xlu1 %v13439_v1, %s11831_s15  ;;  %v13458_v63 = vpop.permute.xlu0 %4426  ;;  %v13462_v9 = vpop.permute.xlu1 %4518 }
 0x247   : > { %10935 = vmatpush3.bf16.msra.mxu1 %v11935_v3  ;;  %9307 = vmatprep.mubr.f32.mxu1 %v3481_v15  ;;  %16622 = vst [vmem:[#allocation42_spill] sm:$0xff] %v13458_v63 }
 0x248   : > { %10911 = vmatpush3.bf16.msra.mxu0 %v11980_v10  ;;  %10937 = vmatprep.subr.bf16.mxu1 %v11943_v5 }
 0x249   : > { %10913 = vmatprep.subr.bf16.mxu0 %v12010_v19  ;;  %5503 = vrot.lane.b32.xlu0 %v13452_v4, %s11831_s15 }
 0x24a   : > { %5509 = vrot.lane.b32.xlu1 %v13456_v6, %s11831_s15  ;;  %v13473_v36 = vpop.permute.xlu0 %4516  ;;  %v13477_v30 = vpop.permute.xlu1 %4522 }
 0x24b   : > { %10939 = vmatpush3.bf16.msra.mxu1 %v11943_v5  ;;  %16624 = vst [vmem:[#allocation44_spill] sm:$0xff] %v13477_v30 }
 0x24c   : > { %10915 = vmatpush3.bf16.msra.mxu0 %v12010_v19  ;;  %10941 = vmatprep.subr.bf16.mxu1 %v11980_v10 }
 0x24d   : > { %10917 = vmatprep.subr.bf16.mxu0 %v12026_v22  ;;  %5507 = vrot.lane.b32.xlu0 %v13470_v13, %s11831_s15 }
 0x24e   : > { %5531 = vrot.lane.b32.xlu1 %v13439_v1, %s11832_s30  ;;  %v13485_v48 = vpop.permute.xlu0 %4520  ;;  %v13489_v15 = vpop.permute.xlu1 %4719 }
 0x24f   : > { %10943 = vmatpush3.bf16.msra.mxu1 %v11980_v10  ;;  %16625 = vst [vmem:[#allocation45_spill] sm:$0xff] %v13485_v48  ;;  %16626 = vst [vmem:[#allocation46_spill] sm:$0xff] %v13489_v15 }
 0x250   : > { %10919 = vmatpush3.bf16.msra.mxu0 %v12026_v22  ;;  %10945 = vmatprep.subr.bf16.mxu1 %v12010_v19 }
 0x251   : > { %10921 = vmatprep.subr.bf16.mxu0 %v12042_v25  ;;  %5529 = vrot.lane.b32.xlu0 %v13452_v4, %s11832_s30 }
 0x252   : > { %v8784_v60 = vpop.f32.mrb[16].mxu0  ;;  %5535 = vrot.lane.b32.xlu1 %v13456_v6, %s11832_s30 }
 0x253   : > { %v13497_v21 = vadd.f32 %v8784_v60, %v12487_v47  ;;  %v2113_v30 = vpop.f32.mrb[17].mxu0  ;;  %10947 = vmatpush3.bf16.msra.mxu1 %v12010_v19 }
 0x254   : > { %v13501_v48 = vadd.f32 %v2113_v30, %v12493_v51  ;;  %10923 = vmatpush3.bf16.msra.mxu0 %v12042_v25  ;;  %10949 = vmatprep.subr.bf16.mxu1 %v12026_v22  ;;  %v13505_v15 = vpop.permute.xlu0 %4717  ;;  %v13510_v63 = vpop.permute.xlu1 %4723  ;;  %v3384_v30 = vsel %vm693_vm2, %v13075_v0, %v13071_v26 }
 0x255   : > { %16627 = vst [vmem:[#allocation47_spill] sm:$0xff] %v13497_v21  ;;  %16629 = vst [vmem:[#allocation49_spill] sm:$0xff] %v13505_v15  ;;  %10925 = vmatprep.subr.bf16.mxu0 %v12058_v28  ;;  %5533 = vrot.lane.b32.xlu0 %v13470_v13, %s11832_s30  ;;  %v3571_v15 = vsel %vm883_vm4, %v13128_v57, %v13121_v55  ;;  %v3388_v26 = vmul.f32 %v13398_v18, %v3384_v30 }
 0x256   : > { %16628 = vst [vmem:[#allocation48_spill] sm:$0xff] %v13501_v48  ;;  %16630 = vst [vmem:[#allocation50_spill] sm:$0xff] %v13510_v63  ;;  %5557 = vrot.lane.b32.xlu1 %v13439_v1, %s11833_s26  ;;  %v3575_v55 = vmul.f32 %v13286_v56, %v3571_v15  ;;  %v3478_v57 = vsel %vm788_vm3, %v13113_v12, %v13106_v61  ;;  %v3665_v15 = vsel %vm978_vm5, %v13179_v7, %v13175_v17 }
 0x257   : > { %10951 = vmatpush3.bf16.msra.mxu1 %v12026_v22  ;;  %v3669_v61 = vmul.f32 %v13286_v56, %v3665_v15 }
 0x258   : > { %10927 = vmatpush3.bf16.msra.mxu0 %v12058_v28  ;;  %10953 = vmatprep.subr.bf16.mxu1 %v12042_v25  ;;  %v13520_v60 = vpop.permute.xlu0 %4721 }
 0x259   : > { %16631 = vst [vmem:[#allocation51_spill] sm:$0xff] %v13520_v60  ;;  %v8819_v21 = vpop.f32.mrb[16].mxu1  ;;  %10929 = vmatprep.subr.bf16.mxu0 %v12074_v31  ;;  %5555 = vrot.lane.b32.xlu0 %v13452_v4, %s11833_s26 }
 0x25a   : > { %v13526_v48 = vadd.f32 %v8819_v21, %v12487_v47  ;;  %v2207_v63 = vpop.f32.mrb[17].mxu1  ;;  %5561 = vrot.lane.b32.xlu1 %v13456_v6, %s11833_s26 }
 0x25b   : > { %v13535_v0 = vadd.f32 %v2207_v63, %v12493_v51  ;;  %10955 = vmatpush3.bf16.msra.mxu1 %v12042_v25  ;;  %v13538_v60 = vpop.permute.xlu1 %4813 }
 0x25c   : > { %16632 = vst [vmem:[#allocation52_spill] sm:$0xff] %v13526_v48  ;;  %10931 = vmatpush3.bf16.msra.mxu0 %v12074_v31  ;;  %10957 = vmatprep.subr.bf16.mxu1 %v12058_v28  ;;  %v13542_v21 = vpop.permute.xlu0 %4811 }
 0x25d   : > { %16633 = vst [vmem:[#allocation53_spill] sm:$0xff] %v13535_v0  ;;  %10965 = vmatprep.subr.bf16.mxu0 %v11935_v3  ;;  %5559 = vrot.lane.b32.xlu0 %v13470_v13, %s11833_s26  ;;  %v5649_v0 = vld [vmem:[%s13203_s19] sm:$0xfc] }
 0x25e   : > { %5583 = vrot.lane.b32.xlu1 %v13439_v1, %s11834_s12 }
 0x25f   : > { %9273 = vmatmul.mubr.f32.vlgmr.msra.gmra.mrb[30].mxu0 %v3388_v26  ;;  %10959 = vmatpush3.bf16.msra.mxu1 %v12058_v28  ;;  %v13554_v63 = vpop.permute.xlu1 %4817  ;;  %v3482_v26 = vmul.f32 %v13398_v18, %v3478_v57 }
 0x260   : > { %16634 = vst [vmem:[#allocation54_spill] sm:$0xff] %v13554_v63  ;;  %10967 = vmatpush3.bf16.msra.mxu0 %v11935_v3  ;;  %10961 = vmatprep.subr.bf16.mxu1 %v12074_v31  ;;  %v13561_v30 = vpop.permute.xlu0 %4815 }
 0x261   : > { %16635 = vst [vmem:[#allocation55_spill] sm:$0xff] %v13561_v30  ;;  %10969 = vmatprep.subr.bf16.mxu0 %v11943_v5  ;;  %9342 = vmatprep.mubr.f32.mxu0 %v3575_v55 }
 0x262   : > { %5581 = vrot.lane.b32.xlu0 %v13452_v4, %s11834_s12  ;;  %5587 = vrot.lane.b32.xlu1 %v13456_v6, %s11834_s12 }
 0x263   : > { %10963 = vmatpush3.bf16.msra.mxu1 %v12074_v31  ;;  %v13571_v12 = vpop.permute.xlu1 %4907 }
 0x264   : > { %10971 = vmatpush3.bf16.msra.mxu0 %v11943_v5  ;;  %10997 = vmatprep.subr.bf16.mxu1 %v11935_v3  ;;  %v13575_v17 = vpop.permute.xlu0 %4905 }
 0x265   : > { %16636 = vst [vmem:[#allocation56_spill] sm:$0xff] %v13575_v17  ;;  %10973 = vmatprep.subr.bf16.mxu0 %v11980_v10 }
 0x266   : > { %9308 = vmatmul.mubr.f32.vlgmr.msra.gmra.mrb[30].mxu1 %v3482_v26  ;;  %5585 = vrot.lane.b32.xlu0 %v13470_v13, %s11834_s12 }
 0x267   : > { %10999 = vmatpush3.bf16.msra.mxu1 %v11935_v3  ;;  %9377 = vmatprep.mubr.f32.mxu1 %v3669_v61  ;;  %v13581_v7 = vpop.permute.xlu1 %4911  ;;  %v5650_v61 = vld [vmem:[%s13203_s19 + $0x8] sm:$0xfc] }
 0x268   : > { %16637 = vst [vmem:[#allocation57_spill] sm:$0xff] %v13581_v7  ;;  %10975 = vmatpush3.bf16.msra.mxu0 %v11980_v10  ;;  %11001 = vmatprep.subr.bf16.mxu1 %v11943_v5  ;;  %v13585_v55 = vpop.permute.xlu0 %4909  ;;  %v5689_v7 = vrot.slane %v13233_v8, 2 }
 0x269   : > { %16638 = vst [vmem:[#allocation58_spill] sm:$0xff] %v13585_v55  ;;  %10977 = vmatprep.subr.bf16.mxu0 %v12010_v19  ;;  %5609 = vrot.lane.b32.xlu1 %v13439_v1, %s16481_s13 }
 0x26a   : > { %5607 = vrot.lane.b32.xlu0 %v13452_v4, %s16481_s13 }
 0x26b   : > { %11003 = vmatpush3.bf16.msra.mxu1 %v11943_v5  ;;  %v13593_v57 = vpop.permute.xlu1 %5001 }
 0x26c   : > { %16639 = vst [vmem:[#allocation59_spill] sm:$0xff] %v13593_v57  ;;  %10979 = vmatpush3.bf16.msra.mxu0 %v12010_v19  ;;  %11005 = vmatprep.subr.bf16.mxu1 %v11980_v10  ;;  %v13597_v15 = vpop.permute.xlu0 %4999  ;;  %v5652_v57 = vld [vmem:[%s13203_s19 + $0x28] sm:$0x3] }
 0x26d   : > { %16640 = vst [vmem:[#allocation60_spill] sm:$0xff] %v13597_v15  ;;  %10981 = vmatprep.subr.bf16.mxu0 %v12026_v22  ;;  %5613 = vrot.lane.b32.xlu1 %v13456_v6, %s16481_s13  ;;  %v5666_v15 = vrot.slane %v13250_v23, 2 }
 0x26e   : > { %5611 = vrot.lane.b32.xlu0 %v13470_v13, %s16481_s13 }
 0x26f   : > { %11007 = vmatpush3.bf16.msra.mxu1 %v11980_v10  ;;  %v13605_v26 = vpop.permute.xlu1 %5005 }
 0x270   : > { %16641 = vst [vmem:[#allocation61_spill] sm:$0xff] %v13605_v26  ;;  %10983 = vmatpush3.bf16.msra.mxu0 %v12026_v22  ;;  %11009 = vmatprep.subr.bf16.mxu1 %v12010_v19  ;;  %v13610_v48 = vpop.permute.xlu0 %5003  ;;  %v5688_v26 = vrot.slane %v5650_v61, 2  ;;  %v5651_v61 = vld [vmem:[%s13203_s19 + $0x20] sm:$0x3] }
 0x271   : > { %16642 = vst [vmem:[#allocation62_spill] sm:$0xff] %v13610_v48  ;;  %10985 = vmatprep.subr.bf16.mxu0 %v12042_v25  ;;  %5635 = vrot.lane.b32.xlu1 %v13439_v1, %s11836_s14  ;;  %v5665_v48 = vrot.slane %v5649_v0, 2 }
 0x272   : > { %v8854_v55 = vpop.f32.mrb[18].mxu0  ;;  %5633 = vrot.lane.b32.xlu0 %v13452_v4, %s11836_s14  ;;  %v13641_v0 = vsel %vm1935_vm1, %v5688_v26, %v5689_v7  ;;  %v3759_v26 = vsel %vm1073_vm6, %v13212_v32, %v13208_v27 }
 0x273   : > { %v13620_v30 = vadd.f32 %v8854_v55, %v12487_v47  ;;  %v2301_v63 = vpop.f32.mrb[19].mxu0  ;;  %11011 = vmatpush3.bf16.msra.mxu1 %v12010_v19  ;;  %v13645_v4 = vsel %vm1935_vm1, %v5665_v48, %v5666_v15  ;;  %v3763_v32 = vmul.f32 %v13286_v56, %v3759_v26 }
 0x274   : > { %v13626_v17 = vadd.f32 %v2301_v63, %v12493_v51  ;;  %10987 = vmatpush3.bf16.msra.mxu0 %v12042_v25  ;;  %11013 = vmatprep.subr.bf16.mxu1 %v12026_v22  ;;  %v13630_v1 = vpop.permute.xlu1 %5095  ;;  %v13636_v55 = vpop.permute.xlu0 %5093  ;;  %v5691_v63 = vrot.slane %v5652_v57, 2  ;;  %16645 = vst [vmem:[#allocation65_spill] sm:$0xff] %v13645_v4 }
 0x275   : > { %16643 = vst [vmem:[#allocation63_spill] sm:$0xff] %v13620_v30  ;;  %10989 = vmatprep.subr.bf16.mxu0 %v12058_v28  ;;  %5639 = vrot.lane.b32.xlu1 %v13456_v6, %s11836_s14  ;;  %v5668_v30 = vrot.slane %v5651_v61, 2  ;;  %v3572_v6 = vsel %vm883_vm4, %v13156_v52, %v13152_v20 }
 0x276   : > { %16644 = vst [vmem:[#allocation64_spill] sm:$0xff] %v13626_v17  ;;  %5637 = vrot.lane.b32.xlu0 %v13470_v13, %s11836_s14  ;;  %v13666_v20 = vsel %vm1935_vm1, %v5689_v7, %v5691_v63  ;;  %v3576_v52 = vmul.f32 %v13398_v18, %v3572_v6 }
 0x277   : > { %11015 = vmatpush3.bf16.msra.mxu1 %v12026_v22 }
 0x278   : > { %10991 = vmatpush3.bf16.msra.mxu0 %v12058_v28  ;;  %11017 = vmatprep.subr.bf16.mxu1 %v12042_v25  ;;  %v13652_v17 = vpop.permute.xlu1 %5099 }
 0x279   : > { %v8889_v13 = vpop.f32.mrb[18].mxu1  ;;  %10993 = vmatprep.subr.bf16.mxu0 %v12074_v31  ;;  %5695 = vrot.lane.b32.xlu1 %v13641_v0, %s11831_s15 }
 0x27a   : > { %v13658_v48 = vadd.f32 %v8889_v13, %v12487_v47  ;;  %v2395_v57 = vpop.f32.mrb[19].mxu1  ;;  %5693 = vrot.lane.b32.xlu0 %v13645_v4, %s11831_s15  ;;  %v13674_v13 = vsel %vm1935_vm1, %v5666_v15, %v5668_v30  ;;  %v3666_v30 = vsel %vm978_vm5, %v13192_v24, %v13190_v16  ;;  %v3853_v15 = vsel %vm1168_vm7, %v13260_v2, %v13253_v29 }
 0x27b   : > { %v13670_v61 = vadd.f32 %v2395_v57, %v12493_v51  ;;  %11019 = vmatpush3.bf16.msra.mxu1 %v12042_v25  ;;  %16648 = vst [vmem:[#allocation68_spill] sm:$0xff] %v13674_v13  ;;  %v3670_v6 = vmul.f32 %v13398_v18, %v3666_v30  ;;  %v3857_v16 = vmul.f32 %v13286_v56, %v3853_v15 }
 0x27c   : > { %16646 = vst [vmem:[#allocation66_spill] sm:$0xff] %v13658_v48  ;;  %v13676_v48 = vpop.permute.xlu0 %5097  ;;  %10995 = vmatpush3.bf16.msra.mxu0 %v12074_v31  ;;  %11021 = vmatprep.subr.bf16.mxu1 %v12058_v28  ;;  %v13680_v27 = vpop.permute.xlu1 %5189 }
 0x27d   : > { %16647 = vst [vmem:[#allocation67_spill] sm:$0xff] %v13670_v61  ;;  %11029 = vmatprep.subr.bf16.mxu0 %v11935_v3  ;;  %5699 = vrot.lane.b32.xlu1 %v13666_v20, %s11831_s15 }
 0x27e   : > { %5697 = vrot.lane.b32.xlu0 %v13674_v13, %s11831_s15 }
 0x27f   : > { %9343 = vmatmul.mubr.f32.vlgmr.msra.gmra.mrb[32].mxu0 %v3576_v52  ;;  %11023 = vmatpush3.bf16.msra.mxu1 %v12058_v28 }
 0x280   : > { %v13692_v7 = vpop.permute.xlu0 %5187  ;;  %11031 = vmatpush3.bf16.msra.mxu0 %v11935_v3  ;;  %11025 = vmatprep.subr.bf16.mxu1 %v12074_v31  ;;  %v13699_v63 = vpop.permute.xlu1 %5193 }
 0x281   : > { %11033 = vmatprep.subr.bf16.mxu0 %v11943_v5  ;;  %9412 = vmatprep.mubr.f32.mxu0 %v3763_v32 }
 0x282   : > { %5721 = vrot.lane.b32.xlu1 %v13641_v0, %s11832_s30  ;;  %5719 = vrot.lane.b32.xlu0 %v13645_v4, %s11832_s30 }
 0x283   : > { %11027 = vmatpush3.bf16.msra.mxu1 %v12074_v31 }
 0x284   : > { %v13709_v24 = vpop.permute.xlu0 %5191  ;;  %11035 = vmatpush3.bf16.msra.mxu0 %v11943_v5  ;;  %11061 = vmatprep.subr.bf16.mxu1 %v11935_v3  ;;  %v13713_v2 = vpop.permute.xlu1 %5315 }
 0x285   : > { %16649 = vst [vmem:[#allocation69_spill] sm:$0xff] %v13713_v2  ;;  %11037 = vmatprep.subr.bf16.mxu0 %v11980_v10 }
 0x286   : > { %9378 = vmatmul.mubr.f32.vlgmr.msra.gmra.mrb[32].mxu1 %v3670_v6  ;;  %5725 = vrot.lane.b32.xlu1 %v13666_v20, %s11832_s30 }
 0x287   : > { %11063 = vmatpush3.bf16.msra.mxu1 %v11935_v3  ;;  %9447 = vmatprep.mubr.f32.mxu1 %v3857_v16 }
 0x288   : > { %v13719_v29 = vpop.permute.xlu0 %5313  ;;  %11039 = vmatpush3.bf16.msra.mxu0 %v11980_v10  ;;  %11065 = vmatprep.subr.bf16.mxu1 %v11943_v5  ;;  %v13723_v57 = vpop.permute.xlu1 %5319 }
 0x289   : > { %16650 = vst [vmem:[#allocation70_spill] sm:$0xff] %v13719_v29  ;;  %16651 = vst [vmem:[#allocation71_spill] sm:$0xff] %v13723_v57  ;;  %11041 = vmatprep.subr.bf16.mxu0 %v12010_v19  ;;  %5723 = vrot.lane.b32.xlu0 %v13674_v13, %s11832_s30  ;;  %v16783_v29 = vld [vmem:[#allocation55_spill] sm:$0xff] }
 0x28a   : > { %5747 = vrot.lane.b32.xlu1 %v13641_v0, %s11833_s26 }
 0x28b   : > { %11067 = vmatpush3.bf16.msra.mxu1 %v11943_v5 }
 0x28c   : > { %v13731_v26 = vpop.permute.xlu0 %5317  ;;  %11043 = vmatpush3.bf16.msra.mxu0 %v12010_v19  ;;  %11069 = vmatprep.subr.bf16.mxu1 %v11980_v10  ;;  %v13735_v52 = vpop.permute.xlu1 %5341 }
 0x28d   : > { %16652 = vst [vmem:[#allocation72_spill] sm:$0xff] %v13731_v26  ;;  %16653 = vst [vmem:[#allocation73_spill] sm:$0xff] %v13735_v52  ;;  %11045 = vmatprep.subr.bf16.mxu0 %v12026_v22  ;;  %5745 = vrot.lane.b32.xlu0 %v13645_v4, %s11833_s26 }
 0x28e   : > { %5751 = vrot.lane.b32.xlu1 %v13666_v20, %s11833_s26 }
 0x28f   : > { %11071 = vmatpush3.bf16.msra.mxu1 %v11980_v10 }
 0x290   : > { %v13743_v32 = vpop.permute.xlu0 %5339  ;;  %11047 = vmatpush3.bf16.msra.mxu0 %v12026_v22  ;;  %11073 = vmatprep.subr.bf16.mxu1 %v12010_v19  ;;  %v13747_v30 = vpop.permute.xlu1 %5345 }
 0x291   : > { %16654 = vst [vmem:[#allocation74_spill] sm:$0xff] %v13743_v32  ;;  %16655 = vst [vmem:[#allocation75_spill] sm:$0xff] %v13747_v30  ;;  %11049 = vmatprep.subr.bf16.mxu0 %v12042_v25  ;;  %5749 = vrot.lane.b32.xlu0 %v13674_v13, %s11833_s26 }
 0x292   : > { %v8924_v15 = vpop.f32.mrb[20].mxu0  ;;  %5773 = vrot.lane.b32.xlu1 %v13641_v0, %s11834_s12 }
 0x293   : > { %v13755_v6 = vadd.f32 %v8924_v15, %v12487_v47  ;;  %v2489_v16 = vpop.f32.mrb[21].mxu0  ;;  %11075 = vmatpush3.bf16.msra.mxu1 %v12010_v19  ;;  %v3760_v15 = vsel %vm1073_vm6, %v13242_v50, %v13235_v44 }
 0x294   : > { %v13759_v32 = vadd.f32 %v2489_v16, %v12493_v51  ;;  %11051 = vmatpush3.bf16.msra.mxu0 %v12042_v25  ;;  %11077 = vmatprep.subr.bf16.mxu1 %v12026_v22  ;;  %v13763_v30 = vpop.permute.xlu0 %5343  ;;  %v13768_v52 = vpop.permute.xlu1 %5367  ;;  %v3764_v50 = vmul.f32 %v13398_v18, %v3760_v15 }
 0x295   : > { %16656 = vst [vmem:[#allocation76_spill] sm:$0xff] %v13755_v6  ;;  %16658 = vst [vmem:[#allocation78_spill] sm:$0xff] %v13763_v30  ;;  %11053 = vmatprep.subr.bf16.mxu0 %v12058_v28  ;;  %5771 = vrot.lane.b32.xlu0 %v13645_v4, %s11834_s12 }
 0x296   : > { %16657 = vst [vmem:[#allocation77_spill] sm:$0xff] %v13759_v32  ;;  %16659 = vst [vmem:[#allocation79_spill] sm:$0xff] %v13768_v52  ;;  %5777 = vrot.lane.b32.xlu1 %v13666_v20, %s11834_s12 }
 0x297   : > { %11079 = vmatpush3.bf16.msra.mxu1 %v12026_v22 }
 0x298   : > { %11055 = vmatpush3.bf16.msra.mxu0 %v12058_v28  ;;  %11081 = vmatprep.subr.bf16.mxu1 %v12042_v25  ;;  %v13778_v16 = vpop.permute.xlu0 %5365 }
 0x299   : > { %16660 = vst [vmem:[#allocation80_spill] sm:$0xff] %v13778_v16  ;;  %v8959_v30 = vpop.f32.mrb[20].mxu1  ;;  %11057 = vmatprep.subr.bf16.mxu0 %v12074_v31  ;;  %5775 = vrot.lane.b32.xlu0 %v13674_v13, %s11834_s12 }
 0x29a   : > { %v13784_v52 = vadd.f32 %v8959_v30, %v12487_v47  ;;  %v2583_v26 = vpop.f32.mrb[21].mxu1  ;;  %5799 = vrot.lane.b32.xlu1 %v13641_v0, %s16481_s13  ;;  %v3956_v30 = vmul.f32 %v13286_v56, %v12837_v33  ;;  %v4054_v33 = vsel %vm693_vm2, %v13301_v11, %v13297_v39  ;;  %v5840_v11 = vld [vmem:[%s13203_s19 + $0x8] sm:$0xf8] }
 0x29b   : > { %v13790_v44 = vadd.f32 %v2583_v26, %v12493_v51  ;;  %11083 = vmatpush3.bf16.msra.mxu1 %v12042_v25  ;;  %v13793_v16 = vpop.permute.xlu1 %5371  ;;  %v3854_v26 = vsel %vm1168_vm7, %v13282_v14, %v13278_v40  ;;  %v4058_v14 = vmul.f32 %v13286_v56, %v4054_v33 }
 0x29c   : > { %16661 = vst [vmem:[#allocation81_spill] sm:$0xff] %v13784_v52  ;;  %16663 = vst [vmem:[#allocation83_spill] sm:$0xff] %v13793_v16  ;;  %11059 = vmatpush3.bf16.msra.mxu0 %v12074_v31  ;;  %11085 = vmatprep.subr.bf16.mxu1 %v12058_v28  ;;  %v13797_v57 = vpop.permute.xlu0 %5369  ;;  %v3858_v40 = vmul.f32 %v13398_v18, %v3854_v26  ;;  %v5879_v26 = vrot.slane %v13233_v8, 3  ;;  %v16782_v16 = vld [vmem:[#allocation54_spill] sm:$0xff] }
 0x29d   : > { %16662 = vst [vmem:[#allocation82_spill] sm:$0xff] %v13790_v44  ;;  %16664 = vst [vmem:[#allocation84_spill] sm:$0xff] %v13797_v57  ;;  %11093 = vmatprep.subr.bf16.mxu0 %v11935_v3  ;;  %5797 = vrot.lane.b32.xlu0 %v13645_v4, %s16481_s13  ;;  %v4820_v2 = vsel %vm788_vm3, %v16783_v29, %v16782_v16  ;;  %v14529_v29 = vld [vmem:[%s14494_s28 + $0x8] sm:$0xff] }
 0x29e   : > { %5803 = vrot.lane.b32.xlu1 %v13666_v20, %s16481_s13 }
 0x29f   : > { %9413 = vmatmul.mubr.f32.vlgmr.msra.gmra.mrb[34].mxu0 %v3764_v50  ;;  %11087 = vmatpush3.bf16.msra.mxu1 %v12058_v28  ;;  %v13810_v15 = vpop.permute.xlu1 %5393 }
 0x2a0   : > { %16665 = vst [vmem:[#allocation85_spill] sm:$0xff] %v13810_v15  ;;  %11095 = vmatpush3.bf16.msra.mxu0 %v11935_v3  ;;  %11089 = vmatprep.subr.bf16.mxu1 %v12074_v31  ;;  %v13817_v57 = vpop.permute.xlu0 %5391  ;;  %v5841_v15 = vld [vmem:[%s13203_s19 + $0x20] sm:$0x7] }
 0x2a1   : > { %16666 = vst [vmem:[#allocation86_spill] sm:$0xff] %v13817_v57  ;;  %11097 = vmatprep.subr.bf16.mxu0 %v11943_v5  ;;  %9482 = vmatprep.mubr.f32.mxu0 %v3956_v30  ;;  %v5839_v30 = vld [vmem:[%s13203_s19] sm:$0xf8] }
 0x2a2   : > { %5801 = vrot.lane.b32.xlu0 %v13674_v13, %s16481_s13  ;;  %5825 = vrot.lane.b32.xlu1 %v13641_v0, %s11836_s14  ;;  %v5878_v0 = vrot.slane %v5840_v11, 3  ;;  %v5855_v33 = vrot.slane %v5839_v30, 3  ;;  %v5858_v11 = vrot.slane %v5841_v15, 3 }
 0x2a3   : > { %11091 = vmatpush3.bf16.msra.mxu1 %v12074_v31  ;;  %v13827_v39 = vpop.permute.xlu1 %5397 }
 0x2a4   : > { %16667 = vst [vmem:[#allocation87_spill] sm:$0xff] %v13827_v39  ;;  %11099 = vmatpush3.bf16.msra.mxu0 %v11943_v5  ;;  %11125 = vmatprep.subr.bf16.mxu1 %v11935_v3  ;;  %v13832_v50 = vpop.permute.xlu0 %5395  ;;  %v5856_v39 = vrot.slane %v13250_v23, 3  ;;  %v13855_v8 = vsel %vm2606_vm8, %v5878_v0, %v5879_v26 }
 0x2a5   : > { %16668 = vst [vmem:[#allocation88_spill] sm:$0xff] %v13832_v50  ;;  %11101 = vmatprep.subr.bf16.mxu0 %v11980_v10  ;;  %v5842_v50 = vld [vmem:[%s13203_s19 + $0x28] sm:$0x7] }
 0x2a6   : > { %9448 = vmatmul.mubr.f32.vlgmr.msra.gmra.mrb[34].mxu1 %v3858_v40  ;;  %5823 = vrot.lane.b32.xlu0 %v13645_v4, %s11836_s14  ;;  %v5881_v23 = vrot.slane %v5842_v50, 3  ;;  %v13877_v15 = vsel %vm2606_vm8, %v5856_v39, %v5858_v11 }
 0x2a7   : > { %11127 = vmatpush3.bf16.msra.mxu1 %v11935_v3  ;;  %9517 = vmatprep.mubr.f32.mxu1 %v4058_v14  ;;  %v13841_v57 = vpop.permute.xlu1 %5419  ;;  %v13859_v14 = vsel %vm2606_vm8, %v5855_v33, %v5856_v39  ;;  %16674 = vst [vmem:[#allocation94_spill] sm:$0xff] %v13877_v15 }
 0x2a8   : > { %16669 = vst [vmem:[#allocation89_spill] sm:$0xff] %v13841_v57  ;;  %11103 = vmatpush3.bf16.msra.mxu0 %v11980_v10  ;;  %11129 = vmatprep.subr.bf16.mxu1 %v11943_v5  ;;  %v13846_v40 = vpop.permute.xlu0 %5417  ;;  %16671 = vst [vmem:[#allocation91_spill] sm:$0xff] %v13859_v14  ;;  %v13873_v50 = vsel %vm2606_vm8, %v5879_v26, %v5881_v23  ;;  %v16780_v57 = vld [vmem:[#allocation60_spill] sm:$0xff] }
 0x2a9   : > { %16670 = vst [vmem:[#allocation90_spill] sm:$0xff] %v13846_v40  ;;  %11105 = vmatprep.subr.bf16.mxu0 %v12010_v19  ;;  %5829 = vrot.lane.b32.xlu1 %v13666_v20, %s11836_s14  ;;  %v16779_v40 = vld [vmem:[#allocation59_spill] sm:$0xff] }
 0x2aa   : > { %5827 = vrot.lane.b32.xlu0 %v13674_v13, %s11836_s14 }
 0x2ab   : > { %11131 = vmatpush3.bf16.msra.mxu1 %v11943_v5  ;;  %v13861_v30 = vpop.permute.xlu1 %5423 }
 0x2ac   : > { %16672 = vst [vmem:[#allocation92_spill] sm:$0xff] %v13861_v30  ;;  %11107 = vmatpush3.bf16.msra.mxu0 %v12010_v19  ;;  %11133 = vmatprep.subr.bf16.mxu1 %v11980_v10  ;;  %v13865_v20 = vpop.permute.xlu0 %5421 }
 0x2ad   : > { %16673 = vst [vmem:[#allocation93_spill] sm:$0xff] %v13865_v20  ;;  %11109 = vmatprep.subr.bf16.mxu0 %v12026_v22  ;;  %5885 = vrot.lane.b32.xlu1 %v13855_v8, %s11831_s15 }
 0x2ae   : > { %5883 = vrot.lane.b32.xlu0 %v13859_v14, %s11831_s15 }
 0x2af   : > { %11135 = vmatpush3.bf16.msra.mxu1 %v11980_v10  ;;  %v13879_v0 = vpop.permute.xlu1 %5445 }
 0x2b0   : > { %16675 = vst [vmem:[#allocation95_spill] sm:$0xff] %v13879_v0  ;;  %11111 = vmatpush3.bf16.msra.mxu0 %v12026_v22  ;;  %11137 = vmatprep.subr.bf16.mxu1 %v12010_v19  ;;  %v13883_v33 = vpop.permute.xlu0 %5443 }
 0x2b1   : > { %16676 = vst [vmem:[#allocation96_spill] sm:$0xff] %v13883_v33  ;;  %11113 = vmatprep.subr.bf16.mxu0 %v12042_v25  ;;  %5889 = vrot.lane.b32.xlu1 %v13873_v50, %s11831_s15 }
 0x2b2   : > { %v8994_v26 = vpop.f32.mrb[22].mxu0  ;;  %5887 = vrot.lane.b32.xlu0 %v13877_v15, %s11831_s15 }
 0x2b3   : > { %v13891_v39 = vadd.f32 %v8994_v26, %v12487_v47  ;;  %v2682_v23 = vpop.f32.mrb[23].mxu0  ;;  %11139 = vmatpush3.bf16.msra.mxu1 %v12010_v19 }
 0x2b4   : > { %v13895_v11 = vadd.f32 %v2682_v23, %v12493_v51  ;;  %11115 = vmatpush3.bf16.msra.mxu0 %v12042_v25  ;;  %11141 = vmatprep.subr.bf16.mxu1 %v12026_v22  ;;  %v13899_v4 = vpop.permute.xlu1 %5449  ;;  %v13904_v13 = vpop.permute.xlu0 %5447 }
 0x2b5   : > { %16677 = vst [vmem:[#allocation97_spill] sm:$0xff] %v13891_v39  ;;  %16679 = vst [vmem:[#allocation99_spill] sm:$0xff] %v13899_v4  ;;  %11117 = vmatprep.subr.bf16.mxu0 %v12058_v28  ;;  %5911 = vrot.lane.b32.xlu1 %v13855_v8, %s11832_s30 }
 0x2b6   : > { %16678 = vst [vmem:[#allocation98_spill] sm:$0xff] %v13895_v11  ;;  %16680 = vst [vmem:[#allocation100_spill] sm:$0xff] %v13904_v13  ;;  %5909 = vrot.lane.b32.xlu0 %v13859_v14, %s11832_s30  ;;  %v4148_v13 = vsel %vm788_vm3, %v13326_v54, %v13322_v43 }
 0x2b7   : > { %11143 = vmatpush3.bf16.msra.mxu1 %v12026_v22  ;;  %v4152_v54 = vmul.f32 %v13286_v56, %v4148_v13  ;;  %v4242_v13 = vsel %vm883_vm4, %v13350_v35, %v13346_v34 }
 0x2b8   : > { %11119 = vmatpush3.bf16.msra.mxu0 %v12058_v28  ;;  %11145 = vmatprep.subr.bf16.mxu1 %v12042_v25  ;;  %v13911_v26 = vpop.permute.xlu1 %5505 }
 0x2b9   : > { %16681 = vst [vmem:[#allocation101_spill] sm:$0xff] %v13911_v26  ;;  %v9029_v23 = vpop.f32.mrb[22].mxu1  ;;  %11121 = vmatprep.subr.bf16.mxu0 %v12074_v31  ;;  %5915 = vrot.lane.b32.xlu1 %v13873_v50, %s11832_s30  ;;  %v3957_v26 = vmul.f32 %v13398_v18, %v12853_v37  ;;  %v4055_v37 = vsel %vm693_vm2, %v13316_v62, %v13312_v46 }
 0x2ba   : > { %v13920_v4 = vadd.f32 %v9029_v23, %v12487_v47  ;;  %v2784_v33 = vpop.f32.mrb[23].mxu1  ;;  %5913 = vrot.lane.b32.xlu0 %v13877_v15, %s11832_s30  ;;  %v4059_v46 = vmul.f32 %v13398_v18, %v4055_v37  ;;  %v4246_v62 = vmul.f32 %v13286_v56, %v4242_v13 }
 0x2bb   : > { %v13925_v0 = vadd.f32 %v2784_v33, %v12493_v51  ;;  %11147 = vmatpush3.bf16.msra.mxu1 %v12042_v25  ;;  %v13930_v20 = vpop.permute.xlu0 %5503 }
 0x2bc   : > { %16682 = vst [vmem:[#allocation102_spill] sm:$0xff] %v13920_v4  ;;  %16684 = vst [vmem:[#allocation104_spill] sm:$0xff] %v13930_v20  ;;  %11123 = vmatpush3.bf16.msra.mxu0 %v12074_v31  ;;  %11149 = vmatprep.subr.bf16.mxu1 %v12058_v28  ;;  %v13934_v43 = vpop.permute.xlu1 %5509 }
 0x2bd   : > { %16683 = vst [vmem:[#allocation103_spill] sm:$0xff] %v13925_v0  ;;  %16685 = vst [vmem:[#allocation105_spill] sm:$0xff] %v13934_v43  ;;  %11157 = vmatprep.subr.bf16.mxu0 %v11935_v3  ;;  %5937 = vrot.lane.b32.xlu1 %v13855_v8, %s11833_s26 }
 0x2be   : > { %5935 = vrot.lane.b32.xlu0 %v13859_v14, %s11833_s26 }
 0x2bf   : > { %9483 = vmatmul.mubr.f32.vlgmr.msra.gmra.mrb[36].mxu0 %v3957_v26  ;;  %11151 = vmatpush3.bf16.msra.mxu1 %v12058_v28  ;;  %v13946_v33 = vpop.permute.xlu0 %5507 }
 0x2c0   : > { %16686 = vst [vmem:[#allocation106_spill] sm:$0xff] %v13946_v33  ;;  %11159 = vmatpush3.bf16.msra.mxu0 %v11935_v3  ;;  %11153 = vmatprep.subr.bf16.mxu1 %v12074_v31  ;;  %v13953_v23 = vpop.permute.xlu1 %5531 }
 0x2c1   : > { %16687 = vst [vmem:[#allocation107_spill] sm:$0xff] %v13953_v23  ;;  %11161 = vmatprep.subr.bf16.mxu0 %v11943_v5  ;;  %9552 = vmatprep.mubr.f32.mxu0 %v4152_v54 }
 0x2c2   : > { %5941 = vrot.lane.b32.xlu1 %v13873_v50, %s11833_s26  ;;  %5939 = vrot.lane.b32.xlu0 %v13877_v15, %s11833_s26 }
 0x2c3   : > { %11155 = vmatpush3.bf16.msra.mxu1 %v12074_v31  ;;  %v13963_v34 = vpop.permute.xlu0 %5529 }
 0x2c4   : > { %16688 = vst [vmem:[#allocation108_spill] sm:$0xff] %v13963_v34  ;;  %11163 = vmatpush3.bf16.msra.mxu0 %v11943_v5  ;;  %11189 = vmatprep.subr.bf16.mxu1 %v11935_v3  ;;  %v13967_v35 = vpop.permute.xlu1 %5535  ;;  %v6029_v34 = vld [vmem:[%s13203_s19] sm:$0xf0] }
 0x2c5   : > { %16689 = vst [vmem:[#allocation109_spill] sm:$0xff] %v13967_v35  ;;  %11165 = vmatprep.subr.bf16.mxu0 %v11980_v10  ;;  %v14032_v35 = vld [vmem:[%s13203_s19 + $0x18] sm:$0xff] }
 0x2c6   : > { %9518 = vmatmul.mubr.f32.vlgmr.msra.gmra.mrb[36].mxu1 %v4059_v46  ;;  %5963 = vrot.lane.b32.xlu1 %v13855_v8, %s11834_s12 }
 0x2c7   : > { %11191 = vmatpush3.bf16.msra.mxu1 %v11935_v3  ;;  %9587 = vmatprep.mubr.f32.mxu1 %v4246_v62  ;;  %v13973_v56 = vpop.permute.xlu0 %5533 }
 0x2c8   : > { %16690 = vst [vmem:[#allocation110_spill] sm:$0xff] %v13973_v56  ;;  %11167 = vmatpush3.bf16.msra.mxu0 %v11980_v10  ;;  %11193 = vmatprep.subr.bf16.mxu1 %v11943_v5  ;;  %v13977_v26 = vpop.permute.xlu1 %5557 }
 0x2c9   : > { %16691 = vst [vmem:[#allocation111_spill] sm:$0xff] %v13977_v26  ;;  %11169 = vmatprep.subr.bf16.mxu0 %v12010_v19  ;;  %5961 = vrot.lane.b32.xlu0 %v13859_v14, %s11834_s12  ;;  %v6030_v26 = vld [vmem:[%s13203_s19 + $0x8] sm:$0xf0] }
 0x2ca   : > { %5967 = vrot.lane.b32.xlu1 %v13873_v50, %s11834_s12  ;;  %v6068_v56 = vrot.slane %v6030_v26, 4 }
 0x2cb   : > { %11195 = vmatpush3.bf16.msra.mxu1 %v11943_v5  ;;  %v13985_v54 = vpop.permute.xlu0 %5555 }
 0x2cc   : > { %16692 = vst [vmem:[#allocation112_spill] sm:$0xff] %v13985_v54  ;;  %11171 = vmatpush3.bf16.msra.mxu0 %v12010_v19  ;;  %11197 = vmatprep.subr.bf16.mxu1 %v11980_v10  ;;  %v13989_v37 = vpop.permute.xlu1 %5561 }
 0x2cd   : > { %16693 = vst [vmem:[#allocation113_spill] sm:$0xff] %v13989_v37  ;;  %11173 = vmatprep.subr.bf16.mxu0 %v12026_v22  ;;  %5965 = vrot.lane.b32.xlu0 %v13877_v15, %s11834_s12 }
 0x2ce   : > { %5989 = vrot.lane.b32.xlu1 %v13855_v8, %s16481_s13 }
 0x2cf   : > { %11199 = vmatpush3.bf16.msra.mxu1 %v11980_v10  ;;  %v13997_v13 = vpop.permute.xlu0 %5559 }
 0x2d0   : > { %16694 = vst [vmem:[#allocation114_spill] sm:$0xff] %v13997_v13  ;;  %11175 = vmatpush3.bf16.msra.mxu0 %v12026_v22  ;;  %11201 = vmatprep.subr.bf16.mxu1 %v12010_v19  ;;  %v14001_v46 = vpop.permute.xlu1 %5583 }
 0x2d1   : > { %16695 = vst [vmem:[#allocation115_spill] sm:$0xff] %v14001_v46  ;;  %11177 = vmatprep.subr.bf16.mxu0 %v12042_v25  ;;  %5987 = vrot.lane.b32.xlu0 %v13859_v14, %s16481_s13 }
 0x2d2   : > { %v9064_v62 = vpop.f32.mrb[24].mxu0  ;;  %5993 = vrot.lane.b32.xlu1 %v13873_v50, %s16481_s13 }
 0x2d3   : > { %v14009_v37 = vadd.f32 %v9064_v62, %v12487_v47  ;;  %v2878_v13 = vpop.f32.mrb[25].mxu0  ;;  %11203 = vmatpush3.bf16.msra.mxu1 %v12010_v19 }
 0x2d4   : > { %v14013_v54 = vadd.f32 %v2878_v13, %v12493_v51  ;;  %11179 = vmatpush3.bf16.msra.mxu0 %v12042_v25  ;;  %11205 = vmatprep.subr.bf16.mxu1 %v12026_v22  ;;  %v14017_v46 = vpop.permute.xlu0 %5581  ;;  %v14023_v62 = vpop.permute.xlu1 %5587  ;;  %v4149_v13 = vsel %vm788_vm3, %v13338_v59, %v13334_v42  ;;  %v4336_v59 = vsel %vm978_vm5, %v13402_v58, %v13381_v38 }
 0x2d5   : > { %16696 = vst [vmem:[#allocation116_spill] sm:$0xff] %v14009_v37  ;;  %16697 = vst [vmem:[#allocation117_spill] sm:$0xff] %v14017_v46  ;;  %11181 = vmatprep.subr.bf16.mxu0 %v12058_v28  ;;  %5991 = vrot.lane.b32.xlu0 %v13877_v15, %s16481_s13  ;;  %v6069_v46 = vrot.slane %v14032_v35, 4  ;;  %v4153_v42 = vmul.f32 %v13398_v18, %v4149_v13 }
 0x2d6   : > { %16698 = vst [vmem:[#allocation118_spill] sm:$0xff] %v14023_v62  ;;  %6015 = vrot.lane.b32.xlu1 %v13855_v8, %s11836_s14  ;;  %v6032_v8 = vld [vmem:[%s13203_s19 + $0x28] sm:$0xf] }
 0x2d7   : > { %11207 = vmatpush3.bf16.msra.mxu1 %v12026_v22  ;;  %v14058_v13 = vsel %vm3277_vm9, %v6068_v56, %v6069_v46  ;;  %v4243_v56 = vsel %vm883_vm4, %v13371_v45, %v13366_v41 }
 0x2d8   : > { %11183 = vmatpush3.bf16.msra.mxu0 %v12058_v28  ;;  %11209 = vmatprep.subr.bf16.mxu1 %v12042_v25  ;;  %v14038_v62 = vpop.permute.xlu0 %5585  ;;  %v4247_v45 = vmul.f32 %v13398_v18, %v4243_v56 }
 0x2d9   : > { %16699 = vst [vmem:[#allocation119_spill] sm:$0xff] %v14038_v62  ;;  %v9099_v23 = vpop.f32.mrb[24].mxu1  ;;  %11185 = vmatprep.subr.bf16.mxu0 %v12074_v31  ;;  %6013 = vrot.lane.b32.xlu0 %v13859_v14, %s11836_s14  ;;  %v6045_v62 = vrot.slane %v6029_v34, 4  ;;  %v14061_v14 = vld [vmem:[%s13203_s19 + $0x10] sm:$0xff]  ;;  %v14072_v34 = vld [vmem:[%s11964_s24] sm:$0xff] }
 0x2da   : > { %v14049_v26 = vadd.f32 %v9099_v23, %v12487_v47  ;;  %v2972_v33 = vpop.f32.mrb[25].mxu1  ;;  %6019 = vrot.lane.b32.xlu1 %v13873_v50, %s11836_s14  ;;  %v6046_v38 = vrot.slane %v14061_v14, 4  ;;  %v6071_v23 = vrot.slane %v6032_v8, 4  ;;  %v4340_v20 = vmul.f32 %v14072_v34, %v4336_v59 }
 0x2db   : > { %v14054_v43 = vadd.f32 %v2972_v33, %v12493_v51  ;;  %11211 = vmatpush3.bf16.msra.mxu1 %v12042_v25  ;;  %v14064_v58 = vpop.permute.xlu1 %5609  ;;  %v6031_v33 = vld [vmem:[%s13203_s19 + $0x20] sm:$0xf] }
 0x2dc   : > { %16700 = vst [vmem:[#allocation120_spill] sm:$0xff] %v14049_v26  ;;  %16702 = vst [vmem:[#allocation122_spill] sm:$0xff] %v14064_v58  ;;  %11187 = vmatpush3.bf16.msra.mxu0 %v12074_v31  ;;  %11213 = vmatprep.subr.bf16.mxu1 %v12058_v28  ;;  %v14068_v50 = vpop.permute.xlu0 %5607  ;;  %v14085_v8 = vsel %vm3277_vm9, %v6045_v62, %v6046_v38  ;;  %v14088_v59 = vsel %vm3277_vm9, %v6069_v46, %v6071_v23 }
 0x2dd   : > { %16701 = vst [vmem:[#allocation121_spill] sm:$0xff] %v14054_v43  ;;  %16703 = vst [vmem:[#allocation123_spill] sm:$0xff] %v14068_v50  ;;  %11221 = vmatprep.subr.bf16.mxu0 %v11935_v3  ;;  %6017 = vrot.lane.b32.xlu0 %v13877_v15, %s11836_s14  ;;  %v6048_v50 = vrot.slane %v6031_v33, 4  ;;  %v16706_v15 = vld [vmem:[#allocation40_spill] sm:$0xff] }
 0x2de   : > { %6075 = vrot.lane.b32.xlu1 %v14058_v13, %s11831_s15  ;;  %16704 = vst [vmem:[#allocation124_spill] sm:$0xff] %v14085_v8  ;;  %v4430_v30 = vsel %vm1073_vm6, %v13441_v53, %v16706_v15 }
 0x2df   : > { %9553 = vmatmul.mubr.f32.vlgmr.msra.gmra.mrb[38].mxu0 %v4153_v42  ;;  %11215 = vmatpush3.bf16.msra.mxu1 %v12058_v28  ;;  %v14090_v58 = vpop.permute.xlu1 %5613  ;;  %v4434_v46 = vmul.f32 %v14072_v34, %v4430_v30  ;;  %v14108_v53 = vsel %vm3277_vm9, %v6046_v38, %v6048_v50 }
 0x2e0   : > { %16705 = vst [vmem:[#allocation125_spill] sm:$0xff] %v14090_v58  ;;  %11223 = vmatpush3.bf16.msra.mxu0 %v11935_v3  ;;  %11217 = vmatprep.subr.bf16.mxu1 %v12074_v31  ;;  %v14097_v41 = vpop.permute.xlu0 %5611  ;;  %16708 = vst [vmem:[#allocation126_spill] sm:$0xff] %v14108_v53 }
 0x2e1   : > { %16707 = vst [vmem:[#allocation40_spill] sm:$0xff] %v14097_v41  ;;  %11225 = vmatprep.subr.bf16.mxu0 %v11943_v5  ;;  %9622 = vmatprep.mubr.f32.mxu0 %v4340_v20 }
 0x2e2   : > { %6073 = vrot.lane.b32.xlu0 %v14085_v8, %s11831_s15  ;;  %6079 = vrot.lane.b32.xlu1 %v14088_v59, %s11831_s15 }
 0x2e3   : > { %11219 = vmatpush3.bf16.msra.mxu1 %v12074_v31  ;;  %v14110_v15 = vpop.permute.xlu1 %5635 }
 0x2e4   : > { %16709 = vst [vmem:[#allocation127_spill] sm:$0xff] %v14110_v15  ;;  %11227 = vmatpush3.bf16.msra.mxu0 %v11943_v5  ;;  %11253 = vmatprep.subr.bf16.mxu1 %v11935_v3  ;;  %v14114_v18 = vpop.permute.xlu0 %5633 }
 0x2e5   : > { %16710 = vst [vmem:[#allocation128_spill] sm:$0xff] %v14114_v18  ;;  %11229 = vmatprep.subr.bf16.mxu0 %v11980_v10 }
 0x2e6   : > { %9588 = vmatmul.mubr.f32.vlgmr.msra.gmra.mrb[38].mxu1 %v4247_v45  ;;  %6077 = vrot.lane.b32.xlu0 %v14108_v53, %s11831_s15 }
 0x2e7   : > { %11255 = vmatpush3.bf16.msra.mxu1 %v11935_v3  ;;  %9657 = vmatprep.mubr.f32.mxu1 %v4434_v46  ;;  %v14120_v30 = vpop.permute.xlu1 %5639 }
 0x2e8   : > { %16711 = vst [vmem:[#allocation129_spill] sm:$0xff] %v14120_v30  ;;  %11231 = vmatpush3.bf16.msra.mxu0 %v11980_v10  ;;  %11257 = vmatprep.subr.bf16.mxu1 %v11943_v5  ;;  %v14124_v20 = vpop.permute.xlu0 %5637 }
 0x2e9   : > { %16712 = vst [vmem:[#allocation130_spill] sm:$0xff] %v14124_v20  ;;  %11233 = vmatprep.subr.bf16.mxu0 %v12010_v19  ;;  %6101 = vrot.lane.b32.xlu1 %v14058_v13, %s11832_s30 }
 0x2ea   : > { %6099 = vrot.lane.b32.xlu0 %v14085_v8, %s11832_s30 }
 0x2eb   : > { %11259 = vmatpush3.bf16.msra.mxu1 %v11943_v5  ;;  %v14132_v62 = vpop.permute.xlu1 %5695 }
 0x2ec   : > { %16713 = vst [vmem:[#allocation131_spill] sm:$0xff] %v14132_v62  ;;  %11235 = vmatpush3.bf16.msra.mxu0 %v12010_v19  ;;  %11261 = vmatprep.subr.bf16.mxu1 %v11980_v10  ;;  %v14136_v42 = vpop.permute.xlu0 %5693 }
 0x2ed   : > { %16714 = vst [vmem:[#allocation132_spill] sm:$0xff] %v14136_v42  ;;  %11237 = vmatprep.subr.bf16.mxu0 %v12026_v22  ;;  %6105 = vrot.lane.b32.xlu1 %v14088_v59, %s11832_s30 }
 0x2ee   : > { %6103 = vrot.lane.b32.xlu0 %v14108_v53, %s11832_s30 }
 0x2ef   : > { %11263 = vmatpush3.bf16.msra.mxu1 %v11980_v10  ;;  %v14144_v38 = vpop.permute.xlu1 %5699 }
 0x2f0   : > { %16715 = vst [vmem:[#allocation133_spill] sm:$0xff] %v14144_v38  ;;  %11239 = vmatpush3.bf16.msra.mxu0 %v12026_v22  ;;  %11265 = vmatprep.subr.bf16.mxu1 %v12010_v19  ;;  %v14148_v23 = vpop.permute.xlu0 %5697 }
 0x2f1   : > { %16716 = vst [vmem:[#allocation134_spill] sm:$0xff] %v14148_v23  ;;  %11241 = vmatprep.subr.bf16.mxu0 %v12042_v25  ;;  %6127 = vrot.lane.b32.xlu1 %v14058_v13, %s11833_s26  ;;  %v16722_v23 = vld [vmem:[#allocation39_spill] sm:$0xff] }
 0x2f2   : > { %v9134_v50 = vpop.f32.mrb[26].mxu0  ;;  %6125 = vrot.lane.b32.xlu0 %v14085_v8, %s11833_s26 }
 0x2f3   : > { %v14156_v33 = vadd.f32 %v9134_v50, %v12487_v47  ;;  %v3066_v56 = vpop.f32.mrb[27].mxu0  ;;  %11267 = vmatpush3.bf16.msra.mxu1 %v12010_v19 }
 0x2f4   : > { %v14160_v45 = vadd.f32 %v3066_v56, %v12493_v51  ;;  %11243 = vmatpush3.bf16.msra.mxu0 %v12042_v25  ;;  %11269 = vmatprep.subr.bf16.mxu1 %v12026_v22  ;;  %v14164_v46 = vpop.permute.xlu1 %5721  ;;  %v14169_v50 = vpop.permute.xlu0 %5719  ;;  %v16721_v56 = vld [vmem:[#allocation38_spill] sm:$0xff] }
 0x2f5   : > { %16717 = vst [vmem:[#allocation135_spill] sm:$0xff] %v14156_v33  ;;  %16719 = vst [vmem:[#allocation137_spill] sm:$0xff] %v14164_v46  ;;  %11245 = vmatprep.subr.bf16.mxu0 %v12058_v28  ;;  %6131 = vrot.lane.b32.xlu1 %v14088_v59, %s11833_s26  ;;  %v4337_v38 = vsel %vm978_vm5, %v16722_v23, %v16721_v56  ;;  %v14193_v56 = vld [vmem:[%s11964_s24 + $0x8] sm:$0xff] }
 0x2f6   : > { %16718 = vst [vmem:[#allocation136_spill] sm:$0xff] %v14160_v45  ;;  %16720 = vst [vmem:[#allocation138_spill] sm:$0xff] %v14169_v50  ;;  %6129 = vrot.lane.b32.xlu0 %v14108_v53, %s11833_s26  ;;  %v4524_v50 = vsel %vm1168_vm7, %v13473_v36, %v13462_v9  ;;  %v4824_v33 = vmul.f32 %v14193_v56, %v4820_v2  ;;  %v14784_v45 = vld [vmem:[%s14494_s28 + $0x20] sm:$0x1] }
 0x2f7   : > { %11271 = vmatpush3.bf16.msra.mxu1 %v12026_v22  ;;  %v4528_v36 = vmul.f32 %v14072_v34, %v4524_v50 }
 0x2f8   : > { %11247 = vmatpush3.bf16.msra.mxu0 %v12058_v28  ;;  %11273 = vmatprep.subr.bf16.mxu1 %v12042_v25  ;;  %v14179_v46 = vpop.permute.xlu1 %5725 }
 0x2f9   : > { %16723 = vst [vmem:[#allocation38_spill] sm:$0xff] %v14179_v46  ;;  %v9169_v42 = vpop.f32.mrb[26].mxu1  ;;  %11249 = vmatprep.subr.bf16.mxu0 %v12074_v31  ;;  %6153 = vrot.lane.b32.xlu1 %v14058_v13, %s11834_s12  ;;  %v4341_v46 = vmul.f32 %v14193_v56, %v4337_v38 }
 0x2fa   : > { %v14188_v62 = vadd.f32 %v9169_v42, %v12487_v47  ;;  %v3160_v23 = vpop.f32.mrb[27].mxu1  ;;  %6151 = vrot.lane.b32.xlu0 %v14085_v8, %s11834_s12  ;;  %v16728_v42 = vld [vmem:[#allocation42_spill] sm:$0xff] }
 0x2fb   : > { %v14197_v20 = vadd.f32 %v3160_v23, %v12493_v51  ;;  %11275 = vmatpush3.bf16.msra.mxu1 %v12042_v25  ;;  %v14200_v30 = vpop.permute.xlu0 %5723  ;;  %v4431_v38 = vsel %vm1073_vm6, %v16728_v42, %v13446_v49  ;;  %v16731_v49 = vld [vmem:[#allocation24_spill] sm:$0xff] }
 0x2fc   : > { %16724 = vst [vmem:[#allocation39_spill] sm:$0xff] %v14188_v62  ;;  %16726 = vst [vmem:[#allocation140_spill] sm:$0xff] %v14200_v30  ;;  %11251 = vmatpush3.bf16.msra.mxu0 %v12074_v31  ;;  %11277 = vmatprep.subr.bf16.mxu1 %v12058_v28  ;;  %v14204_v9 = vpop.permute.xlu1 %5747  ;;  %v6221_v30 = vld [vmem:[%s13203_s19 + $0x20] sm:$0x1f]  ;;  %v14542_v62 = vld [vmem:[%s14471_s29 + $0x18] sm:$0xff] }
 0x2fd   : > { %16725 = vst [vmem:[#allocation139_spill] sm:$0xff] %v14197_v20  ;;  %16727 = vst [vmem:[#allocation141_spill] sm:$0xff] %v14204_v9  ;;  %11285 = vmatprep.subr.bf16.mxu0 %v11935_v3  ;;  %6157 = vrot.lane.b32.xlu1 %v14088_v59, %s11834_s12  ;;  %v4435_v9 = vmul.f32 %v14193_v56, %v4431_v38 }
 0x2fe   : > { %6155 = vrot.lane.b32.xlu0 %v14108_v53, %s11834_s12 }
 0x2ff   : > { %9623 = vmatmul.mubr.f32.vlgmr.msra.gmra.mrb[40].mxu0 %v4341_v46  ;;  %11279 = vmatpush3.bf16.msra.mxu1 %v12058_v28  ;;  %v14216_v23 = vpop.permute.xlu0 %5745  ;;  %v4627_v46 = vmul.f32 %v14072_v34, %v16731_v49 }
 0x300   : > { %16729 = vst [vmem:[#allocation42_spill] sm:$0xff] %v14216_v23  ;;  %11287 = vmatpush3.bf16.msra.mxu0 %v11935_v3  ;;  %11281 = vmatprep.subr.bf16.mxu1 %v12074_v31  ;;  %v14220_v50 = vpop.permute.xlu1 %5751 }
 0x301   : > { %16730 = vst [vmem:[#allocation142_spill] sm:$0xff] %v14220_v50  ;;  %11289 = vmatprep.subr.bf16.mxu0 %v11943_v5  ;;  %9692 = vmatprep.mubr.f32.mxu0 %v4528_v36  ;;  %v6222_v50 = vld [vmem:[%s13203_s19 + $0x28] sm:$0x1f] }
 0x302   : > { %6179 = vrot.lane.b32.xlu1 %v14058_v13, %s16481_s13  ;;  %6177 = vrot.lane.b32.xlu0 %v14085_v8, %s16481_s13 }
 0x303   : > { %11283 = vmatpush3.bf16.msra.mxu1 %v12074_v31  ;;  %v14231_v42 = vpop.permute.xlu0 %5749 }
 0x304   : > { %16732 = vst [vmem:[#allocation24_spill] sm:$0xff] %v14231_v42  ;;  %11291 = vmatpush3.bf16.msra.mxu0 %v11943_v5  ;;  %11317 = vmatprep.subr.bf16.mxu1 %v11935_v3  ;;  %v14235_v36 = vpop.permute.xlu1 %5773  ;;  %v6219_v42 = vld [vmem:[%s13203_s19] sm:$0xe0] }
 0x305   : > { %16733 = vst [vmem:[#allocation143_spill] sm:$0xff] %v14235_v36  ;;  %11293 = vmatprep.subr.bf16.mxu0 %v11980_v10  ;;  %v6220_v36 = vld [vmem:[%s13203_s19 + $0x8] sm:$0xe0] }
 0x306   : > { %9658 = vmatmul.mubr.f32.vlgmr.msra.gmra.mrb[40].mxu1 %v4435_v9  ;;  %6183 = vrot.lane.b32.xlu1 %v14088_v59, %s16481_s13 }
 0x307   : > { %11319 = vmatpush3.bf16.msra.mxu1 %v11935_v3  ;;  %9727 = vmatprep.mubr.f32.mxu1 %v4627_v46  ;;  %v14241_v38 = vpop.permute.xlu0 %5771  ;;  %v6258_v46 = vrot.slane %v6220_v36, 5  ;;  %v6236_v36 = vrot.slane %v14061_v14, 5 }
 0x308   : > { %16734 = vst [vmem:[#allocation144_spill] sm:$0xff] %v14241_v38  ;;  %11295 = vmatpush3.bf16.msra.mxu0 %v11980_v10  ;;  %11321 = vmatprep.subr.bf16.mxu1 %v11943_v5  ;;  %v14245_v49 = vpop.permute.xlu1 %5777  ;;  %v6259_v38 = vrot.slane %v14032_v35, 5 }
 0x309   : > { %16735 = vst [vmem:[#allocation145_spill] sm:$0xff] %v14245_v49  ;;  %11297 = vmatprep.subr.bf16.mxu0 %v12010_v19  ;;  %6181 = vrot.lane.b32.xlu0 %v14108_v53, %s16481_s13 }
 0x30a   : > { %6205 = vrot.lane.b32.xlu1 %v14058_v13, %s11836_s14  ;;  %v6235_v13 = vrot.slane %v6219_v42, 5 }
 0x30b   : > { %11323 = vmatpush3.bf16.msra.mxu1 %v11943_v5  ;;  %v14254_v9 = vpop.permute.xlu0 %5775 }
 0x30c   : > { %16736 = vst [vmem:[#allocation146_spill] sm:$0xff] %v14254_v9  ;;  %11299 = vmatpush3.bf16.msra.mxu0 %v12010_v19  ;;  %11325 = vmatprep.subr.bf16.mxu1 %v11980_v10  ;;  %v14260_v49 = vpop.permute.xlu1 %5799  ;;  %v14271_v9 = vsel %vm3948_vm10, %v6258_v46, %v6259_v38  ;;  %v14286_v42 = vsel %vm3948_vm10, %v6235_v13, %v6236_v36 }
 0x30d   : > { %16737 = vst [vmem:[#allocation147_spill] sm:$0xff] %v14260_v49  ;;  %11301 = vmatprep.subr.bf16.mxu0 %v12026_v22  ;;  %6203 = vrot.lane.b32.xlu0 %v14085_v8, %s11836_s14  ;;  %v6261_v49 = vrot.slane %v6222_v50, 5  ;;  %16740 = vst [vmem:[#allocation150_spill] sm:$0xff] %v14286_v42  ;;  %v6238_v50 = vrot.slane %v6221_v30, 5 }
 0x30e   : > { %6209 = vrot.lane.b32.xlu1 %v14088_v59, %s11836_s14 }
 0x30f   : > { %11327 = vmatpush3.bf16.msra.mxu1 %v11980_v10  ;;  %v14273_v23 = vpop.permute.xlu0 %5797 }
 0x310   : > { %16738 = vst [vmem:[#allocation148_spill] sm:$0xff] %v14273_v23  ;;  %11303 = vmatpush3.bf16.msra.mxu0 %v12026_v22  ;;  %11329 = vmatprep.subr.bf16.mxu1 %v12010_v19  ;;  %v14278_v8 = vpop.permute.xlu1 %5803 }
 0x311   : > { %16739 = vst [vmem:[#allocation149_spill] sm:$0xff] %v14278_v8  ;;  %11305 = vmatprep.subr.bf16.mxu0 %v12042_v25  ;;  %6207 = vrot.lane.b32.xlu0 %v14108_v53, %s11836_s14  ;;  %v14293_v8 = vsel %vm3948_vm10, %v6259_v38, %v6261_v49  ;;  %v14310_v38 = vsel %vm3948_vm10, %v6236_v36, %v6238_v50  ;;  %v16747_v49 = vld [vmem:[#allocation45_spill] sm:$0xff]  ;;  %v16749_v36 = vld [vmem:[#allocation46_spill] sm:$0xff] }
 0x312   : > { %v9204_v59 = vpop.f32.mrb[28].mxu0  ;;  %6265 = vrot.lane.b32.xlu1 %v14271_v9, %s11831_s15  ;;  %16745 = vst [vmem:[#allocation155_spill] sm:$0xff] %v14310_v38  ;;  %v16750_v50 = vld [vmem:[#allocation49_spill] sm:$0xff] }
 0x313   : > { %v14289_v46 = vadd.f32 %v9204_v59, %v12487_v47  ;;  %v3254_v23 = vpop.f32.mrb[29].mxu0  ;;  %11331 = vmatpush3.bf16.msra.mxu1 %v12010_v19 }
 0x314   : > { %v14296_v18 = vadd.f32 %v3254_v23, %v12493_v51  ;;  %11307 = vmatpush3.bf16.msra.mxu0 %v12042_v25  ;;  %11333 = vmatprep.subr.bf16.mxu1 %v12026_v22  ;;  %v14300_v53 = vpop.permute.xlu0 %5801  ;;  %v14305_v30 = vpop.permute.xlu1 %5825  ;;  %v16746_v23 = vld [vmem:[#allocation44_spill] sm:$0xff] }
 0x315   : > { %16741 = vst [vmem:[#allocation151_spill] sm:$0xff] %v14289_v46  ;;  %16743 = vst [vmem:[#allocation153_spill] sm:$0xff] %v14300_v53  ;;  %11309 = vmatprep.subr.bf16.mxu0 %v12058_v28  ;;  %6263 = vrot.lane.b32.xlu0 %v14286_v42, %s11831_s15  ;;  %v4525_v13 = vsel %vm1168_vm7, %v16747_v49, %v16746_v23 }
 0x316   : > { %16742 = vst [vmem:[#allocation152_spill] sm:$0xff] %v14296_v18  ;;  %16744 = vst [vmem:[#allocation154_spill] sm:$0xff] %v14305_v30  ;;  %6269 = vrot.lane.b32.xlu1 %v14293_v8, %s11831_s15  ;;  %v4725_v30 = vsel %vm693_vm2, %v16750_v50, %v16749_v36  ;;  %v4529_v49 = vmul.f32 %v14193_v56, %v4525_v13  ;;  %v4819_v50 = vsel %vm788_vm3, %v13542_v21, %v13538_v60 }
 0x317   : > { %11335 = vmatpush3.bf16.msra.mxu1 %v12026_v22  ;;  %v4823_v60 = vmul.f32 %v14072_v34, %v4819_v50 }
 0x318   : > { %11311 = vmatpush3.bf16.msra.mxu0 %v12058_v28  ;;  %11337 = vmatprep.subr.bf16.mxu1 %v12042_v25  ;;  %v14318_v59 = vpop.permute.xlu0 %5823 }
 0x319   : > { %16748 = vst [vmem:[#allocation44_spill] sm:$0xff] %v14318_v59  ;;  %v9239_v53 = vpop.f32.mrb[28].mxu1  ;;  %11313 = vmatprep.subr.bf16.mxu0 %v12074_v31  ;;  %6267 = vrot.lane.b32.xlu0 %v14310_v38, %s11831_s15 }
 0x31a   : > { %v14327_v15 = vadd.f32 %v9239_v53, %v12487_v47  ;;  %v3353_v23 = vpop.f32.mrb[29].mxu1  ;;  %6291 = vrot.lane.b32.xlu1 %v14271_v9, %s11832_s30  ;;  %v4729_v53 = vmul.f32 %v14072_v34, %v4725_v30 }
 0x31b   : > { %v14333_v59 = vadd.f32 %v3353_v23, %v12493_v51  ;;  %11339 = vmatpush3.bf16.msra.mxu1 %v12042_v25  ;;  %v14336_v41 = vpop.permute.xlu1 %5829  ;;  %v16757_v23 = vld [vmem:[#allocation25_spill] sm:$0xff] }
 0x31c   : > { %16751 = vst [vmem:[#allocation45_spill] sm:$0xff] %v14327_v15  ;;  %16753 = vst [vmem:[#allocation49_spill] sm:$0xff] %v14336_v41  ;;  %11315 = vmatpush3.bf16.msra.mxu0 %v12074_v31  ;;  %11341 = vmatprep.subr.bf16.mxu1 %v12058_v28  ;;  %v14340_v36 = vpop.permute.xlu0 %5827 }
 0x31d   : > { %16752 = vst [vmem:[#allocation46_spill] sm:$0xff] %v14333_v59  ;;  %16754 = vst [vmem:[#allocation156_spill] sm:$0xff] %v14340_v36  ;;  %11349 = vmatprep.subr.bf16.mxu0 %v11935_v3  ;;  %6289 = vrot.lane.b32.xlu0 %v14286_v42, %s11832_s30  ;;  %v14602_v59 = vld [vmem:[%s14494_s28 + $0x10] sm:$0xff] }
 0x31e   : > { %6295 = vrot.lane.b32.xlu1 %v14293_v8, %s11832_s30 }
 0x31f   : > { %9693 = vmatmul.mubr.f32.vlgmr.msra.gmra.mrb[42].mxu0 %v4529_v49  ;;  %11343 = vmatpush3.bf16.msra.mxu1 %v12058_v28  ;;  %v14349_v13 = vpop.permute.xlu1 %5885  ;;  %v4628_v49 = vmul.f32 %v14193_v56, %v16757_v23 }
 0x320   : > { %16755 = vst [vmem:[#allocation157_spill] sm:$0xff] %v14349_v13  ;;  %11351 = vmatpush3.bf16.msra.mxu0 %v11935_v3  ;;  %11345 = vmatprep.subr.bf16.mxu1 %v12074_v31  ;;  %v14356_v30 = vpop.permute.xlu0 %5883  ;;  %v16773_v13 = vld [vmem:[#allocation51_spill] sm:$0xff] }
 0x321   : > { %16756 = vst [vmem:[#allocation158_spill] sm:$0xff] %v14356_v30  ;;  %11353 = vmatprep.subr.bf16.mxu0 %v11943_v5  ;;  %9762 = vmatprep.mubr.f32.mxu0 %v4729_v53  ;;  %v16772_v30 = vld [vmem:[#allocation50_spill] sm:$0xff] }
 0x322   : > { %6293 = vrot.lane.b32.xlu0 %v14310_v38, %s11832_s30  ;;  %6317 = vrot.lane.b32.xlu1 %v14271_v9, %s11833_s26  ;;  %v4726_v36 = vsel %vm693_vm2, %v16773_v13, %v16772_v30  ;;  %v6410_v30 = vld [vmem:[%s13203_s19 + $0x8] sm:$0xc0] }
 0x323   : > { %11347 = vmatpush3.bf16.msra.mxu1 %v12074_v31  ;;  %v14367_v21 = vpop.permute.xlu1 %5889 }
 0x324   : > { %16758 = vst [vmem:[#allocation25_spill] sm:$0xff] %v14367_v21  ;;  %11355 = vmatpush3.bf16.msra.mxu0 %v11943_v5  ;;  %11381 = vmatprep.subr.bf16.mxu1 %v11935_v3  ;;  %v14371_v53 = vpop.permute.xlu0 %5887 }
 0x325   : > { %16759 = vst [vmem:[#allocation159_spill] sm:$0xff] %v14371_v53  ;;  %11357 = vmatprep.subr.bf16.mxu0 %v11980_v10 }
 0x326   : > { %9728 = vmatmul.mubr.f32.vlgmr.msra.gmra.mrb[42].mxu1 %v4628_v49  ;;  %6315 = vrot.lane.b32.xlu0 %v14286_v42, %s11833_s26 }
 0x327   : > { %11383 = vmatpush3.bf16.msra.mxu1 %v11935_v3  ;;  %9797 = vmatprep.mubr.f32.mxu1 %v4823_v60  ;;  %v14377_v50 = vpop.permute.xlu1 %5911 }
 0x328   : > { %16760 = vst [vmem:[#allocation160_spill] sm:$0xff] %v14377_v50  ;;  %11359 = vmatpush3.bf16.msra.mxu0 %v11980_v10  ;;  %11385 = vmatprep.subr.bf16.mxu1 %v11943_v5  ;;  %v14381_v23 = vpop.permute.xlu0 %5909 }
 0x329   : > { %16761 = vst [vmem:[#allocation161_spill] sm:$0xff] %v14381_v23  ;;  %11361 = vmatprep.subr.bf16.mxu0 %v12010_v19  ;;  %6321 = vrot.lane.b32.xlu1 %v14293_v8, %s11833_s26 }
 0x32a   : > { %6319 = vrot.lane.b32.xlu0 %v14310_v38, %s11833_s26 }
 0x32b   : > { %11387 = vmatpush3.bf16.msra.mxu1 %v11943_v5  ;;  %v14389_v49 = vpop.permute.xlu1 %5915 }
 0x32c   : > { %16762 = vst [vmem:[#allocation162_spill] sm:$0xff] %v14389_v49  ;;  %11363 = vmatpush3.bf16.msra.mxu0 %v12010_v19  ;;  %11389 = vmatprep.subr.bf16.mxu1 %v11980_v10  ;;  %v14393_v60 = vpop.permute.xlu0 %5913 }
 0x32d   : > { %16763 = vst [vmem:[#allocation163_spill] sm:$0xff] %v14393_v60  ;;  %11365 = vmatprep.subr.bf16.mxu0 %v12026_v22  ;;  %6343 = vrot.lane.b32.xlu1 %v14271_v9, %s11834_s12 }
 0x32e   : > { %6341 = vrot.lane.b32.xlu0 %v14286_v42, %s11834_s12 }
 0x32f   : > { %11391 = vmatpush3.bf16.msra.mxu1 %v11980_v10  ;;  %v14401_v23 = vpop.permute.xlu1 %5937 }
 0x330   : > { %16764 = vst [vmem:[#allocation164_spill] sm:$0xff] %v14401_v23  ;;  %11367 = vmatpush3.bf16.msra.mxu0 %v12026_v22  ;;  %11393 = vmatprep.subr.bf16.mxu1 %v12010_v19  ;;  %v14405_v50 = vpop.permute.xlu0 %5935 }
 0x331   : > { %16765 = vst [vmem:[#allocation165_spill] sm:$0xff] %v14405_v50  ;;  %11369 = vmatprep.subr.bf16.mxu0 %v12042_v25  ;;  %6347 = vrot.lane.b32.xlu1 %v14293_v8, %s11834_s12 }
 0x332   : > { %v9274_v60 = vpop.f32.mrb[30].mxu0  ;;  %6345 = vrot.lane.b32.xlu0 %v14310_v38, %s11834_s12 }
 0x333   : > { %v14413_v49 = vadd.f32 %v9274_v60, %v12487_v47  ;;  %v3455_v53 = vpop.f32.mrb[31].mxu0  ;;  %11395 = vmatpush3.bf16.msra.mxu1 %v12010_v19  ;;  %v16771_v60 = vld [vmem:[#allocation56_spill] sm:$0xff] }
 0x334   : > { %v14417_v23 = vadd.f32 %v3455_v53, %v12493_v51  ;;  %11371 = vmatpush3.bf16.msra.mxu0 %v12042_v25  ;;  %11397 = vmatprep.subr.bf16.mxu1 %v12026_v22  ;;  %v14421_v50 = vpop.permute.xlu1 %5941  ;;  %v14426_v21 = vpop.permute.xlu0 %5939 }
 0x335   : > { %16766 = vst [vmem:[#allocation166_spill] sm:$0xff] %v14413_v49  ;;  %16768 = vst [vmem:[#allocation168_spill] sm:$0xff] %v14421_v50  ;;  %11373 = vmatprep.subr.bf16.mxu0 %v12058_v28  ;;  %6369 = vrot.lane.b32.xlu1 %v14271_v9, %s16481_s13  ;;  %v4913_v50 = vsel %vm883_vm4, %v16771_v60, %v13571_v12  ;;  %v6426_v49 = vrot.slane %v14061_v14, 6 }
 0x336   : > { %16767 = vst [vmem:[#allocation167_spill] sm:$0xff] %v14417_v23  ;;  %16769 = vst [vmem:[#allocation169_spill] sm:$0xff] %v14426_v21  ;;  %6367 = vrot.lane.b32.xlu0 %v14286_v42, %s16481_s13  ;;  %v4917_v58 = vmul.f32 %v14072_v34, %v4913_v50  ;;  %v6409_v50 = vld [vmem:[%s13203_s19] sm:$0xc0] }
 0x337   : > { %11399 = vmatpush3.bf16.msra.mxu1 %v12026_v22 }
 0x338   : > { %11375 = vmatpush3.bf16.msra.mxu0 %v12058_v28  ;;  %11401 = vmatprep.subr.bf16.mxu1 %v12042_v25  ;;  %v14437_v53 = vpop.permute.xlu1 %5963 }
 0x339   : > { %16770 = vst [vmem:[#allocation170_spill] sm:$0xff] %v14437_v53  ;;  %v9309_v21 = vpop.f32.mrb[30].mxu1  ;;  %11377 = vmatprep.subr.bf16.mxu0 %v12074_v31  ;;  %6373 = vrot.lane.b32.xlu1 %v14293_v8, %s16481_s13 }
 0x33a   : > { %v14449_v41 = vadd.f32 %v9309_v21, %v12487_v47  ;;  %v3549_v53 = vpop.f32.mrb[31].mxu1  ;;  %6371 = vrot.lane.b32.xlu0 %v14310_v38, %s16481_s13  ;;  %s14477_s13 = scalar_lea.vmem %s16426_s5, %s11954_s20  ;;  %v4730_v21 = vmul.f32 %v14193_v56, %v4726_v36  ;;  %s14572_s20 = sld [smem:[#allocation3 + $0x6]] }
 0x33b   : > { %v14456_v12 = vadd.f32 %v3549_v53, %v12493_v51  ;;  %11403 = vmatpush3.bf16.msra.mxu1 %v12042_v25  ;;  %v14459_v60 = vpop.permute.xlu0 %5961  ;;  %v14500_v36 = vld [vmem:[%s14477_s13 + $0x8] sm:$0xff]  ;;  %v14570_v39 = vld [vmem:[%s14477_s13 + $0x10] sm:$0xff] }
 0x33c   : > { %16774 = vst [vmem:[#allocation56_spill] sm:$0xff] %v14449_v41  ;;  %16776 = vst [vmem:[#allocation51_spill] sm:$0xff] %v14459_v60  ;;  %11379 = vmatpush3.bf16.msra.mxu0 %v12074_v31  ;;  %11405 = vmatprep.subr.bf16.mxu1 %v12058_v28  ;;  %v14464_v13 = vpop.permute.xlu1 %5967  ;;  %v6448_v60 = vrot.slane %v6410_v30, 6  ;;  %v5007_v30 = vsel %vm978_vm5, %v16780_v57, %v16779_v40  ;;  %v6425_v41 = vrot.slane %v6409_v50, 6  ;;  %v6411_v57 = vld [vmem:[%s13203_s19 + $0x20] sm:$0x3f] }
 0x33d   : > { %16775 = vst [vmem:[#allocation50_spill] sm:$0xff] %v14456_v12  ;;  %16777 = vst [vmem:[#allocation171_spill] sm:$0xff] %v14464_v13  ;;  %11413 = vmatprep.subr.bf16.mxu0 %v11935_v3  ;;  %6395 = vrot.lane.b32.xlu1 %v14271_v9, %s11836_s14  ;;  %v6449_v13 = vrot.slane %v14032_v35, 6  ;;  %v14497_v9 = vld [vmem:[%s14471_s29 + $0x8] sm:$0xff]  ;;  %v14519_v40 = vld [vmem:[%s14471_s29] sm:$0xff]  ;;  %v5011_v14 = vmul.f32 %v14072_v34, %v5007_v30  ;;  %v6428_v30 = vrot.slane %v6411_v57, 6 }
 0x33e   : > { %6393 = vrot.lane.b32.xlu0 %v14286_v42, %s11836_s14  ;;  %v6640_v42 = vstv %s14433_s23  ;;  %s7265_s23 = sld [smem:[#allocation3 + $0x8]] }
 0x33f   : > { %9763 = vmatmul.mubr.f32.vlgmr.msra.gmra.mrb[44].mxu0 %v4730_v21  ;;  %11407 = vmatpush3.bf16.msra.mxu1 %v12058_v28  ;;  %v14487_v53 = vpop.permute.xlu0 %5965  ;;  %v6634_v21 = vstv %s14431_s22  ;;  %v6642_v50 = vmul.f32 %v6640_v42, %v14500_v36  ;;  %v14537_v15 = vsel %vm4619_vm11, %v6448_v60, %v6449_v13  ;;  %v14554_v60 = vsel %vm4619_vm11, %v6425_v41, %v6426_v49  ;;  %v14567_v41 = vld [vmem:[%s14471_s29 + $0x10] sm:$0xff]  ;;  %s14574_s22 = sld [smem:[#allocation3 + $0x7]] }
 0x340   : > { %16778 = vst [vmem:[#allocation172_spill] sm:$0xff] %v14487_v53  ;;  %11415 = vmatpush3.bf16.msra.mxu0 %v11935_v3  ;;  %9832 = vmatprep.mubr.f32.mxu0 %v4917_v58  ;;  %v14508_v35 = vpop.permute.xlu1 %5989  ;;  %v6412_v53 = vld [vmem:[%s13203_s19 + $0x28] sm:$0x3f]  ;;  %v14522_v58 = vld [vmem:[%s14477_s13] sm:$0xff]  ;;  %v6636_v16 = vmul.f32 %v6634_v21, %v14497_v9  ;;  %16786 = vst [vmem:[#allocation55_spill] sm:$0xff] %v14554_v60  ;;  %v6635_v2 = vmul.f32 %v6634_v21, %v14519_v40 }
 0x341   : > { %16781 = vst [vmem:[#allocation59_spill] sm:$0xff] %v14508_v35  ;;  %11409 = vmatprep.subr.bf16.mxu1 %v12074_v31  ;;  %11417 = vmatprep.subr.bf16.mxu0 %v11943_v5  ;;  %v6650_v35 = vstv %s14453_s25  ;;  %v6641_v37 = vmul.f32 %v6640_v42, %v14522_v58  ;;  %s14658_s25 = sld [smem:[#allocation3 + $0xc]] }
 0x342   : > { %6399 = vrot.lane.b32.xlu1 %v14293_v8, %s11836_s14  ;;  %6397 = vrot.lane.b32.xlu0 %v14310_v38, %s11836_s14  ;;  %v6451_v8 = vrot.slane %v6412_v53, 6  ;;  %v14545_v38 = vld [vmem:[%s14477_s13 + $0x18] sm:$0xff]  ;;  %v6652_v53 = vmul.f32 %v6650_v35, %v14529_v29  ;;  %v6646_v57 = vadd.f32 %v6642_v50, %v6636_v16 }
 0x343   : > { %11411 = vmatpush3.bf16.msra.mxu1 %v12074_v31  ;;  %v14539_v46 = vpop.permute.xlu0 %5987  ;;  %v6644_v4 = vmul.f32 %v6640_v42, %v14545_v38  ;;  %v14583_v16 = vld [vmem:[%s14494_s28 + $0x18] sm:$0xff] }
 0x344   : > { %16784 = vst [vmem:[#allocation60_spill] sm:$0xff] %v14539_v46  ;;  %11419 = vmatpush3.bf16.msra.mxu0 %v11943_v5  ;;  %11445 = vmatprep.subr.bf16.mxu1 %v11935_v3  ;;  %v14550_v26 = vpop.permute.xlu1 %5993  ;;  %v14558_v46 = vld [vmem:[%s14494_s28] sm:$0xff]  ;;  %v6656_v12 = vadd.f32 %v6652_v53, %v6646_v57 }
 0x345   : > { %16785 = vst [vmem:[#allocation54_spill] sm:$0xff] %v14550_v26  ;;  %11421 = vmatprep.subr.bf16.mxu0 %v11980_v10  ;;  %v6638_v26 = vmul.f32 %v6634_v21, %v14542_v62  ;;  %v6651_v50 = vmul.f32 %v6650_v35, %v14558_v46  ;;  %v6684_v53 = vstv %s14574_s22  ;;  %s14791_s22 = sld [smem:[#allocation3 + $0x11]] }
 0x346   : > { %9798 = vmatmul.mubr.f32.vlgmr.msra.gmra.mrb[44].mxu1 %v4824_v33  ;;  %6455 = vrot.lane.b32.xlu1 %v14537_v15, %s11831_s15  ;;  %v14578_v33 = vsel %vm4619_vm11, %v6449_v13, %v6451_v8  ;;  %v6645_v13 = vadd.f32 %v6641_v37, %v6635_v2  ;;  %v6643_v8 = vmul.f32 %v6640_v42, %v14570_v39 }
 0x347   : > { %11447 = vmatpush3.bf16.msra.mxu1 %v11935_v3  ;;  %9867 = vmatprep.mubr.f32.mxu1 %v5011_v14  ;;  %v14580_v52 = vpop.permute.xlu0 %5991  ;;  %v6637_v14 = vmul.f32 %v6634_v21, %v14567_v41  ;;  %v6648_v23 = vadd.f32 %v6644_v4, %v6638_v26 }
 0x348   : > { %16787 = vst [vmem:[#allocation173_spill] sm:$0xff] %v14580_v52  ;;  %11423 = vmatpush3.bf16.msra.mxu0 %v11980_v10  ;;  %11449 = vmatprep.subr.bf16.mxu1 %v11943_v5  ;;  %v14588_v6 = vpop.permute.xlu1 %6015  ;;  %v14598_v52 = vsel %vm4619_vm11, %v6426_v49, %v6428_v30  ;;  %v6655_v4 = vadd.f32 %v6651_v50, %v6645_v13  ;;  %v6678_v30 = vstv %s14572_s20  ;;  %v6694_v50 = vstv %s7265_s23  ;;  %s14774_s20 = sld [smem:[#allocation3 + $0x10]]  ;;  %s7280_s23 = sld [smem:[#allocation3 + $0x17]] }
 0x349   : > { %16788 = vst [vmem:[#allocation174_spill] sm:$0xff] %v14588_v6  ;;  %11425 = vmatprep.subr.bf16.mxu0 %v12010_v19  ;;  %6453 = vrot.lane.b32.xlu0 %v14554_v60, %s11831_s15  ;;  %16789 = vst [vmem:[#allocation175_spill] sm:$0xff] %v14598_v52  ;;  %v6654_v6 = vmul.f32 %v6650_v35, %v14583_v16  ;;  %v6647_v26 = vadd.f32 %v6643_v8, %v6637_v14 }
 0x34a   : > { %6459 = vrot.lane.b32.xlu1 %v14578_v33, %s11831_s15  ;;  %v6653_v49 = vmul.f32 %v6650_v35, %v14602_v59 }
 0x34b   : > { %11451 = vmatpush3.bf16.msra.mxu1 %v11943_v5  ;;  %v14605_v37 = vpop.permute.xlu0 %6013  ;;  %v6658_v21 = vadd.f32 %v6654_v6, %v6648_v23  ;;  %v6680_v6 = vmul.f32 %v6678_v30, %v14497_v9  ;;  %v6686_v23 = vmul.f32 %v6684_v53, %v14500_v36  ;;  %v6679_v36 = vmul.f32 %v6678_v30, %v14519_v40 }
 0x34c   : > { %16790 = vst [vmem:[#allocation176_spill] sm:$0xff] %v14605_v37  ;;  %11427 = vmatpush3.bf16.msra.mxu0 %v12010_v19  ;;  %11453 = vmatprep.subr.bf16.mxu1 %v11980_v10  ;;  %v6020_v42 = vpop.permute.xlu1 %6019  ;;  %v6657_v35 = vadd.f32 %v6653_v49, %v6647_v26  ;;  %v6688_v40 = vmul.f32 %v6684_v53, %v14545_v38 }
 0x34d   : > { %11429 = vmatprep.subr.bf16.mxu0 %v12026_v22  ;;  %6457 = vrot.lane.b32.xlu0 %v14598_v52, %s11831_s15  ;;  %v6690_v49 = vadd.f32 %v6686_v23, %v6680_v6  ;;  %v6695_v6 = vmul.f32 %v6694_v50, %v14558_v46 }
 0x34e   : > { %6665 = vrot.lane.b32.xlu1 %v6656_v12, %s11831_s15 }
 0x34f   : > { %11455 = vmatpush3.bf16.msra.mxu1 %v11980_v10  ;;  %v6018_v2 = vpop.permute.xlu0 %6017 }
 0x350   : > { %11431 = vmatpush3.bf16.msra.mxu0 %v12026_v22  ;;  %11457 = vmatprep.subr.bf16.mxu1 %v12010_v19  ;;  %v14620_v57 = vsel %vm1168_vm7, %v6018_v2, %v6020_v42  ;;  %v6076_v37 = vpop.permute.xlu1 %6075  ;;  %v6685_v42 = vmul.f32 %v6684_v53, %v14522_v58  ;;  %v6682_v2 = vmul.f32 %v6678_v30, %v14542_v62  ;;  %v16796_v58 = vld [vmem:[#allocation58_spill] sm:$0xff] }
 0x351   : > { %16791 = vst [vmem:[#allocation177_spill] sm:$0xff] %v14620_v57  ;;  %11433 = vmatprep.subr.bf16.mxu0 %v12042_v25  ;;  %6663 = vrot.lane.b32.xlu0 %v6655_v4, %s11831_s15  ;;  %v14757_v57 = vld [vmem:[%s14494_s28] sm:$0xfe] }
 0x352   : > { %v9344_v12 = vpop.f32.mrb[32].mxu0  ;;  %6669 = vrot.lane.b32.xlu1 %v6658_v21, %s11831_s15  ;;  %v6696_v21 = vmul.f32 %v6694_v50, %v14529_v29 }
 0x353   : > { %v14628_v13 = vadd.f32 %v9344_v12, %v12487_v47  ;;  %v3643_v14 = vpop.f32.mrb[33].mxu0  ;;  %11459 = vmatpush3.bf16.msra.mxu1 %v12010_v19  ;;  %v16795_v12 = vld [vmem:[#allocation57_spill] sm:$0xff] }
 0x354   : > { %v14632_v8 = vadd.f32 %v3643_v14, %v12493_v51  ;;  %11435 = vmatpush3.bf16.msra.mxu0 %v12042_v25  ;;  %11461 = vmatprep.subr.bf16.mxu1 %v12026_v22  ;;  %v6074_v9 = vpop.permute.xlu0 %6073  ;;  %v6080_v26 = vpop.permute.xlu1 %6079  ;;  %v4914_v14 = vsel %vm883_vm4, %v16796_v58, %v16795_v12  ;;  %v6681_v12 = vmul.f32 %v6678_v30, %v14567_v41 }
 0x355   : > { %16792 = vst [vmem:[#allocation178_spill] sm:$0xff] %v14628_v13  ;;  %11437 = vmatprep.subr.bf16.mxu0 %v12058_v28  ;;  %6667 = vrot.lane.b32.xlu0 %v6657_v35, %s11831_s15  ;;  %v14641_v4 = vsel %vm693_vm2, %v6074_v9, %v6076_v37  ;;  %v5101_v37 = vsel %vm1073_vm6, %v13636_v55, %v13630_v1 }
 0x356   : > { %16793 = vst [vmem:[#allocation179_spill] sm:$0xff] %v14632_v8  ;;  %16794 = vst [vmem:[#allocation180_spill] sm:$0xff] %v14641_v4  ;;  %6481 = vrot.lane.b32.xlu1 %v14537_v15, %s11832_s30  ;;  %v6689_v35 = vadd.f32 %v6685_v42, %v6679_v36  ;;  %v6700_v55 = vadd.f32 %v6696_v21, %v6690_v49  ;;  %v6698_v9 = vmul.f32 %v6694_v50, %v14583_v16  ;;  %v14766_v8 = vld [vmem:[%s14494_s28 + $0x28] sm:$0x1] }
 0x357   : > { %11463 = vmatpush3.bf16.msra.mxu1 %v12026_v22  ;;  %v6692_v42 = vadd.f32 %v6688_v40, %v6682_v2  ;;  %v6687_v58 = vmul.f32 %v6684_v53, %v14570_v39  ;;  %v4918_v21 = vmul.f32 %v14193_v56, %v4914_v14  ;;  %v5105_v2 = vmul.f32 %v14072_v34, %v5101_v37 }
 0x358   : > { %11439 = vmatpush3.bf16.msra.mxu0 %v12058_v28  ;;  %11465 = vmatprep.subr.bf16.mxu1 %v12042_v25  ;;  %v6078_v29 = vpop.permute.xlu0 %6077  ;;  %v6699_v53 = vadd.f32 %v6695_v6, %v6689_v35  ;;  %v6697_v14 = vmul.f32 %v6694_v50, %v14602_v59  ;;  %v14703_v35 = vld [vmem:[%s14477_s13 + $0x8] sm:$0xfe]  ;;  %v6773_v6 = vstv %s14658_s25  ;;  %v6781_v50 = vstv %s14660_s16  ;;  %s14961_s25 = sld [smem:[#allocation3 + $0x18]]  ;;  %s14963_s16 = sld [smem:[#allocation3 + $0x19]] }
 0x359   : > { %v9379_v23 = vpop.f32.mrb[32].mxu1  ;;  %11441 = vmatprep.subr.bf16.mxu0 %v12074_v31  ;;  %6479 = vrot.lane.b32.xlu0 %v14554_v60, %s11832_s30  ;;  %v14666_v1 = vsel %vm693_vm2, %v6078_v29, %v6080_v26  ;;  %v6702_v40 = vadd.f32 %v6698_v9, %v6692_v42  ;;  %v6691_v29 = vadd.f32 %v6687_v58, %v6681_v12  ;;  %v14718_v58 = vld [vmem:[%s14471_s29] sm:$0xfe] }
 0x35a   : > { %16797 = vst [vmem:[#allocation57_spill] sm:$0xff] %v14666_v1  ;;  %v14670_v36 = vadd.f32 %v9379_v23, %v12487_v47  ;;  %v3737_v46 = vpop.f32.mrb[33].mxu1  ;;  %6485 = vrot.lane.b32.xlu1 %v14578_v33, %s11832_s30  ;;  %v16801_v23 = vld [vmem:[#allocation61_spill] sm:$0xff]  ;;  %v5195_v9 = vsel %vm1168_vm7, %v13692_v7, %v13680_v27 }
 0x35b   : > { %v14677_v4 = vadd.f32 %v3737_v46, %v12493_v51  ;;  %11467 = vmatpush3.bf16.msra.mxu1 %v12042_v25  ;;  %v6102_v26 = vpop.permute.xlu1 %6101  ;;  %v16802_v46 = vld [vmem:[#allocation62_spill] sm:$0xff]  ;;  %v6701_v12 = vadd.f32 %v6697_v14, %v6691_v29  ;;  %v5199_v29 = vmul.f32 %v14072_v34, %v5195_v9  ;;  %v6777_v14 = vmul.f32 %v6773_v6, %v14542_v62 }
 0x35c   : > { %16798 = vst [vmem:[#allocation58_spill] sm:$0xff] %v14670_v36  ;;  %11443 = vmatpush3.bf16.msra.mxu0 %v12074_v31  ;;  %11469 = vmatprep.subr.bf16.mxu1 %v12058_v28  ;;  %v6100_v49 = vpop.permute.xlu0 %6099  ;;  %v5008_v1 = vsel %vm978_vm5, %v16802_v46, %v16801_v23  ;;  %v6795_v23 = vstv %s14682_s21  ;;  %v6774_v34 = vmul.f32 %v6773_v6, %v14718_v58  ;;  %s14986_s21 = sld [smem:[#allocation3 + $0x1a]] }
 0x35d   : > { %16799 = vst [vmem:[#allocation181_spill] sm:$0xff] %v14677_v4  ;;  %11477 = vmatprep.subr.bf16.mxu0 %v11935_v3  ;;  %6483 = vrot.lane.b32.xlu0 %v14598_v52, %s11832_s30  ;;  %v14690_v30 = vsel %vm788_vm3, %v6100_v49, %v6102_v26  ;;  %v14721_v49 = vld [vmem:[%s14477_s13] sm:$0xfe]  ;;  %v5012_v27 = vmul.f32 %v14193_v56, %v5008_v1  ;;  %v14737_v1 = vld [vmem:[%s14494_s28 + $0x8] sm:$0xfe] }
 0x35e   : > { %16800 = vst [vmem:[#allocation182_spill] sm:$0xff] %v14690_v30  ;;  %6709 = vrot.lane.b32.xlu1 %v6700_v55, %s11832_s30  ;;  %v14700_v55 = vld [vmem:[%s14471_s29 + $0x8] sm:$0xfe]  ;;  %v6782_v9 = vmul.f32 %v6781_v50, %v14721_v49  ;;  %v14753_v30 = vld [vmem:[%s14477_s13 + $0x20] sm:$0x1]  ;;  %v6784_v36 = vmul.f32 %v6781_v50, %v14570_v39  ;;  %v6797_v4 = vmul.f32 %v6795_v23, %v14737_v1 }
 0x35f   : > { %9833 = vmatmul.mubr.f32.vlgmr.msra.gmra.mrb[46].mxu0 %v4918_v21  ;;  %11471 = vmatpush3.bf16.msra.mxu1 %v12058_v28  ;;  %v6106_v37 = vpop.permute.xlu1 %6105  ;;  %v6775_v21 = vmul.f32 %v6773_v6, %v14700_v55  ;;  %v6796_v20 = vmul.f32 %v6795_v23, %v14757_v57 }
 0x360   : > { %11479 = vmatpush3.bf16.msra.mxu0 %v11935_v3  ;;  %9902 = vmatprep.mubr.f32.mxu0 %v5105_v2  ;;  %v6104_v26 = vpop.permute.xlu0 %6103  ;;  %v6783_v2 = vmul.f32 %v6781_v50, %v14703_v35 }
 0x361   : > { %11473 = vmatprep.subr.bf16.mxu1 %v12074_v31  ;;  %11481 = vmatprep.subr.bf16.mxu0 %v11943_v5  ;;  %v14713_v42 = vsel %vm788_vm3, %v6104_v26, %v6106_v37  ;;  %v6785_v37 = vmul.f32 %v6781_v50, %v14545_v38  ;;  %v6776_v26 = vmul.f32 %v6773_v6, %v14567_v41 }
 0x362   : > { %16803 = vst [vmem:[#allocation61_spill] sm:$0xff] %v14713_v42  ;;  %6707 = vrot.lane.b32.xlu0 %v6699_v53, %s11832_s30  ;;  %6713 = vrot.lane.b32.xlu1 %v6702_v40, %s11832_s30  ;;  %v14728_v53 = vld [vmem:[%s14471_s29 + $0x28] sm:$0x1]  ;;  %v14750_v42 = vld [vmem:[%s14471_s29 + $0x20] sm:$0x1]  ;;  %v6789_v13 = vadd.f32 %v6783_v2, %v6775_v21  ;;  %v6788_v2 = vadd.f32 %v6782_v9, %v6774_v34 }
 0x363   : > { %11475 = vmatpush3.bf16.msra.mxu1 %v12074_v31  ;;  %v6128_v7 = vpop.permute.xlu1 %6127  ;;  %v14731_v40 = vld [vmem:[%s14477_s13 + $0x28] sm:$0x1]  ;;  %v6791_v18 = vadd.f32 %v6785_v37, %v6777_v14  ;;  %v6801_v37 = vmul.f32 %v6795_v23, %v14766_v8 }
 0x364   : > { %11483 = vmatpush3.bf16.msra.mxu0 %v11943_v5  ;;  %11509 = vmatprep.subr.bf16.mxu1 %v11935_v3  ;;  %v6126_v56 = vpop.permute.xlu0 %6125  ;;  %v6803_v34 = vadd.f32 %v6797_v4, %v6789_v13  ;;  %v14806_v4 = vstv %s14768_s27  ;;  %s7266_s27 = sld [smem:[#allocation3 + $0x9]] }
 0x365   : > { %11485 = vmatprep.subr.bf16.mxu0 %v11980_v10  ;;  %v14744_v46 = vsel %vm883_vm4, %v6126_v56, %v6128_v7  ;;  %v6779_v7 = vmul.f32 %v6773_v6, %v14728_v53  ;;  %v6787_v56 = vmul.f32 %v6781_v50, %v14731_v40 }
 0x366   : > { %16804 = vst [vmem:[#allocation62_spill] sm:$0xff] %v14744_v46  ;;  %9868 = vmatmul.mubr.f32.vlgmr.msra.gmra.mrb[46].mxu1 %v5012_v27  ;;  %6711 = vrot.lane.b32.xlu0 %v6701_v12, %s11832_s30  ;;  %v6799_v27 = vmul.f32 %v6795_v23, %v14583_v16 }
 0x367   : > { %11511 = vmatpush3.bf16.msra.mxu1 %v11935_v3  ;;  %9937 = vmatprep.mubr.f32.mxu1 %v5199_v29  ;;  %v6132_v46 = vpop.permute.xlu1 %6131  ;;  %v6778_v3 = vmul.f32 %v6773_v6, %v14750_v42  ;;  %v6786_v29 = vmul.f32 %v6781_v50, %v14753_v30  ;;  %v6790_v6 = vadd.f32 %v6784_v36, %v6776_v26 }
 0x368   : > { %11487 = vmatpush3.bf16.msra.mxu0 %v11980_v10  ;;  %11513 = vmatprep.subr.bf16.mxu1 %v11943_v5  ;;  %v6130_v12 = vpop.permute.xlu0 %6129  ;;  %v6798_v50 = vmul.f32 %v6795_v23, %v14602_v59  ;;  %v6793_v14 = vadd.f32 %v6787_v56, %v6779_v7  ;;  %v6800_v36 = vmul.f32 %v6795_v23, %v14784_v45 }
 0x369   : > { %11489 = vmatprep.subr.bf16.mxu0 %v12010_v19  ;;  %6507 = vrot.lane.b32.xlu1 %v14537_v15, %s11833_s26  ;;  %v14780_v21 = vsel %vm883_vm4, %v6130_v12, %v6132_v46  ;;  %v6792_v9 = vadd.f32 %v6786_v29, %v6778_v3  ;;  %v6805_v26 = vadd.f32 %v6799_v27, %v6791_v18 }
 0x36a   : > { %16805 = vst [vmem:[#allocation183_spill] sm:$0xff] %v14780_v21  ;;  %6505 = vrot.lane.b32.xlu0 %v14554_v60, %s11833_s26  ;;  %v6802_v7 = vadd.f32 %v6796_v20, %v6788_v2  ;;  %v6804_v56 = vadd.f32 %v6798_v50, %v6790_v6  ;;  %v6807_v12 = vadd.f32 %v6801_v37, %v6793_v14  ;;  %v14993_v21 = vld [vmem:[%s14471_s29 + $0x20] sm:$0x3] }
 0x36b   : > { %11515 = vmatpush3.bf16.msra.mxu1 %v11943_v5  ;;  %v6154_v43 = vpop.permute.xlu1 %6153  ;;  %v6806_v3 = vadd.f32 %v6800_v36, %v6792_v9  ;;  %v6818_v20 = vrot.slane %v6805_v26, 1  ;;  %v6841_v50 = vmul.f32 %v14806_v4, %v14700_v55  ;;  %v6843_v14 = vmul.f32 %v14806_v4, %v14542_v62 }
 0x36c   : > { %11491 = vmatpush3.bf16.msra.mxu0 %v12010_v19  ;;  %11517 = vmatprep.subr.bf16.mxu1 %v11980_v10  ;;  %v6152_v46 = vpop.permute.xlu0 %6151  ;;  %v6814_v27 = vrot.slane %v6802_v7, 1  ;;  %v6815_v2 = vrot.slane %v6804_v56, 1  ;;  %v6822_v6 = vrot.slane %v6807_v12, 1  ;;  %v14830_v36 = vstv %s14791_s22  ;;  %s7268_s22 = sld [smem:[#allocation3 + $0xb]] }
 0x36d   : > { %11493 = vmatprep.subr.bf16.mxu0 %v12026_v22  ;;  %6511 = vrot.lane.b32.xlu1 %v14578_v33, %s11833_s26  ;;  %v14800_v5 = vsel %vm978_vm5, %v6152_v46, %v6154_v43  ;;  %v6847_v43 = vstv %s14774_s20  ;;  %v6820_v56 = vrot.slane %v6806_v3, 1  ;;  %v6840_v12 = vmul.f32 %v14806_v4, %v14718_v58  ;;  %s7267_s20 = sld [smem:[#allocation3 + $0xa]] }
 0x36e   : > { %16806 = vst [vmem:[#allocation184_spill] sm:$0xff] %v14800_v5  ;;  %6509 = vrot.lane.b32.xlu0 %v14598_v52, %s11833_s26  ;;  %v6851_v9 = vmul.f32 %v6847_v43, %v14545_v38  ;;  %v5102_v3 = vsel %vm1073_vm6, %v13676_v48, %v13652_v17  ;;  %v6865_v17 = vmul.f32 %v14830_v36, %v14583_v16  ;;  %s7278_s26 = sld [smem:[#allocation3 + $0x15]]  ;;  %v16880_v5 = vld [vmem:[#allocation12_spill] sm:$0xff] }
 0x36f   : > { %11519 = vmatpush3.bf16.msra.mxu1 %v11980_v10  ;;  %v6158_v13 = vpop.permute.xlu1 %6157  ;;  %v6817_v10 = vrot.slane %v6803_v34, 1  ;;  %v6849_v34 = vmul.f32 %v6847_v43, %v14703_v35 }
 0x370   : > { %11495 = vmatpush3.bf16.msra.mxu0 %v12026_v22  ;;  %11521 = vmatprep.subr.bf16.mxu1 %v12010_v19  ;;  %v6156_v23 = vpop.permute.xlu0 %6155 }
 0x371   : > { %11497 = vmatprep.subr.bf16.mxu0 %v12042_v25  ;;  %6533 = vrot.lane.b32.xlu1 %v14537_v15, %s11834_s12  ;;  %v14815_v18 = vsel %vm978_vm5, %v6156_v23, %v6158_v13  ;;  %v6848_v13 = vmul.f32 %v6847_v43, %v14721_v49  ;;  %v6850_v23 = vmul.f32 %v6847_v43, %v14570_v39 }
 0x372   : > { %16807 = vst [vmem:[#allocation185_spill] sm:$0xff] %v14815_v18  ;;  %v9414_v29 = vpop.f32.mrb[34].mxu0  ;;  %6531 = vrot.lane.b32.xlu0 %v14554_v60, %s11834_s12  ;;  %v6819_v58 = vsel %vm1264_vm0, %v6817_v10, %v6818_v20  ;;  %v6863_v49 = vmul.f32 %v14830_v36, %v14737_v1 }
 0x373   : > { %v14824_v37 = vadd.f32 %v9414_v29, %v12487_v47  ;;  %v3831_v46 = vpop.f32.mrb[35].mxu0  ;;  %11523 = vmatpush3.bf16.msra.mxu1 %v12010_v19  ;;  %v6842_v19 = vmul.f32 %v14806_v4, %v14567_v41  ;;  %v6816_v29 = vsel %vm1264_vm0, %v6814_v27, %v6815_v2 }
 0x374   : > { %v14833_v26 = vadd.f32 %v3831_v46, %v12493_v51  ;;  %11499 = vmatpush3.bf16.msra.mxu0 %v12042_v25  ;;  %11525 = vmatprep.subr.bf16.mxu1 %v12026_v22  ;;  %v6180_v55 = vpop.permute.xlu1 %6179  ;;  %v6178_v7 = vpop.permute.xlu0 %6177  ;;  %v6823_v46 = vsel %vm1264_vm0, %v6818_v20, %v6822_v6  ;;  %v6854_v20 = vadd.f32 %v6848_v13, %v6840_v12 }
 0x375   : > { %16808 = vst [vmem:[#allocation186_spill] sm:$0xff] %v14824_v37  ;;  %11501 = vmatprep.subr.bf16.mxu0 %v12058_v28  ;;  %6537 = vrot.lane.b32.xlu1 %v14578_v33, %s11834_s12  ;;  %v14845_v35 = vsel %vm1073_vm6, %v6178_v7, %v6180_v55  ;;  %v6821_v55 = vsel %vm1264_vm0, %v6815_v2, %v6820_v56 }
 0x376   : > { %16809 = vst [vmem:[#allocation187_spill] sm:$0xff] %v14845_v35  ;;  %6535 = vrot.lane.b32.xlu0 %v14598_v52, %s11834_s12  ;;  %v6855_v7 = vadd.f32 %v6849_v34, %v6841_v50  ;;  %v6856_v27 = vadd.f32 %v6850_v23, %v6842_v19  ;;  %v6862_v2 = vmul.f32 %v14830_v36, %v14757_v57  ;;  %s7279_s12 = sld [smem:[#allocation3 + $0x16]]  ;;  %v16879_v35 = vld [vmem:[#allocation10_spill] sm:$0xff] }
 0x377   : > { %11527 = vmatpush3.bf16.msra.mxu1 %v12026_v22  ;;  %v6857_v22 = vadd.f32 %v6851_v9, %v6843_v14  ;;  %v6845_v50 = vmul.f32 %v14806_v4, %v14728_v53  ;;  %v6853_v34 = vmul.f32 %v6847_v43, %v14731_v40  ;;  %v6864_v9 = vmul.f32 %v14830_v36, %v14602_v59  ;;  %v11782_v40 = vld [vmem:[%s11964_s24 + $0x8] sm:$0xff]  ;;  %s16813_s24 = smov 88  }
 0x378   : > { %11503 = vmatpush3.bf16.msra.mxu0 %v12058_v28  ;;  %11529 = vmatprep.subr.bf16.mxu1 %v12042_v25  ;;  %v6184_v10 = vpop.permute.xlu1 %6183  ;;  %v6844_v12 = vmul.f32 %v14806_v4, %v14750_v42  ;;  %v6852_v19 = vmul.f32 %v6847_v43, %v14753_v30  ;;  %v5106_v13 = vmul.f32 %v11782_v40, %v5102_v3 }
 0x379   : > { %v9449_v48 = vpop.f32.mrb[34].mxu1  ;;  %11505 = vmatprep.subr.bf16.mxu0 %v12074_v31  ;;  %6826 = vrot.lane.b32.xlu1 %v6819_v58, %s11831_s15  ;;  %v6871_v23 = vadd.f32 %v6865_v17, %v6857_v22  ;;  %v6868_v58 = vadd.f32 %v6862_v2, %v6854_v20  ;;  %v6859_v4 = vadd.f32 %v6853_v34, %v6845_v50 }
 0x37a   : > { %v14868_v1 = vadd.f32 %v9449_v48, %v12487_v47  ;;  %v3925_v6 = vpop.f32.mrb[35].mxu1  ;;  %6824 = vrot.lane.b32.xlu0 %v6816_v29, %s11831_s15  ;;  %v6867_v43 = vmul.f32 %v14830_v36, %v14766_v8  ;;  %v6858_v48 = vadd.f32 %v6852_v19, %v6844_v12  ;;  %v6866_v3 = vmul.f32 %v14830_v36, %v14784_v45 }
 0x37b   : > { %v14877_v56 = vadd.f32 %v3925_v6, %v12493_v51  ;;  %11531 = vmatpush3.bf16.msra.mxu1 %v12042_v25  ;;  %v6182_v14 = vpop.permute.xlu0 %6181  ;;  %v6869_v25 = vadd.f32 %v6863_v49, %v6855_v7  ;;  %v6884_v8 = vrot.slane %v6871_v23, 1  ;;  %v6880_v17 = vrot.slane %v6868_v58, 1  ;;  %v14934_v23 = vld [vmem:[%s14477_s13 + $0x8] sm:$0xfc] }
 0x37c   : > { %16810 = vst [vmem:[#allocation188_spill] sm:$0xff] %v14868_v1  ;;  %11507 = vmatpush3.bf16.msra.mxu0 %v12074_v31  ;;  %11533 = vmatprep.subr.bf16.mxu1 %v12058_v28  ;;  %v14888_v57 = vsel %vm1073_vm6, %v6182_v14, %v6184_v10  ;;  %v6206_v53 = vpop.permute.xlu1 %6205  ;;  %v6870_v10 = vadd.f32 %v6864_v9, %v6856_v27  ;;  %v6950_v58 = vstv %s7278_s26  ;;  %s16259_s26 = sld [smem:[#allocation3 + $0x14]] }
 0x37d   : > { %16811 = vst [vmem:[#allocation189_spill] sm:$0xff] %v14888_v57  ;;  %6830 = vrot.lane.b32.xlu1 %v6823_v46, %s11831_s15  ;;  %v6873_v7 = vadd.f32 %v6867_v43, %v6859_v4  ;;  %v6872_v20 = vadd.f32 %v6866_v3, %v6858_v48  ;;  %v6954_v43 = vmul.f32 %v6950_v58, %v14542_v62  ;;  %v14943_v48 = vld [vmem:[%s14477_s13] sm:$0xfc] }
 0x37e   : > { %6828 = vrot.lane.b32.xlu0 %v6821_v55, %s11831_s15  ;;  %v5196_v55 = vsel %vm1168_vm7, %v13709_v24, %v13699_v63  ;;  %v6881_v22 = vrot.slane %v6870_v10, 1  ;;  %v14940_v10 = vld [vmem:[%s14471_s29] sm:$0xfc]  ;;  %v6953_v3 = vmul.f32 %v6950_v58, %v14567_v41 }
 0x37f   : > { %9903 = vmatmul.mubr.f32.vlgmr.msra.gmra.mrb[48].mxu0 %v5106_v13  ;;  %11535 = vmatpush3.bf16.msra.mxu1 %v12058_v28  ;;  %v6204_v29 = vpop.permute.xlu0 %6203  ;;  %v6883_v28 = vrot.slane %v6869_v25, 1  ;;  %v5200_v27 = vmul.f32 %v11782_v40, %v5196_v55  ;;  %v6888_v2 = vrot.slane %v6873_v7, 1  ;;  %v6886_v34 = vrot.slane %v6872_v20, 1  ;;  %v14931_v25 = vld [vmem:[%s14471_s29 + $0x8] sm:$0xfc] }
 0x380   : > { %11537 = vmatprep.subr.bf16.mxu1 %v12074_v31  ;;  %v14900_v46 = vsel %vm1168_vm7, %v6204_v29, %v6206_v53  ;;  %v6210_v49 = vpop.permute.xlu1 %6209  ;;  %v6952_v4 = vmul.f32 %v6950_v58, %v14931_v25  ;;  %v6958_v29 = vstv %s7279_s12  ;;  %v14947_v55 = vld [vmem:[%s14494_s28 + $0x8] sm:$0xfc]  ;;  %v6972_v7 = vstv %s7280_s23 }
 0x381   : > { %16812 = vst [vmem:[#allocation190_spill] sm:$0xff] %v14900_v46  ;;  %6559 = vrot.lane.b32.xlu1 %v14537_v15, %s16813_s24  ;;  %v6885_v24 = vsel %vm1264_vm0, %v6883_v28, %v6884_v8  ;;  %v6889_v12 = vsel %vm1264_vm0, %v6884_v8, %v6888_v2  ;;  %v6887_v19 = vsel %vm1264_vm0, %v6881_v22, %v6886_v34 }
 0x382   : > { %6557 = vrot.lane.b32.xlu0 %v14554_v60, %s16813_s24  ;;  %v6960_v28 = vmul.f32 %v6958_v29, %v14934_v23  ;;  %v6962_v8 = vmul.f32 %v6958_v29, %v14545_v38 }
 0x383   : > { %11539 = vmatpush3.bf16.msra.mxu1 %v12074_v31  ;;  %v6208_v36 = vpop.permute.xlu0 %6207  ;;  %v6882_v31 = vsel %vm1264_vm0, %v6880_v17, %v6881_v22  ;;  %v6951_v17 = vmul.f32 %v6950_v58, %v14940_v10 }
 0x384   : > { %v14911_v6 = vsel %vm1168_vm7, %v6208_v36, %v6210_v49  ;;  %v6266_v63 = vpop.permute.xlu1 %6265  ;;  %v14952_v36 = vld [vmem:[%s14494_s28] sm:$0xfc]  ;;  %v6966_v2 = vadd.f32 %v6960_v28, %v6952_v4 }
 0x385   : > { %16814 = vst [vmem:[#allocation191_spill] sm:$0xff] %v14911_v6  ;;  %6563 = vrot.lane.b32.xlu1 %v14578_v33, %s16813_s24  ;;  %v6973_v34 = vmul.f32 %v6972_v7, %v14952_v36  ;;  %v14984_v6 = vld [vmem:[%s14494_s28 + $0x28] sm:$0x3] }
 0x386   : > { %9938 = vmatmul.mubr.f32.vlgmr.msra.gmra.mrb[48].mxu1 %v5200_v27  ;;  %6561 = vrot.lane.b32.xlu0 %v14598_v52, %s16813_s24  ;;  %v6974_v27 = vmul.f32 %v6972_v7, %v14947_v55  ;;  %v6978_v18 = vmul.f32 %v6972_v7, %v14984_v6  ;;  %s16247_s24 = sld [smem:[#allocation3 + $0x13]] }
 0x387   : > { %v6264_v50 = vpop.permute.xlu0 %6263 }
 0x388   : > { %v14920_v14 = vsel %vm693_vm2, %v6264_v50, %v6266_v63  ;;  %v6270_v9 = vpop.permute.xlu1 %6269  ;;  %v6976_v63 = vmul.f32 %v6972_v7, %v14583_v16  ;;  %v6961_v50 = vmul.f32 %v6958_v29, %v14570_v39  ;;  %v6980_v28 = vadd.f32 %v6974_v27, %v6966_v2 }
 0x389   : > { %16815 = vst [vmem:[#allocation192_spill] sm:$0xff] %v14920_v14  ;;  %6892 = vrot.lane.b32.xlu1 %v6885_v24, %s11832_s30  ;;  %v6959_v24 = vmul.f32 %v6958_v29, %v14943_v48  ;;  %v16878_v14 = vld [vmem:[#allocation6_spill] sm:$0xff] }
 0x38a   : > { %6890 = vrot.lane.b32.xlu0 %v6882_v31, %s11832_s30  ;;  %v6968_v31 = vadd.f32 %v6962_v8, %v6954_v43 }
 0x38b   : > { %v6268_v53 = vpop.permute.xlu0 %6267 }
 0x38c   : > { %v14927_v40 = vsel %vm693_vm2, %v6268_v53, %v6270_v9  ;;  %v6292_v13 = vpop.permute.xlu1 %6291  ;;  %v14970_v9 = vld [vmem:[%s14471_s29 + $0x28] sm:$0x3]  ;;  %v6965_v53 = vadd.f32 %v6959_v24, %v6951_v17  ;;  %v6982_v8 = vadd.f32 %v6976_v63, %v6968_v31  ;;  %v6994_v63 = vrot.slane %v6980_v28, 2 }
 0x38d   : > { %16816 = vst [vmem:[#allocation193_spill] sm:$0xff] %v14927_v40  ;;  %6896 = vrot.lane.b32.xlu1 %v6889_v12, %s11832_s30  ;;  %v14973_v12 = vld [vmem:[%s14477_s13 + $0x28] sm:$0x3]  ;;  %v6967_v40 = vadd.f32 %v6961_v50, %v6953_v3  ;;  %v7024_v28 = vstv %s14963_s16 }
 0x38e   : > { %6894 = vrot.lane.b32.xlu0 %v6887_v19, %s11832_s30  ;;  %v6964_v4 = vmul.f32 %v6958_v29, %v14973_v12  ;;  %v6995_v2 = vrot.slane %v6982_v8, 2 }
 0x38f   : > { %v6290_v49 = vpop.permute.xlu0 %6289 }
 0x390   : > { %v14956_v22 = vsel %vm788_vm3, %v6290_v49, %v6292_v13  ;;  %v6296_v20 = vpop.permute.xlu1 %6295  ;;  %v6975_v13 = vmul.f32 %v6972_v7, %v14602_v59 }
 0x391   : > { %16817 = vst [vmem:[#allocation194_spill] sm:$0xff] %v14956_v22  ;;  %6585 = vrot.lane.b32.xlu1 %v14537_v15, %s11836_s14  ;;  %v6956_v15 = vmul.f32 %v6950_v58, %v14970_v9  ;;  %v14999_v22 = vld [vmem:[%s14494_s28 + $0x20] sm:$0x3] }
 0x392   : > { %v9484_v19 = vpop.f32.mrb[36].mxu0  ;;  %6583 = vrot.lane.b32.xlu0 %v14554_v60, %s11836_s14  ;;  %v6979_v60 = vadd.f32 %v6973_v34, %v6965_v53  ;;  %v6981_v31 = vadd.f32 %v6975_v13, %v6967_v40  ;;  %v6996_v53 = vsel %vm1935_vm1, %v6994_v63, %v6995_v2  ;;  %v7026_v13 = vmul.f32 %v7024_v28, %v14934_v23 }
 0x393   : > { %v14981_v43 = vadd.f32 %v9484_v19, %v12487_v47  ;;  %v4024_v49 = vpop.f32.mrb[37].mxu0  ;;  %v6970_v57 = vadd.f32 %v6964_v4, %v6956_v15  ;;  %v14996_v19 = vld [vmem:[%s14477_s13 + $0x20] sm:$0x3]  ;;  %v6955_v15 = vmul.f32 %v6950_v58, %v14993_v21  ;;  %v6977_v4 = vmul.f32 %v6972_v7, %v14999_v22 }
 0x394   : > { %v14989_v17 = vadd.f32 %v4024_v49, %v12493_v51  ;;  %v6294_v24 = vpop.permute.xlu0 %6293  ;;  %v6318_v27 = vpop.permute.xlu1 %6317  ;;  %v6991_v50 = vrot.slane %v6979_v60, 2  ;;  %v6992_v49 = vrot.slane %v6981_v31, 2 }
 0x395   : > { %16818 = vst [vmem:[#allocation195_spill] sm:$0xff] %v14981_v43  ;;  %6589 = vrot.lane.b32.xlu1 %v14578_v33, %s11836_s14  ;;  %v15004_v3 = vsel %vm788_vm3, %v6294_v24, %v6296_v20  ;;  %v6984_v34 = vadd.f32 %v6978_v18, %v6970_v57  ;;  %v6963_v33 = vmul.f32 %v6958_v29, %v14996_v19 }
 0x396   : > { %16819 = vst [vmem:[#allocation196_spill] sm:$0xff] %v15004_v3  ;;  %6587 = vrot.lane.b32.xlu0 %v14598_v52, %s11836_s14  ;;  %v7016_v3 = vstv %s14961_s25  ;;  %v6993_v29 = vsel %vm1935_vm1, %v6991_v50, %v6992_v49  ;;  %s15103_s14 = sld [smem:[#allocation3 + $0x2]] }
 0x397   : > { %v6999_v24 = vrot.slane %v6984_v34, 2  ;;  %v6969_v60 = vadd.f32 %v6963_v33, %v6955_v15  ;;  %v7018_v18 = vmul.f32 %v7016_v3, %v14931_v25  ;;  %v7020_v57 = vmul.f32 %v7016_v3, %v14542_v62 }
 0x398   : > { %v6316_v20 = vpop.permute.xlu0 %6315  ;;  %v7028_v25 = vmul.f32 %v7024_v28, %v14545_v38  ;;  %v7038_v62 = vstv %s14986_s21  ;;  %v7025_v38 = vmul.f32 %v7024_v28, %v14943_v48 }
 0x399   : > { %v9519_v8 = vpop.f32.mrb[36].mxu1  ;;  %v15015_v52 = vsel %vm883_vm4, %v6316_v20, %v6318_v27  ;;  %7003 = vrot.lane.b32.xlu1 %v6996_v53, %s11831_s15  ;;  %v7000_v7 = vsel %vm1935_vm1, %v6995_v2, %v6999_v24  ;;  %v6983_v31 = vadd.f32 %v6977_v4, %v6969_v60  ;;  %v7032_v53 = vadd.f32 %v7026_v13, %v7018_v18 }
 0x39a   : > { %16820 = vst [vmem:[#allocation197_spill] sm:$0xff] %v15015_v52  ;;  %v15021_v40 = vadd.f32 %v9519_v8, %v12487_v47  ;;  %v4126_v58 = vpop.f32.mrb[37].mxu1  ;;  %7001 = vrot.lane.b32.xlu0 %v6993_v29, %s11831_s15  ;;  %v7040_v15 = vmul.f32 %v7038_v62, %v14947_v55  ;;  %v7042_v50 = vmul.f32 %v7038_v62, %v14583_v16  ;;  %v16877_v52 = vld [vmem:[#allocation8_spill] sm:$0xff] }
 0x39b   : > { %v15027_v27 = vadd.f32 %v4126_v58, %v12493_v51  ;;  %v6322_v63 = vpop.permute.xlu1 %6321  ;;  %v6997_v23 = vrot.slane %v6983_v31, 2  ;;  %v7034_v33 = vadd.f32 %v7028_v25, %v7020_v57  ;;  %v7017_v24 = vmul.f32 %v7016_v3, %v14940_v10 }
 0x39c   : > { %16821 = vst [vmem:[#allocation198_spill] sm:$0xff] %v15021_v40  ;;  %v6320_v34 = vpop.permute.xlu0 %6319  ;;  %v7046_v20 = vadd.f32 %v7040_v15, %v7032_v53  ;;  %v7019_v4 = vmul.f32 %v7016_v3, %v14567_v41  ;;  %v7027_v16 = vmul.f32 %v7024_v28, %v14570_v39  ;;  %v7039_v18 = vmul.f32 %v7038_v62, %v14952_v36 }
 0x39d   : > { %v15035_v2 = vsel %vm883_vm4, %v6320_v34, %v6322_v63  ;;  %7007 = vrot.lane.b32.xlu1 %v7000_v7, %s11831_s15  ;;  %v6998_v60 = vsel %vm1935_vm1, %v6992_v49, %v6997_v23  ;;  %v7048_v55 = vadd.f32 %v7042_v50, %v7034_v33  ;;  %v7031_v57 = vadd.f32 %v7025_v38, %v7017_v24 }
 0x39e   : > { %16822 = vst [vmem:[#allocation199_spill] sm:$0xff] %v15035_v2  ;;  %7005 = vrot.lane.b32.xlu0 %v6998_v60, %s11831_s15  ;;  %v7060_v29 = vrot.slane %v7046_v20, 2  ;;  %v7041_v7 = vmul.f32 %v7038_v62, %v14602_v59  ;;  %v7022_v10 = vmul.f32 %v7016_v3, %v14970_v9  ;;  %v7033_v63 = vadd.f32 %v7027_v16, %v7019_v4  ;;  %s15096_s15 = sld [smem:[#allocation3]] }
 0x39f   : > { %v6344_v8 = vpop.permute.xlu1 %6343  ;;  %v7061_v48 = vrot.slane %v7048_v55, 2  ;;  %v7030_v49 = vmul.f32 %v7024_v28, %v14973_v12  ;;  %v7045_v31 = vadd.f32 %v7039_v18, %v7031_v57  ;;  %v7044_v25 = vmul.f32 %v7038_v62, %v14984_v6 }
 0x3a0   : > { %v6342_v58 = vpop.permute.xlu0 %6341  ;;  %v7021_v36 = vmul.f32 %v7016_v3, %v14993_v21  ;;  %v7029_v34 = vmul.f32 %v7024_v28, %v14996_v19  ;;  %v7047_v50 = vadd.f32 %v7041_v7, %v7033_v63  ;;  %v7043_v9 = vmul.f32 %v7038_v62, %v14999_v22 }
 0x3a1   : > { %v15048_v13 = vsel %vm978_vm5, %v6342_v58, %v6344_v8  ;;  %v7062_v15 = vsel %vm1935_vm1, %v7060_v29, %v7061_v48  ;;  %v7036_v23 = vadd.f32 %v7030_v49, %v7022_v10  ;;  %v7057_v20 = vrot.slane %v7045_v31, 2 }
 0x3a2   : > { %16823 = vst [vmem:[#allocation200_spill] sm:$0xff] %v15048_v13  ;;  %7069 = vrot.lane.b32.xlu1 %v7062_v15, %s11832_s30  ;;  %v7035_v24 = vadd.f32 %v7029_v34, %v7021_v36  ;;  %v7058_v6 = vrot.slane %v7047_v50, 2 }
 0x3a3   : > { %v6348_v53 = vpop.permute.xlu1 %6347  ;;  %v7050_v4 = vadd.f32 %v7044_v25, %v7036_v23 }
 0x3a4   : > { %v6346_v33 = vpop.permute.xlu0 %6345  ;;  %v7049_v21 = vadd.f32 %v7043_v9, %v7035_v24  ;;  %v7059_v19 = vsel %vm1935_vm1, %v7057_v20, %v7058_v6 }
 0x3a5   : > { %v15058_v12 = vsel %vm978_vm5, %v6346_v33, %v6348_v53  ;;  %v7065_v28 = vrot.slane %v7050_v4, 2  ;;  %7067 = vrot.lane.b32.xlu0 %v7059_v19, %s11832_s30 }
 0x3a6   : > { %16824 = vst [vmem:[#allocation201_spill] sm:$0xff] %v15058_v12  ;;  %v7063_v8 = vrot.slane %v7049_v21, 2  ;;  %v16872_v12 = vld [vmem:[#allocation37_spill] sm:$0xff] }
 0x3a7   : > { %v6370_v3 = vpop.permute.xlu1 %6369  ;;  %v7066_v62 = vsel %vm1935_vm1, %v7061_v48, %v7065_v28 }
 0x3a8   : > { %v6368_v38 = vpop.permute.xlu0 %6367  ;;  %7073 = vrot.lane.b32.xlu1 %v7066_v62, %s11832_s30  ;;  %v7064_v60 = vsel %vm1935_vm1, %v7058_v6, %v7063_v8  ;;  %v16512_v8 = vstv %s15096_s15 }
 0x3a9   : > { %v15063_v22 = vsel %vm1073_vm6, %v6368_v38, %v6370_v3  ;;  %7071 = vrot.lane.b32.xlu0 %v7064_v60, %s11832_s30  ;;  %s15098_s30 = sld [smem:[#allocation3 + $0x1]]  ;;  %v6618_v60 = vmul.f32 %v16512_v8, %v14567_v41  ;;  %v11785_v8 = vld [vmem:[%s14494_s28 + $0x10] sm:$0xff] }
 0x3aa   : > { %16825 = vst [vmem:[#allocation202_spill] sm:$0xff] %v15063_v22 }
 0x3ab   : > { %v6374_v55 = vpop.permute.xlu1 %6373 }
 0x3ac   : > { %v6372_v16 = vpop.permute.xlu0 %6371 }
 0x3ad   : > { %v15070_v18 = vsel %vm1073_vm6, %v6372_v16, %v6374_v55 }
 0x3ae   : > { %16826 = vst [vmem:[#allocation203_spill] sm:$0xff] %v15070_v18  ;;  %v16871_v18 = vld [vmem:[#allocation35_spill] sm:$0xff] }
 0x3af   : > { %v6396_v58 = vpop.permute.xlu1 %6395  ;;  %v16511_v62 = vstv %s15098_s30 }
 0x3b0   : > { %v6394_v29 = vpop.permute.xlu0 %6393  ;;  %v6622_v55 = vmul.f32 %v16511_v62, %v14570_v39 }
 0x3b1   : > { %v15073_v57 = vsel %vm1168_vm7, %v6394_v29, %v6396_v58  ;;  %v16510_v29 = vstv %s15103_s14 }
 0x3b2   : > { %16827 = vst [vmem:[#allocation204_spill] sm:$0xff] %v15073_v57  ;;  %v9554_v7 = vpop.f32.mrb[38].mxu0  ;;  %v16875_v57 = vld [vmem:[#allocation53_spill] sm:$0xff] }
 0x3b3   : > { %v15076_v10 = vadd.f32 %v9554_v7, %v12487_v47  ;;  %v4220_v48 = vpop.f32.mrb[39].mxu0  ;;  %v6624_v7 = vadd.f32 %v6622_v55, %v6618_v60 }
 0x3b4   : > { %v15079_v63 = vadd.f32 %v4220_v48, %v12493_v51  ;;  %v6400_v49 = vpop.permute.xlu1 %6399  ;;  %v6398_v31 = vpop.permute.xlu0 %6397  ;;  %v6628_v48 = vmul.f32 %v16510_v29, %v14602_v59 }
 0x3b5   : > { %16828 = vst [vmem:[#allocation205_spill] sm:$0xff] %v15076_v10  ;;  %v15082_v25 = vsel %vm1168_vm7, %v6398_v31, %v6400_v49 }
 0x3b6   : > { %16829 = vst [vmem:[#allocation206_spill] sm:$0xff] %v15082_v25 }
 0x3b8   : > { %v6456_v36 = vpop.permute.xlu1 %6455 }
 0x3b9   : > { %v9589_v34 = vpop.f32.mrb[38].mxu1 }
 0x3ba   : > { %v15085_v53 = vadd.f32 %v9589_v34, %v12487_v47  ;;  %v4314_v15 = vpop.f32.mrb[39].mxu1 }
 0x3bb   : > { %v15088_v50 = vadd.f32 %v4314_v15, %v12493_v51  ;;  %v6454_v23 = vpop.permute.xlu0 %6453  ;;  %v6630_v15 = vadd.f32 %v6628_v48, %v6624_v7  ;;  %v15141_v7 = vstv %s7267_s20 }
 0x3bc   : > { %16830 = vst [vmem:[#allocation207_spill] sm:$0xff] %v15085_v53  ;;  %v15091_v9 = vsel %vm693_vm2, %v6454_v23, %v6456_v36  ;;  %v6460_v33 = vpop.permute.xlu1 %6459  ;;  %16842 = vst [vmem:[#allocation219_spill] sm:$0xff] %v15141_v7 }
 0x3bd   : > { %16831 = vst [vmem:[#allocation208_spill] sm:$0xff] %v15091_v9  ;;  %v16874_v9 = vld [vmem:[#allocation48_spill] sm:$0xff] }
 0x3bf   : > { %v6458_v20 = vpop.permute.xlu0 %6457 }
 0x3c0   : > { %v15094_v24 = vsel %vm693_vm2, %v6458_v20, %v6460_v33  ;;  %v6666_v6 = vpop.permute.xlu1 %6665 }
 0x3c1   : > { %16832 = vst [vmem:[#allocation209_spill] sm:$0xff] %v15094_v24 }
 0x3c3   : > { %v6664_v4 = vpop.permute.xlu0 %6663 }
 0x3c4   : > { %v15101_v21 = vsel %vm693_vm2, %v6664_v4, %v6666_v6  ;;  %v6670_v3 = vpop.permute.xlu1 %6669 }
 0x3c5   : > { %16833 = vst [vmem:[#allocation210_spill] sm:$0xff] %v15101_v21  ;;  %v16863_v21 = vld [vmem:[#allocation21_spill] sm:$0xff] }
 0x3c7   : > { %v6668_v19 = vpop.permute.xlu0 %6667 }
 0x3c8   : > { %v6672_v28 = vsel %vm693_vm2, %v6668_v19, %v6670_v3  ;;  %v15106_v38 = vpop.permute.xlu1 %6481 }
 0x3c9   : > { %16834 = vst [vmem:[#allocation211_spill] sm:$0xff] %v15106_v38  ;;  %v6676_v20 = vadd.f32 %v6672_v28, %v6630_v15 }
 0x3cb   : > { %v15116_v16 = vpop.permute.xlu0 %6479 }
 0x3cc   : > { %16835 = vst [vmem:[#allocation212_spill] sm:$0xff] %v15116_v16  ;;  %v6486_v58 = vpop.permute.xlu1 %6485 }
 0x3cf   : > { %v6484_v49 = vpop.permute.xlu0 %6483 }
 0x3d0   : > { %v15123_v31 = vsel %vm788_vm3, %v6484_v49, %v6486_v58  ;;  %v15125_v36 = vpop.permute.xlu1 %6709  ;;  %v15139_v58 = vstv %s7266_s27 }
 0x3d1   : > { %16836 = vst [vmem:[#allocation213_spill] sm:$0xff] %v15123_v31  ;;  %16837 = vst [vmem:[#allocation214_spill] sm:$0xff] %v15125_v36  ;;  %v6743_v49 = vmul.f32 %v15139_v58, %v14750_v42  ;;  %v16865_v31 = vld [vmem:[#allocation27_spill] sm:$0xff] }
 0x3d2   : > { %v9624_v34 = vpop.f32.mrb[40].mxu0  ;;  %16841 = vst [vmem:[#allocation218_spill] sm:$0xff] %v15139_v58 }
 0x3d3   : > { %v15128_v39 = vadd.f32 %v9624_v34, %v12487_v47  ;;  %v4408_v41 = vpop.f32.mrb[41].mxu0  ;;  %v6748_v34 = vmul.f32 %v15141_v7, %v14753_v30 }
 0x3d4   : > { %v15131_v23 = vadd.f32 %v4408_v41, %v12493_v51  ;;  %v15133_v33 = vpop.permute.xlu0 %6707  ;;  %v6714_v59 = vpop.permute.xlu1 %6713  ;;  %v11783_v41 = vld [vmem:[%s14471_s29 + $0x10] sm:$0xff] }
 0x3d5   : > { %16838 = vst [vmem:[#allocation215_spill] sm:$0xff] %v15128_v39  ;;  %16839 = vst [vmem:[#allocation216_spill] sm:$0xff] %v15133_v33  ;;  %v16862_v33 = vld [vmem:[#allocation19_spill] sm:$0xff] }
 0x3d8   : > { %v6712_v6 = vpop.permute.xlu0 %6711 }
 0x3d9   : > { %v9659_v4 = vpop.f32.mrb[40].mxu1  ;;  %v6716_v3 = vsel %vm788_vm3, %v6712_v6, %v6714_v59  ;;  %v6742_v59 = vmul.f32 %v11783_v41, %v15139_v58  ;;  %v16867_v58 = vld [vmem:[#allocation31_spill] sm:$0xff] }
 0x3da   : > { %v15137_v19 = vadd.f32 %v9659_v4, %v12487_v47  ;;  %v4502_v60 = vpop.f32.mrb[41].mxu1  ;;  %v6720_v55 = vadd.f32 %v6716_v3, %v6676_v20  ;;  %v11784_v20 = vld [vmem:[%s14477_s13 + $0x10] sm:$0xff]  ;;  %v15158_v4 = vstv %s7268_s22 }
 0x3db   : > { %v15144_v48 = vadd.f32 %v4502_v60, %v12493_v51  ;;  %v15146_v28 = vpop.permute.xlu1 %6507  ;;  %v6747_v6 = vmul.f32 %v11784_v20, %v15141_v7  ;;  %16845 = vst [vmem:[#allocation222_spill] sm:$0xff] %v15158_v4  ;;  %v6751_v60 = vadd.f32 %v6748_v34, %v6743_v49  ;;  %v6756_v29 = vmul.f32 %v15158_v4, %v14784_v45 }
 0x3dc   : > { %16840 = vst [vmem:[#allocation217_spill] sm:$0xff] %v15137_v19  ;;  %16843 = vst [vmem:[#allocation220_spill] sm:$0xff] %v15146_v28  ;;  %v15152_v15 = vpop.permute.xlu0 %6505 }
 0x3dd   : > { %16844 = vst [vmem:[#allocation221_spill] sm:$0xff] %v15152_v15  ;;  %v6750_v30 = vadd.f32 %v6747_v6, %v6742_v59  ;;  %v6755_v15 = vmul.f32 %v11785_v8, %v15158_v4  ;;  %v6759_v41 = vadd.f32 %v6756_v29, %v6751_v60  ;;  %v16866_v4 = vld [vmem:[#allocation29_spill] sm:$0xff] }
 0x3df   : > { %v6512_v3 = vpop.permute.xlu1 %6511  ;;  %v15171_v20 = vadd.f32 %v6755_v15, %v6750_v30  ;;  %v6766_v49 = vrot.slane %v6759_v41, 1 }
 0x3e0   : > { %v6510_v62 = vpop.permute.xlu0 %6509 }
 0x3e1   : > { %v15163_v42 = vsel %vm883_vm4, %v6510_v62, %v6512_v3  ;;  %16849 = vst [vmem:[#allocation226_spill] sm:$0xff] %v15171_v20  ;;  %v16513_v62 = vrot.slane %v15171_v20, 1  ;;  %v16861_v20 = vld [vmem:[#allocation17_spill] sm:$0xff] }
 0x3e2   : > { %16846 = vst [vmem:[#allocation223_spill] sm:$0xff] %v15163_v42 }
 0x3e3   : > { %v15167_v28 = vpop.permute.xlu1 %6533  ;;  %v6767_v8 = vsel %vm1264_vm0, %v16513_v62, %v6766_v49 }
 0x3e4   : > { %16847 = vst [vmem:[#allocation224_spill] sm:$0xff] %v15167_v28  ;;  %v15169_v16 = vpop.permute.xlu0 %6531  ;;  %v6771_v29 = vadd.f32 %v6767_v8, %v6720_v55  ;;  %v16856_v8 = vld [vmem:[#allocation9_spill] sm:$0xff] }
 0x3e5   : > { %16848 = vst [vmem:[#allocation225_spill] sm:$0xff] %v15169_v16 }
 0x3e7   : > { %v6538_v38 = vpop.permute.xlu1 %6537 }
 0x3e8   : > { %v6536_v34 = vpop.permute.xlu0 %6535 }
 0x3e9   : > { %v15174_v45 = vsel %vm978_vm5, %v6536_v34, %v6538_v38 }
 0x3ea   : > { %16850 = vst [vmem:[#allocation227_spill] sm:$0xff] %v15174_v45  ;;  %v16864_v45 = vld [vmem:[#allocation23_spill] sm:$0xff] }
 0x3eb   : > { %v15177_v3 = vpop.permute.xlu1 %6826 }
 0x3ec   : > { %16851 = vst [vmem:[#allocation228_spill] sm:$0xff] %v15177_v3  ;;  %v15182_v59 = vpop.permute.xlu0 %6824 }
 0x3ed   : > { %16852 = vst [vmem:[#allocation229_spill] sm:$0xff] %v15182_v59  ;;  %v16860_v59 = vld [vmem:[#allocation15_spill] sm:$0xff] }
 0x3ef   : > { %v6831_v6 = vpop.permute.xlu1 %6830 }
 0x3f0   : > { %v6829_v15 = vpop.permute.xlu0 %6828 }
 0x3f1   : > { %v6833_v60 = vsel %vm693_vm2, %v6829_v15, %v6831_v6  ;;  %v16857_v6 = vld [vmem:[#allocation7_spill] sm:$0xff] }
 0x3f2   : > { %v9694_v30 = vpop.f32.mrb[42].mxu0  ;;  %v15185_v41 = vadd.f32 %v6833_v60, %v6771_v29  ;;  %v778_v15 = vmax.f32 %v16857_v6, %v16856_v8  ;;  %v16858_v29 = vld [vmem:[#allocation11_spill] sm:$0xff] }
 0x3f3   : > { %v15188_v38 = vadd.f32 %v9694_v30, %v12487_v47  ;;  %v4596_v34 = vpop.f32.mrb[43].mxu0 }
 0x3f4   : > { %16853 = vst [vmem:[#allocation230_spill] sm:$0xff] %v15185_v41  ;;  %v15191_v16 = vadd.f32 %v4596_v34, %v12493_v51  ;;  %v873_v60 = vmax.f32 %v778_v15, %v16858_v29  ;;  %v16859_v41 = vld [vmem:[#allocation13_spill] sm:$0xff] }
 0x3f5   : > { %16854 = vst [vmem:[#allocation231_spill] sm:$0xff] %v15188_v38 }
 0x3f6   : > { %v968_v30 = vmax.f32 %v873_v60, %v16859_v41 }
 0x3f8   : > { %v1063_v3 = vmax.f32 %v968_v30, %v16860_v59 }
 0x3f9   : > { %v9729_v28 = vpop.f32.mrb[42].mxu1 }
 0x3fa   : > { %v15194_v49 = vadd.f32 %v9729_v28, %v12487_v47  ;;  %v4695_v62 = vpop.f32.mrb[43].mxu1  ;;  %v1158_v34 = vmax.f32 %v1063_v3, %v16861_v20  ;;  %v16870_v3 = vld [vmem:[#allocation33_spill] sm:$0xff] }
 0x3fb   : > { %v15197_v55 = vadd.f32 %v4695_v62, %v12493_v51 }
 0x3fc   : > { %16855 = vst [vmem:[#allocation232_spill] sm:$0xff] %v15194_v49  ;;  %v1253_v36 = vmax.f32 %v1158_v34, %v16862_v33 }
 0x3fe   : > { %v1352_v28 = vmax.f32 %v1253_v36, %v16863_v21 }
 0x400   : > { %v1454_v42 = vmax.f32 %v1352_v28, %v16864_v45 }
 0x402   : > { %v1548_v62 = vmax.f32 %v1454_v42, %v16865_v31 }
 0x404   : > { %v1642_v24 = vmax.f32 %v1548_v62, %v16866_v4 }
 0x406   : > { %v1736_v25 = vmax.f32 %v1642_v24, %v16867_v58 }
 0x408   : > { %v1830_v34 = vmax.f32 %v1736_v25, %v16870_v3 }
 0x40a   : > { %v1924_v36 = vmax.f32 %v1830_v34, %v16871_v18 }
 0x40c   : > { %v2023_v28 = vmax.f32 %v1924_v36, %v16872_v12 }
 0x40e   : > { %v2125_v24 = vmax.f32 %v2023_v28, %v16874_v9 }
 0x410   : > { %v2219_v22 = vmax.f32 %v2125_v24, %v16875_v57 }
 0x412   : > { %v9764_v7 = vpop.f32.mrb[44].mxu0 }
 0x413   : > { %v15212_v15 = vadd.f32 %v9764_v7, %v12487_v47  ;;  %v4797_v60 = vpop.f32.mrb[45].mxu0 }
 0x414   : > { %v15215_v30 = vadd.f32 %v4797_v60, %v12493_v51  ;;  %v16876_v60 = vld [vmem:[#allocation64_spill] sm:$0xff] }
 0x415   : > { %16868 = vst [vmem:[#allocation9_spill] sm:$0xff] %v15212_v15  ;;  %v2313_v13 = vmax.f32 %v2219_v22, %v16876_v60  ;;  %v16881_v22 = vld [vmem:[#allocation14_spill] sm:$0xff] }
 0x416   : > { %16869 = vst [vmem:[#allocation7_spill] sm:$0xff] %v15215_v30  ;;  %v16885_v60 = vld [vmem:[#allocation18_spill] sm:$0xff] }
 0x417   : > { %v2407_v25 = vmax.f32 %v2313_v13, %v13670_v61  ;;  %v16882_v13 = vld [vmem:[#allocation121_spill] sm:$0xff] }
 0x419   : > { %v9799_v2 = vpop.f32.mrb[44].mxu1  ;;  %v2501_v34 = vmax.f32 %v2407_v25, %v13759_v32  ;;  %v16883_v25 = vld [vmem:[#allocation16_spill] sm:$0xff] }
 0x41a   : > { %v15221_v42 = vadd.f32 %v9799_v2, %v12487_v47  ;;  %v4891_v62 = vpop.f32.mrb[45].mxu1  ;;  %v779_v2 = vmax.f32 %v16878_v14, %v16877_v52  ;;  %v16886_v14 = vld [vmem:[#allocation139_spill] sm:$0xff] }
 0x41b   : > { %v15225_v7 = vadd.f32 %v4891_v62, %v12493_v51  ;;  %v2595_v36 = vmax.f32 %v2501_v34, %v13790_v44  ;;  %v16884_v34 = vld [vmem:[#allocation136_spill] sm:$0xff] }
 0x41c   : > { %16873 = vst [vmem:[#allocation11_spill] sm:$0xff] %v15221_v42  ;;  %v874_v28 = vmax.f32 %v779_v2, %v16879_v35  ;;  %v16887_v2 = vld [vmem:[#allocation20_spill] sm:$0xff] }
 0x41d   : > { %v2694_v46 = vmax.f32 %v2595_v36, %v13895_v11 }
 0x41e   : > { %v969_v42 = vmax.f32 %v874_v28, %v16880_v5  ;;  %v16894_v5 = vld [vmem:[#allocation28_spill] sm:$0xff] }
 0x41f   : > { %v2796_v62 = vmax.f32 %v2694_v46, %v13925_v0  ;;  %v16888_v46 = vld [vmem:[#allocation152_spill] sm:$0xff] }
 0x420   : > { %v1064_v15 = vmax.f32 %v969_v42, %v16881_v22  ;;  %v16892_v22 = vld [vmem:[#allocation26_spill] sm:$0xff] }
 0x421   : > { %v2890_v24 = vmax.f32 %v2796_v62, %v14013_v54 }
 0x422   : > { %v1159_v32 = vmax.f32 %v1064_v15, %v16883_v25  ;;  %v16891_v25 = vld [vmem:[#allocation46_spill] sm:$0xff] }
 0x423   : > { %v2984_v61 = vmax.f32 %v2890_v24, %v16882_v13  ;;  %v16890_v24 = vld [vmem:[#allocation22_spill] sm:$0xff] }
 0x424   : > { %v1254_v52 = vmax.f32 %v1159_v32, %v16885_v60  ;;  %v16893_v60 = vld [vmem:[#allocation167_spill] sm:$0xff] }
 0x425   : > { %v3078_v44 = vmax.f32 %v2984_v61, %v16884_v34  ;;  %v16898_v34 = vld [vmem:[#allocation179_spill] sm:$0xff] }
 0x426   : > { %v1353_v35 = vmax.f32 %v1254_v52, %v16887_v2  ;;  %v16895_v52 = vld [vmem:[#allocation50_spill] sm:$0xff] }
 0x427   : > { %v3172_v36 = vmax.f32 %v3078_v44, %v16886_v14 }
 0x428   : > { %v1455_v15 = vmax.f32 %v1353_v35, %v16890_v24  ;;  %v16901_v24 = vld [vmem:[#allocation34_spill] sm:$0xff] }
 0x429   : > { %v3266_v0 = vmax.f32 %v3172_v36, %v16888_v46 }
 0x42a   : > { %v1549_v32 = vmax.f32 %v1455_v15, %v16892_v22  ;;  %v16900_v22 = vld [vmem:[#allocation181_spill] sm:$0xff] }
 0x42b   : > { %v3365_v61 = vmax.f32 %v3266_v0, %v16891_v25  ;;  %v16899_v0 = vld [vmem:[#allocation32_spill] sm:$0xff] }
 0x42c   : > { %v1643_v14 = vmax.f32 %v1549_v32, %v16894_v5  ;;  %v16902_v5 = vld [vmem:[#allocation36_spill] sm:$0xff] }
 0x42d   : > { %v3467_v44 = vmax.f32 %v3365_v61, %v16893_v60  ;;  %v16903_v60 = vld [vmem:[#allocation47_spill] sm:$0xff] }
 0x42f   : > { %v3561_v2 = vmax.f32 %v3467_v44, %v16895_v52 }
 0x431   : > { %v3655_v13 = vmax.f32 %v3561_v2, %v16898_v34  ;;  %v16904_v2 = vld [vmem:[#allocation52_spill] sm:$0xff]  ;;  %v15277_v34 = vpop.permute.xlu1 %6559 }
 0x432   : > { %v9834_v11 = vpop.f32.mrb[46].mxu0  ;;  %16905 = vst [vmem:[#allocation17_spill] sm:$0xff] %v15277_v34 }
 0x433   : > { %v15248_v28 = vadd.f32 %v9834_v11, %v12487_v47  ;;  %v4985_v62 = vpop.f32.mrb[47].mxu0  ;;  %v3749_v61 = vmax.f32 %v3655_v13, %v16900_v22  ;;  %v16907_v13 = vld [vmem:[#allocation63_spill] sm:$0xff] }
 0x434   : > { %v15251_v42 = vadd.f32 %v4985_v62, %v12493_v51 }
 0x435   : > { %16889 = vst [vmem:[#allocation13_spill] sm:$0xff] %v15248_v28  ;;  %v16897_v28 = vld [vmem:[#allocation30_spill] sm:$0xff]  ;;  %v3843_v44 = vmax.f32 %v3749_v61, %v14833_v26 }
 0x436   : > { %v1737_v62 = vmax.f32 %v1643_v14, %v16897_v28 }
 0x438   : > { %v1831_v15 = vmax.f32 %v1737_v62, %v16899_v0  ;;  %v15279_v62 = vpop.permute.xlu0 %6557 }
 0x439   : > { %v9869_v36 = vpop.f32.mrb[46].mxu1  ;;  %16906 = vst [vmem:[#allocation19_spill] sm:$0xff] %v15279_v62 }
 0x43a   : > { %v15260_v11 = vadd.f32 %v9869_v36, %v12487_v47  ;;  %v5079_v46 = vpop.f32.mrb[47].mxu1  ;;  %v1925_v32 = vmax.f32 %v1831_v15, %v16901_v24  ;;  %v3937_v36 = vmax.f32 %v3843_v44, %v14877_v56  ;;  %v16908_v24 = vld [vmem:[#allocation66_spill] sm:$0xff] }
 0x43b   : > { %v15265_v35 = vadd.f32 %v5079_v46, %v12493_v51 }
 0x43c   : > { %16896 = vst [vmem:[#allocation15_spill] sm:$0xff] %v15260_v11  ;;  %v2024_v52 = vmax.f32 %v1925_v32, %v16902_v5  ;;  %v4036_v14 = vmax.f32 %v3937_v36, %v14989_v17  ;;  %v16909_v5 = vld [vmem:[#allocation76_spill] sm:$0xff] }
 0x43e   : > { %v2126_v25 = vmax.f32 %v2024_v52, %v16903_v60  ;;  %v4138_v46 = vmax.f32 %v4036_v14, %v15027_v27  ;;  %v6564_v60 = vpop.permute.xlu1 %6563 }
 0x440   : > { %v2220_v28 = vmax.f32 %v2126_v25, %v16904_v2  ;;  %v4232_v61 = vmax.f32 %v4138_v46, %v15079_v63  ;;  %v6562_v25 = vpop.permute.xlu0 %6561  ;;  %v16910_v2 = vld [vmem:[#allocation81_spill] sm:$0xff] }
 0x441   : > { %v15290_v62 = vsel %vm1073_vm6, %v6562_v25, %v6564_v60  ;;  %v16916_v25 = vld [vmem:[#allocation120_spill] sm:$0xff] }
 0x442   : > { %v2314_v15 = vmax.f32 %v2220_v28, %v16907_v13  ;;  %v4326_v44 = vmax.f32 %v4232_v61, %v15088_v50  ;;  %16911 = vst [vmem:[#allocation21_spill] sm:$0xff] %v15290_v62  ;;  %v16912_v28 = vld [vmem:[#allocation97_spill] sm:$0xff]  ;;  %v16917_v62 = vld [vmem:[#allocation135_spill] sm:$0xff] }
 0x444   : > { %v2408_v32 = vmax.f32 %v2314_v15, %v16908_v24  ;;  %v4420_v36 = vmax.f32 %v4326_v44, %v15131_v23  ;;  %v16913_v15 = vld [vmem:[#allocation102_spill] sm:$0xff] }
 0x446   : > { %v2502_v52 = vmax.f32 %v2408_v32, %v16909_v5  ;;  %v4514_v34 = vmax.f32 %v4420_v36, %v15144_v48  ;;  %v16914_v5 = vld [vmem:[#allocation116_spill] sm:$0xff] }
 0x448   : > { %v2596_v14 = vmax.f32 %v2502_v52, %v16910_v2  ;;  %v4608_v46 = vmax.f32 %v4514_v34, %v15191_v16  ;;  %v16920_v2 = vld [vmem:[#allocation151_spill] sm:$0xff] }
 0x44a   : > { %v2695_v13 = vmax.f32 %v2596_v14, %v16912_v28  ;;  %v4707_v61 = vmax.f32 %v4608_v46, %v15197_v55 }
 0x44c   : > { %v2797_v24 = vmax.f32 %v2695_v13, %v16913_v15  ;;  %v4809_v0 = vmax.f32 %v4707_v61, %v15215_v30  ;;  %v16918_v15 = vld [vmem:[#allocation39_spill] sm:$0xff] }
 0x44e   : > { %v2891_v44 = vmax.f32 %v2797_v24, %v16914_v5  ;;  %v4903_v34 = vmax.f32 %v4809_v0, %v15225_v7  ;;  %v16921_v0 = vld [vmem:[#allocation45_spill] sm:$0xff] }
 0x450   : > { %v2985_v14 = vmax.f32 %v2891_v44, %v16916_v25  ;;  %v4997_v46 = vmax.f32 %v4903_v34, %v15251_v42 }
 0x452   : > { %v9904_v32 = vpop.f32.mrb[48].mxu0  ;;  %v3079_v13 = vmax.f32 %v2985_v14, %v16917_v62  ;;  %v5091_v24 = vmax.f32 %v4997_v46, %v15265_v35 }
 0x453   : > { %v15299_v52 = vadd.f32 %v9904_v32, %v12487_v47  ;;  %v5173_v36 = vpop.f32.mrb[49].mxu0 }
 0x454   : > { %v15302_v60 = vadd.f32 %v5173_v36, %v12493_v51  ;;  %v3173_v28 = vmax.f32 %v3079_v13, %v16918_v15  ;;  %v16922_v13 = vld [vmem:[#allocation166_spill] sm:$0xff] }
 0x455   : > { %16915 = vst [vmem:[#allocation23_spill] sm:$0xff] %v15299_v52 }
 0x456   : > { %v3267_v36 = vmax.f32 %v3173_v28, %v16920_v2  ;;  %v5185_v30 = vmax.f32 %v5091_v24, %v15302_v60  ;;  %v16926_v2 = vld [vmem:[#allocation70_spill] sm:$0xff] }
 0x458   : > { %v3366_v14 = vmax.f32 %v3267_v36, %v16921_v0 }
 0x459   : > { %v9939_v61 = vpop.f32.mrb[48].mxu1 }
 0x45a   : > { %v15311_v32 = vadd.f32 %v9939_v61, %v12487_v47  ;;  %v5267_v5 = vpop.f32.mrb[49].mxu1  ;;  %v3468_v15 = vmax.f32 %v3366_v14, %v16922_v13  ;;  %v16924_v13 = vld [vmem:[#allocation178_spill] sm:$0xff] }
 0x45b   : > { %v15316_v44 = vadd.f32 %v5267_v5, %v12493_v51  ;;  %v16923_v5 = vld [vmem:[#allocation56_spill] sm:$0xff] }
 0x45c   : > { %16919 = vst [vmem:[#allocation27_spill] sm:$0xff] %v15311_v32  ;;  %v3562_v24 = vmax.f32 %v3468_v15, %v16923_v5  ;;  %v16928_v15 = vld [vmem:[#allocation71_spill] sm:$0xff]  ;;  %v16937_v5 = vld [vmem:[#allocation80_spill] sm:$0xff] }
 0x45d   : > { %v15320_v34 = vmax.f32 %v5185_v30, %v15316_v44 }
 0x45e   : > { %v3656_v0 = vmax.f32 %v3562_v24, %v16924_v13  ;;  %v16934_v13 = vld [vmem:[#allocation78_spill] sm:$0xff] }
 0x45f   : > { %v5287_v46 = vsub.f32 %v16857_v6, %v15320_v34  ;;  %v5301_v47 = vsub.f32 %v16856_v8, %v15320_v34  ;;  %v5331_v28 = vsub.f32 %v16858_v29, %v15320_v34  ;;  %v5357_v51 = vsub.f32 %v16859_v41, %v15320_v34  ;;  %v16925_v6 = vld [vmem:[#allocation69_spill] sm:$0xff] }
 0x460   : > { %v5383_v14 = vsub.f32 %v16860_v59, %v15320_v34  ;;  %v15338_v8 = vsel %vm693_vm2, %v16926_v2, %v16925_v6  ;;  %v5409_v41 = vsub.f32 %v16861_v20, %v15320_v34  ;;  %v16931_v59 = vld [vmem:[#allocation74_spill] sm:$0xff]  ;;  %v16936_v6 = vld [vmem:[#allocation79_spill] sm:$0xff] }
 0x461   : > { %v5289_v61 = vmul.f32 1.442695, %v5287_v46  ;;  %v5303_v36 = vmul.f32 1.442695, %v5301_v47  ;;  %v5333_v30 = vmul.f32 1.442695, %v5331_v28  ;;  %v15361_v20 = vsel %vm883_vm4, %v16937_v5, %v16936_v6 }
 0x462   : > { %16927 = vst [vmem:[#allocation29_spill] sm:$0xff] %v15338_v8  ;;  %v5359_v29 = vmul.f32 1.442695, %v5357_v51  ;;  %v16929_v46 = vld [vmem:[#allocation72_spill] sm:$0xff]  ;;  %v16930_v28 = vld [vmem:[#allocation73_spill] sm:$0xff]  ;;  %16938 = vst [vmem:[#allocation33_spill] sm:$0xff] %v15361_v20 }
 0x463   : > { %11566 = vpow2.f32 %v5289_v61  ;;  %v15345_v47 = vsel %vm693_vm2, %v16929_v46, %v16928_v15  ;;  %v15350_v24 = vsel %vm788_vm3, %v16931_v59, %v16930_v28  ;;  %v16933_v61 = vld [vmem:[#allocation75_spill] sm:$0xff]  ;;  %v5385_v15 = vmul.f32 1.442695, %v5383_v14  ;;  %v16940_v28 = vld [vmem:[#allocation84_spill] sm:$0xff]  ;;  %v16946_v14 = vld [vmem:[#allocation89_spill] sm:$0xff] }
 0x464   : > { %11568 = vpow2.f32 %v5303_v36  ;;  %16932 = vst [vmem:[#allocation31_spill] sm:$0xff] %v15350_v24  ;;  %v15355_v2 = vsel %vm788_vm3, %v16934_v13, %v16933_v61  ;;  %v16935_v36 = vld [vmem:[#allocation58_spill] sm:$0xff]  ;;  %v5435_v46 = vsub.f32 %v16862_v33, %v15320_v34  ;;  %v16939_v8 = vld [vmem:[#allocation83_spill] sm:$0xff]  ;;  %v16941_v24 = vld [vmem:[#allocation85_spill] sm:$0xff] }
 0x465   : > { %v3750_v51 = vmax.f32 %v3656_v0, %v16935_v36  ;;  %11570 = vpow2.f32 %v5333_v30  ;;  %v15368_v59 = vsel %vm883_vm4, %v16940_v28, %v16939_v8  ;;  %v16942_v13 = vld [vmem:[#allocation86_spill] sm:$0xff]  ;;  %v16944_v0 = vld [vmem:[#allocation87_spill] sm:$0xff]  ;;  %v16945_v36 = vld [vmem:[#allocation88_spill] sm:$0xff]  ;;  %v5411_v8 = vmul.f32 1.442695, %v5409_v41 }
 0x466   : > { %v15373_v61 = vsel %vm978_vm5, %v16942_v13, %v16941_v24  ;;  %v15378_v5 = vsel %vm978_vm5, %v16945_v36, %v16944_v0  ;;  %v16947_v6 = vld [vmem:[#allocation90_spill] sm:$0xff]  ;;  %11572 = vpow2.f32 %v5359_v29  ;;  %v5465_v28 = vsub.f32 %v16863_v21, %v15320_v34  ;;  %v16949_v20 = vld [vmem:[#allocation92_spill] sm:$0xff]  ;;  %v16950_v24 = vld [vmem:[#allocation93_spill] sm:$0xff] }
 0x467   : > { %16943 = vst [vmem:[#allocation35_spill] sm:$0xff] %v15373_v61  ;;  %v3844_v30 = vmax.f32 %v3750_v51, %v14824_v37  ;;  %v15384_v33 = vsel %vm1073_vm6, %v16947_v6, %v16946_v14  ;;  %v15391_v13 = vsel %vm1073_vm6, %v16950_v24, %v16949_v20  ;;  %v16951_v61 = vld [vmem:[#allocation95_spill] sm:$0xff]  ;;  %v16952_v36 = vld [vmem:[#allocation96_spill] sm:$0xff]  ;;  %v16956_v41 = vld [vmem:[#allocation101_spill] sm:$0xff]  ;;  %11574 = vpow2.f32 %v5385_v15 }
 0x468   : > { %16948 = vst [vmem:[#allocation37_spill] sm:$0xff] %v15384_v33  ;;  %v15396_v0 = vsel %vm1168_vm7, %v16952_v36, %v16951_v61  ;;  %v16954_v51 = vld [vmem:[#allocation99_spill] sm:$0xff]  ;;  %v16955_v37 = vld [vmem:[#allocation100_spill] sm:$0xff]  ;;  %v5437_v20 = vmul.f32 1.442695, %v5435_v46  ;;  %v5488_v24 = vsub.f32 %v16864_v45, %v15320_v34  ;;  %v16959_v33 = vld [vmem:[#allocation105_spill] sm:$0xff]  ;;  %11576 = vpow2.f32 %v5411_v8 }
 0x469   : > { %16953 = vst [vmem:[#allocation48_spill] sm:$0xff] %v15396_v0  ;;  %v15401_v14 = vsel %vm1168_vm7, %v16955_v37, %v16954_v51  ;;  %v3938_v29 = vmax.f32 %v3844_v30, %v14868_v1  ;;  %v16957_v6 = vld [vmem:[#allocation104_spill] sm:$0xff]  ;;  %v16960_v61 = vld [vmem:[#allocation106_spill] sm:$0xff]  ;;  %v16961_v0 = vld [vmem:[#allocation107_spill] sm:$0xff] }
 0x46a   : > { %v15407_v21 = vsel %vm693_vm2, %v16957_v6, %v16956_v41  ;;  %v15414_v36 = vsel %vm693_vm2, %v16960_v61, %v16959_v33  ;;  %v16962_v37 = vld [vmem:[#allocation108_spill] sm:$0xff]  ;;  %v16964_v30 = vld [vmem:[#allocation109_spill] sm:$0xff]  ;;  %v16965_v1 = vld [vmem:[#allocation110_spill] sm:$0xff]  ;;  %v5467_v33 = vmul.f32 1.442695, %v5465_v28  ;;  %v5521_v61 = vsub.f32 %v16865_v31, %v15320_v34 }
 0x46b   : > { %16958 = vst [vmem:[#allocation53_spill] sm:$0xff] %v15407_v21  ;;  %v15419_v51 = vsel %vm788_vm3, %v16962_v37, %v16961_v0  ;;  %v15424_v41 = vsel %vm788_vm3, %v16965_v1, %v16964_v30  ;;  %v4037_v15 = vmax.f32 %v3938_v29, %v14981_v43  ;;  %v16966_v46 = vld [vmem:[#allocation111_spill] sm:$0xff]  ;;  %v16967_v6 = vld [vmem:[#allocation112_spill] sm:$0xff]  ;;  %v16969_v0 = vld [vmem:[#allocation113_spill] sm:$0xff]  ;;  %11578 = vpow2.f32 %v5437_v20 }
 0x46c   : > { %16963 = vst [vmem:[#allocation181_spill] sm:$0xff] %v15419_v51  ;;  %v15430_v45 = vsel %vm883_vm4, %v16967_v6, %v16966_v46  ;;  %v16970_v37 = vld [vmem:[#allocation114_spill] sm:$0xff]  ;;  %v16971_v1 = vld [vmem:[#allocation115_spill] sm:$0xff]  ;;  %v16972_v30 = vld [vmem:[#allocation117_spill] sm:$0xff]  ;;  %11580 = vpow2.f32 %v5467_v33 }
 0x46d   : > { %16968 = vst [vmem:[#allocation120_spill] sm:$0xff] %v15430_v45  ;;  %v15434_v21 = vpop.eup %11566  ;;  %v15439_v51 = vsel %vm883_vm4, %v16970_v37, %v16969_v0  ;;  %v15444_v29 = vsel %vm978_vm5, %v16972_v30, %v16971_v1  ;;  %v16974_v43 = vld [vmem:[#allocation118_spill] sm:$0xff]  ;;  %v16975_v46 = vld [vmem:[#allocation119_spill] sm:$0xff]  ;;  %v4139_v28 = vmax.f32 %v4037_v15, %v15021_v40  ;;  %v5490_v0 = vmul.f32 1.442695, %v5488_v24  ;;  %v16980_v1 = vld [vmem:[#allocation125_spill] sm:$0xff] }
 0x46e   : > { %16973 = vst [vmem:[#allocation69_spill] sm:$0xff] %v15444_v29  ;;  %v15449_v8 = vsel %vm978_vm5, %v16975_v46, %v16974_v43  ;;  %v15452_v31 = vpop.eup %11568  ;;  %v16977_v6 = vld [vmem:[#allocation122_spill] sm:$0xff]  ;;  %v16978_v45 = vld [vmem:[#allocation123_spill] sm:$0xff]  ;;  %v5547_v37 = vsub.f32 %v16866_v4, %v15320_v34  ;;  %v16981_v30 = vld [vmem:[#allocation40_spill] sm:$0xff] }
 0x46f   : > { %16976 = vst [vmem:[#allocation70_spill] sm:$0xff] %v15452_v31  ;;  %v15457_v62 = vsel %vm1073_vm6, %v16978_v45, %v16977_v6  ;;  %v15464_v29 = vsel %vm1073_vm6, %v16981_v30, %v16980_v1  ;;  %v16982_v43 = vld [vmem:[#allocation127_spill] sm:$0xff]  ;;  %v16983_v46 = vld [vmem:[#allocation128_spill] sm:$0xff]  ;;  %v4233_v40 = vmax.f32 %v4139_v28, %v15076_v10  ;;  %v5307_v45 = vadd.f32 %v15452_v31, %v15434_v21  ;;  %v15474_v20 = vpop.eup %11570  ;;  %v16985_v24 = vld [vmem:[#allocation129_spill] sm:$0xff] }
 0x470   : > { %16979 = vst [vmem:[#allocation71_spill] sm:$0xff] %v15457_v62  ;;  %v15469_v15 = vsel %vm1168_vm7, %v16983_v46, %v16982_v43  ;;  %v16986_v6 = vld [vmem:[#allocation130_spill] sm:$0xff]  ;;  %v5523_v1 = vmul.f32 1.442695, %v5521_v61  ;;  %v5573_v30 = vsub.f32 %v16867_v58, %v15320_v34  ;;  %v16988_v62 = vld [vmem:[#allocation131_spill] sm:$0xff]  ;;  %v16989_v43 = vld [vmem:[#allocation132_spill] sm:$0xff]  ;;  %11582 = vpow2.f32 %v5490_v0 }
 0x471   : > { %16984 = vst [vmem:[#allocation72_spill] sm:$0xff] %v15469_v15  ;;  %v15479_v4 = vsel %vm1168_vm7, %v16986_v6, %v16985_v24  ;;  %v15486_v46 = vsel %vm693_vm2, %v16989_v43, %v16988_v62  ;;  %v16991_v28 = vld [vmem:[#allocation133_spill] sm:$0xff]  ;;  %v16992_v15 = vld [vmem:[#allocation134_spill] sm:$0xff]  ;;  %v4327_v31 = vmax.f32 %v4233_v40, %v15085_v53  ;;  %v5337_v24 = vadd.f32 %v15474_v20, %v5307_v45  ;;  %v15495_v6 = vpop.eup %11572 }
 0x472   : > { %16987 = vst [vmem:[#allocation73_spill] sm:$0xff] %v15479_v4  ;;  %16990 = vst [vmem:[#allocation74_spill] sm:$0xff] %v15486_v46  ;;  %v15491_v10 = vsel %vm693_vm2, %v16992_v15, %v16991_v28  ;;  %v16993_v33 = vld [vmem:[#allocation137_spill] sm:$0xff]  ;;  %v16994_v61 = vld [vmem:[#allocation138_spill] sm:$0xff]  ;;  %v5549_v4 = vmul.f32 1.442695, %v5547_v37  ;;  %v5599_v62 = vsub.f32 %v16870_v3, %v15320_v34  ;;  %11584 = vpow2.f32 %v5523_v1 }
 0x473   : > { %v15500_v58 = vsel %vm788_vm3, %v16994_v61, %v16993_v33  ;;  %v16996_v43 = vld [vmem:[#allocation38_spill] sm:$0xff]  ;;  %v16997_v46 = vld [vmem:[#allocation140_spill] sm:$0xff]  ;;  %v16999_v40 = vld [vmem:[#allocation141_spill] sm:$0xff]  ;;  %v4421_v53 = vmax.f32 %v4327_v31, %v15128_v39  ;;  %v5363_v33 = vadd.f32 %v15495_v6, %v5337_v24  ;;  %v15516_v61 = vpop.eup %11574 }
 0x474   : > { %16995 = vst [vmem:[#allocation75_spill] sm:$0xff] %v15500_v58  ;;  %v15507_v15 = vsel %vm788_vm3, %v16997_v46, %v16996_v43  ;;  %v17000_v28 = vld [vmem:[#allocation42_spill] sm:$0xff]  ;;  %v17003_v37 = vld [vmem:[#allocation24_spill] sm:$0xff]  ;;  %v5575_v58 = vmul.f32 1.442695, %v5573_v30  ;;  %v5625_v46 = vsub.f32 %v16871_v18, %v15320_v34  ;;  %v17005_v43 = vld [vmem:[#allocation143_spill] sm:$0xff]  ;;  %11586 = vpow2.f32 %v5549_v4 }
 0x475   : > { %16998 = vst [vmem:[#allocation78_spill] sm:$0xff] %v15507_v15  ;;  %v15512_v45 = vsel %vm883_vm4, %v17000_v28, %v16999_v40  ;;  %v17002_v0 = vld [vmem:[#allocation142_spill] sm:$0xff]  ;;  %v17006_v15 = vld [vmem:[#allocation144_spill] sm:$0xff]  ;;  %v17008_v31 = vld [vmem:[#allocation145_spill] sm:$0xff]  ;;  %v5601_v39 = vmul.f32 1.442695, %v5599_v62 }
 0x476   : > { %17001 = vst [vmem:[#allocation79_spill] sm:$0xff] %v15512_v45  ;;  %v15521_v3 = vsel %vm883_vm4, %v17003_v37, %v17002_v0  ;;  %v15528_v40 = vsel %vm978_vm5, %v17006_v15, %v17005_v43  ;;  %v17009_v28 = vld [vmem:[#allocation146_spill] sm:$0xff]  ;;  %v4515_v45 = vmax.f32 %v4421_v53, %v15137_v19  ;;  %v5389_v0 = vadd.f32 %v15516_v61, %v5363_v33  ;;  %v15537_v37 = vpop.eup %11576  ;;  %v17012_v1 = vld [vmem:[#allocation147_spill] sm:$0xff]  ;;  %v17013_v30 = vld [vmem:[#allocation148_spill] sm:$0xff] }
 0x477   : > { %17004 = vst [vmem:[#allocation80_spill] sm:$0xff] %v15521_v3  ;;  %17007 = vst [vmem:[#allocation83_spill] sm:$0xff] %v15528_v40  ;;  %v15533_v24 = vsel %vm978_vm5, %v17009_v28, %v17008_v31  ;;  %v15542_v18 = vsel %vm1073_vm6, %v17013_v30, %v17012_v1  ;;  %v5655_v15 = vsub.f32 %v16872_v12, %v15320_v34  ;;  %v17015_v43 = vld [vmem:[#allocation149_spill] sm:$0xff]  ;;  %v15555_v19 = vpop.eup %11578  ;;  %v17019_v1 = vld [vmem:[#allocation154_spill] sm:$0xff]  ;;  %11588 = vpow2.f32 %v5575_v58 }
 0x478   : > { %17010 = vst [vmem:[#allocation84_spill] sm:$0xff] %v15533_v24  ;;  %17011 = vst [vmem:[#allocation85_spill] sm:$0xff] %v15537_v37  ;;  %v17016_v40 = vld [vmem:[#allocation153_spill] sm:$0xff]  ;;  %v4609_v53 = vmax.f32 %v4515_v45, %v15188_v38  ;;  %v5415_v33 = vadd.f32 %v15537_v37, %v5389_v0  ;;  %v5678_v28 = vsub.f32 %v16874_v9, %v15320_v34  ;;  %v17020_v4 = vld [vmem:[#allocation44_spill] sm:$0xff]  ;;  %v5627_v12 = vmul.f32 1.442695, %v5625_v46 }
 0x479   : > { %17014 = vst [vmem:[#allocation86_spill] sm:$0xff] %v15542_v18  ;;  %v15549_v31 = vsel %vm1073_vm6, %v17016_v40, %v17015_v43  ;;  %17018 = vst [vmem:[#allocation88_spill] sm:$0xff] %v15555_v19  ;;  %v15560_v62 = vsel %vm1168_vm7, %v17020_v4, %v17019_v1  ;;  %v5711_v40 = vsub.f32 %v16875_v57, %v15320_v34  ;;  %v17022_v30 = vld [vmem:[#allocation49_spill] sm:$0xff]  ;;  %v17023_v43 = vld [vmem:[#allocation156_spill] sm:$0xff]  ;;  %11590 = vpow2.f32 %v5601_v39 }
 0x47a   : > { %17017 = vst [vmem:[#allocation87_spill] sm:$0xff] %v15549_v31  ;;  %17021 = vst [vmem:[#allocation89_spill] sm:$0xff] %v15560_v62  ;;  %v15567_v45 = vsel %vm1168_vm7, %v17023_v43, %v17022_v30  ;;  %v4708_v0 = vmax.f32 %v4609_v53, %v15194_v49  ;;  %v5441_v9 = vadd.f32 %v15555_v19, %v5415_v33  ;;  %v17025_v18 = vld [vmem:[#allocation64_spill] sm:$0xff]  ;;  %v15573_v31 = vpop.eup %11580  ;;  %v5657_v58 = vmul.f32 1.442695, %v5655_v15  ;;  %v17027_v46 = vld [vmem:[#allocation67_spill] sm:$0xff] }
 0x47b   : > { %17024 = vst [vmem:[#allocation90_spill] sm:$0xff] %v15567_v45  ;;  %v5737_v38 = vsub.f32 %v17025_v18, %v15320_v34  ;;  %17026 = vst [vmem:[#allocation92_spill] sm:$0xff] %v15573_v31  ;;  %v5763_v1 = vsub.f32 %v17027_v46, %v15320_v34  ;;  %v17028_v57 = vld [vmem:[#allocation77_spill] sm:$0xff]  ;;  %v5680_v53 = vmul.f32 1.442695, %v5678_v28  ;;  %v17030_v33 = vld [vmem:[#allocation82_spill] sm:$0xff]  ;;  %v15583_v45 = vpop.eup %11582  ;;  %11592 = vpow2.f32 %v5627_v12 }
 0x47c   : > { %v5789_v4 = vsub.f32 %v17028_v57, %v15320_v34  ;;  %v17029_v62 = vld [vmem:[#allocation9_spill] sm:$0xff]  ;;  %v5471_v43 = vadd.f32 %v15573_v31, %v5441_v9  ;;  %v5815_v49 = vsub.f32 %v17030_v33, %v15320_v34  ;;  %v17032_v19 = vld [vmem:[#allocation158_spill] sm:$0xff]  ;;  %v17035_v46 = vld [vmem:[#allocation159_spill] sm:$0xff]  ;;  %v15599_v37 = vpop.eup %11584  ;;  %11594 = vpow2.f32 %v5657_v58 }
 0x47d   : > { %v4810_v30 = vmax.f32 %v4708_v0, %v17029_v62  ;;  %v17031_v18 = vld [vmem:[#allocation157_spill] sm:$0xff]  ;;  %v5713_v0 = vmul.f32 1.442695, %v5711_v40  ;;  %v17036_v57 = vld [vmem:[#allocation11_spill] sm:$0xff]  ;;  %v5739_v62 = vmul.f32 1.442695, %v5737_v38  ;;  %11596 = vpow2.f32 %v5680_v53 }
 0x47e   : > { %v15588_v39 = vsel %vm693_vm2, %v17032_v19, %v17031_v18  ;;  %v17034_v15 = vld [vmem:[#allocation25_spill] sm:$0xff]  ;;  %v5494_v28 = vadd.f32 %v15583_v45, %v5471_v43  ;;  %v17037_v33 = vld [vmem:[#allocation98_spill] sm:$0xff]  ;;  %v5765_v19 = vmul.f32 1.442695, %v5763_v1  ;;  %v5791_v18 = vmul.f32 1.442695, %v5789_v4 }
 0x47f   : > { %17033 = vst [vmem:[#allocation93_spill] sm:$0xff] %v15588_v39  ;;  %v15593_v24 = vsel %vm693_vm2, %v17035_v46, %v17034_v15  ;;  %v4904_v9 = vmax.f32 %v4810_v30, %v17036_v57  ;;  %v5845_v31 = vsub.f32 %v17037_v33, %v15320_v34  ;;  %v17038_v39 = vld [vmem:[#allocation103_spill] sm:$0xff]  ;;  %v5817_v12 = vmul.f32 1.442695, %v5815_v49  ;;  %v15606_v30 = vpop.eup %11586  ;;  %v17039_v38 = vld [vmem:[#allocation121_spill] sm:$0xff]  ;;  %v17040_v49 = vld [vmem:[#allocation136_spill] sm:$0xff] }
 0x480   : > { %v5868_v3 = vsub.f32 %v17038_v39, %v15320_v34  ;;  %v5527_v15 = vadd.f32 %v15599_v37, %v5494_v28  ;;  %v5901_v40 = vsub.f32 %v14013_v54, %v15320_v34  ;;  %11598 = vpow2.f32 %v5713_v0  ;;  %v17041_v46 = vld [vmem:[#allocation13_spill] sm:$0xff]  ;;  %v17042_v33 = vld [vmem:[#allocation139_spill] sm:$0xff] }
 0x481   : > { %v5927_v43 = vsub.f32 %v17039_v38, %v15320_v34  ;;  %11600 = vpow2.f32 %v5739_v62  ;;  %v5847_v53 = vmul.f32 1.442695, %v5845_v31  ;;  %v5953_v39 = vsub.f32 %v17040_v49, %v15320_v34  ;;  %v15617_v54 = vpop.eup %11588 }
 0x482   : > { %v5553_v4 = vadd.f32 %v15606_v30, %v5527_v15  ;;  %v4998_v0 = vmax.f32 %v4904_v9, %v17041_v46  ;;  %11602 = vpow2.f32 %v5765_v19  ;;  %v5870_v28 = vmul.f32 1.442695, %v5868_v3  ;;  %v17043_v15 = vld [vmem:[#allocation152_spill] sm:$0xff]  ;;  %v17045_v9 = vld [vmem:[#allocation46_spill] sm:$0xff] }
 0x483   : > { %v5979_v38 = vsub.f32 %v17042_v33, %v15320_v34  ;;  %11604 = vpow2.f32 %v5791_v18  ;;  %v5903_v1 = vmul.f32 1.442695, %v5901_v40  ;;  %v6005_v62 = vsub.f32 %v17043_v15, %v15320_v34  ;;  %v15625_v31 = vpop.eup %11590 }
 0x484   : > { %v5579_v58 = vadd.f32 %v15617_v54, %v5553_v4  ;;  %17044 = vst [vmem:[#allocation95_spill] sm:$0xff] %v15625_v31  ;;  %v5092_v49 = vmax.f32 %v4998_v0, %v15260_v11  ;;  %11606 = vpow2.f32 %v5817_v12  ;;  %v5929_v57 = vmul.f32 1.442695, %v5927_v43  ;;  %v17046_v4 = vld [vmem:[#allocation167_spill] sm:$0xff]  ;;  %v17048_v0 = vld [vmem:[#allocation50_spill] sm:$0xff] }
 0x485   : > { %v6035_v19 = vsub.f32 %v17045_v9, %v15320_v34  ;;  %11608 = vpow2.f32 %v5847_v53  ;;  %v5955_v33 = vmul.f32 1.442695, %v5953_v39  ;;  %v6058_v18 = vsub.f32 %v17046_v4, %v15320_v34  ;;  %v15633_v40 = vpop.eup %11592 }
 0x486   : > { %v5605_v3 = vadd.f32 %v15625_v31, %v5579_v58  ;;  %17047 = vst [vmem:[#allocation96_spill] sm:$0xff] %v15633_v40  ;;  %v5186_v15 = vmax.f32 %v5092_v49, %v15299_v52  ;;  %11610 = vpow2.f32 %v5870_v28  ;;  %v5981_v46 = vmul.f32 1.442695, %v5979_v38  ;;  %v17049_v58 = vld [vmem:[#allocation179_spill] sm:$0xff]  ;;  %v15641_v39 = vpop.eup %11594  ;;  %v17058_v52 = vld [vmem:[#allocation169_spill] sm:$0xff] }
 0x487   : > { %v6091_v12 = vsub.f32 %v17048_v0, %v15320_v34  ;;  %11612 = vpow2.f32 %v5903_v1  ;;  %v6007_v9 = vmul.f32 1.442695, %v6005_v62  ;;  %v6117_v53 = vsub.f32 %v17049_v58, %v15320_v34  ;;  %17050 = vst [vmem:[#allocation99_spill] sm:$0xff] %v15641_v39  ;;  %v15648_v38 = vpop.eup %11596  ;;  %v17053_v0 = vld [vmem:[#allocation162_spill] sm:$0xff]  ;;  %v17054_v58 = vld [vmem:[#allocation163_spill] sm:$0xff] }
 0x488   : > { %v5631_v43 = vadd.f32 %v15633_v40, %v5605_v3  ;;  %v15644_v4 = vmax.f32 %v5186_v15, %v15311_v32  ;;  %11614 = vpow2.f32 %v5929_v57  ;;  %v6037_v11 = vmul.f32 1.442695, %v6035_v19  ;;  %17051 = vst [vmem:[#allocation100_spill] sm:$0xff] %v15648_v38  ;;  %v17057_v32 = vld [vmem:[#allocation168_spill] sm:$0xff] }
 0x489   : > { %v6143_v28 = vsub.f32 %v16900_v22, %v15320_v34  ;;  %11616 = vpow2.f32 %v5955_v33  ;;  %v6060_v1 = vmul.f32 1.442695, %v6058_v18  ;;  %v6169_v62 = vsub.f32 %v14833_v26, %v15320_v34  ;;  %v17065_v40 = vld [vmem:[#allocation172_spill] sm:$0xff] }
 0x48a   : > { %v5661_v49 = vadd.f32 %v15641_v39, %v5631_v43  ;;  %v15653_v3 = vpop.eup %11598  ;;  %v15658_v15 = vsel %vm788_vm3, %v17054_v58, %v17053_v0  ;;  %11618 = vpow2.f32 %v5981_v46  ;;  %v6093_v57 = vmul.f32 1.442695, %v6091_v12  ;;  %v17064_v39 = vld [vmem:[#allocation171_spill] sm:$0xff] }
 0x48b   : > { %17052 = vst [vmem:[#allocation101_spill] sm:$0xff] %v15653_v3  ;;  %v6195_v22 = vsub.f32 %v14877_v56, %v15320_v34  ;;  %v15662_v19 = vpop.eup %11600  ;;  %11620 = vpow2.f32 %v6007_v9  ;;  %v6119_v18 = vmul.f32 1.442695, %v6117_v53  ;;  %v6225_v26 = vsub.f32 %v14989_v17, %v15320_v34  ;;  %v17060_v56 = vld [vmem:[#allocation6_spill] sm:$0xff]  ;;  %v17062_v17 = vld [vmem:[#allocation8_spill] sm:$0xff] }
 0x48c   : > { %17055 = vst [vmem:[#allocation104_spill] sm:$0xff] %v15662_v19  ;;  %v5684_v33 = vadd.f32 %v15648_v38, %v5661_v49  ;;  %v15667_v43 = vpop.eup %11602  ;;  %v15672_v0 = vsel %vm883_vm4, %v17058_v52, %v17057_v32  ;;  %11622 = vpow2.f32 %v6037_v11  ;;  %v6145_v46 = vmul.f32 1.442695, %v6143_v28  ;;  %v17067_v32 = vld [vmem:[#allocation10_spill] sm:$0xff] }
 0x48d   : > { %17056 = vst [vmem:[#allocation105_spill] sm:$0xff] %v15667_v43  ;;  %17059 = vst [vmem:[#allocation106_spill] sm:$0xff] %v15672_v0  ;;  %v5288_v12 = vsub.f32 %v17060_v56, %v15644_v4  ;;  %v15676_v58 = vpop.eup %11604  ;;  %11624 = vpow2.f32 %v6060_v1  ;;  %v6171_v53 = vmul.f32 1.442695, %v6169_v62  ;;  %v5302_v49 = vsub.f32 %v17062_v17, %v15644_v4 }
 0x48e   : > { %17061 = vst [vmem:[#allocation107_spill] sm:$0xff] %v15676_v58  ;;  %v5717_v9 = vadd.f32 %v15653_v3, %v5684_v33  ;;  %v15681_v38 = vpop.eup %11606  ;;  %v15686_v52 = vsel %vm978_vm5, %v17065_v40, %v17064_v39  ;;  %11626 = vpow2.f32 %v6093_v57  ;;  %v6197_v11 = vmul.f32 1.442695, %v6195_v22  ;;  %v17069_v33 = vld [vmem:[#allocation12_spill] sm:$0xff] }
 0x48f   : > { %17063 = vst [vmem:[#allocation108_spill] sm:$0xff] %v15681_v38  ;;  %17066 = vst [vmem:[#allocation109_spill] sm:$0xff] %v15686_v52  ;;  %v5332_v28 = vsub.f32 %v17067_v32, %v15644_v4  ;;  %v15690_v56 = vpop.eup %11608  ;;  %11628 = vpow2.f32 %v6119_v18  ;;  %v6227_v62 = vmul.f32 1.442695, %v6225_v26  ;;  %v5358_v17 = vsub.f32 %v17069_v33, %v15644_v4  ;;  %v17072_v26 = vld [vmem:[#allocation14_spill] sm:$0xff] }
 0x490   : > { %17068 = vst [vmem:[#allocation110_spill] sm:$0xff] %v15690_v56  ;;  %v5743_v1 = vadd.f32 %v15662_v19, %v5717_v9  ;;  %v15695_v3 = vpop.eup %11610  ;;  %11630 = vpow2.f32 %v6145_v46  ;;  %v6248_v40 = vsub.f32 %v15027_v27, %v15320_v34  ;;  %v6281_v39 = vsub.f32 %v15079_v63, %v15320_v34 }
 0x491   : > { %17070 = vst [vmem:[#allocation111_spill] sm:$0xff] %v15695_v3  ;;  %v5291_v57 = vmul.f32 1.442695, %v5288_v12  ;;  %v15701_v22 = vpop.eup %11612  ;;  %11632 = vpow2.f32 %v6171_v53  ;;  %v5305_v18 = vmul.f32 1.442695, %v5302_v49  ;;  %v5384_v9 = vsub.f32 %v17072_v26, %v15644_v4  ;;  %v17075_v49 = vld [vmem:[#allocation16_spill] sm:$0xff] }
 0x492   : > { %17071 = vst [vmem:[#allocation112_spill] sm:$0xff] %v15701_v22  ;;  %v5769_v32 = vadd.f32 %v15667_v43, %v5743_v1  ;;  %v15706_v33 = vpop.eup %11614  ;;  %11634 = vpow2.f32 %v6197_v11  ;;  %v6307_v46 = vsub.f32 %v15088_v50, %v15320_v34  ;;  %v6333_v27 = vsub.f32 %v15131_v23, %v15320_v34  ;;  %v17077_v43 = vld [vmem:[#allocation54_spill] sm:$0xff]  ;;  %v17078_v11 = vld [vmem:[#allocation173_spill] sm:$0xff] }
 0x493   : > { %17073 = vst [vmem:[#allocation113_spill] sm:$0xff] %v15706_v33  ;;  %v5335_v63 = vmul.f32 1.442695, %v5332_v28  ;;  %v15712_v12 = vpop.eup %11616  ;;  %11636 = vpow2.f32 %v6227_v62  ;;  %v5361_v53 = vmul.f32 1.442695, %v5358_v17  ;;  %v5410_v1 = vsub.f32 %v17075_v49, %v15644_v4 }
 0x494   : > { %17074 = vst [vmem:[#allocation114_spill] sm:$0xff] %v15712_v12  ;;  %v5795_v19 = vadd.f32 %v15676_v58, %v5769_v32  ;;  %v15717_v26 = vpop.eup %11618  ;;  %v15722_v52 = vsel %vm1073_vm6, %v17078_v11, %v17077_v43  ;;  %v6250_v50 = vmul.f32 1.442695, %v6248_v40  ;;  %v6359_v23 = vsub.f32 %v15144_v48, %v15320_v34  ;;  %v17081_v32 = vld [vmem:[#allocation18_spill] sm:$0xff]  ;;  %v17083_v11 = vld [vmem:[#allocation20_spill] sm:$0xff] }
 0x495   : > { %17076 = vst [vmem:[#allocation115_spill] sm:$0xff] %v15717_v26  ;;  %17079 = vst [vmem:[#allocation117_spill] sm:$0xff] %v15722_v52  ;;  %11638 = vpow2.f32 %v5291_v57  ;;  %v15726_v28 = vpop.eup %11620  ;;  %v5387_v17 = vmul.f32 1.442695, %v5384_v9  ;;  %v5436_v49 = vsub.f32 %v17081_v32, %v15644_v4  ;;  %v6283_v31 = vmul.f32 1.442695, %v6281_v39 }
 0x496   : > { %17080 = vst [vmem:[#allocation118_spill] sm:$0xff] %v15726_v28  ;;  %v5821_v62 = vadd.f32 %v15681_v38, %v5795_v19  ;;  %11640 = vpow2.f32 %v5305_v18  ;;  %v15731_v58 = vpop.eup %11622  ;;  %v6309_v0 = vmul.f32 1.442695, %v6307_v46  ;;  %v6335_v43 = vmul.f32 1.442695, %v6333_v27  ;;  %v11786_v52 = vld [vmem:[%s13203_s19 + $0x10] sm:$0xff] }
 0x497   : > { %17082 = vst [vmem:[#allocation119_spill] sm:$0xff] %v15731_v58  ;;  %11642 = vpow2.f32 %v5335_v63  ;;  %v15733_v40 = vpop.eup %11624  ;;  %v5413_v57 = vmul.f32 1.442695, %v5410_v1  ;;  %v5466_v19 = vsub.f32 %v17083_v11, %v15644_v4  ;;  %v6361_v9 = vmul.f32 1.442695, %v6359_v23 }
 0x498   : > { %v5851_v48 = vadd.f32 %v15690_v56, %v5821_v62  ;;  %11644 = vpow2.f32 %v5361_v53  ;;  %v15738_v18 = vpop.eup %11626  ;;  %v6385_v32 = vsub.f32 %v15191_v16, %v15320_v34  ;;  %v6415_v39 = vsub.f32 %v15197_v55, %v15320_v34  ;;  %v17084_v53 = vld [vmem:[#allocation22_spill] sm:$0xff] }
 0x499   : > { %11646 = vpow2.f32 %v6250_v50  ;;  %v15744_v46 = vpop.eup %11628  ;;  %v5439_v63 = vmul.f32 1.442695, %v5436_v49  ;;  %v5489_v1 = vsub.f32 %v17084_v53, %v15644_v4  ;;  %v17085_v50 = vld [vmem:[#allocation7_spill] sm:$0xff]  ;;  %v6471_v16 = vsub.f32 %v15225_v7, %v15320_v34 }
 0x49a   : > { %v5874_v27 = vadd.f32 %v15695_v3, %v5851_v48  ;;  %11648 = vpow2.f32 %v5387_v17  ;;  %v15749_v62 = vpop.eup %11630  ;;  %v6438_v23 = vsub.f32 %v17085_v50, %v15320_v34  ;;  %v6497_v55 = vsub.f32 %v15251_v42, %v15320_v34  ;;  %v17086_v48 = vld [vmem:[#allocation26_spill] sm:$0xff] }
 0x49b   : > { %11650 = vpow2.f32 %v6283_v31  ;;  %v15757_v11 = vpop.eup %11632  ;;  %v5469_v49 = vmul.f32 1.442695, %v5466_v19  ;;  %v5522_v53 = vsub.f32 %v17086_v48, %v15644_v4  ;;  %v6387_v31 = vmul.f32 1.442695, %v6385_v32  ;;  %v17089_v32 = vld [vmem:[#allocation30_spill] sm:$0xff] }
 0x49c   : > { %v5907_v17 = vadd.f32 %v15701_v22, %v5874_v27  ;;  %11652 = vpow2.f32 %v5413_v57  ;;  %v15762_v3 = vpop.eup %11634  ;;  %v6417_v50 = vmul.f32 1.442695, %v6415_v39  ;;  %v6523_v7 = vsub.f32 %v15265_v35, %v15320_v34  ;;  %v17088_v57 = vld [vmem:[#allocation28_spill] sm:$0xff] }
 0x49d   : > { %11654 = vpow2.f32 %v6309_v0  ;;  %v15766_v56 = vpop.eup %11636  ;;  %v5492_v27 = vmul.f32 1.442695, %v5489_v1  ;;  %v5548_v19 = vsub.f32 %v17088_v57, %v15644_v4  ;;  %v6440_v48 = vmul.f32 1.442695, %v6438_v23  ;;  %v17090_v23 = vld [vmem:[#allocation32_spill] sm:$0xff] }
 0x49e   : > { %17087 = vst [vmem:[#allocation122_spill] sm:$0xff] %v15766_v56  ;;  %v5933_v42 = vadd.f32 %v15706_v33, %v5907_v17  ;;  %11656 = vpow2.f32 %v5439_v63  ;;  %v6473_v0 = vmul.f32 1.442695, %v6471_v16  ;;  %v5574_v39 = vsub.f32 %v17089_v32, %v15644_v4 }
 0x49f   : > { %v15771_v22 = vpop.eup %11638  ;;  %11658 = vpow2.f32 %v6335_v43  ;;  %v5525_v63 = vmul.f32 1.442695, %v5522_v53  ;;  %v6499_v57 = vmul.f32 1.442695, %v6497_v55  ;;  %v5600_v16 = vsub.f32 %v17090_v23, %v15644_v4 }
 0x4a0   : > { %v15775_v38 = vpop.eup %11640  ;;  %v5959_v35 = vadd.f32 %v15712_v12, %v5933_v42  ;;  %v5296_v17 = vmul.f32 %v11786_v52, %v15771_v22  ;;  %11660 = vpow2.f32 %v5469_v49  ;;  %v6525_v42 = vmul.f32 1.442695, %v6523_v7  ;;  %v17092_v7 = vld [vmem:[#allocation34_spill] sm:$0xff] }
 0x4a1   : > { %v15780_v1 = vpop.eup %11642  ;;  %11662 = vpow2.f32 %v6361_v9  ;;  %v5326_v43 = vmul.f32 %v15775_v38, %v15345_v47  ;;  %v5551_v12 = vmul.f32 1.442695, %v5548_v19  ;;  %v17091_v9 = vsub.f32 %v15302_v60, %v15320_v34 }
 0x4a2   : > { %v15786_v32 = vpop.eup %11644  ;;  %v5985_v33 = vadd.f32 %v15717_v26, %v5959_v35  ;;  %11664 = vpow2.f32 %v5492_v27  ;;  %v5352_v47 = vmul.f32 %v15780_v1, %v15355_v2  ;;  %v5577_v35 = vmul.f32 1.442695, %v5574_v39  ;;  %v17094_v39 = vld [vmem:[#allocation47_spill] sm:$0xff] }
 0x4a3   : > { %v15789_v52 = vpop.eup %11646  ;;  %11666 = vpow2.f32 %v6387_v31  ;;  %v6551_v55 = vmul.f32 1.442695, %v17091_v9  ;;  %v5328_v49 = vadd.f32 %v5326_v43, %v5296_v17  ;;  %v5626_v27 = vsub.f32 %v17092_v7, %v15644_v4 }
 0x4a4   : > { %v15796_v53 = vpop.eup %11648  ;;  %v6011_v23 = vadd.f32 %v15726_v28, %v5985_v33  ;;  %11668 = vpow2.f32 %v5525_v63  ;;  %v5378_v60 = vmul.f32 %v15786_v32, %v15368_v59  ;;  %v5603_v17 = vmul.f32 1.442695, %v5600_v16  ;;  %v17093_v33 = vld [vmem:[#allocation36_spill] sm:$0xff] }
 0x4a5   : > { %v15801_v19 = vpop.eup %11650  ;;  %11670 = vpow2.f32 %v6417_v50  ;;  %v5354_v31 = vadd.f32 %v5352_v47, %v5328_v49  ;;  %v5656_v63 = vsub.f32 %v17093_v33, %v15644_v4  ;;  %v5679_v9 = vsub.f32 %v17094_v39, %v15644_v4  ;;  %v17096_v33 = vld [vmem:[#allocation52_spill] sm:$0xff] }
 0x4a6   : > { %v15805_v43 = vpop.eup %11652  ;;  %v6041_v2 = vadd.f32 %v15731_v58, %v6011_v23  ;;  %11672 = vpow2.f32 %v5551_v12  ;;  %v17095_v50 = vsub.f32 %v15316_v44, %v15320_v34  ;;  %v5404_v16 = vmul.f32 %v15796_v53, %v15378_v5  ;;  %v17097_v34 = vld [vmem:[#allocation63_spill] sm:$0xff] }
 0x4a7   : > { %v15812_v7 = vpop.eup %11654  ;;  %11674 = vpow2.f32 %v6440_v48  ;;  %v5380_v59 = vadd.f32 %v5378_v60, %v5354_v31  ;;  %v5629_v23 = vmul.f32 1.442695, %v5626_v27  ;;  %v5712_v39 = vsub.f32 %v17096_v33, %v15644_v4 }
 0x4a8   : > { %v6577_v49 = vmul.f32 1.442695, %v17095_v50  ;;  %v15819_v47 = vpop.eup %11656  ;;  %v6064_v12 = vadd.f32 %v15733_v40, %v6041_v2  ;;  %11676 = vpow2.f32 %v5577_v35  ;;  %v5430_v44 = vmul.f32 %v15805_v43, %v15391_v13 }
 0x4a9   : > { %v15824_v58 = vpop.eup %11658  ;;  %11678 = vpow2.f32 %v6473_v0  ;;  %v5406_v48 = vadd.f32 %v5404_v16, %v5380_v59  ;;  %v5738_v31 = vsub.f32 %v17097_v34, %v15644_v4  ;;  %v5659_v35 = vmul.f32 1.442695, %v5656_v63  ;;  %v17098_v59 = vld [vmem:[#allocation66_spill] sm:$0xff] }
 0x4aa   : > { %v15830_v5 = vpop.eup %11660  ;;  %v6097_v60 = vadd.f32 %v15738_v18, %v6064_v12  ;;  %11680 = vpow2.f32 %v5603_v17  ;;  %v5682_v27 = vmul.f32 1.442695, %v5679_v9  ;;  %v5456_v0 = vmul.f32 %v15819_v47, %v15401_v14  ;;  %v17100_v17 = vld [vmem:[#allocation76_spill] sm:$0xff]  ;;  %v17101_v12 = vld [vmem:[#allocation43_spill] sm:$0xff]  ;;  %v17102_v14 = vld [vmem:[#allocation81_spill] sm:$0xff] }
 0x4ab   : > { %v15833_v2 = vpop.eup %11662  ;;  %11682 = vpow2.f32 %v6499_v57  ;;  %v5432_v50 = vadd.f32 %v5430_v44, %v5406_v48  ;;  %v5764_v13 = vsub.f32 %v17098_v59, %v15644_v4  ;;  %v5715_v34 = vmul.f32 1.442695, %v5712_v39  ;;  %v17104_v39 = vld [vmem:[#allocation97_spill] sm:$0xff] }
 0x4ac   : > { %v15839_v16 = vpop.eup %11664  ;;  %v6123_v33 = vadd.f32 %v15744_v46, %v6097_v60  ;;  %11684 = vpow2.f32 %v5629_v23  ;;  %v5790_v63 = vsub.f32 %v17100_v17, %v15644_v4  ;;  %v5483_v48 = vmul.f32 %v15830_v5, %v17101_v12 }
 0x4ad   : > { %17099 = vst [vmem:[#allocation123_spill] sm:$0xff] %v15839_v16  ;;  %v15844_v9 = vpop.eup %11666  ;;  %11686 = vpow2.f32 %v6525_v42  ;;  %v5458_v57 = vadd.f32 %v5456_v0, %v5432_v50  ;;  %v5816_v44 = vsub.f32 %v17102_v14, %v15644_v4  ;;  %v5741_v23 = vmul.f32 1.442695, %v5738_v31 }
 0x4ae   : > { %v15850_v59 = vpop.eup %11668  ;;  %v6149_v28 = vadd.f32 %v15749_v62, %v6123_v33  ;;  %11688 = vpow2.f32 %v5659_v35  ;;  %v5846_v60 = vsub.f32 %v17104_v39, %v15644_v4  ;;  %v5516_v50 = vmul.f32 %v15839_v16, %v15414_v36  ;;  %v17107_v35 = vld [vmem:[#allocation102_spill] sm:$0xff] }
 0x4af   : > { %17103 = vst [vmem:[#allocation125_spill] sm:$0xff] %v15850_v59  ;;  %v15855_v17 = vpop.eup %11670  ;;  %11690 = vpow2.f32 %v6551_v55  ;;  %v5485_v42 = vadd.f32 %v5483_v48, %v5458_v57  ;;  %v5767_v0 = vmul.f32 1.442695, %v5764_v13  ;;  %v5793_v26 = vmul.f32 1.442695, %v5790_v63  ;;  %v17108_v48 = vld [vmem:[#allocation116_spill] sm:$0xff] }
 0x4b0   : > { %17105 = vst [vmem:[#allocation40_spill] sm:$0xff] %v15855_v17  ;;  %v15859_v12 = vpop.eup %11672  ;;  %v6175_v14 = vadd.f32 %v15757_v11, %v6149_v28  ;;  %11692 = vpow2.f32 %v5682_v27  ;;  %v5869_v31 = vsub.f32 %v17107_v35, %v15644_v4  ;;  %v5542_v55 = vmul.f32 %v15850_v59, %v15424_v41 }
 0x4b1   : > { %17106 = vst [vmem:[#allocation127_spill] sm:$0xff] %v15859_v12  ;;  %v15864_v33 = vpop.eup %11674  ;;  %v5518_v39 = vadd.f32 %v5516_v50, %v5485_v42  ;;  %v5819_v57 = vmul.f32 1.442695, %v5816_v44  ;;  %v5902_v36 = vsub.f32 %v17108_v48, %v15644_v4  ;;  %11694 = vpow2.f32 %v5715_v34  ;;  %v17111_v44 = vld [vmem:[#allocation135_spill] sm:$0xff] }
 0x4b2   : > { %v15870_v13 = vpop.eup %11676  ;;  %v6201_v16 = vadd.f32 %v15762_v3, %v6175_v14  ;;  %v5849_v28 = vmul.f32 1.442695, %v5846_v60  ;;  %v5928_v27 = vsub.f32 %v16916_v25, %v15644_v4  ;;  %11696 = vpow2.f32 %v6577_v49  ;;  %v17113_v60 = vld [vmem:[#allocation39_spill] sm:$0xff] }
 0x4b3   : > { %17109 = vst [vmem:[#allocation128_spill] sm:$0xff] %v15870_v13  ;;  %v15875_v63 = vpop.eup %11678  ;;  %v5544_v42 = vadd.f32 %v5542_v55, %v5518_v39  ;;  %v5568_v41 = vmul.f32 %v15859_v12, %v15439_v51  ;;  %v5954_v50 = vsub.f32 %v17111_v44, %v15644_v4  ;;  %11698 = vpow2.f32 %v5741_v23  ;;  %v17115_v23 = vld [vmem:[#allocation151_spill] sm:$0xff]  ;;  %v17140_v12 = vld [vmem:[#allocation48_spill] sm:$0xff] }
 0x4b4   : > { %17110 = vst [vmem:[#allocation129_spill] sm:$0xff] %v15875_v63  ;;  %v15881_v35 = vpop.eup %11680  ;;  %v6231_v48 = vadd.f32 %v15766_v56, %v6201_v16  ;;  %v5872_v34 = vmul.f32 1.442695, %v5869_v31  ;;  %v5980_v14 = vsub.f32 %v17113_v60, %v15644_v4  ;;  %v5594_v49 = vmul.f32 %v15870_v13, %v15449_v8  ;;  %v17119_v56 = vld [vmem:[#allocation73_spill] sm:$0xff]  ;;  %v17125_v13 = vld [vmem:[#allocation31_spill] sm:$0xff] }
 0x4b5   : > { %17112 = vst [vmem:[#allocation130_spill] sm:$0xff] %v15881_v35  ;;  %v15886_v25 = vpop.eup %11682  ;;  %v5570_v59 = vadd.f32 %v5568_v41, %v5544_v42  ;;  %11700 = vpow2.f32 %v5767_v0  ;;  %v5905_v51 = vmul.f32 1.442695, %v5902_v36  ;;  %v5931_v16 = vmul.f32 1.442695, %v5928_v27 }
 0x4b6   : > { %v15890_v39 = vpop.eup %11684  ;;  %v6254_v55 = vadd.f32 %v15789_v52, %v6231_v48  ;;  %11702 = vpow2.f32 %v5793_v26  ;;  %v6006_v31 = vsub.f32 %v17115_v23, %v15644_v4  ;;  %v5620_v42 = vmul.f32 %v15881_v35, %v15464_v29  ;;  %v11787_v48 = vld [vmem:[%s13203_s19] sm:$0xff]  ;;  %s16241_s19 = sld [smem:[#allocation3 + $0x12]] }
 0x4b7   : > { %17114 = vst [vmem:[#allocation131_spill] sm:$0xff] %v15890_v39  ;;  %v15895_v44 = vpop.eup %11686  ;;  %v5596_v60 = vadd.f32 %v5594_v49, %v5570_v59  ;;  %11704 = vpow2.f32 %v5819_v57  ;;  %v5957_v8 = vmul.f32 1.442695, %v5954_v50  ;;  %v5983_v41 = vmul.f32 1.442695, %v5980_v14  ;;  %v17120_v49 = vld [vmem:[#allocation29_spill] sm:$0xff] }
 0x4b8   : > { %17116 = vst [vmem:[#allocation132_spill] sm:$0xff] %v15895_v44  ;;  %v15899_v0 = vpop.eup %11688  ;;  %v6287_v36 = vadd.f32 %v15801_v19, %v6254_v55  ;;  %11706 = vpow2.f32 %v5849_v28  ;;  %v5295_v26 = vmul.f32 %v11787_v48, %v15434_v21  ;;  %v5646_v59 = vmul.f32 %v15890_v39, %v17119_v56  ;;  %v17121_v29 = vld [vmem:[#allocation70_spill] sm:$0xff]  ;;  %v17123_v14 = vld [vmem:[#allocation45_spill] sm:$0xff]  ;;  %v17124_v48 = vld [vmem:[#allocation68_spill] sm:$0xff] }
 0x4b9   : > { %17117 = vst [vmem:[#allocation133_spill] sm:$0xff] %v15899_v0  ;;  %v15904_v27 = vpop.eup %11690  ;;  %v5622_v23 = vadd.f32 %v5620_v42, %v5596_v60  ;;  %11708 = vpow2.f32 %v5872_v34  ;;  %v5325_v57 = vmul.f32 %v17121_v29, %v17120_v49  ;;  %v6009_v28 = vmul.f32 1.442695, %v6006_v31  ;;  %v17128_v31 = vld [vmem:[#allocation56_spill] sm:$0xff] }
 0x4ba   : > { %17118 = vst [vmem:[#allocation134_spill] sm:$0xff] %v15904_v27  ;;  %v15910_v50 = vpop.eup %11692  ;;  %v6313_v35 = vadd.f32 %v15812_v7, %v6287_v36  ;;  %11710 = vpow2.f32 %v5905_v51  ;;  %v6036_v55 = vsub.f32 %v17123_v14, %v15644_v4  ;;  %v5673_v60 = vmul.f32 %v15899_v0, %v17124_v48  ;;  %v17127_v36 = vld [vmem:[#allocation166_spill] sm:$0xff]  ;;  %v17139_v39 = vld [vmem:[#allocation84_spill] sm:$0xff] }
 0x4bb   : > { %17122 = vst [vmem:[#allocation137_spill] sm:$0xff] %v15910_v50  ;;  %v5648_v21 = vadd.f32 %v5646_v59, %v5622_v23  ;;  %v5327_v42 = vadd.f32 %v5325_v57, %v5295_v26  ;;  %v5351_v56 = vmul.f32 %v15474_v20, %v17125_v13  ;;  %v15919_v34 = vpop.eup %11694  ;;  %11712 = vpow2.f32 %v5931_v16  ;;  %v17130_v57 = vld [vmem:[#allocation33_spill] sm:$0xff]  ;;  %v17131_v48 = vld [vmem:[#allocation178_spill] sm:$0xff] }
 0x4bc   : > { %17126 = vst [vmem:[#allocation138_spill] sm:$0xff] %v15919_v34  ;;  %v6339_v49 = vadd.f32 %v15824_v58, %v6313_v35  ;;  %v6059_v51 = vsub.f32 %v17127_v36, %v15644_v4  ;;  %v6092_v29 = vsub.f32 %v17128_v31, %v15644_v4  ;;  %v15926_v14 = vpop.eup %11696  ;;  %v5706_v26 = vmul.f32 %v15910_v50, %v15491_v10 }
 0x4bd   : > { %17129 = vst [vmem:[#allocation38_spill] sm:$0xff] %v15926_v14  ;;  %v5675_v23 = vadd.f32 %v5673_v60, %v5648_v21  ;;  %v5353_v59 = vadd.f32 %v5351_v56, %v5327_v42  ;;  %v5377_v20 = vmul.f32 %v15495_v6, %v17130_v57  ;;  %v15932_v13 = vpop.eup %11698  ;;  %11714 = vpow2.f32 %v5957_v8  ;;  %v17132_v21 = vld [vmem:[#allocation78_spill] sm:$0xff]  ;;  %v17133_v42 = vld [vmem:[#allocation35_spill] sm:$0xff] }
 0x4be   : > { %v6365_v35 = vadd.f32 %v15833_v2, %v6339_v49  ;;  %v6039_v16 = vmul.f32 1.442695, %v6036_v55  ;;  %v6118_v36 = vsub.f32 %v17131_v48, %v15644_v4  ;;  %v5732_v60 = vmul.f32 %v15919_v34, %v17132_v21  ;;  %v17135_v55 = vld [vmem:[#allocation58_spill] sm:$0xff] }
 0x4bf   : > { %v15937_v31 = vpop.eup %11700  ;;  %v5708_v0 = vadd.f32 %v5706_v26, %v5675_v23  ;;  %v5379_v10 = vadd.f32 %v5377_v20, %v5353_v59  ;;  %v5403_v56 = vmul.f32 %v15516_v61, %v17133_v42  ;;  %11716 = vpow2.f32 %v5983_v41  ;;  %v17136_v23 = vld [vmem:[#allocation80_spill] sm:$0xff]  ;;  %v17137_v59 = vld [vmem:[#allocation37_spill] sm:$0xff] }
 0x4c0   : > { %v15943_v6 = vpop.eup %11702  ;;  %v6391_v57 = vadd.f32 %v15844_v9, %v6365_v35  ;;  %v6062_v8 = vmul.f32 1.442695, %v6059_v51  ;;  %v6144_v49 = vsub.f32 %v17135_v55, %v15644_v4  ;;  %v5758_v26 = vmul.f32 %v15932_v13, %v17136_v23  ;;  %v17138_v20 = vld [vmem:[#allocation85_spill] sm:$0xff]  ;;  %v17141_v23 = vld [vmem:[#allocation88_spill] sm:$0xff] }
 0x4c1   : > { %17134 = vst [vmem:[#allocation140_spill] sm:$0xff] %v15943_v6  ;;  %v15948_v48 = vpop.eup %11704  ;;  %v5734_v50 = vadd.f32 %v5732_v60, %v5708_v0  ;;  %v5405_v21 = vadd.f32 %v5403_v56, %v5379_v10  ;;  %v5429_v34 = vmul.f32 %v17138_v20, %v17137_v59  ;;  %11718 = vpow2.f32 %v6009_v28  ;;  %v17142_v28 = vld [vmem:[#allocation186_spill] sm:$0xff] }
 0x4c2   : > { %v15954_v61 = vpop.eup %11706  ;;  %v6421_v42 = vadd.f32 %v15855_v17, %v6391_v57  ;;  %v6095_v41 = vmul.f32 1.442695, %v6092_v29  ;;  %v6121_v51 = vmul.f32 1.442695, %v6118_v36  ;;  %v5784_v0 = vmul.f32 %v15937_v31, %v17139_v39  ;;  %v17143_v57 = vld [vmem:[#allocation87_spill] sm:$0xff]  ;;  %v17144_v17 = vld [vmem:[#allocation41_spill] sm:$0xff] }
 0x4c3   : > { %v15957_v35 = vpop.eup %11708  ;;  %v5760_v55 = vadd.f32 %v5758_v26, %v5734_v50  ;;  %v5431_v60 = vadd.f32 %v5429_v34, %v5405_v21  ;;  %v5455_v10 = vmul.f32 %v17141_v23, %v17140_v12  ;;  %11720 = vpow2.f32 %v6039_v16  ;;  %v17145_v39 = vld [vmem:[#allocation92_spill] sm:$0xff] }
 0x4c4   : > { %v15963_v56 = vpop.eup %11710  ;;  %v6444_v59 = vadd.f32 %v15864_v33, %v6421_v42  ;;  %v6147_v20 = vmul.f32 1.442695, %v6144_v49  ;;  %v6170_v29 = vsub.f32 %v17142_v28, %v15644_v4  ;;  %v5810_v50 = vmul.f32 %v15943_v6, %v17143_v57  ;;  %v17146_v42 = vld [vmem:[#allocation188_spill] sm:$0xff]  ;;  %v17147_v49 = vld [vmem:[#allocation195_spill] sm:$0xff]  ;;  %v17151_v6 = vld [vmem:[#allocation94_spill] sm:$0xff] }
 0x4c5   : > { %v5786_v36 = vadd.f32 %v5784_v0, %v5760_v55  ;;  %v5457_v26 = vadd.f32 %v5455_v10, %v5431_v60  ;;  %v5482_v34 = vmul.f32 %v17145_v39, %v17144_v17  ;;  %v15972_v21 = vpop.eup %11712  ;;  %11722 = vpow2.f32 %v6062_v8  ;;  %v17148_v55 = vld [vmem:[#allocation90_spill] sm:$0xff]  ;;  %v17149_v60 = vld [vmem:[#allocation53_spill] sm:$0xff] }
 0x4c6   : > { %v6477_v12 = vadd.f32 %v15875_v63, %v6444_v59  ;;  %v6196_v16 = vsub.f32 %v17146_v42, %v15644_v4  ;;  %v6226_v23 = vsub.f32 %v17147_v49, %v15644_v4  ;;  %v5836_v0 = vmul.f32 %v15948_v48, %v17148_v55  ;;  %v17150_v59 = vld [vmem:[#allocation198_spill] sm:$0xff]  ;;  %v17152_v49 = vld [vmem:[#allocation181_spill] sm:$0xff] }
 0x4c7   : > { %v5812_v28 = vadd.f32 %v5810_v50, %v5786_v36  ;;  %v5484_v57 = vadd.f32 %v5482_v34, %v5457_v26  ;;  %v5515_v10 = vmul.f32 %v15583_v45, %v17149_v60  ;;  %v15983_v17 = vpop.eup %11714  ;;  %11724 = vpow2.f32 %v6095_v41  ;;  %v17153_v41 = vld [vmem:[#allocation205_spill] sm:$0xff]  ;;  %v17154_v60 = vld [vmem:[#allocation120_spill] sm:$0xff] }
 0x4c8   : > { %v6503_v39 = vadd.f32 %v15886_v25, %v6477_v12  ;;  %v6173_v8 = vmul.f32 1.442695, %v6170_v29  ;;  %v6249_v42 = vsub.f32 %v17150_v59, %v15644_v4  ;;  %v5863_v36 = vmul.f32 %v15954_v61, %v17151_v6 }
 0x4c9   : > { %v5838_v63 = vadd.f32 %v5836_v0, %v5812_v28  ;;  %v5517_v50 = vadd.f32 %v5515_v10, %v5484_v57  ;;  %v5541_v26 = vmul.f32 %v15599_v37, %v17152_v49  ;;  %v15992_v34 = vpop.eup %11716  ;;  %11726 = vpow2.f32 %v6121_v51  ;;  %v17158_v49 = vld [vmem:[#allocation207_spill] sm:$0xff] }
 0x4ca   : > { %v6529_v45 = vadd.f32 %v15895_v44, %v6503_v39  ;;  %v6199_v55 = vmul.f32 1.442695, %v6196_v16  ;;  %v6282_v29 = vsub.f32 %v17153_v41, %v15644_v4  ;;  %v5896_v28 = vmul.f32 %v15957_v35, %v15593_v24  ;;  %v17161_v41 = vld [vmem:[#allocation95_spill] sm:$0xff] }
 0x4cb   : > { %v5865_v12 = vadd.f32 %v5863_v36, %v5838_v63  ;;  %v5543_v0 = vadd.f32 %v5541_v26, %v5517_v50  ;;  %v5567_v6 = vmul.f32 %v15606_v30, %v17154_v60  ;;  %v16001_v57 = vpop.eup %11718  ;;  %11728 = vpow2.f32 %v6147_v20  ;;  %v17156_v63 = vld [vmem:[#allocation69_spill] sm:$0xff] }
 0x4cc   : > { %17155 = vst [vmem:[#allocation141_spill] sm:$0xff] %v16001_v57  ;;  %v6555_v37 = vadd.f32 %v15904_v27, %v6529_v45  ;;  %v6229_v10 = vmul.f32 1.442695, %v6226_v23  ;;  %v6252_v39 = vmul.f32 1.442695, %v6249_v42  ;;  %v5922_v16 = vmul.f32 %v15963_v56, %v15658_v15  ;;  %v17159_v42 = vld [vmem:[#allocation106_spill] sm:$0xff] }
 0x4cd   : > { %v5898_v51 = vadd.f32 %v5896_v28, %v5865_v12  ;;  %v5569_v59 = vadd.f32 %v5567_v6, %v5543_v0  ;;  %v5593_v36 = vmul.f32 %v15617_v54, %v17156_v63  ;;  %v16008_v24 = vpop.eup %11720  ;;  %11730 = vpow2.f32 %v6173_v8  ;;  %v17160_v15 = vld [vmem:[#allocation71_spill] sm:$0xff]  ;;  %v17163_v54 = vld [vmem:[#allocation109_spill] sm:$0xff]  ;;  %v17167_v63 = vld [vmem:[#allocation96_spill] sm:$0xff] }
 0x4ce   : > { %17157 = vst [vmem:[#allocation42_spill] sm:$0xff] %v16008_v24  ;;  %v16011_v50 = vadd.f32 %v15926_v14, %v6555_v37  ;;  %v6285_v30 = vmul.f32 1.442695, %v6282_v29  ;;  %v6308_v20 = vsub.f32 %v17158_v49, %v15644_v4  ;;  %v5948_v26 = vmul.f32 %v15972_v21, %v17159_v42  ;;  %v17164_v60 = vld [vmem:[#allocation117_spill] sm:$0xff]  ;;  %v17169_v49 = vld [vmem:[#allocation99_spill] sm:$0xff]  ;;  %v17171_v14 = vld [vmem:[#allocation182_spill] sm:$0xff] }
 0x4cf   : > { %v5924_v23 = vadd.f32 %v5922_v16, %v5898_v51  ;;  %v5595_v45 = vadd.f32 %v5593_v36, %v5569_v59  ;;  %v5619_v12 = vmul.f32 %v17161_v41, %v17160_v15  ;;  %v16019_v28 = vpop.eup %11722  ;;  %v5974_v0 = vmul.f32 %v15983_v17, %v17163_v54  ;;  %v17165_v29 = vld [vmem:[#allocation177_spill] sm:$0xff]  ;;  %v17166_v16 = vld [vmem:[#allocation72_spill] sm:$0xff] }
 0x4d0   : > { %17162 = vst [vmem:[#allocation142_spill] sm:$0xff] %v16019_v28  ;;  %v6000_v8 = vmul.f32 %v15992_v34, %v17164_v60  ;;  %v6026_v6 = vmul.f32 %v16001_v57, %v17165_v29  ;;  %11732 = vpow2.f32 %v6199_v55  ;;  %v5645_v59 = vmul.f32 %v17167_v63, %v17166_v16  ;;  %v17168_v36 = vld [vmem:[#allocation65_spill] sm:$0xff]  ;;  %v17170_v41 = vld [vmem:[#allocation180_spill] sm:$0xff]  ;;  %v17172_v29 = vld [vmem:[#allocation62_spill] sm:$0xff] }
 0x4d1   : > { %v5950_v37 = vadd.f32 %v5948_v26, %v5924_v23  ;;  %v5621_v51 = vadd.f32 %v5619_v12, %v5595_v45  ;;  %v5672_v42 = vmul.f32 %v17169_v49, %v17168_v36  ;;  %v16031_v15 = vpop.eup %11724  ;;  %v16035_v54 = vmul.f32 %v15733_v40, %v17170_v41  ;;  %v17173_v23 = vld [vmem:[#allocation184_spill] sm:$0xff]  ;;  %v17174_v16 = vld [vmem:[#allocation187_spill] sm:$0xff]  ;;  %v17175_v40 = vld [vmem:[#allocation190_spill] sm:$0xff] }
 0x4d2   : > { %v16039_v60 = vmul.f32 %v15738_v18, %v17171_v14  ;;  %v16043_v55 = vmul.f32 %v15744_v46, %v17172_v29  ;;  %v16047_v26 = vmul.f32 %v15749_v62, %v17173_v23  ;;  %v16051_v63 = vmul.f32 %v15757_v11, %v17174_v16  ;;  %v17176_v14 = vld [vmem:[#allocation74_spill] sm:$0xff]  ;;  %v17177_v49 = vld [vmem:[#allocation100_spill] sm:$0xff] }
 0x4d3   : > { %v5976_v45 = vadd.f32 %v5974_v0, %v5950_v37  ;;  %v5647_v12 = vadd.f32 %v5645_v59, %v5621_v51  ;;  %v16055_v36 = vmul.f32 %v15762_v3, %v17175_v40  ;;  %v16057_v18 = vpop.eup %11726  ;;  %v5705_v46 = vmul.f32 %v17177_v49, %v17176_v14  ;;  %v17178_v41 = vld [vmem:[#allocation192_spill] sm:$0xff]  ;;  %v17179_v62 = vld [vmem:[#allocation194_spill] sm:$0xff]  ;;  %v17180_v37 = vld [vmem:[#allocation197_spill] sm:$0xff] }
 0x4d4   : > { %v16063_v29 = vmul.f32 %v15789_v52, %v17178_v41  ;;  %v16067_v0 = vmul.f32 %v15801_v19, %v17179_v62  ;;  %v16071_v11 = vmul.f32 %v15812_v7, %v17180_v37  ;;  %v17181_v59 = vld [vmem:[#allocation200_spill] sm:$0xff]  ;;  %v17182_v16 = vld [vmem:[#allocation202_spill] sm:$0xff]  ;;  %11734 = vpow2.f32 %v6229_v10  ;;  %v17183_v19 = vld [vmem:[#allocation215_spill] sm:$0xff] }
 0x4d5   : > { %v6002_v51 = vadd.f32 %v6000_v8, %v5976_v45  ;;  %v5674_v3 = vadd.f32 %v5672_v42, %v5647_v12  ;;  %v16075_v23 = vmul.f32 %v15824_v58, %v17181_v59  ;;  %v16079_v40 = vmul.f32 %v15833_v2, %v17182_v16  ;;  %v16081_v52 = vpop.eup %11728  ;;  %v17184_v49 = vld [vmem:[#allocation204_spill] sm:$0xff]  ;;  %v17186_v45 = vld [vmem:[#allocation126_spill] sm:$0xff]  ;;  %v17187_v41 = vld [vmem:[#allocation75_spill] sm:$0xff] }
 0x4d6   : > { %v6334_v14 = vsub.f32 %v17183_v19, %v15644_v4  ;;  %v16087_v7 = vmul.f32 %v15844_v9, %v17184_v49  ;;  %v17185_v8 = vld [vmem:[#allocation208_spill] sm:$0xff]  ;;  %v6053_v12 = vmul.f32 %v16008_v24, %v17186_v45  ;;  %v17188_v62 = vld [vmem:[#allocation101_spill] sm:$0xff]  ;;  %11736 = vpow2.f32 %v6252_v39 }
 0x4d7   : > { %v16091_v42 = vmul.f32 %v15864_v33, %v17185_v8  ;;  %v6028_v58 = vadd.f32 %v6026_v6, %v6002_v51  ;;  %v5707_v2 = vadd.f32 %v5705_v46, %v5674_v3  ;;  %v5731_v37 = vmul.f32 %v17188_v62, %v17187_v41  ;;  %v16097_v10 = vpop.eup %11730  ;;  %v17189_v59 = vld [vmem:[#allocation160_spill] sm:$0xff]  ;;  %v17190_v16 = vld [vmem:[#allocation161_spill] sm:$0xff]  ;;  %v17193_v46 = vld [vmem:[#allocation79_spill] sm:$0xff] }
 0x4d8   : > { %v5917_v19 = vsel %vm788_vm3, %v17190_v16, %v17189_v59  ;;  %v6311_v9 = vmul.f32 1.442695, %v6308_v20  ;;  %v17191_v49 = vld [vmem:[#allocation217_spill] sm:$0xff]  ;;  %v17194_v3 = vld [vmem:[#allocation104_spill] sm:$0xff]  ;;  %11738 = vpow2.f32 %v6285_v30  ;;  %v6337_v39 = vmul.f32 1.442695, %v6334_v14 }
 0x4d9   : > { %v6360_v33 = vsub.f32 %v17191_v49, %v15644_v4  ;;  %v6055_v8 = vadd.f32 %v6053_v12, %v6028_v58  ;;  %v17192_v6 = vld [vmem:[#allocation57_spill] sm:$0xff]  ;;  %v5733_v45 = vadd.f32 %v5731_v37, %v5707_v2  ;;  %v5757_v27 = vmul.f32 %v17194_v3, %v17193_v46  ;;  %v17195_v62 = vld [vmem:[#allocation164_spill] sm:$0xff]  ;;  %v17197_v20 = vld [vmem:[#allocation231_spill] sm:$0xff] }
 0x4da   : > { %v6086_v51 = vmul.f32 %v16019_v28, %v17192_v6  ;;  %v16108_v41 = vpop.eup %11732  ;;  %v17196_v24 = vld [vmem:[#allocation165_spill] sm:$0xff]  ;;  %v6386_v59 = vsub.f32 %v17197_v20, %v15644_v4  ;;  %v17199_v2 = vld [vmem:[#allocation83_spill] sm:$0xff]  ;;  %v17201_v46 = vld [vmem:[#allocation170_spill] sm:$0xff]  ;;  %11740 = vpow2.f32 %v6311_v9  ;;  %v5308_v9 = vadd.f32 %v15775_v38, %v15771_v22 }
 0x4db   : > { %v5943_v44 = vsel %vm883_vm4, %v17196_v24, %v17195_v62  ;;  %v17198_v58 = vld [vmem:[#allocation61_spill] sm:$0xff]  ;;  %v5759_v49 = vadd.f32 %v5757_v27, %v5733_v45  ;;  %v17202_v3 = vld [vmem:[#allocation51_spill] sm:$0xff]  ;;  %v6363_v57 = vmul.f32 1.442695, %v6360_v33  ;;  %v17203_v24 = vld [vmem:[#allocation232_spill] sm:$0xff]  ;;  %11742 = vpow2.f32 %v6337_v39 }
 0x4dc   : > { %v6088_v16 = vadd.f32 %v6086_v51, %v6055_v8  ;;  %v6112_v12 = vmul.f32 %v16031_v15, %v17198_v58  ;;  %v17200_v37 = vld [vmem:[#allocation105_spill] sm:$0xff]  ;;  %v5969_v28 = vsel %vm978_vm5, %v17202_v3, %v17201_v46  ;;  %v6416_v30 = vsub.f32 %v17203_v24, %v15644_v4  ;;  %v17204_v62 = vld [vmem:[#allocation183_spill] sm:$0xff]  ;;  %v17205_v20 = vld [vmem:[#allocation86_spill] sm:$0xff] }
 0x4dd   : > { %v5783_v6 = vmul.f32 %v17200_v37, %v17199_v2  ;;  %v6138_v8 = vmul.f32 %v16057_v18, %v17204_v62  ;;  %v17206_v58 = vld [vmem:[#allocation107_spill] sm:$0xff]  ;;  %v6389_v45 = vmul.f32 1.442695, %v6386_v59  ;;  %v17207_v2 = vld [vmem:[#allocation9_spill] sm:$0xff]  ;;  %v17210_v24 = vld [vmem:[#allocation108_spill] sm:$0xff]  ;;  %11744 = vpow2.f32 %v6363_v57 }
 0x4de   : > { %v6114_v14 = vadd.f32 %v6112_v12, %v6088_v16  ;;  %v5809_v27 = vmul.f32 %v17206_v58, %v17205_v20  ;;  %v6439_v37 = vsub.f32 %v17207_v2, %v15644_v4  ;;  %v17208_v46 = vld [vmem:[#allocation185_spill] sm:$0xff]  ;;  %v17211_v39 = vld [vmem:[#allocation11_spill] sm:$0xff]  ;;  %v5338_v20 = vadd.f32 %v15780_v1, %v5308_v9 }
 0x4df   : > { %v5785_v51 = vadd.f32 %v5783_v6, %v5759_v49  ;;  %v6164_v3 = vmul.f32 %v16081_v52, %v17208_v46  ;;  %v17209_v12 = vld [vmem:[#allocation89_spill] sm:$0xff]  ;;  %v16136_v49 = vpop.eup %11734  ;;  %v6419_v6 = vmul.f32 1.442695, %v6416_v30  ;;  %v6472_v59 = vsub.f32 %v17211_v39, %v15644_v4  ;;  %v17216_v39 = vld [vmem:[#allocation191_spill] sm:$0xff] }
 0x4e0   : > { %v6140_v33 = vadd.f32 %v6138_v8, %v6114_v14  ;;  %v5835_v62 = vmul.f32 %v17210_v24, %v17209_v12  ;;  %v17212_v2 = vld [vmem:[#allocation189_spill] sm:$0xff]  ;;  %v17213_v14 = vld [vmem:[#allocation91_spill] sm:$0xff]  ;;  %v17214_v8 = vld [vmem:[#allocation110_spill] sm:$0xff]  ;;  %11746 = vpow2.f32 %v6389_v45  ;;  %v6442_v46 = vmul.f32 1.442695, %v6439_v37 }
 0x4e1   : > { %v5811_v16 = vadd.f32 %v5809_v27, %v5785_v51  ;;  %v6190_v38 = vmul.f32 %v16097_v10, %v17212_v2  ;;  %v5862_v51 = vmul.f32 %v17214_v8, %v17213_v14  ;;  %v16145_v27 = vpop.eup %11736  ;;  %v17215_v57 = vld [vmem:[#allocation13_spill] sm:$0xff]  ;;  %v5364_v12 = vadd.f32 %v15786_v32, %v5338_v20  ;;  %v17219_v45 = vld [vmem:[#allocation15_spill] sm:$0xff] }
 0x4e2   : > { %v6166_v58 = vadd.f32 %v6164_v3, %v6140_v33  ;;  %v6498_v30 = vsub.f32 %v17215_v57, %v15644_v4  ;;  %v6216_v1 = vmul.f32 %v16108_v41, %v17216_v39  ;;  %v17217_v33 = vld [vmem:[#allocation93_spill] sm:$0xff]  ;;  %v17218_v3 = vld [vmem:[#allocation111_spill] sm:$0xff]  ;;  %11748 = vpow2.f32 %v6419_v6 }
 0x4e3   : > { %v5837_v22 = vadd.f32 %v5835_v62, %v5811_v16  ;;  %v5895_v16 = vmul.f32 %v17218_v3, %v17217_v33  ;;  %v16154_v62 = vpop.eup %11738  ;;  %v6475_v2 = vmul.f32 1.442695, %v6472_v59  ;;  %v6524_v37 = vsub.f32 %v17219_v45, %v15644_v4  ;;  %v17220_v57 = vld [vmem:[#allocation155_spill] sm:$0xff]  ;;  %v16166_v59 = vpop.permute.xlu1 %6892  ;;  %v17224_v3 = vld [vmem:[#allocation113_spill] sm:$0xff] }
 0x4e4   : > { %v6192_v24 = vadd.f32 %v6190_v38, %v6166_v58  ;;  %v5390_v14 = vadd.f32 %v15796_v53, %v5364_v12  ;;  %v6243_v32 = vmul.f32 %v16136_v49, %v17220_v57  ;;  %v17221_v58 = vld [vmem:[#allocation112_spill] sm:$0xff]  ;;  %11750 = vpow2.f32 %v6442_v46  ;;  %v17222_v39 = vld [vmem:[#allocation23_spill] sm:$0xff]  ;;  %v16168_v33 = vpop.permute.xlu0 %6890 }
 0x4e5   : > { %v5864_v9 = vadd.f32 %v5862_v51, %v5837_v22  ;;  %v5921_v38 = vmul.f32 %v17221_v58, %v5917_v19  ;;  %v16162_v22 = vpop.eup %11740  ;;  %v6501_v51 = vmul.f32 1.442695, %v6498_v30  ;;  %v6550_v6 = vsub.f32 %v17222_v39, %v15644_v4  ;;  %v17225_v46 = vld [vmem:[#allocation27_spill] sm:$0xff]  ;;  %v17226_v39 = vld [vmem:[#allocation196_spill] sm:$0xff] }
 0x4e6   : > { %v6218_v8 = vadd.f32 %v6216_v1, %v6192_v24  ;;  %v5416_v53 = vadd.f32 %v15805_v43, %v5390_v14  ;;  %v17223_v24 = vld [vmem:[#allocation193_spill] sm:$0xff]  ;;  %v5947_v19 = vmul.f32 %v17224_v3, %v5943_v44  ;;  %v6576_v30 = vsub.f32 %v17225_v46, %v15644_v4  ;;  %v17230_v44 = vld [vmem:[#allocation60_spill] sm:$0xff] }
 0x4e7   : > { %v5897_v20 = vadd.f32 %v5895_v16, %v5864_v9  ;;  %v6276_v1 = vmul.f32 %v16145_v27, %v17223_v24  ;;  %v16174_v16 = vpop.eup %11742  ;;  %11752 = vpow2.f32 %v6475_v2  ;;  %v6527_v45 = vmul.f32 1.442695, %v6524_v37  ;;  %v17231_v37 = vld [vmem:[#allocation199_spill] sm:$0xff] }
 0x4e8   : > { %v6245_v12 = vadd.f32 %v6243_v32, %v6218_v8  ;;  %v5442_v57 = vadd.f32 %v15819_v47, %v5416_v53  ;;  %v6302_v43 = vmul.f32 %v16154_v62, %v17226_v39  ;;  %v17227_v8 = vld [vmem:[#allocation114_spill] sm:$0xff]  ;;  %v16182_v24 = vpop.eup %11744  ;;  %11754 = vpow2.f32 %v6501_v51  ;;  %v16196_v51 = vpop.permute.xlu1 %6896 }
 0x4e9   : > { %v5923_v9 = vadd.f32 %v5921_v38, %v5897_v20  ;;  %v5973_v32 = vmul.f32 %v17227_v8, %v5969_v28  ;;  %17228 = vst [vmem:[#allocation24_spill] sm:$0xff] %v16182_v24  ;;  %v17229_v20 = vld [vmem:[#allocation59_spill] sm:$0xff]  ;;  %v6553_v3 = vmul.f32 1.442695, %v6550_v6  ;;  %v6328_v47 = vmul.f32 %v16162_v22, %v17231_v37  ;;  %v17234_v28 = vld [vmem:[#allocation174_spill] sm:$0xff]  ;;  %17236 = vst [vmem:[#allocation144_spill] sm:$0xff] %v16196_v51 }
 0x4ea   : > { %v6278_v58 = vadd.f32 %v6276_v1, %v6245_v12  ;;  %v5995_v38 = vsel %vm1073_vm6, %v17230_v44, %v17229_v20  ;;  %v5472_v4 = vadd.f32 %v15830_v5, %v5442_v57  ;;  %v17232_v12 = vld [vmem:[#allocation115_spill] sm:$0xff]  ;;  %v6579_v39 = vmul.f32 1.442695, %v6576_v30  ;;  %v16198_v5 = vpop.permute.xlu0 %6894  ;;  %v17241_v30 = vld [vmem:[#allocation125_spill] sm:$0xff] }
 0x4eb   : > { %v5949_v14 = vadd.f32 %v5947_v19, %v5923_v9  ;;  %v5999_v1 = vmul.f32 %v17232_v12, %v5995_v38  ;;  %v16191_v9 = vpop.eup %11746  ;;  %v17235_v19 = vld [vmem:[#allocation176_spill] sm:$0xff]  ;;  %11756 = vpow2.f32 %v6527_v45  ;;  %17237 = vst [vmem:[#allocation145_spill] sm:$0xff] %v16198_v5  ;;  %v17238_v6 = vld [vmem:[#allocation123_spill] sm:$0xff]  ;;  %v11791_v5 = vld [vmem:[%s14477_s13] sm:$0xfe] }
 0x4ec   : > { %v6304_v2 = vadd.f32 %v6302_v43, %v6278_v58  ;;  %17233 = vst [vmem:[#allocation143_spill] sm:$0xff] %v16191_v9  ;;  %v6021_v46 = vsel %vm1168_vm7, %v17235_v19, %v17234_v28  ;;  %v5495_v57 = vadd.f32 %v17238_v6, %v5472_v4  ;;  %v17239_v43 = vld [vmem:[#allocation201_spill] sm:$0xff]  ;;  %v16204_v44 = vpop.eup %11748  ;;  %11758 = vpow2.f32 %v6553_v3  ;;  %v17242_v37 = vld [vmem:[#allocation203_spill] sm:$0xff]  ;;  %v17243_v28 = vld [vmem:[#allocation124_spill] sm:$0xff]  ;;  %v16228_v51 = vpop.permute.xlu1 %6585 }
 0x4ed   : > { %v5975_v53 = vadd.f32 %v5973_v32, %v5949_v14  ;;  %v6354_v14 = vmul.f32 %v16174_v16, %v17239_v43  ;;  %v17240_v32 = vld [vmem:[#allocation118_spill] sm:$0xff]  ;;  %v6380_v12 = vmul.f32 %v16182_v24, %v17242_v37  ;;  %v17246_v43 = vstv %s15098_s30  ;;  %v17255_v24 = vld [vmem:[#allocation209_spill] sm:$0xff] }
 0x4ee   : > { %v6330_v58 = vadd.f32 %v6328_v47, %v6304_v2  ;;  %v6025_v20 = vmul.f32 %v17240_v32, %v6021_v46  ;;  %v5528_v45 = vadd.f32 %v17241_v30, %v5495_v57  ;;  %v17244_v2 = vld [vmem:[#allocation119_spill] sm:$0xff]  ;;  %v16211_v19 = vpop.eup %11750  ;;  %v11789_v6 = vld [vmem:[%s14477_s13] sm:$0xff]  ;;  %11760 = vpow2.f32 %v6579_v39  ;;  %v17251_v39 = vld [vmem:[#allocation128_spill] sm:$0xff] }
 0x4ef   : > { %v6001_v8 = vadd.f32 %v5999_v1, %v5975_v53  ;;  %v6052_v47 = vmul.f32 %v17244_v2, %v17243_v28  ;;  %v11788_v53 = vld [vmem:[%s14471_s29] sm:$0xff]  ;;  %v17245_v1 = vstv %s15096_s15  ;;  %v6621_v3 = vmul.f32 %v11789_v6, %v17246_v43  ;;  %v17247_v32 = vld [vmem:[#allocation127_spill] sm:$0xff]  ;;  %v16230_v6 = vpop.permute.xlu0 %6583 }
 0x4f0   : > { %v6356_v38 = vadd.f32 %v6354_v14, %v6330_v58  ;;  %v6617_v46 = vmul.f32 %v11788_v53, %v17245_v1  ;;  %v5554_v57 = vadd.f32 %v17247_v32, %v5528_v45  ;;  %v17248_v14 = vld [vmem:[#allocation206_spill] sm:$0xff]  ;;  %v17250_v53 = vld [vmem:[#allocation219_spill] sm:$0xff]  ;;  %11762 = vrcp.f32 %v16011_v50 }
 0x4f1   : > { %v6027_v4 = vadd.f32 %v6025_v20, %v6001_v8  ;;  %v6406_v30 = vmul.f32 %v16191_v9, %v17248_v14  ;;  %v16222_v20 = vpop.eup %11752  ;;  %v11790_v37 = vld [vmem:[%s14471_s29] sm:$0xfe]  ;;  %v6746_v1 = vmul.f32 %v11791_v5, %v17250_v53 }
 0x4f2   : > { %v6382_v58 = vadd.f32 %v6380_v12, %v6356_v38  ;;  %v17249_v28 = vld [vmem:[#allocation218_spill] sm:$0xff]  ;;  %v5580_v45 = vadd.f32 %v17251_v39, %v5554_v57  ;;  %v17252_v12 = vld [vmem:[#allocation175_spill] sm:$0xff]  ;;  %v6623_v32 = vadd.f32 %v6621_v3, %v6617_v46  ;;  %v6466_v57 = vmul.f32 %v16211_v19, %v17255_v24 }
 0x4f3   : > { %v6054_v8 = vadd.f32 %v6052_v47, %v6027_v4  ;;  %v6741_v2 = vmul.f32 %v11790_v37, %v17249_v28  ;;  %v6433_v43 = vmul.f32 %v16204_v44, %v17252_v12  ;;  %v16236_v47 = vpop.eup %11754  ;;  %v11792_v14 = vld [vmem:[%s14494_s28] sm:$0xff]  ;;  %v17253_v37 = vstv %s15103_s14  ;;  %v17258_v39 = vld [vmem:[#allocation131_spill] sm:$0xff] }
 0x4f4   : > { %v6408_v38 = vadd.f32 %v6406_v30, %v6382_v58  ;;  %v6627_v28 = vmul.f32 %v11792_v14, %v17253_v37  ;;  %v17254_v5 = vld [vmem:[#allocation130_spill] sm:$0xff]  ;;  %v17259_v37 = vld [vmem:[#allocation213_spill] sm:$0xff] }
 0x4f5   : > { %v6087_v4 = vadd.f32 %v16035_v54, %v6054_v8  ;;  %v5606_v53 = vadd.f32 %v17254_v5, %v5580_v45  ;;  %v16249_v30 = vpop.eup %11756  ;;  %v6749_v54 = vadd.f32 %v6746_v1, %v6741_v2  ;;  %v11793_v8 = vld [vmem:[%s14494_s28] sm:$0xfe]  ;;  %v6492_v45 = vmul.f32 %v16222_v20, %v17259_v37  ;;  %v17261_v2 = vld [vmem:[#allocation133_spill] sm:$0xff] }
 0x4f6   : > { %v6435_v9 = vadd.f32 %v6433_v43, %v6408_v38  ;;  %17256 = vst [vmem:[#allocation146_spill] sm:$0xff] %v16249_v30  ;;  %v17257_v46 = vld [vmem:[#allocation222_spill] sm:$0xff]  ;;  %v16257_v43 = vpop.eup %11758  ;;  %v6629_v24 = vadd.f32 %v6627_v28, %v6623_v32  ;;  %v17265_v28 = vld [vmem:[#allocation227_spill] sm:$0xff] }
 0x4f7   : > { %v6113_v58 = vadd.f32 %v16039_v60, %v6087_v4  ;;  %v6754_v3 = vmul.f32 %v11793_v8, %v17257_v46  ;;  %v5632_v12 = vadd.f32 %v17258_v39, %v5606_v53  ;;  %17260 = vst [vmem:[#allocation147_spill] sm:$0xff] %v16257_v43  ;;  %v6590_v60 = vpop.permute.xlu1 %6589  ;;  %v6588_v4 = vpop.permute.xlu0 %6587  ;;  %v17262_v8 = vld [vmem:[#allocation223_spill] sm:$0xff]  ;;  %v17263_v46 = vld [vmem:[#allocation137_spill] sm:$0xff]  ;;  %v6544_v39 = vmul.f32 %v16249_v30, %v17265_v28  ;;  %v11799_v30 = vld [vmem:[%s14494_s28 + $0x10] sm:$0xff] }
 0x4f8   : > { %v6468_v14 = vadd.f32 %v6466_v57, %v6435_v9  ;;  %v6518_v53 = vmul.f32 %v16236_v47, %v17262_v8  ;;  %v17269_v8 = vld [vmem:[#allocation150_spill] sm:$0xff] }
 0x4f9   : > { %v6139_v38 = vadd.f32 %v16043_v55, %v6113_v58  ;;  %v5662_v1 = vadd.f32 %v17261_v2, %v5632_v12  ;;  %v6757_v57 = vadd.f32 %v6754_v3, %v6749_v54  ;;  %v16266_v58 = vpop.eup %11760  ;;  %v6592_v12 = vsel %vm1168_vm7, %v6588_v4, %v6590_v60  ;;  %v17267_v2 = vld [vmem:[#allocation21_spill] sm:$0xff]  ;;  %v17268_v3 = vld [vmem:[#allocation138_spill] sm:$0xff]  ;;  %v17272_v4 = vld [vmem:[#allocation216_spill] sm:$0xff] }
 0x4fa   : > { %v6494_v5 = vadd.f32 %v6492_v45, %v6468_v14  ;;  %17264 = vst [vmem:[#allocation148_spill] sm:$0xff] %v16266_v58  ;;  %v17266_v14 = vld [vmem:[#allocation210_spill] sm:$0xff]  ;;  %v16276_v54 = vstv %s16241_s19  ;;  %v16283_v60 = vstv %s16247_s24  ;;  %v6596_v28 = vmul.f32 %v16266_v58, %v6592_v12 }
 0x4fb   : > { %v6165_v9 = vadd.f32 %v16047_v26, %v6139_v38  ;;  %v5685_v55 = vadd.f32 %v17263_v46, %v5662_v1  ;;  %v6675_v45 = vadd.f32 %v17266_v14, %v6629_v24  ;;  %v6570_v26 = vmul.f32 %v16257_v43, %v17267_v2  ;;  %v17271_v24 = vld [vmem:[#allocation214_spill] sm:$0xff] }
 0x4fc   : > { %v6520_v32 = vadd.f32 %v6518_v53, %v6494_v5  ;;  %v6763_v46 = vrot.slane %v6757_v57, 1 }
 0x4fd   : > { %v6191_v37 = vadd.f32 %v16051_v63, %v6165_v9  ;;  %v5718_v38 = vadd.f32 %v17268_v3, %v5685_v55  ;;  %v17270_v63 = vld [vmem:[#allocation122_spill] sm:$0xff]  ;;  %v6715_v9 = vsel %vm788_vm3, %v17272_v4, %v17271_v24  ;;  %v16299_v24 = vstv %s16259_s26 }
 0x4fe   : > { %v6546_v1 = vadd.f32 %v6544_v39, %v6520_v32  ;;  %v6242_v53 = vmul.f32 %v17270_v63, %v17269_v8  ;;  %v11794_v39 = vld [vmem:[%s14471_s29] sm:$0xfc]  ;;  %v11797_v63 = vld [vmem:[%s14477_s13 + $0x10] sm:$0xff] }
 0x4ff   : > { %v6217_v5 = vadd.f32 %v16055_v36, %v6191_v37  ;;  %v5744_v14 = vadd.f32 %v15932_v13, %v5718_v38  ;;  %v6918_v36 = vmul.f32 %v11794_v39, %v16276_v54  ;;  %v11795_v37 = vld [vmem:[%s14471_s29 + $0x10] sm:$0xff]  ;;  %v11796_v3 = vld [vmem:[%s14477_s13] sm:$0xfc]  ;;  %v6924_v57 = vmul.f32 %v11797_v63, %v16283_v60 }
 0x500   : > { %v6572_v55 = vadd.f32 %v6570_v26, %v6546_v1  ;;  %v6919_v2 = vmul.f32 %v11795_v37, %v16276_v54  ;;  %v6923_v8 = vmul.f32 %v11796_v3, %v16283_v60  ;;  %v17273_v38 = vld [vmem:[#allocation140_spill] sm:$0xff]  ;;  %v11798_v3 = vld [vmem:[%s14494_s28] sm:$0xfc] }
 0x501   : > { %v6244_v32 = vadd.f32 %v6242_v53, %v6217_v5  ;;  %v5770_v13 = vadd.f32 %v15937_v31, %v5744_v14  ;;  %v6719_v5 = vadd.f32 %v6715_v9, %v6675_v45  ;;  %v17274_v53 = vld [vmem:[#allocation226_spill] sm:$0xff]  ;;  %v6931_v63 = vmul.f32 %v11798_v3, %v16299_v24 }
 0x502   : > { %v16303_v26 = vadd.f32 %v6596_v28, %v6572_v55  ;;  %v17275_v4 = vrot.slane %v17274_v53, 1  ;;  %v6926_v58 = vadd.f32 %v6923_v8, %v6918_v36  ;;  %v6927_v43 = vadd.f32 %v6924_v57, %v6919_v2  ;;  %v17277_v55 = vld [vmem:[#allocation229_spill] sm:$0xff]  ;;  %v7004_v2 = vpop.permute.xlu1 %7003  ;;  %v17278_v8 = vld [vmem:[#allocation211_spill] sm:$0xff]  ;;  %v17282_v53 = vld [vmem:[#allocation220_spill] sm:$0xff] }
 0x503   : > { %v6277_v12 = vadd.f32 %v16063_v29, %v6244_v32  ;;  %v5796_v1 = vadd.f32 %v17273_v38, %v5770_v13  ;;  %v6932_v31 = vmul.f32 %v11799_v30, %v16299_v24  ;;  %v17280_v38 = vld [vmem:[#allocation55_spill] sm:$0xff] }
 0x504   : > { %v6765_v39 = vsel %vm1264_vm0, %v6763_v46, %v17275_v4  ;;  %v17276_v46 = vld [vmem:[#allocation228_spill] sm:$0xff]  ;;  %v6934_v32 = vadd.f32 %v6931_v63, %v6926_v58  ;;  %v17283_v4 = vld [vmem:[#allocation221_spill] sm:$0xff] }
 0x505   : > { %v6303_v37 = vadd.f32 %v16067_v0, %v6277_v12  ;;  %v5822_v29 = vadd.f32 %v15948_v48, %v5796_v1  ;;  %v6770_v9 = vadd.f32 %v6765_v39, %v6719_v5  ;;  %v6832_v0 = vsel %vm693_vm2, %v17277_v55, %v17276_v46  ;;  %v7002_v48 = vpop.permute.xlu0 %7001  ;;  %v17281_v1 = vld [vmem:[#allocation40_spill] sm:$0xff]  ;;  %v17284_v63 = vld [vmem:[#allocation129_spill] sm:$0xff] }
 0x506   : > { %v16321_v13 = vadd.f32 %v6932_v31, %v6927_v43  ;;  %v6432_v58 = vmul.f32 %v17281_v1, %v17280_v38  ;;  %v6940_v43 = vrot.slane %v6934_v32, 2  ;;  %v6513_v39 = vsel %vm883_vm4, %v17283_v4, %v17282_v53  ;;  %v17289_v55 = vld [vmem:[#allocation141_spill] sm:$0xff]  ;;  %v11763_v4 = vpop.eup %11762 }
 0x507   : > { %v6329_v28 = vadd.f32 %v16071_v11, %v6303_v37  ;;  %v5852_v45 = vadd.f32 %v15954_v61, %v5822_v29  ;;  %v17279_v61 = vld [vmem:[#allocation212_spill] sm:$0xff] }
 0x508   : > { %v6487_v57 = vsel %vm788_vm3, %v17279_v61, %v17278_v8  ;;  %v17285_v29 = vld [vmem:[#allocation224_spill] sm:$0xff]  ;;  %v6591_v8 = vsel %vm1168_vm7, %v16230_v6, %v16228_v51  ;;  %v7009_v61 = vsel %vm693_vm2, %v7002_v48, %v7004_v2 }
 0x509   : > { %v6355_v14 = vadd.f32 %v16075_v23, %v6329_v28  ;;  %v5875_v36 = vadd.f32 %v15957_v35, %v5852_v45  ;;  %v6836_v23 = vadd.f32 %v6832_v0, %v6770_v9  ;;  %v6898_v35 = vsel %vm788_vm3, %v16168_v33, %v16166_v59  ;;  %v16344_v59 = vpop.permute.xlu1 %7007  ;;  %v16346_v33 = vpop.permute.xlu0 %7005 }
 0x50a   : > { %v6491_v31 = vmul.f32 %v17284_v63, %v6487_v57  ;;  %v6517_v9 = vmul.f32 %v15886_v25, %v6513_v39  ;;  %v17292_v25 = vld [vmem:[#allocation134_spill] sm:$0xff] }
 0x50b   : > { %v6381_v30 = vadd.f32 %v16079_v40, %v6355_v14  ;;  %v5908_v11 = vadd.f32 %v15963_v56, %v5875_v36  ;;  %v6941_v40 = vrot.slane %v16321_v13, 2  ;;  %v6902_v37 = vadd.f32 %v6898_v35, %v6836_v23  ;;  %v17288_v14 = vld [vmem:[#allocation19_spill] sm:$0xff]  ;;  %v17290_v36 = vld [vmem:[#allocation132_spill] sm:$0xff] }
 0x50d   : > { %v6407_v12 = vadd.f32 %v16087_v7, %v6381_v30  ;;  %v5934_v5 = vadd.f32 %v15972_v21, %v5908_v11  ;;  %v17286_v21 = vld [vmem:[#allocation225_spill] sm:$0xff]  ;;  %v6942_v45 = vsel %vm1935_vm1, %v6940_v43, %v6941_v40  ;;  %v7070_v38 = vpop.permute.xlu1 %7069  ;;  %v7068_v1 = vpop.permute.xlu0 %7067 }
 0x50e   : > { %v6539_v28 = vsel %vm978_vm5, %v17286_v21, %v17285_v29  ;;  %v6947_v11 = vadd.f32 %v6942_v45, %v6902_v37  ;;  %v7075_v39 = vsel %vm788_vm3, %v7068_v1, %v7070_v38  ;;  %v7284_v37 = vld [vmem:[%s16430_s9] ss:$0 sm:$0xff]  ;;  %v17301_v1 = vld [vmem:[#allocation148_spill] sm:$0xff] }
 0x50f   : > { %v6434_v56 = vadd.f32 %v6432_v58, %v6407_v12  ;;  %v5960_v7 = vadd.f32 %v15983_v17, %v5934_v5  ;;  %v6543_v30 = vmul.f32 %v17290_v36, %v6539_v28  ;;  %v17293_v58 = vld [vmem:[#allocation142_spill] sm:$0xff] }
 0x510   : > { %v17294_v5 = vld [vmem:[#allocation38_spill] sm:$0xff]  ;;  %v7013_v53 = vadd.f32 %v7009_v61, %v6947_v11 }
 0x511   : > { %v6467_v3 = vadd.f32 %v16091_v42, %v6434_v56  ;;  %v5986_v50 = vadd.f32 %v15992_v34, %v5960_v7  ;;  %v17287_v42 = vld [vmem:[#allocation17_spill] sm:$0xff]  ;;  %v17291_v34 = vld [vmem:[#allocation42_spill] sm:$0xff]  ;;  %v6595_v56 = vmul.f32 %v17294_v5, %v6591_v8  ;;  %v7010_v5 = vsel %vm693_vm2, %v16346_v33, %v16344_v59 }
 0x512   : > { %v6565_v46 = vsel %vm1073_vm6, %v17288_v14, %v17287_v42  ;;  %v7079_v7 = vadd.f32 %v7075_v39, %v7013_v53  ;;  %v17295_v14 = vld [vmem:[#allocation24_spill] sm:$0xff]  ;;  %v7072_v53 = vpop.permute.xlu0 %7071 }
 0x513   : > { %v6493_v17 = vadd.f32 %v6491_v31, %v6467_v3  ;;  %v6012_v0 = vadd.f32 %v17289_v55, %v5986_v50  ;;  %v6569_v12 = vmul.f32 %v17292_v25, %v6565_v46  ;;  %v7285_v31 = vld [vmem:[%s16431_s10] ss:$0 sm:$0xff] }
 0x514   : > { %v11800_v46 = vld [vmem:[%s14471_s29 + $0x20] sm:$0x3] }
 0x515   : > { %v6519_v32 = vadd.f32 %v6517_v9, %v6493_v17  ;;  %v6042_v57 = vadd.f32 %v17291_v34, %v6012_v0  ;;  %v11801_v55 = vld [vmem:[%s14477_s13 + $0x20] sm:$0x3]  ;;  %v17296_v0 = vld [vmem:[#allocation143_spill] sm:$0xff]  ;;  %s17303_s13 = sshll.u32 %s17305_s18, 4 }
 0x516   : > { %s500_s21 = scalar_lea.vmem %s16432_s11, %s17303_s13 }
 0x517   : > { %v6545_v23 = vadd.f32 %v6543_v30, %v6519_v32  ;;  %v6065_v35 = vadd.f32 %v17293_v58, %v6042_v57  ;;  %v17298_v57 = vld [vmem:[#allocation144_spill] sm:$0xff]  ;;  %v17302_v58 = vld [vmem:[#allocation230_spill] sm:$0xff] }
 0x519   : > { %v6571_v43 = vadd.f32 %v6569_v12, %v6545_v23  ;;  %v6098_v51 = vadd.f32 %v16031_v15, %v6065_v35  ;;  %v17299_v23 = vld [vmem:[#allocation145_spill] sm:$0xff]  ;;  %v17300_v12 = vld [vmem:[#allocation147_spill] sm:$0xff] }
 0x51b   : > { %v6597_v6 = vadd.f32 %v6595_v56, %v6571_v43  ;;  %v6124_v2 = vadd.f32 %v16057_v18, %v6098_v51  ;;  %v7074_v56 = vpop.permute.xlu1 %7073 }
 0x51c   : > { %v7076_v13 = vsel %vm788_vm3, %v7072_v53, %v7074_v56 }
 0x51d   : > { %v6601_v48 = vmul.f32 %v11763_v4, %v6597_v6  ;;  %v6150_v3 = vadd.f32 %v16081_v52, %v6124_v2 }
 0x51f   : > { %v7081_v63 = vmul.f32 %v7079_v7, %v6601_v48  ;;  %v6176_v15 = vadd.f32 %v16097_v10, %v6150_v3 }
 0x521   : > { %v7090_v29 = vmul.f32 %v7284_v37, %v7081_v63  ;;  %v6202_v18 = vadd.f32 %v16108_v41, %v6176_v15  ;;  %v6920_v41 = vmul.f32 %v11800_v46, %v16276_v54 }
 0x523   : > { %v7099_v21 = vadd.f32 %v7285_v31, %v7090_v29  ;;  %v6232_v28 = vadd.f32 %v16136_v49, %v6202_v18  ;;  %v6925_v49 = vmul.f32 %v11801_v55, %v16283_v60  ;;  %v17297_v60 = vld [vmem:[#allocation146_spill] sm:$0xff] }
 0x525   : > { %v7101_v45 = vsub.f32 0.0, %v7099_v21  ;;  %v6255_v50 = vadd.f32 %v16145_v27, %v6232_v28  ;;  %v6928_v30 = vadd.f32 %v6925_v49, %v6920_v41 }
 0x527   : > { %v7103_v52 = vmul.f32 1.442695, %v7101_v45  ;;  %v6288_v17 = vadd.f32 %v16154_v62, %v6255_v50  ;;  %v11802_v62 = vld [vmem:[%s14494_s28 + $0x20] sm:$0x3] }
 0x529   : > { %11764 = vpow2.f32 %v7103_v52  ;;  %v6314_v9 = vadd.f32 %v16162_v22, %v6288_v17  ;;  %v6933_v22 = vmul.f32 %v11802_v62, %v16299_v24 }
 0x52b   : > { %v6340_v42 = vadd.f32 %v16174_v16, %v6314_v9  ;;  %v6936_v54 = vadd.f32 %v6933_v22, %v6928_v30 }
 0x52d   : > { %v6366_v10 = vadd.f32 %v17295_v14, %v6340_v42  ;;  %v6943_v25 = vrot.slane %v6936_v54, 2 }
 0x52f   : > { %v6392_v32 = vadd.f32 %v17296_v0, %v6366_v10 }
 0x531   : > { %v6422_v27 = vadd.f32 %v16204_v44, %v6392_v32  ;;  %v6899_v44 = vsel %vm788_vm3, %v17299_v23, %v17298_v57 }
 0x532   : > { %v6903_v35 = vadd.f32 %v6899_v44, %v17302_v58 }
 0x533   : > { %v11765_v36 = vpop.eup %11764  ;;  %v6445_v16 = vadd.f32 %v16211_v19, %v6422_v27 }
 0x534   : > { %v7107_v11 = vadd.f32 1.0, %v11765_v36 }
 0x535   : > { %v6478_v8 = vadd.f32 %v16222_v20, %v6445_v16  ;;  %v6944_v20 = vsel %vm1935_vm1, %v6941_v40, %v6943_v25 }
 0x536   : > { %11766 = vrcp.f32 %v7107_v11  ;;  %v6948_v43 = vadd.f32 %v6944_v20, %v6903_v35 }
 0x537   : > { %v6504_v61 = vadd.f32 %v16236_v47, %v6478_v8 }
 0x538   : > { %v7014_v4 = vadd.f32 %v7010_v5, %v6948_v43 }
 0x539   : > { %v6530_v34 = vadd.f32 %v17297_v60, %v6504_v61 }
 0x53a   : > { %v7080_v51 = vadd.f32 %v7076_v13, %v7014_v4 }
 0x53b   : > { %v6556_v38 = vadd.f32 %v17300_v12, %v6530_v34 }
 0x53d   : > { %v6582_v24 = vadd.f32 %v17301_v1, %v6556_v38 }
 0x53f   : > { %11768 = vrcp.f32 %v6582_v24 }
 0x540   : > { %v11767_v19 = vpop.eup %11766 }
 0x541   : > { %v7111_v47 = vmul.f32 %v11767_v19, %v7099_v21 }
 0x543   : > { %7113 = vst [vmem:[%s500_s21] sm:$0xff] %v7111_v47 }
 0x549   : > { %v11769_v39 = vpop.eup %11768 }
 0x54a   : > { %v6602_v40 = vmul.f32 %v11769_v39, %v16303_v26 }
 0x54c   : > { %v7082_v6 = vmul.f32 %v7080_v51, %v6602_v40 }
 0x54e   : > { %v7091_v2 = vmul.f32 %v7284_v37, %v7082_v6 }
 0x550   : > { %v7100_v48 = vadd.f32 %v7285_v31, %v7091_v2 }
 0x552   : > { %v7102_v7 = vsub.f32 0.0, %v7100_v48 }
 0x554   : > { %v7105_v3 = vmul.f32 1.442695, %v7102_v7 }
 0x556   : > { %11770 = vpow2.f32 %v7105_v3 }
 0x560   : > { %v11771_v63 = vpop.eup %11770 }
 0x561   : > { %v7108_v15 = vadd.f32 1.0, %v11771_v63 }
 0x563   : > { %11772 = vrcp.f32 %v7108_v15 }
 0x56d   : > { %v11773_v29 = vpop.eup %11772 }
 0x56e   : > { %v7112_v59 = vmul.f32 %v11773_v29, %v7100_v48 }
 0x570   : > { %7114 = vst [vmem:[%s500_s21 + $0x8] sm:$0xff] %v7112_v59 }
 0x571 PF: > { %s22_s17 = sadd.s32 1, %s11828_s17  }
 0x572   : > { %p19_p1 = scmp.ge.s32.totalorder %s22_s17, 4  }
 0x574   :  { %21 = sbr.rel (!%p19_p1) target bundleno = 1 (0x1), region = 162 }
 0x57b   :  { %7136 = vsyncpa [#allocation4], 1 }
 0x57c   :  { %7138 = vsyncpa [#allocation4 + $0x1], 1 }

</bundles_post_ra>
